<compile_context>
chip_gen: v5e
topology: v5e:2x2
jax: 0.10.0
libtpu: 0.0.40
codegen_flags: <defaults>
</compile_context>

<pallas_src>
import functools

import jax
import jax.numpy as jnp
import numpy as np
from jax.experimental import pallas as pl
from jax.experimental.pallas import tpu as pltpu


# --------------------------------------------------------------------------
# Pallas kernels
# --------------------------------------------------------------------------
def _conv3x3_kernel(*refs, apply_prologue):
    """Fused [affine+LeakyReLU prologue] -> 3x3 same conv -> BN-stat epilogue.

    Ref order (inputs, outputs, scratch):
      x_ref       : (1, H, W, Cin)    un-padded input tile (one batch element)
      w_ref       : (9*Cin, Cout)     im2col weights, row = (dy*3+dx)*Cin + ci
      [scale_ref, shift_ref : (1, Cin)]  folded BN of the *previous* stage
      o_ref       : (1, H, W, Cout)   conv output (no bias: cancels under BN)
      stats_ref   : (1, 2, Cout)      per-image [sum, sum_sq] over H*W (f32)
      xpad_ref    : (H+2, W+2, Cin)   VMEM scratch; zero halo built in-kernel
      patches_ref : (H*W, 9*Cin)      VMEM scratch; im2col patch tile
    """
    if apply_prologue:
        (x_ref, w_ref, scale_ref, shift_ref,
         o_ref, stats_ref, xpad_ref, patches_ref) = refs
    else:
        x_ref, w_ref, o_ref, stats_ref, xpad_ref, patches_ref = refs

    _, H, W, Cout = o_ref.shape
    Cin = x_ref.shape[-1]

    x = x_ref[0]                                          # (H, W, Cin)
    if apply_prologue:
        # Previous stage's BatchNorm (folded to scale/shift) + LeakyReLU(0.2),
        # applied in VMEM so the activation never makes an extra HBM pass.
        s = scale_ref[...].reshape(1, 1, Cin)
        t = shift_ref[...].reshape(1, 1, Cin)
        x = x * s + t
        x = jnp.where(x >= 0, x, 0.2 * x)

    # 1-pixel zero halo handled in VMEM (no wrapper-side jnp.pad / HBM copy).
    xpad_ref[...] = jnp.zeros_like(xpad_ref)
    xpad_ref[1:H + 1, 1:W + 1, :] = x

    # im2col: gather the 9 shifted views into one (H*W, 9*Cin) patch tile,
    # then do a single MXU matmul (K = 9*Cin instead of 9 matmuls with K=Cin).
    for k in range(9):                                    # static unroll
        dy, dx = k // 3, k % 3
        patches_ref[:, k * Cin:(k + 1) * Cin] = (
            xpad_ref[dy:dy + H, dx:dx + W, :].reshape(H * W, Cin))

    acc = jnp.dot(patches_ref[...], w_ref[...],
                  preferred_element_type=jnp.float32)      # (H*W, Cout)

    # BatchNorm statistics accumulated in the conv epilogue (per-image
    # partials; the tiny cross-batch reduction happens in the wrapper).
    stats_ref[0, 0:1, :] = jnp.sum(acc, axis=0, keepdims=True)
    stats_ref[0, 1:2, :] = jnp.sum(acc * acc, axis=0, keepdims=True)

    o_ref[...] = acc.reshape(1, H, W, Cout)


def _bn_lrelu_kernel(x_ref, scale_ref, shift_ref, o_ref):
    """Final per-channel affine (folded batchnorm) + LeakyReLU(0.2)."""
    s = scale_ref[...].reshape(1, 1, 1, -1)
    t = shift_ref[...].reshape(1, 1, 1, -1)
    y = x_ref[...] * s + t
    o_ref[...] = jnp.where(y >= 0, y, 0.2 * y)


# --------------------------------------------------------------------------
# Wrappers
# --------------------------------------------------------------------------
def conv3x3_stats(x_nhwc, w_hwio, prev_scale=None, prev_shift=None):
    """3x3 same conv (bias-free) with fused BN-stat epilogue.

    If prev_scale/prev_shift are given, the previous stage's folded BatchNorm
    + LeakyReLU(0.2) is applied to the input inside the kernel prologue.
    Returns (y, stats) with stats[n] = [sum, sum_sq] over H*W per channel.
    """
    N, H, W, Cin = x_nhwc.shape
    Cout = w_hwio.shape[-1]
    w_r = w_hwio.reshape(9 * Cin, Cout)                    # (dy,dx,ci) row-major

    apply_prologue = prev_scale is not None
    kernel = functools.partial(_conv3x3_kernel, apply_prologue=apply_prologue)

    in_specs = [
        pl.BlockSpec((1, H, W, Cin), lambda n: (n, 0, 0, 0)),
        pl.BlockSpec((9 * Cin, Cout), lambda n: (0, 0)),
    ]
    args = [x_nhwc, w_r]
    if apply_prologue:
        in_specs += [pl.BlockSpec((1, Cin), lambda n: (0, 0)),
                     pl.BlockSpec((1, Cin), lambda n: (0, 0))]
        args += [prev_scale.reshape(1, Cin), prev_shift.reshape(1, Cin)]

    y, stats = pl.pallas_call(
        kernel,
        out_shape=(jax.ShapeDtypeStruct((N, H, W, Cout), jnp.float32),
                   jax.ShapeDtypeStruct((N, 2, Cout), jnp.float32)),
        grid=(N,),
        in_specs=in_specs,
        out_specs=(pl.BlockSpec((1, H, W, Cout), lambda n: (n, 0, 0, 0)),
                   pl.BlockSpec((1, 2, Cout), lambda n: (n, 0, 0))),
        scratch_shapes=[pltpu.VMEM((H + 2, W + 2, Cin), jnp.float32),
                        pltpu.VMEM((H * W, 9 * Cin), jnp.float32)],
        compiler_params=pltpu.CompilerParams(dimension_semantics=("parallel",)),
    )(*args)
    return y, stats


def bn_lrelu(y_nhwc, scale, shift):
    """Final fused folded-BatchNorm + LeakyReLU(0.2) pass."""
    N, H, W, C = y_nhwc.shape
    return pl.pallas_call(
        _bn_lrelu_kernel,
        out_shape=jax.ShapeDtypeStruct((N, H, W, C), jnp.float32),
        grid=(N,),
        in_specs=[
            pl.BlockSpec((1, H, W, C), lambda n: (n, 0, 0, 0)),
            pl.BlockSpec((1, C), lambda n: (0, 0)),
            pl.BlockSpec((1, C), lambda n: (0, 0)),
        ],
        out_specs=pl.BlockSpec((1, H, W, C), lambda n: (n, 0, 0, 0)),
        compiler_params=pltpu.CompilerParams(dimension_semantics=("parallel",)),
    )(y_nhwc, scale.reshape(1, C), shift.reshape(1, C))


def _fold_bn(stats, count, gamma, beta, eps):
    """Fold training-mode BatchNorm into per-channel scale/shift from the
    kernel-accumulated [sum, sum_sq] partials (tiny (N,2,C) reduction)."""
    tot = jnp.sum(stats, axis=0)                           # (2, C), f32
    mean = tot[0] / count
    var = jnp.maximum(tot[1] / count - mean * mean, 0.0)   # biased variance
    scale = gamma / jnp.sqrt(var + eps)
    shift = beta - mean * scale
    return scale, shift


def conv_block_forward(x_nchw, params, eps=1e-5):
    """ConvBlock.forward: NCHW in, NCHW out (matches the PyTorch module)."""
    x = jnp.transpose(x_nchw, (0, 2, 3, 1))                # NCHW -> NHWC
    N, H, W, _ = x.shape
    count = float(N * H * W)

    # NOTE: conv biases (b1/b2) are intentionally dropped — a bias that feeds
    # straight into BatchNorm cancels exactly in the mean subtraction.
    y1, st1 = conv3x3_stats(x, params["w1"])
    scale1, shift1 = _fold_bn(st1, count, params["g1"], params["beta1"], eps)

    # Stage-1 BN + LeakyReLU are fused into the second conv's prologue.
    y2, st2 = conv3x3_stats(y1, params["w2"], scale1, shift1)
    scale2, shift2 = _fold_bn(st2, count, params["g2"], params["beta2"], eps)

    out = bn_lrelu(y2, scale2, shift2)
    return jnp.transpose(out, (0, 3, 1, 2))                # NHWC -> NCHW


# --------------------------------------------------------------------------
# Pure-JAX reference (for a correctness check; includes the conv biases)
# --------------------------------------------------------------------------
def conv_block_reference(x_nchw, params, eps=1e-5):
    x = jnp.transpose(x_nchw, (0, 2, 3, 1))

    def conv(x, w, b):
        y = jax.lax.conv_general_dilated(
            x, w, (1, 1), "SAME",
            dimension_numbers=("NHWC", "HWIO", "NHWC"))
        return y + b

    def bn_lrelu_ref(y, g, bta):
        m = jnp.mean(y, axis=(0, 1, 2))
        v = jnp.mean((y - m) ** 2, axis=(0, 1, 2))
        yn = (y - m) / jnp.sqrt(v + eps) * g + bta
        return jnp.where(yn >= 0, yn, 0.2 * yn)

    y = bn_lrelu_ref(conv(x, params["w1"], params["b1"]),
                     params["g1"], params["beta1"])
    y = bn_lrelu_ref(conv(y, params["w2"], params["b2"]),
                     params["g2"], params["beta2"])
    return jnp.transpose(y, (0, 3, 1, 2))


# --------------------------------------------------------------------------
# Main
# --------------------------------------------------------------------------
if __name__ == "__main__":
    key = jax.random.PRNGKey(0)
    N, Cin, Cout, H, W = 2, 4, 8, 16, 16

    keys = jax.random.split(key, 9)
    params = {
        # conv weights stored HWIO: (3, 3, Cin, Cout)
        "w1": 0.1 * jax.random.normal(keys[0], (3, 3, Cin, Cout), jnp.float32),
        "b1": 0.1 * jax.random.normal(keys[1], (Cout,), jnp.float32),
        "g1": 1.0 + 0.1 * jax.random.normal(keys[2], (Cout,), jnp.float32),
        "beta1": 0.1 * jax.random.normal(keys[3], (Cout,), jnp.float32),
        "w2": 0.1 * jax.random.normal(keys[4], (3, 3, Cout, Cout), jnp.float32),
        "b2": 0.1 * jax.random.normal(keys[5], (Cout,), jnp.float32),
        "g2": 1.0 + 0.1 * jax.random.normal(keys[6], (Cout,), jnp.float32),
        "beta2": 0.1 * jax.random.normal(keys[7], (Cout,), jnp.float32),
    }

    x = jax.random.normal(keys[8], (N, Cin, H, W), jnp.float32)   # NCHW input

    forward = jax.jit(conv_block_forward)
    out = jax.block_until_ready(forward(x, params))

    ref = jax.block_until_ready(conv_block_reference(x, params))
    np.testing.assert_allclose(np.asarray(out), np.asarray(ref),
                               rtol=1e-3, atol=1e-3)

    assert out.shape == (N, Cout, H, W)
    print("KERNEL_OK")
</pallas_src>

<mosaic_0001>
module attributes {stable_mosaic.version = 11 : i64} {
  func.func @_conv3x3_kernel(%arg0: i32, %arg1: memref<1x16x16x4xf32, #tpu.memory_space<vmem>>, %arg2: memref<36x8xf32, #tpu.memory_space<vmem>>, %arg3: memref<1x16x16x8xf32, #tpu.memory_space<vmem>>, %arg4: memref<1x2x8xf32, #tpu.memory_space<vmem>>, %arg5: memref<18x18x4xf32, #tpu.memory_space<vmem>>, %arg6: memref<256x36xf32, #tpu.memory_space<vmem>>) attributes {dimension_semantics = [#tpu.dimension_semantics<parallel>], iteration_bounds = array<i64: 2>, scalar_prefetch = 0 : i64, scratch_operands = 2 : i64, tpu.core_type = #tpu.core_type<tc>, window_params = [{transform_indices = @transform_0, window_bounds = array<i64: 1, 16, 16, 4>}, {pipeline_mode = #tpu.pipeline_mode<synchronous>, transform_indices = @transform_1, window_bounds = array<i64: 36, 8>}, {transform_indices = @transform_2, window_bounds = array<i64: 1, 16, 16, 8>}, {transform_indices = @transform_3, window_bounds = array<i64: 1, 2, 8>}]} {
    %c0 = arith.constant 0 : index
    %c0_0 = arith.constant 0 : index
    %c0_1 = arith.constant 0 : index
    %c0_2 = arith.constant 0 : index
    %0 = vector.load %arg1[%c0, %c0_0, %c0_1, %c0_2] : memref<1x16x16x4xf32, #tpu.memory_space<vmem>>, vector<1x16x16x4xf32>
    %1 = vector.shape_cast %0 : vector<1x16x16x4xf32> to vector<16x16x4xf32>
    %cst = arith.constant 0.000000e+00 : f32
    %2 = vector.broadcast %cst : f32 to vector<18x18x4xf32>
    %c0_3 = arith.constant 0 : index
    %c0_4 = arith.constant 0 : index
    %c0_5 = arith.constant 0 : index
    %3 = vector.load %arg5[%c0_3, %c0_4, %c0_5] : memref<18x18x4xf32, #tpu.memory_space<vmem>>, vector<18x18x4xf32>
    tpu.vector_store %arg5[%c0_3, %c0_4, %c0_5], %2 {strides = array<i32>} : memref<18x18x4xf32, #tpu.memory_space<vmem>>, vector<18x18x4xf32>,
    %c1 = arith.constant 1 : index
    %c1_6 = arith.constant 1 : index
    %c0_7 = arith.constant 0 : index
    %4 = vector.load %arg5[%c1, %c1_6, %c0_7] : memref<18x18x4xf32, #tpu.memory_space<vmem>>, vector<16x16x4xf32>
    tpu.vector_store %arg5[%c1, %c1_6, %c0_7], %1 {strides = array<i32>} : memref<18x18x4xf32, #tpu.memory_space<vmem>>, vector<16x16x4xf32>,
    %c0_8 = arith.constant 0 : index
    %c0_9 = arith.constant 0 : index
    %c0_10 = arith.constant 0 : index
    %5 = vector.load %arg5[%c0_8, %c0_9, %c0_10] : memref<18x18x4xf32, #tpu.memory_space<vmem>>, vector<16x16x4xf32>
    %6 = vector.shape_cast %5 : vector<16x16x4xf32> to vector<256x4xf32>
    %c0_11 = arith.constant 0 : index
    %c0_12 = arith.constant 0 : index
    %7 = vector.load %arg6[%c0_11, %c0_12] : memref<256x36xf32, #tpu.memory_space<vmem>>, vector<256x4xf32>
    tpu.vector_store %arg6[%c0_11, %c0_12], %6 {strides = array<i32>} : memref<256x36xf32, #tpu.memory_space<vmem>>, vector<256x4xf32>,
    %c0_13 = arith.constant 0 : index
    %c1_14 = arith.constant 1 : index
    %c0_15 = arith.constant 0 : index
    %8 = vector.load %arg5[%c0_13, %c1_14, %c0_15] : memref<18x18x4xf32, #tpu.memory_space<vmem>>, vector<16x16x4xf32>
    %9 = vector.shape_cast %8 : vector<16x16x4xf32> to vector<256x4xf32>
    %c0_16 = arith.constant 0 : index
    %c4 = arith.constant 4 : index
    %10 = vector.load %arg6[%c0_16, %c4] : memref<256x36xf32, #tpu.memory_space<vmem>>, vector<256x4xf32>
    tpu.vector_store %arg6[%c0_16, %c4], %9 {strides = array<i32>} : memref<256x36xf32, #tpu.memory_space<vmem>>, vector<256x4xf32>,
    %c0_17 = arith.constant 0 : index
    %c2 = arith.constant 2 : index
    %c0_18 = arith.constant 0 : index
    %11 = vector.load %arg5[%c0_17, %c2, %c0_18] : memref<18x18x4xf32, #tpu.memory_space<vmem>>, vector<16x16x4xf32>
    %12 = vector.shape_cast %11 : vector<16x16x4xf32> to vector<256x4xf32>
    %c0_19 = arith.constant 0 : index
    %c8 = arith.constant 8 : index
    %13 = vector.load %arg6[%c0_19, %c8] : memref<256x36xf32, #tpu.memory_space<vmem>>, vector<256x4xf32>
    tpu.vector_store %arg6[%c0_19, %c8], %12 {strides = array<i32>} : memref<256x36xf32, #tpu.memory_space<vmem>>, vector<256x4xf32>,
    %c1_20 = arith.constant 1 : index
    %c0_21 = arith.constant 0 : index
    %c0_22 = arith.constant 0 : index
    %14 = vector.load %arg5[%c1_20, %c0_21, %c0_22] : memref<18x18x4xf32, #tpu.memory_space<vmem>>, vector<16x16x4xf32>
    %15 = vector.shape_cast %14 : vector<16x16x4xf32> to vector<256x4xf32>
    %c0_23 = arith.constant 0 : index
    %c12 = arith.constant 12 : index
    %16 = vector.load %arg6[%c0_23, %c12] : memref<256x36xf32, #tpu.memory_space<vmem>>, vector<256x4xf32>
    tpu.vector_store %arg6[%c0_23, %c12], %15 {strides = array<i32>} : memref<256x36xf32, #tpu.memory_space<vmem>>, vector<256x4xf32>,
    %c1_24 = arith.constant 1 : index
    %c1_25 = arith.constant 1 : index
    %c0_26 = arith.constant 0 : index
    %17 = vector.load %arg5[%c1_24, %c1_25, %c0_26] : memref<18x18x4xf32, #tpu.memory_space<vmem>>, vector<16x16x4xf32>
    %18 = vector.shape_cast %17 : vector<16x16x4xf32> to vector<256x4xf32>
    %c0_27 = arith.constant 0 : index
    %c16 = arith.constant 16 : index
    %19 = vector.load %arg6[%c0_27, %c16] : memref<256x36xf32, #tpu.memory_space<vmem>>, vector<256x4xf32>
    tpu.vector_store %arg6[%c0_27, %c16], %18 {strides = array<i32>} : memref<256x36xf32, #tpu.memory_space<vmem>>, vector<256x4xf32>,
    %c1_28 = arith.constant 1 : index
    %c2_29 = arith.constant 2 : index
    %c0_30 = arith.constant 0 : index
    %20 = vector.load %arg5[%c1_28, %c2_29, %c0_30] : memref<18x18x4xf32, #tpu.memory_space<vmem>>, vector<16x16x4xf32>
    %21 = vector.shape_cast %20 : vector<16x16x4xf32> to vector<256x4xf32>
    %c0_31 = arith.constant 0 : index
    %c20 = arith.constant 20 : index
    %22 = vector.load %arg6[%c0_31, %c20] : memref<256x36xf32, #tpu.memory_space<vmem>>, vector<256x4xf32>
    tpu.vector_store %arg6[%c0_31, %c20], %21 {strides = array<i32>} : memref<256x36xf32, #tpu.memory_space<vmem>>, vector<256x4xf32>,
    %c2_32 = arith.constant 2 : index
    %c0_33 = arith.constant 0 : index
    %c0_34 = arith.constant 0 : index
    %23 = vector.load %arg5[%c2_32, %c0_33, %c0_34] : memref<18x18x4xf32, #tpu.memory_space<vmem>>, vector<16x16x4xf32>
    %24 = vector.shape_cast %23 : vector<16x16x4xf32> to vector<256x4xf32>
    %c0_35 = arith.constant 0 : index
    %c24 = arith.constant 24 : index
    %25 = vector.load %arg6[%c0_35, %c24] : memref<256x36xf32, #tpu.memory_space<vmem>>, vector<256x4xf32>
    tpu.vector_store %arg6[%c0_35, %c24], %24 {strides = array<i32>} : memref<256x36xf32, #tpu.memory_space<vmem>>, vector<256x4xf32>,
    %c2_36 = arith.constant 2 : index
    %c1_37 = arith.constant 1 : index
    %c0_38 = arith.constant 0 : index
    %26 = vector.load %arg5[%c2_36, %c1_37, %c0_38] : memref<18x18x4xf32, #tpu.memory_space<vmem>>, vector<16x16x4xf32>
    %27 = vector.shape_cast %26 : vector<16x16x4xf32> to vector<256x4xf32>
    %c0_39 = arith.constant 0 : index
    %c28 = arith.constant 28 : index
    %28 = vector.load %arg6[%c0_39, %c28] : memref<256x36xf32, #tpu.memory_space<vmem>>, vector<256x4xf32>
    tpu.vector_store %arg6[%c0_39, %c28], %27 {strides = array<i32>} : memref<256x36xf32, #tpu.memory_space<vmem>>, vector<256x4xf32>,
    %c2_40 = arith.constant 2 : index
    %c2_41 = arith.constant 2 : index
    %c0_42 = arith.constant 0 : index
    %29 = vector.load %arg5[%c2_40, %c2_41, %c0_42] : memref<18x18x4xf32, #tpu.memory_space<vmem>>, vector<16x16x4xf32>
    %30 = vector.shape_cast %29 : vector<16x16x4xf32> to vector<256x4xf32>
    %c0_43 = arith.constant 0 : index
    %c32 = arith.constant 32 : index
    %31 = vector.load %arg6[%c0_43, %c32] : memref<256x36xf32, #tpu.memory_space<vmem>>, vector<256x4xf32>
    tpu.vector_store %arg6[%c0_43, %c32], %30 {strides = array<i32>} : memref<256x36xf32, #tpu.memory_space<vmem>>, vector<256x4xf32>,
    %c0_44 = arith.constant 0 : index
    %c0_45 = arith.constant 0 : index
    %32 = vector.load %arg6[%c0_44, %c0_45] : memref<256x36xf32, #tpu.memory_space<vmem>>, vector<256x36xf32>
    %c0_46 = arith.constant 0 : index
    %c0_47 = arith.constant 0 : index
    %33 = vector.load %arg2[%c0_46, %c0_47] : memref<36x8xf32, #tpu.memory_space<vmem>>, vector<36x8xf32>
    %cst_48 = arith.constant dense<0.000000e+00> : vector<256x8xf32>
    %34 = tpu.matmul %32, %33, %cst_48 {dimension_numbers = #tpu.dot_dimension_numbers<[1], [0], [0], [1], [0, 0, 1, 1], [], []>} : vector<256x36xf32>, vector<36x8xf32>, vector<256x8xf32> -> vector<256x8xf32>
    %cst_49 = arith.constant dense<0.000000e+00> : vector<8xf32>
    %35 = vector.multi_reduction <add>, %34, %cst_49 [0] : vector<256x8xf32> to vector<8xf32>
    %36 = vector.shape_cast %35 : vector<8xf32> to vector<1x8xf32>
    %c0_50 = arith.constant 0 : index
    %c0_51 = arith.constant 0 : index
    %c0_52 = arith.constant 0 : index
    %37 = vector.load %arg4[%c0_50, %c0_51, %c0_52] : memref<1x2x8xf32, #tpu.memory_space<vmem>>, vector<1x1x8xf32>
    %38 = vector.shape_cast %37 : vector<1x1x8xf32> to vector<1x8xf32>
    %39 = vector.shape_cast %36 : vector<1x8xf32> to vector<1x1x8xf32>
    tpu.vector_store %arg4[%c0_50, %c0_51, %c0_52], %39 {strides = array<i32>} : memref<1x2x8xf32, #tpu.memory_space<vmem>>, vector<1x1x8xf32>,
    %40 = arith.mulf %34, %34 : vector<256x8xf32>
    %cst_53 = arith.constant dense<0.000000e+00> : vector<8xf32>
    %41 = vector.multi_reduction <add>, %40, %cst_53 [0] : vector<256x8xf32> to vector<8xf32>
    %42 = vector.shape_cast %41 : vector<8xf32> to vector<1x8xf32>
    %c0_54 = arith.constant 0 : index
    %c1_55 = arith.constant 1 : index
    %c0_56 = arith.constant 0 : index
    %43 = vector.load %arg4[%c0_54, %c1_55, %c0_56] : memref<1x2x8xf32, #tpu.memory_space<vmem>>, vector<1x1x8xf32>
    %44 = vector.shape_cast %43 : vector<1x1x8xf32> to vector<1x8xf32>
    %45 = vector.shape_cast %42 : vector<1x8xf32> to vector<1x1x8xf32>
    tpu.vector_store %arg4[%c0_54, %c1_55, %c0_56], %45 {strides = array<i32>} : memref<1x2x8xf32, #tpu.memory_space<vmem>>, vector<1x1x8xf32>,
    %46 = vector.shape_cast %34 : vector<256x8xf32> to vector<1x16x16x8xf32>
    %c0_57 = arith.constant 0 : index
    %c0_58 = arith.constant 0 : index
    %c0_59 = arith.constant 0 : index
    %c0_60 = arith.constant 0 : index
    %47 = vector.load %arg3[%c0_57, %c0_58, %c0_59, %c0_60] : memref<1x16x16x8xf32, #tpu.memory_space<vmem>>, vector<1x16x16x8xf32>
    tpu.vector_store %arg3[%c0_57, %c0_58, %c0_59, %c0_60], %46 {strides = array<i32>} : memref<1x16x16x8xf32, #tpu.memory_space<vmem>>, vector<1x16x16x8xf32>,
    return
  }
  func.func @transform_0(%arg0: i32) -> (i32, i32, i32, i32) {
    %c0_i32 = arith.constant 0 : i32
    %c0_i32_0 = arith.constant 0 : i32
    %c0_i32_1 = arith.constant 0 : i32
    %c0_i32_2 = arith.constant 0 : i32
    return %arg0, %c0_i32, %c0_i32_0, %c0_i32_1 : i32, i32, i32, i32
  }
  func.func @transform_1(%arg0: i32) -> (i32, i32) {
    %c0_i32 = arith.constant 0 : i32
    %c0_i32_0 = arith.constant 0 : i32
    %c0_i32_1 = arith.constant 0 : i32
    return %c0_i32, %c0_i32_0 : i32, i32
  }
  func.func @transform_2(%arg0: i32) -> (i32, i32, i32, i32) {
    %c0_i32 = arith.constant 0 : i32
    %c0_i32_0 = arith.constant 0 : i32
    %c0_i32_1 = arith.constant 0 : i32
    %c0_i32_2 = arith.constant 0 : i32
    return %arg0, %c0_i32, %c0_i32_0, %c0_i32_1 : i32, i32, i32, i32
  }
  func.func @transform_3(%arg0: i32) -> (i32, i32, i32) {
    %c0_i32 = arith.constant 0 : i32
    %c0_i32_0 = arith.constant 0 : i32
    %c0_i32_1 = arith.constant 0 : i32
    return %arg0, %c0_i32, %c0_i32_0 : i32, i32, i32
  }
}

module attributes {stable_mosaic.version = 11 : i64} {
  func.func @_conv3x3_kernel(%arg0: i32, %arg1: memref<1x16x16x8xf32, #tpu.memory_space<vmem>>, %arg2: memref<72x8xf32, #tpu.memory_space<vmem>>, %arg3: memref<1x8xf32, #tpu.memory_space<vmem>>, %arg4: memref<1x8xf32, #tpu.memory_space<vmem>>, %arg5: memref<1x16x16x8xf32, #tpu.memory_space<vmem>>, %arg6: memref<1x2x8xf32, #tpu.memory_space<vmem>>, %arg7: memref<18x18x8xf32, #tpu.memory_space<vmem>>, %arg8: memref<256x72xf32, #tpu.memory_space<vmem>>) attributes {dimension_semantics = [#tpu.dimension_semantics<parallel>], iteration_bounds = array<i64: 2>, scalar_prefetch = 0 : i64, scratch_operands = 2 : i64, tpu.core_type = #tpu.core_type<tc>, window_params = [{transform_indices = @transform_0, window_bounds = array<i64: 1, 16, 16, 8>}, {pipeline_mode = #tpu.pipeline_mode<synchronous>, transform_indices = @transform_1, window_bounds = array<i64: 72, 8>}, {pipeline_mode = #tpu.pipeline_mode<synchronous>, transform_indices = @transform_2, window_bounds = array<i64: 1, 8>}, {pipeline_mode = #tpu.pipeline_mode<synchronous>, transform_indices = @transform_3, window_bounds = array<i64: 1, 8>}, {transform_indices = @transform_4, window_bounds = array<i64: 1, 16, 16, 8>}, {transform_indices = @transform_5, window_bounds = array<i64: 1, 2, 8>}]} {
    %c0 = arith.constant 0 : index
    %c0_0 = arith.constant 0 : index
    %c0_1 = arith.constant 0 : index
    %c0_2 = arith.constant 0 : index
    %0 = vector.load %arg1[%c0, %c0_0, %c0_1, %c0_2] : memref<1x16x16x8xf32, #tpu.memory_space<vmem>>, vector<1x16x16x8xf32>
    %1 = vector.shape_cast %0 : vector<1x16x16x8xf32> to vector<16x16x8xf32>
    %c0_3 = arith.constant 0 : index
    %c0_4 = arith.constant 0 : index
    %2 = vector.load %arg3[%c0_3, %c0_4] : memref<1x8xf32, #tpu.memory_space<vmem>>, vector<1x8xf32>
    %3 = vector.shape_cast %2 : vector<1x8xf32> to vector<1x1x8xf32>
    %c0_5 = arith.constant 0 : index
    %c0_6 = arith.constant 0 : index
    %4 = vector.load %arg4[%c0_5, %c0_6] : memref<1x8xf32, #tpu.memory_space<vmem>>, vector<1x8xf32>
    %5 = vector.shape_cast %4 : vector<1x8xf32> to vector<1x1x8xf32>
    %6 = vector.broadcast %3 : vector<1x1x8xf32> to vector<16x16x8xf32>
    %7 = arith.mulf %1, %6 : vector<16x16x8xf32>
    %8 = vector.broadcast %5 : vector<1x1x8xf32> to vector<16x16x8xf32>
    %9 = arith.addf %7, %8 : vector<16x16x8xf32>
    %cst = arith.constant 0.000000e+00 : f32
    %10 = vector.broadcast %cst : f32 to vector<16x16x8xf32>
    %11 = arith.cmpf oge, %9, %10 : vector<16x16x8xf32>
    %cst_7 = arith.constant 2.000000e-01 : f32
    %12 = vector.broadcast %cst_7 : f32 to vector<16x16x8xf32>
    %13 = arith.mulf %12, %9 : vector<16x16x8xf32>
    %14 = arith.select %11, %9, %13 : vector<16x16x8xi1>, vector<16x16x8xf32>
    %cst_8 = arith.constant 0.000000e+00 : f32
    %15 = vector.broadcast %cst_8 : f32 to vector<18x18x8xf32>
    %c0_9 = arith.constant 0 : index
    %c0_10 = arith.constant 0 : index
    %c0_11 = arith.constant 0 : index
    %16 = vector.load %arg7[%c0_9, %c0_10, %c0_11] : memref<18x18x8xf32, #tpu.memory_space<vmem>>, vector<18x18x8xf32>
    tpu.vector_store %arg7[%c0_9, %c0_10, %c0_11], %15 {strides = array<i32>} : memref<18x18x8xf32, #tpu.memory_space<vmem>>, vector<18x18x8xf32>,
    %c1 = arith.constant 1 : index
    %c1_12 = arith.constant 1 : index
    %c0_13 = arith.constant 0 : index
    %17 = vector.load %arg7[%c1, %c1_12, %c0_13] : memref<18x18x8xf32, #tpu.memory_space<vmem>>, vector<16x16x8xf32>
    tpu.vector_store %arg7[%c1, %c1_12, %c0_13], %14 {strides = array<i32>} : memref<18x18x8xf32, #tpu.memory_space<vmem>>, vector<16x16x8xf32>,
    %c0_14 = arith.constant 0 : index
    %c0_15 = arith.constant 0 : index
    %c0_16 = arith.constant 0 : index
    %18 = vector.load %arg7[%c0_14, %c0_15, %c0_16] : memref<18x18x8xf32, #tpu.memory_space<vmem>>, vector<16x16x8xf32>
    %19 = vector.shape_cast %18 : vector<16x16x8xf32> to vector<256x8xf32>
    %c0_17 = arith.constant 0 : index
    %c0_18 = arith.constant 0 : index
    %20 = vector.load %arg8[%c0_17, %c0_18] : memref<256x72xf32, #tpu.memory_space<vmem>>, vector<256x8xf32>
    tpu.vector_store %arg8[%c0_17, %c0_18], %19 {strides = array<i32>} : memref<256x72xf32, #tpu.memory_space<vmem>>, vector<256x8xf32>,
    %c0_19 = arith.constant 0 : index
    %c1_20 = arith.constant 1 : index
    %c0_21 = arith.constant 0 : index
    %21 = vector.load %arg7[%c0_19, %c1_20, %c0_21] : memref<18x18x8xf32, #tpu.memory_space<vmem>>, vector<16x16x8xf32>
    %22 = vector.shape_cast %21 : vector<16x16x8xf32> to vector<256x8xf32>
    %c0_22 = arith.constant 0 : index
    %c8 = arith.constant 8 : index
    %23 = vector.load %arg8[%c0_22, %c8] : memref<256x72xf32, #tpu.memory_space<vmem>>, vector<256x8xf32>
    tpu.vector_store %arg8[%c0_22, %c8], %22 {strides = array<i32>} : memref<256x72xf32, #tpu.memory_space<vmem>>, vector<256x8xf32>,
    %c0_23 = arith.constant 0 : index
    %c2 = arith.constant 2 : index
    %c0_24 = arith.constant 0 : index
    %24 = vector.load %arg7[%c0_23, %c2, %c0_24] : memref<18x18x8xf32, #tpu.memory_space<vmem>>, vector<16x16x8xf32>
    %25 = vector.shape_cast %24 : vector<16x16x8xf32> to vector<256x8xf32>
    %c0_25 = arith.constant 0 : index
    %c16 = arith.constant 16 : index
    %26 = vector.load %arg8[%c0_25, %c16] : memref<256x72xf32, #tpu.memory_space<vmem>>, vector<256x8xf32>
    tpu.vector_store %arg8[%c0_25, %c16], %25 {strides = array<i32>} : memref<256x72xf32, #tpu.memory_space<vmem>>, vector<256x8xf32>,
    %c1_26 = arith.constant 1 : index
    %c0_27 = arith.constant 0 : index
    %c0_28 = arith.constant 0 : index
    %27 = vector.load %arg7[%c1_26, %c0_27, %c0_28] : memref<18x18x8xf32, #tpu.memory_space<vmem>>, vector<16x16x8xf32>
    %28 = vector.shape_cast %27 : vector<16x16x8xf32> to vector<256x8xf32>
    %c0_29 = arith.constant 0 : index
    %c24 = arith.constant 24 : index
    %29 = vector.load %arg8[%c0_29, %c24] : memref<256x72xf32, #tpu.memory_space<vmem>>, vector<256x8xf32>
    tpu.vector_store %arg8[%c0_29, %c24], %28 {strides = array<i32>} : memref<256x72xf32, #tpu.memory_space<vmem>>, vector<256x8xf32>,
    %c1_30 = arith.constant 1 : index
    %c1_31 = arith.constant 1 : index
    %c0_32 = arith.constant 0 : index
    %30 = vector.load %arg7[%c1_30, %c1_31, %c0_32] : memref<18x18x8xf32, #tpu.memory_space<vmem>>, vector<16x16x8xf32>
    %31 = vector.shape_cast %30 : vector<16x16x8xf32> to vector<256x8xf32>
    %c0_33 = arith.constant 0 : index
    %c32 = arith.constant 32 : index
    %32 = vector.load %arg8[%c0_33, %c32] : memref<256x72xf32, #tpu.memory_space<vmem>>, vector<256x8xf32>
    tpu.vector_store %arg8[%c0_33, %c32], %31 {strides = array<i32>} : memref<256x72xf32, #tpu.memory_space<vmem>>, vector<256x8xf32>,
    %c1_34 = arith.constant 1 : index
    %c2_35 = arith.constant 2 : index
    %c0_36 = arith.constant 0 : index
    %33 = vector.load %arg7[%c1_34, %c2_35, %c0_36] : memref<18x18x8xf32, #tpu.memory_space<vmem>>, vector<16x16x8xf32>
    %34 = vector.shape_cast %33 : vector<16x16x8xf32> to vector<256x8xf32>
    %c0_37 = arith.constant 0 : index
    %c40 = arith.constant 40 : index
    %35 = vector.load %arg8[%c0_37, %c40] : memref<256x72xf32, #tpu.memory_space<vmem>>, vector<256x8xf32>
    tpu.vector_store %arg8[%c0_37, %c40], %34 {strides = array<i32>} : memref<256x72xf32, #tpu.memory_space<vmem>>, vector<256x8xf32>,
    %c2_38 = arith.constant 2 : index
    %c0_39 = arith.constant 0 : index
    %c0_40 = arith.constant 0 : index
    %36 = vector.load %arg7[%c2_38, %c0_39, %c0_40] : memref<18x18x8xf32, #tpu.memory_space<vmem>>, vector<16x16x8xf32>
    %37 = vector.shape_cast %36 : vector<16x16x8xf32> to vector<256x8xf32>
    %c0_41 = arith.constant 0 : index
    %c48 = arith.constant 48 : index
    %38 = vector.load %arg8[%c0_41, %c48] : memref<256x72xf32, #tpu.memory_space<vmem>>, vector<256x8xf32>
    tpu.vector_store %arg8[%c0_41, %c48], %37 {strides = array<i32>} : memref<256x72xf32, #tpu.memory_space<vmem>>, vector<256x8xf32>,
    %c2_42 = arith.constant 2 : index
    %c1_43 = arith.constant 1 : index
    %c0_44 = arith.constant 0 : index
    %39 = vector.load %arg7[%c2_42, %c1_43, %c0_44] : memref<18x18x8xf32, #tpu.memory_space<vmem>>, vector<16x16x8xf32>
    %40 = vector.shape_cast %39 : vector<16x16x8xf32> to vector<256x8xf32>
    %c0_45 = arith.constant 0 : index
    %c56 = arith.constant 56 : index
    %41 = vector.load %arg8[%c0_45, %c56] : memref<256x72xf32, #tpu.memory_space<vmem>>, vector<256x8xf32>
    tpu.vector_store %arg8[%c0_45, %c56], %40 {strides = array<i32>} : memref<256x72xf32, #tpu.memory_space<vmem>>, vector<256x8xf32>,
    %c2_46 = arith.constant 2 : index
    %c2_47 = arith.constant 2 : index
    %c0_48 = arith.constant 0 : index
    %42 = vector.load %arg7[%c2_46, %c2_47, %c0_48] : memref<18x18x8xf32, #tpu.memory_space<vmem>>, vector<16x16x8xf32>
    %43 = vector.shape_cast %42 : vector<16x16x8xf32> to vector<256x8xf32>
    %c0_49 = arith.constant 0 : index
    %c64 = arith.constant 64 : index
    %44 = vector.load %arg8[%c0_49, %c64] : memref<256x72xf32, #tpu.memory_space<vmem>>, vector<256x8xf32>
    tpu.vector_store %arg8[%c0_49, %c64], %43 {strides = array<i32>} : memref<256x72xf32, #tpu.memory_space<vmem>>, vector<256x8xf32>,
    %c0_50 = arith.constant 0 : index
    %c0_51 = arith.constant 0 : index
    %45 = vector.load %arg8[%c0_50, %c0_51] : memref<256x72xf32, #tpu.memory_space<vmem>>, vector<256x72xf32>
    %c0_52 = arith.constant 0 : index
    %c0_53 = arith.constant 0 : index
    %46 = vector.load %arg2[%c0_52, %c0_53] : memref<72x8xf32, #tpu.memory_space<vmem>>, vector<72x8xf32>
    %cst_54 = arith.constant dense<0.000000e+00> : vector<256x8xf32>
    %47 = tpu.matmul %45, %46, %cst_54 {dimension_numbers = #tpu.dot_dimension_numbers<[1], [0], [0], [1], [0, 0, 1, 1], [], []>} : vector<256x72xf32>, vector<72x8xf32>, vector<256x8xf32> -> vector<256x8xf32>
    %cst_55 = arith.constant dense<0.000000e+00> : vector<8xf32>
    %48 = vector.multi_reduction <add>, %47, %cst_55 [0] : vector<256x8xf32> to vector<8xf32>
    %49 = vector.shape_cast %48 : vector<8xf32> to vector<1x8xf32>
    %c0_56 = arith.constant 0 : index
    %c0_57 = arith.constant 0 : index
    %c0_58 = arith.constant 0 : index
    %50 = vector.load %arg6[%c0_56, %c0_57, %c0_58] : memref<1x2x8xf32, #tpu.memory_space<vmem>>, vector<1x1x8xf32>
    %51 = vector.shape_cast %50 : vector<1x1x8xf32> to vector<1x8xf32>
    %52 = vector.shape_cast %49 : vector<1x8xf32> to vector<1x1x8xf32>
    tpu.vector_store %arg6[%c0_56, %c0_57, %c0_58], %52 {strides = array<i32>} : memref<1x2x8xf32, #tpu.memory_space<vmem>>, vector<1x1x8xf32>,
    %53 = arith.mulf %47, %47 : vector<256x8xf32>
    %cst_59 = arith.constant dense<0.000000e+00> : vector<8xf32>
    %54 = vector.multi_reduction <add>, %53, %cst_59 [0] : vector<256x8xf32> to vector<8xf32>
    %55 = vector.shape_cast %54 : vector<8xf32> to vector<1x8xf32>
    %c0_60 = arith.constant 0 : index
    %c1_61 = arith.constant 1 : index
    %c0_62 = arith.constant 0 : index
    %56 = vector.load %arg6[%c0_60, %c1_61, %c0_62] : memref<1x2x8xf32, #tpu.memory_space<vmem>>, vector<1x1x8xf32>
    %57 = vector.shape_cast %56 : vector<1x1x8xf32> to vector<1x8xf32>
    %58 = vector.shape_cast %55 : vector<1x8xf32> to vector<1x1x8xf32>
    tpu.vector_store %arg6[%c0_60, %c1_61, %c0_62], %58 {strides = array<i32>} : memref<1x2x8xf32, #tpu.memory_space<vmem>>, vector<1x1x8xf32>,
    %59 = vector.shape_cast %47 : vector<256x8xf32> to vector<1x16x16x8xf32>
    %c0_63 = arith.constant 0 : index
    %c0_64 = arith.constant 0 : index
    %c0_65 = arith.constant 0 : index
    %c0_66 = arith.constant 0 : index
    %60 = vector.load %arg5[%c0_63, %c0_64, %c0_65, %c0_66] : memref<1x16x16x8xf32, #tpu.memory_space<vmem>>, vector<1x16x16x8xf32>
    tpu.vector_store %arg5[%c0_63, %c0_64, %c0_65, %c0_66], %59 {strides = array<i32>} : memref<1x16x16x8xf32, #tpu.memory_space<vmem>>, vector<1x16x16x8xf32>,
    return
  }
  func.func @transform_0(%arg0: i32) -> (i32, i32, i32, i32) {
    %c0_i32 = arith.constant 0 : i32
    %c0_i32_0 = arith.constant 0 : i32
    %c0_i32_1 = arith.constant 0 : i32
    %c0_i32_2 = arith.constant 0 : i32
    return %arg0, %c0_i32, %c0_i32_0, %c0_i32_1 : i32, i32, i32, i32
  }
  func.func @transform_1(%arg0: i32) -> (i32, i32) {
    %c0_i32 = arith.constant 0 : i32
    %c0_i32_0 = arith.constant 0 : i32
    %c0_i32_1 = arith.constant 0 : i32
    return %c0_i32, %c0_i32_0 : i32, i32
  }
  func.func @transform_2(%arg0: i32) -> (i32, i32) {
    %c0_i32 = arith.constant 0 : i32
    %c0_i32_0 = arith.constant 0 : i32
    %c0_i32_1 = arith.constant 0 : i32
    return %c0_i32, %c0_i32_0 : i32, i32
  }
  func.func @transform_3(%arg0: i32) -> (i32, i32) {
    %c0_i32 = arith.constant 0 : i32
    %c0_i32_0 = arith.constant 0 : i32
    %c0_i32_1 = arith.constant 0 : i32
    return %c0_i32, %c0_i32_0 : i32, i32
  }
  func.func @transform_4(%arg0: i32) -> (i32, i32, i32, i32) {
    %c0_i32 = arith.constant 0 : i32
    %c0_i32_0 = arith.constant 0 : i32
    %c0_i32_1 = arith.constant 0 : i32
    %c0_i32_2 = arith.constant 0 : i32
    return %arg0, %c0_i32, %c0_i32_0, %c0_i32_1 : i32, i32, i32, i32
  }
  func.func @transform_5(%arg0: i32) -> (i32, i32, i32) {
    %c0_i32 = arith.constant 0 : i32
    %c0_i32_0 = arith.constant 0 : i32
    %c0_i32_1 = arith.constant 0 : i32
    return %arg0, %c0_i32, %c0_i32_0 : i32, i32, i32
  }
}

module attributes {stable_mosaic.version = 11 : i64} {
  func.func @_bn_lrelu_kernel(%arg0: i32, %arg1: memref<1x16x16x8xf32, #tpu.memory_space<vmem>>, %arg2: memref<1x8xf32, #tpu.memory_space<vmem>>, %arg3: memref<1x8xf32, #tpu.memory_space<vmem>>, %arg4: memref<1x16x16x8xf32, #tpu.memory_space<vmem>>) attributes {dimension_semantics = [#tpu.dimension_semantics<parallel>], iteration_bounds = array<i64: 2>, scalar_prefetch = 0 : i64, scratch_operands = 0 : i64, tpu.core_type = #tpu.core_type<tc>, window_params = [{transform_indices = @transform_0, window_bounds = array<i64: 1, 16, 16, 8>}, {pipeline_mode = #tpu.pipeline_mode<synchronous>, transform_indices = @transform_1, window_bounds = array<i64: 1, 8>}, {pipeline_mode = #tpu.pipeline_mode<synchronous>, transform_indices = @transform_2, window_bounds = array<i64: 1, 8>}, {transform_indices = @transform_3, window_bounds = array<i64: 1, 16, 16, 8>}]} {
    %c0 = arith.constant 0 : index
    %c0_0 = arith.constant 0 : index
    %0 = vector.load %arg2[%c0, %c0_0] : memref<1x8xf32, #tpu.memory_space<vmem>>, vector<1x8xf32>
    %1 = vector.shape_cast %0 : vector<1x8xf32> to vector<1x1x1x8xf32>
    %c0_1 = arith.constant 0 : index
    %c0_2 = arith.constant 0 : index
    %2 = vector.load %arg3[%c0_1, %c0_2] : memref<1x8xf32, #tpu.memory_space<vmem>>, vector<1x8xf32>
    %3 = vector.shape_cast %2 : vector<1x8xf32> to vector<1x1x1x8xf32>
    %c0_3 = arith.constant 0 : index
    %c0_4 = arith.constant 0 : index
    %c0_5 = arith.constant 0 : index
    %c0_6 = arith.constant 0 : index
    %4 = vector.load %arg1[%c0_3, %c0_4, %c0_5, %c0_6] : memref<1x16x16x8xf32, #tpu.memory_space<vmem>>, vector<1x16x16x8xf32>
    %5 = vector.broadcast %1 : vector<1x1x1x8xf32> to vector<1x16x16x8xf32>
    %6 = arith.mulf %4, %5 : vector<1x16x16x8xf32>
    %7 = vector.broadcast %3 : vector<1x1x1x8xf32> to vector<1x16x16x8xf32>
    %8 = arith.addf %6, %7 : vector<1x16x16x8xf32>
    %cst = arith.constant 0.000000e+00 : f32
    %9 = vector.broadcast %cst : f32 to vector<1x16x16x8xf32>
    %10 = arith.cmpf oge, %8, %9 : vector<1x16x16x8xf32>
    %cst_7 = arith.constant 2.000000e-01 : f32
    %11 = vector.broadcast %cst_7 : f32 to vector<1x16x16x8xf32>
    %12 = arith.mulf %11, %8 : vector<1x16x16x8xf32>
    %13 = arith.select %10, %8, %12 : vector<1x16x16x8xi1>, vector<1x16x16x8xf32>
    %c0_8 = arith.constant 0 : index
    %c0_9 = arith.constant 0 : index
    %c0_10 = arith.constant 0 : index
    %c0_11 = arith.constant 0 : index
    %14 = vector.load %arg4[%c0_8, %c0_9, %c0_10, %c0_11] : memref<1x16x16x8xf32, #tpu.memory_space<vmem>>, vector<1x16x16x8xf32>
    tpu.vector_store %arg4[%c0_8, %c0_9, %c0_10, %c0_11], %13 {strides = array<i32>} : memref<1x16x16x8xf32, #tpu.memory_space<vmem>>, vector<1x16x16x8xf32>,
    return
  }
  func.func @transform_0(%arg0: i32) -> (i32, i32, i32, i32) {
    %c0_i32 = arith.constant 0 : i32
    %c0_i32_0 = arith.constant 0 : i32
    %c0_i32_1 = arith.constant 0 : i32
    %c0_i32_2 = arith.constant 0 : i32
    return %arg0, %c0_i32, %c0_i32_0, %c0_i32_1 : i32, i32, i32, i32
  }
  func.func @transform_1(%arg0: i32) -> (i32, i32) {
    %c0_i32 = arith.constant 0 : i32
    %c0_i32_0 = arith.constant 0 : i32
    %c0_i32_1 = arith.constant 0 : i32
    return %c0_i32, %c0_i32_0 : i32, i32
  }
  func.func @transform_2(%arg0: i32) -> (i32, i32) {
    %c0_i32 = arith.constant 0 : i32
    %c0_i32_0 = arith.constant 0 : i32
    %c0_i32_1 = arith.constant 0 : i32
    return %c0_i32, %c0_i32_0 : i32, i32
  }
  func.func @transform_3(%arg0: i32) -> (i32, i32, i32, i32) {
    %c0_i32 = arith.constant 0 : i32
    %c0_i32_0 = arith.constant 0 : i32
    %c0_i32_1 = arith.constant 0 : i32
    %c0_i32_2 = arith.constant 0 : i32
    return %arg0, %c0_i32, %c0_i32_0, %c0_i32_1 : i32, i32, i32, i32
  }
}

</mosaic_0001>

<bundles_post_ra>
// kernel: conv_block_forward.5
= control target key start
LH: loop header
LB: loop body
LE: loop exit
PB: predicated region body
PF: predicated region fallthrough
CT: control target
= control target key end

     0   :  { %s510_s12 = smov 0   ;;  %s705_s0 = inlined_call_operand.vmem [shape: f32[2,16,16,8], index: 0, kind: input, shape index: {}]   ;;  %s706_s1 = inlined_call_operand.vmem [shape: f32[1,8], index: 1, kind: input, shape index: {}]   ;;  %s707_s2 = inlined_call_operand.vmem [shape: f32[1,8], index: 2, kind: input, shape index: {}]   ;;  %s708_s3 = inlined_call_operand.vmem [shape: f32[2,16,16,8], index: 3, kind: output, shape index: {}]  }
   0x1 LB: > { %s459_s13 = sadd.s32 4294967295, %s488_s12   ;;  %p463_p0 = scmp.ge.s32.totalorder %s488_s12, 1  ;;  %s488_s12 = sphi %s510_s12, %s13_s12  }
   0x2   : > { %p137_p1 = scmp.lt.s32.totalorder %s488_s12, 3 }
   0x4   : > { %p138_p2 = pnand %p463_p0, %p137_p1 }
   0x5   : > { %p161_p3 = scmp.lt.s32.totalorder (!%p138_p2), %s459_s13, 1 }
   0x6   : > { %141 = sbr.rel (%p138_p2) target bundleno = 59 (0x3b), region = 32 }
   0xb   : > { %s710_s13 = smov (!%p161_p3, %s459_s13), 1  ;;  %v523_v0 = vld [vmem:[%s706_s1] ss:$0 sm:$0xff]  ;;  %vm371_vm0 = vcmask 64512  }
   0xc   : > { %s470_s16 = sshll.u32 %s710_s13, 8  ;;  %v534_v1 = vld [vmem:[%s707_s2] ss:$0 sm:$0xff] }
   0xd   : > { %s529_s19 = scalar_lea.vmem %s705_s0, %s470_s16  ;;  %s562_s24 = scalar_lea.vmem %s708_s3, %s470_s16 }
   0xe   : > { %v173_v2 = vld [vmem:[%s529_s19] sm:$0xff]  ;;  %v174_v3 = vld [vmem:[%s529_s19 + $0x8] sm:$0xff]  ;;  %v175_v4 = vld [vmem:[%s529_s19 + $0x10] sm:$0xff] }
   0xf   : > { %v208_v5 = vmul.f32 %v523_v0, %v173_v2  ;;  %v209_v6 = vmul.f32 %v523_v0, %v174_v3  ;;  %v210_v7 = vmul.f32 %v523_v0, %v175_v4  ;;  %v176_v8 = vld [vmem:[%s529_s19 + $0x18] sm:$0xff]  ;;  %v177_v9 = vld [vmem:[%s529_s19 + $0x20] sm:$0xff]  ;;  %v178_v10 = vld [vmem:[%s529_s19 + $0x28] sm:$0xff] }
  0x10   : > { %v211_v11 = vmul.f32 %v523_v0, %v176_v8  ;;  %v212_v12 = vmul.f32 %v523_v0, %v177_v9  ;;  %v213_v13 = vmul.f32 %v523_v0, %v178_v10  ;;  %v179_v14 = vld [vmem:[%s529_s19 + $0x30] sm:$0xff]  ;;  %v180_v15 = vld [vmem:[%s529_s19 + $0x38] sm:$0xff]  ;;  %v181_v24 = vld [vmem:[%s529_s19 + $0x40] sm:$0xff] }
  0x11   : > { %v243_v16 = vadd.f32 %v534_v1, %v208_v5  ;;  %v244_v17 = vadd.f32 %v534_v1, %v209_v6  ;;  %v245_v18 = vadd.f32 %v534_v1, %v210_v7  ;;  %v214_v19 = vmul.f32 %v523_v0, %v179_v14  ;;  %v182_v32 = vld [vmem:[%s529_s19 + $0x48] sm:$0xff]  ;;  %v183_v33 = vld [vmem:[%s529_s19 + $0x50] sm:$0xff]  ;;  %v184_v34 = vld [vmem:[%s529_s19 + $0x58] sm:$0xff] }
  0x12   : > { %v246_v20 = vadd.f32 %v534_v1, %v211_v11  ;;  %v247_v21 = vadd.f32 %v534_v1, %v212_v12  ;;  %v248_v22 = vadd.f32 %v534_v1, %v213_v13  ;;  %v215_v23 = vmul.f32 %v523_v0, %v180_v15  ;;  %v185_v46 = vld [vmem:[%s529_s19 + $0x60] sm:$0xff]  ;;  %v186_v53 = vld [vmem:[%s529_s19 + $0x68] sm:$0xff]  ;;  %v187_v57 = vld [vmem:[%s529_s19 + $0x70] sm:$0xff] }
  0x13   : > { %vm275_vm1 = vcmp.ge.f32.partialorder %v243_v16, 0.0  ;;  %v307_v25 = vmul.f32 0.2, %v243_v16  ;;  %vm276_vm2 = vcmp.ge.f32.partialorder %v244_v17, 0.0  ;;  %v308_v26 = vmul.f32 0.2, %v244_v17 }
  0x14   : > { %vm277_vm3 = vcmp.ge.f32.partialorder %v245_v18, 0.0  ;;  %v309_v27 = vmul.f32 0.2, %v245_v18  ;;  %vm278_vm4 = vcmp.ge.f32.partialorder %v246_v20, 0.0  ;;  %v310_v28 = vmul.f32 0.2, %v246_v20 }
  0x15   : > { %v339_v29 = vsel %vm275_vm1, %v243_v16, %v307_v25  ;;  %v340_v30 = vsel %vm276_vm2, %v244_v17, %v308_v26  ;;  %vm279_vm5 = vcmp.ge.f32.partialorder %v247_v21, 0.0  ;;  %v311_v31 = vmul.f32 0.2, %v247_v21  ;;  %v188_v58 = vld [vmem:[%s529_s19 + $0x78] sm:$0xff]  ;;  %v189_v61 = vld [vmem:[%s529_s19 + $0x80] sm:$0xff]  ;;  %v190_v7 = vld [vmem:[%s529_s19 + $0x88] sm:$0xff] }
  0x16   : > { %372 = vst.msk [vmem:[%s562_s24] sm:$0xff] %vm371_vm0, %v339_v29  ;;  %v341_v35 = vsel %vm277_vm3, %v245_v18, %v309_v27  ;;  %v342_v36 = vsel %vm278_vm4, %v246_v20, %v310_v28  ;;  %vm280_vm6 = vcmp.ge.f32.partialorder %v248_v22, 0.0  ;;  %v312_v37 = vmul.f32 0.2, %v248_v22  ;;  %v191_v8 = vld [vmem:[%s529_s19 + $0x90] sm:$0xff]  ;;  %v193_v29 = vld [vmem:[%s529_s19 + $0xa0] sm:$0xff] }
  0x17   : > { %373 = vst.msk [vmem:[%s562_s24 + $0x8] sm:$0xff] %vm371_vm0, %v340_v30  ;;  %v343_v38 = vsel %vm279_vm5, %v247_v21, %v311_v31  ;;  %v249_v39 = vadd.f32 %v534_v1, %v214_v19  ;;  %v250_v40 = vadd.f32 %v534_v1, %v215_v23  ;;  %v216_v41 = vmul.f32 %v523_v0, %v181_v24  ;;  %v194_v30 = vld [vmem:[%s529_s19 + $0xa8] sm:$0xff]  ;;  %v195_v31 = vld [vmem:[%s529_s19 + $0xb0] sm:$0xff] }
  0x18   : > { %374 = vst.msk [vmem:[%s562_s24 + $0x10] sm:$0xff] %vm371_vm0, %v341_v35  ;;  %v344_v42 = vsel %vm280_vm6, %v248_v22, %v312_v37  ;;  %v217_v43 = vmul.f32 %v523_v0, %v182_v32  ;;  %v218_v44 = vmul.f32 %v523_v0, %v183_v33  ;;  %v219_v45 = vmul.f32 %v523_v0, %v184_v34  ;;  %v192_v22 = vld [vmem:[%s529_s19 + $0x98] sm:$0xff] }
  0x19   : > { %375 = vst.msk [vmem:[%s562_s24 + $0x18] sm:$0xff] %vm371_vm0, %v342_v36  ;;  %vm281_vm7 = vcmp.ge.f32.partialorder %v249_v39, 0.0  ;;  %v313_v47 = vmul.f32 0.2, %v249_v39  ;;  %vm282_vm8 = vcmp.ge.f32.partialorder %v250_v40, 0.0  ;;  %v251_v48 = vadd.f32 %v534_v1, %v216_v41  ;;  %v196_v35 = vld [vmem:[%s529_s19 + $0xb8] sm:$0xff] }
  0x1a   : > { %376 = vst.msk [vmem:[%s562_s24 + $0x20] sm:$0xff] %vm371_vm0, %v343_v38  ;;  %v314_v49 = vmul.f32 0.2, %v250_v40  ;;  %v252_v50 = vadd.f32 %v534_v1, %v217_v43  ;;  %v253_v51 = vadd.f32 %v534_v1, %v218_v44  ;;  %v254_v52 = vadd.f32 %v534_v1, %v219_v45  ;;  %v197_v36 = vld [vmem:[%s529_s19 + $0xc0] sm:$0xff] }
  0x1b   : > { %377 = vst.msk [vmem:[%s562_s24 + $0x28] sm:$0xff] %vm371_vm0, %v344_v42  ;;  %v345_v54 = vsel %vm281_vm7, %v249_v39, %v313_v47  ;;  %vm283_vm9 = vcmp.ge.f32.partialorder %v251_v48, 0.0  ;;  %v315_v55 = vmul.f32 0.2, %v251_v48  ;;  %v220_v56 = vmul.f32 %v523_v0, %v185_v46 }
  0x1c   : > { %378 = vst.msk [vmem:[%s562_s24 + $0x30] sm:$0xff] %vm371_vm0, %v345_v54  ;;  %v346_v59 = vsel %vm282_vm8, %v250_v40, %v314_v49  ;;  %vm284_vm10 = vcmp.ge.f32.partialorder %v252_v50, 0.0  ;;  %v316_v60 = vmul.f32 0.2, %v252_v50  ;;  %vm285_vm11 = vcmp.ge.f32.partialorder %v253_v51, 0.0  ;;  %v198_v40 = vld [vmem:[%s529_s19 + $0xc8] sm:$0xff] }
  0x1d   : > { %379 = vst.msk [vmem:[%s562_s24 + $0x38] sm:$0xff] %vm371_vm0, %v346_v59  ;;  %v347_v62 = vsel %vm283_vm9, %v251_v48, %v315_v55  ;;  %v317_v63 = vmul.f32 0.2, %v253_v51  ;;  %vm286_vm12 = vcmp.ge.f32.partialorder %v254_v52, 0.0  ;;  %v318_v2 = vmul.f32 0.2, %v254_v52 }
  0x1e   : > { %380 = vst.msk [vmem:[%s562_s24 + $0x40] sm:$0xff] %vm371_vm0, %v347_v62  ;;  %v348_v3 = vsel %vm284_vm10, %v252_v50, %v316_v60  ;;  %v255_v4 = vadd.f32 %v534_v1, %v220_v56  ;;  %v221_v5 = vmul.f32 %v523_v0, %v186_v53  ;;  %v222_v6 = vmul.f32 %v523_v0, %v187_v57  ;;  %v199_v56 = vld [vmem:[%s529_s19 + $0xd0] sm:$0xff]  ;;  %v200_v57 = vld [vmem:[%s529_s19 + $0xd8] sm:$0xff]  ;;  %v201_v62 = vld [vmem:[%s529_s19 + $0xe0] sm:$0xff] }
  0x1f   : > { %381 = vst.msk [vmem:[%s562_s24 + $0x48] sm:$0xff] %vm371_vm0, %v348_v3  ;;  %v349_v9 = vsel %vm285_vm11, %v253_v51, %v317_v63  ;;  %v350_v10 = vsel %vm286_vm12, %v254_v52, %v318_v2  ;;  %v223_v11 = vmul.f32 %v523_v0, %v188_v58  ;;  %v224_v12 = vmul.f32 %v523_v0, %v189_v61  ;;  %v202_v63 = vld [vmem:[%s529_s19 + $0xe8] sm:$0xff] }
  0x20   : > { %382 = vst.msk [vmem:[%s562_s24 + $0x50] sm:$0xff] %vm371_vm0, %v349_v9  ;;  %vm287_vm13 = vcmp.ge.f32.partialorder %v255_v4, 0.0  ;;  %v319_v13 = vmul.f32 0.2, %v255_v4  ;;  %v256_v14 = vadd.f32 %v534_v1, %v221_v5  ;;  %v257_v15 = vadd.f32 %v534_v1, %v222_v6  ;;  %v203_v9 = vld [vmem:[%s529_s19 + $0xf0] sm:$0xff] }
  0x21   : > { %383 = vst.msk [vmem:[%s562_s24 + $0x58] sm:$0xff] %vm371_vm0, %v350_v10  ;;  %v258_v16 = vadd.f32 %v534_v1, %v223_v11  ;;  %v259_v17 = vadd.f32 %v534_v1, %v224_v12  ;;  %v225_v18 = vmul.f32 %v523_v0, %v190_v7  ;;  %v226_v19 = vmul.f32 %v523_v0, %v191_v8 }
  0x22   : > { %v351_v20 = vsel %vm287_vm13, %v255_v4, %v319_v13  ;;  %vm288_vm14 = vcmp.ge.f32.partialorder %v256_v14, 0.0  ;;  %v320_v21 = vmul.f32 0.2, %v256_v14  ;;  %vm289_vm15 = vcmp.ge.f32.partialorder %v257_v15, 0.0 }
  0x23   : > { %384 = vst.msk [vmem:[%s562_s24 + $0x60] sm:$0xff] %vm371_vm0, %v351_v20  ;;  %v321_v23 = vmul.f32 0.2, %v257_v15  ;;  %vm290_vm1 = vcmp.ge.f32.partialorder %v258_v16, 0.0  ;;  %v322_v24 = vmul.f32 0.2, %v258_v16  ;;  %v260_v25 = vadd.f32 %v534_v1, %v225_v18 }
  0x24   : > { %v352_v26 = vsel %vm288_vm14, %v256_v14, %v320_v21  ;;  %vm291_vm2 = vcmp.ge.f32.partialorder %v259_v17, 0.0  ;;  %v323_v27 = vmul.f32 0.2, %v259_v17  ;;  %v261_v28 = vadd.f32 %v534_v1, %v226_v19  ;;  %v204_v14 = vld [vmem:[%s529_s19 + $0xf8] sm:$0xff] }
  0x25   : > { %385 = vst.msk [vmem:[%s562_s24 + $0x68] sm:$0xff] %vm371_vm0, %v352_v26  ;;  %v353_v32 = vsel %vm289_vm15, %v257_v15, %v321_v23  ;;  %v354_v33 = vsel %vm290_vm1, %v258_v16, %v322_v24  ;;  %vm292_vm3 = vcmp.ge.f32.partialorder %v260_v25, 0.0  ;;  %v324_v34 = vmul.f32 0.2, %v260_v25 }
  0x26   : > { %386 = vst.msk [vmem:[%s562_s24 + $0x70] sm:$0xff] %vm371_vm0, %v353_v32  ;;  %v355_v37 = vsel %vm291_vm2, %v259_v17, %v323_v27  ;;  %vm293_vm4 = vcmp.ge.f32.partialorder %v261_v28, 0.0  ;;  %v325_v38 = vmul.f32 0.2, %v261_v28  ;;  %v227_v39 = vmul.f32 %v523_v0, %v192_v22 }
  0x27   : > { %387 = vst.msk [vmem:[%s562_s24 + $0x78] sm:$0xff] %vm371_vm0, %v354_v33  ;;  %v356_v41 = vsel %vm292_vm3, %v260_v25, %v324_v34  ;;  %v228_v42 = vmul.f32 %v523_v0, %v193_v29  ;;  %v229_v43 = vmul.f32 %v523_v0, %v194_v30  ;;  %v230_v44 = vmul.f32 %v523_v0, %v195_v31 }
  0x28   : > { %388 = vst.msk [vmem:[%s562_s24 + $0x80] sm:$0xff] %vm371_vm0, %v355_v37  ;;  %v357_v45 = vsel %vm293_vm4, %v261_v28, %v325_v38  ;;  %v262_v46 = vadd.f32 %v534_v1, %v227_v39  ;;  %v231_v47 = vmul.f32 %v523_v0, %v196_v35  ;;  %v232_v48 = vmul.f32 %v523_v0, %v197_v36 }
  0x29   : > { %389 = vst.msk [vmem:[%s562_s24 + $0x88] sm:$0xff] %vm371_vm0, %v356_v41  ;;  %v263_v49 = vadd.f32 %v534_v1, %v228_v42  ;;  %v264_v50 = vadd.f32 %v534_v1, %v229_v43  ;;  %v265_v51 = vadd.f32 %v534_v1, %v230_v44  ;;  %v233_v52 = vmul.f32 %v523_v0, %v198_v40 }
  0x2a   : > { %390 = vst.msk [vmem:[%s562_s24 + $0x90] sm:$0xff] %vm371_vm0, %v357_v45  ;;  %vm294_vm5 = vcmp.ge.f32.partialorder %v262_v46, 0.0  ;;  %v326_v53 = vmul.f32 0.2, %v262_v46  ;;  %v266_v54 = vadd.f32 %v534_v1, %v231_v47  ;;  %v267_v55 = vadd.f32 %v534_v1, %v232_v48 }
  0x2b   : > { %vm295_vm6 = vcmp.ge.f32.partialorder %v263_v49, 0.0  ;;  %v327_v58 = vmul.f32 0.2, %v263_v49  ;;  %vm296_vm7 = vcmp.ge.f32.partialorder %v264_v50, 0.0  ;;  %v328_v59 = vmul.f32 0.2, %v264_v50 }
  0x2c   : > { %v358_v60 = vsel %vm294_vm5, %v262_v46, %v326_v53  ;;  %vm297_vm8 = vcmp.ge.f32.partialorder %v265_v51, 0.0  ;;  %v329_v61 = vmul.f32 0.2, %v265_v51  ;;  %vm298_vm9 = vcmp.ge.f32.partialorder %v266_v54, 0.0 }
  0x2d   : > { %391 = vst.msk [vmem:[%s562_s24 + $0x98] sm:$0xff] %vm371_vm0, %v358_v60  ;;  %v359_v2 = vsel %vm295_vm6, %v263_v49, %v327_v58  ;;  %v360_v3 = vsel %vm296_vm7, %v264_v50, %v328_v59  ;;  %v330_v4 = vmul.f32 0.2, %v266_v54  ;;  %vm299_vm10 = vcmp.ge.f32.partialorder %v267_v55, 0.0 }
  0x2e   : > { %392 = vst.msk [vmem:[%s562_s24 + $0xa0] sm:$0xff] %vm371_vm0, %v359_v2  ;;  %v361_v5 = vsel %vm297_vm8, %v265_v51, %v329_v61  ;;  %v331_v6 = vmul.f32 0.2, %v267_v55  ;;  %v268_v7 = vadd.f32 %v534_v1, %v233_v52  ;;  %v234_v8 = vmul.f32 %v523_v0, %v199_v56 }
  0x2f   : > { %393 = vst.msk [vmem:[%s562_s24 + $0xa8] sm:$0xff] %vm371_vm0, %v360_v3  ;;  %v362_v10 = vsel %vm298_vm9, %v266_v54, %v330_v4  ;;  %v235_v11 = vmul.f32 %v523_v0, %v200_v57  ;;  %v236_v12 = vmul.f32 %v523_v0, %v201_v62  ;;  %v237_v13 = vmul.f32 %v523_v0, %v202_v63 }
  0x30   : > { %394 = vst.msk [vmem:[%s562_s24 + $0xb0] sm:$0xff] %vm371_vm0, %v361_v5  ;;  %v363_v15 = vsel %vm299_vm10, %v267_v55, %v331_v6  ;;  %vm300_vm11 = vcmp.ge.f32.partialorder %v268_v7, 0.0  ;;  %v332_v16 = vmul.f32 0.2, %v268_v7  ;;  %v269_v17 = vadd.f32 %v534_v1, %v234_v8 }
  0x31   : > { %395 = vst.msk [vmem:[%s562_s24 + $0xb8] sm:$0xff] %vm371_vm0, %v362_v10  ;;  %v270_v18 = vadd.f32 %v534_v1, %v235_v11  ;;  %v271_v19 = vadd.f32 %v534_v1, %v236_v12  ;;  %v272_v20 = vadd.f32 %v534_v1, %v237_v13  ;;  %v238_v21 = vmul.f32 %v523_v0, %v203_v9 }
  0x32   : > { %396 = vst.msk [vmem:[%s562_s24 + $0xc0] sm:$0xff] %vm371_vm0, %v363_v15  ;;  %v364_v22 = vsel %vm300_vm11, %v268_v7, %v332_v16  ;;  %vm301_vm12 = vcmp.ge.f32.partialorder %v269_v17, 0.0  ;;  %v333_v23 = vmul.f32 0.2, %v269_v17  ;;  %v239_v24 = vmul.f32 %v523_v0, %v204_v14 }
  0x33   : > { %397 = vst.msk [vmem:[%s562_s24 + $0xc8] sm:$0xff] %vm371_vm0, %v364_v22  ;;  %vm302_vm13 = vcmp.ge.f32.partialorder %v270_v18, 0.0  ;;  %v334_v25 = vmul.f32 0.2, %v270_v18  ;;  %vm303_vm14 = vcmp.ge.f32.partialorder %v271_v19, 0.0  ;;  %vm304_vm15 = vcmp.ge.f32.partialorder %v272_v20, 0.0 }
  0x34   : > { %v365_v26 = vsel %vm301_vm12, %v269_v17, %v333_v23  ;;  %v335_v27 = vmul.f32 0.2, %v271_v19  ;;  %v336_v28 = vmul.f32 0.2, %v272_v20  ;;  %v273_v29 = vadd.f32 %v534_v1, %v238_v21 }
  0x35   : > { %398 = vst.msk [vmem:[%s562_s24 + $0xd0] sm:$0xff] %vm371_vm0, %v365_v26  ;;  %v366_v30 = vsel %vm302_vm13, %v270_v18, %v334_v25  ;;  %v274_v0 = vadd.f32 %v534_v1, %v239_v24 }
  0x36   : > { %399 = vst.msk [vmem:[%s562_s24 + $0xd8] sm:$0xff] %vm371_vm0, %v366_v30  ;;  %v367_v31 = vsel %vm303_vm14, %v271_v19, %v335_v27  ;;  %v368_v32 = vsel %vm304_vm15, %v272_v20, %v336_v28  ;;  %vm305_vm1 = vcmp.ge.f32.partialorder %v273_v29, 0.0  ;;  %v337_v33 = vmul.f32 0.2, %v273_v29 }
  0x37   : > { %400 = vst.msk [vmem:[%s562_s24 + $0xe0] sm:$0xff] %vm371_vm0, %v367_v31  ;;  %vm306_vm2 = vcmp.ge.f32.partialorder %v274_v0, 0.0  ;;  %v338_v34 = vmul.f32 0.2, %v274_v0 }
  0x38   : > { %401 = vst.msk [vmem:[%s562_s24 + $0xe8] sm:$0xff] %vm371_vm0, %v368_v32  ;;  %v369_v35 = vsel %vm305_vm1, %v273_v29, %v337_v33 }
  0x39   : > { %402 = vst.msk [vmem:[%s562_s24 + $0xf0] sm:$0xff] %vm371_vm0, %v369_v35  ;;  %v370_v36 = vsel %vm306_vm2, %v274_v0, %v338_v34 }
  0x3a   : > { %403 = vst.msk [vmem:[%s562_s24 + $0xf8] sm:$0xff] %vm371_vm0, %v370_v36 }
  0x3b PF: > { %s13_s12 = sadd.s32 1, %s488_s12  }
  0x3c   : > { %p10_p4 = scmp.ge.s32.totalorder %s13_s12, 4  }
  0x3e   :  { %12 = sbr.rel (!%p10_p4) target bundleno = 1 (0x1), region = 62 }

// kernel: conv_block_forward.4
= control target key start
LH: loop header
LB: loop body
LE: loop exit
PB: predicated region body
PF: predicated region fallthrough
CT: control target
= control target key end

     0   :  { %s2817_s18 = smov 0   ;;  %s4259_s0 = inlined_call_operand.vmem [shape: f32[2,16,16,8], index: 0, kind: input, shape index: {}]   ;;  %s4260_s1 = inlined_call_operand.vmem [shape: f32[72,8], index: 1, kind: input, shape index: {}]   ;;  %s4261_s2 = inlined_call_operand.vmem [shape: f32[1,8], index: 2, kind: input, shape index: {}]   ;;  %s4262_s3 = inlined_call_operand.vmem [shape: f32[1,8], index: 3, kind: input, shape index: {}]   ;;  %s4263_s4 = inlined_call_operand.vmem [shape: f32[2,16,16,8], index: 4, kind: output, shape index: {0}]   ;;  %s4264_s5 = inlined_call_operand.vmem [shape: f32[2,2,8], index: 5, kind: output, shape index: {1}]  }
   0x1 LB: > { %s2676_s19 = sadd.s32 4294967295, %s2776_s18   ;;  %p2680_p0 = scmp.ge.s32.totalorder %s2776_s18, 1  ;;  %s2776_s18 = sphi %s2817_s18, %s16_s18  }
   0x2   : > { %p190_p1 = scmp.lt.s32.totalorder %s2776_s18, 3 }
   0x4   : > { %p191_p2 = pnand %p2680_p0, %p190_p1 }
   0x6   : > { %194 = sbr.rel (%p191_p2) target bundleno = 1021 (0x3fd), region = 36 }
   0xb   : > { %vm436_vm0 = vcmask 64512   ;;  %v2778_v0 = vmov 0.0   ;;  %s2779_s20 = smov 8   ;;  %p222_p3 = scmp.lt.s32.totalorder %s2676_s19, 1  ;;  %v2907_v2 = vld [vmem:[%s4261_s2] ss:$0 sm:$0xff] }
   0xc   : > { %437 = vst.msk [vmem:[#allocation2] sm:$0xff] %vm436_vm0, %v2778_v0  ;;  %vm439_vm1 = vcmask 58368   ;;  %v2922_v5 = vld [vmem:[%s4262_s3] ss:$0 sm:$0xff]  ;;  %s2780_s29 = smov 16   ;;  %s2781_s30 = smov 24  }
   0xd   : > { %438 = vst.msk [vmem:[#allocation2 + $0x8] sm:$0xff] %vm436_vm0, %v2778_v0  ;;  %s4311_s19 = smov (!%p222_p3, %s2676_s19), 1  ;;  %s2782_s10 = smov 32  }
   0xe   : > { %441 = vst.msk [vmem:[#allocation2 + $0x18] sm:$0xff] %vm436_vm0, %v2778_v0  ;;  %s2720_s21 = sshll.u32 %s4311_s19, 8  ;;  %s2783_s11 = smov 40  }
   0xf   : > { %442 = vst.msk [vmem:[#allocation2 + $0x20] sm:$0xff] %vm436_vm0, %v2778_v0  ;;  %s2898_s24 = scalar_lea.vmem %s4259_s0, %s2720_s21  ;;  %s2784_s12 = smov 56  }
  0x10   : > { %444 = vst.msk [vmem:[#allocation2 + $0x30] sm:$0xff] %vm436_vm0, %v2778_v0  ;;  %v236_v3 = vld [vmem:[%s2898_s24] sm:$0xff]  ;;  %v237_v7 = vld [vmem:[%s2898_s24 + $0x8] sm:$0xff]  ;;  %v243_v8 = vld [vmem:[%s2898_s24 + $0x38] sm:$0xff]  ;;  %s2785_s13 = smov 48   ;;  %s2786_s14 = smov 64  }
  0x11   : > { %445 = vst.msk [vmem:[#allocation2 + $0x38] sm:$0xff] %vm436_vm0, %v2778_v0  ;;  %v273_v4 = vmul.f32 %v2907_v2, %v236_v3  ;;  %v240_v6 = vld [vmem:[%s2898_s24 + $0x20] sm:$0xff]  ;;  %v241_v10 = vld [vmem:[%s2898_s24 + $0x28] sm:$0xff]  ;;  %v274_v12 = vmul.f32 %v2907_v2, %v237_v7  ;;  %v238_v13 = vld [vmem:[%s2898_s24 + $0x10] sm:$0xff]  ;;  %v280_v14 = vmul.f32 %v2907_v2, %v243_v8  ;;  %s3995_s16 = scalar_lea.vmem %s4263_s4, %s2720_s21  ;;  %s2685_s21 = sshll.u32 %s4311_s19, 1 }
  0x12   : > { %447 = vst.msk [vmem:[#allocation2 + $0x48] sm:$0xff] %vm436_vm0, %v2778_v0  ;;  %v277_v11 = vmul.f32 %v2907_v2, %v240_v6  ;;  %v246_v15 = vld [vmem:[%s2898_s24 + $0x50] sm:$0xff]  ;;  %v278_v16 = vmul.f32 %v2907_v2, %v241_v10  ;;  %v244_v17 = vld [vmem:[%s2898_s24 + $0x40] sm:$0xff]  ;;  %v275_v20 = vmul.f32 %v2907_v2, %v238_v13  ;;  %v239_v24 = vld [vmem:[%s2898_s24 + $0x18] sm:$0xff] }
  0x13   : > { %448 = vst.msk [vmem:[#allocation2 + $0x50] sm:$0xff] %vm436_vm0, %v2778_v0  ;;  %v308_v9 = vadd.f32 %v2922_v5, %v273_v4  ;;  %v309_v22 = vadd.f32 %v2922_v5, %v274_v12  ;;  %v283_v23 = vmul.f32 %v2907_v2, %v246_v15  ;;  %v315_v25 = vadd.f32 %v2922_v5, %v280_v14  ;;  %v249_v27 = vld [vmem:[%s2898_s24 + $0x68] sm:$0xff]  ;;  %v247_v29 = vld [vmem:[%s2898_s24 + $0x58] sm:$0xff]  ;;  %v242_v33 = vld [vmem:[%s2898_s24 + $0x30] sm:$0xff] }
  0x14   : > { %v589_v1 = vld [vmem:[#allocation2 + $0x1] sm:$0xff]  ;;  %450 = vst.msk [vmem:[#allocation2 + $0x60] sm:$0xff] %vm436_vm0, %v2778_v0  ;;  %v312_v21 = vadd.f32 %v2922_v5, %v277_v11  ;;  %v281_v26 = vmul.f32 %v2907_v2, %v244_v17  ;;  %v313_v28 = vadd.f32 %v2922_v5, %v278_v16  ;;  %v310_v31 = vadd.f32 %v2922_v5, %v275_v20  ;;  %v250_v56 = vld [vmem:[%s2898_s24 + $0x70] sm:$0xff]  ;;  %v255_v6 = vld [vmem:[%s2898_s24 + $0x98] sm:$0xff] }
  0x15   : > { %653 = vrot.lane.b32.xlu0 %v589_v1, %s2779_s20  ;;  %451 = vst.msk [vmem:[#allocation2 + $0x68] sm:$0xff] %vm436_vm0, %v2778_v0  ;;  %v372_v19 = vmul.f32 0.2, %v308_v9  ;;  %vm340_vm2 = vcmp.ge.f32.partialorder %v308_v9, 0.0  ;;  %v276_v32 = vmul.f32 %v2907_v2, %v239_v24  ;;  %v373_v35 = vmul.f32 0.2, %v309_v22 }
  0x16   : > { %453 = vst.msk [vmem:[#allocation2 + $0x78] sm:$0xff] %vm436_vm0, %v2778_v0  ;;  %v376_v34 = vmul.f32 0.2, %v312_v21  ;;  %v318_v36 = vadd.f32 %v2922_v5, %v283_v23  ;;  %v286_v37 = vmul.f32 %v2907_v2, %v249_v27  ;;  %vm344_vm3 = vcmp.ge.f32.partialorder %v312_v21, 0.0  ;;  %v252_v41 = vld [vmem:[%s2898_s24 + $0x80] sm:$0xff]  ;;  %v245_v61 = vld [vmem:[%s2898_s24 + $0x48] sm:$0xff] }
  0x17   : > { %454 = vst.msk [vmem:[#allocation2 + $0x80] sm:$0xff] %vm436_vm0, %v2778_v0  ;;  %v404_v30 = vsel %vm340_vm2, %v308_v9, %v372_v19  ;;  %v379_v38 = vmul.f32 0.2, %v315_v25  ;;  %v316_v39 = vadd.f32 %v2922_v5, %v281_v26  ;;  %v284_v40 = vmul.f32 %v2907_v2, %v247_v29  ;;  %v248_v24 = vld [vmem:[%s2898_s24 + $0x60] sm:$0xff]  ;;  %v258_v29 = vld [vmem:[%s2898_s24 + $0xb0] sm:$0xff] }
  0x18   : > { %456 = vst.msk [vmem:[#allocation2 + $0x90] sm:$0xff] %vm436_vm0, %v2778_v0  ;;  %vm341_vm4 = vcmp.ge.f32.partialorder %v309_v22, 0.0  ;;  %vm347_vm5 = vcmp.ge.f32.partialorder %v315_v25, 0.0  ;;  %v377_v42 = vmul.f32 0.2, %v313_v28  ;;  %v279_v43 = vmul.f32 %v2907_v2, %v242_v33 }
  0x19   : > { %457 = vst.msk [vmem:[#allocation2 + $0x98] sm:$0xff] %vm436_vm0, %v2778_v0  ;;  %vm345_vm6 = vcmp.ge.f32.partialorder %v313_v28, 0.0  ;;  %v374_v44 = vmul.f32 0.2, %v310_v31  ;;  %v311_v45 = vadd.f32 %v2922_v5, %v276_v32  ;;  %v289_v46 = vmul.f32 %v2907_v2, %v252_v41 }
  0x1a   : > { %459 = vst.msk [vmem:[#allocation2 + $0xa8] sm:$0xff] %vm436_vm0, %v2778_v0  ;;  %v408_v47 = vsel %vm344_vm3, %v312_v21, %v376_v34  ;;  %vm342_vm7 = vcmp.ge.f32.partialorder %v310_v31, 0.0  ;;  %v382_v48 = vmul.f32 0.2, %v318_v36  ;;  %v321_v49 = vadd.f32 %v2922_v5, %v286_v37  ;;  %v253_v21 = vld [vmem:[%s2898_s24 + $0x88] sm:$0xff] }
  0x1b   : > { %460 = vst.msk [vmem:[#allocation2 + $0xb0] sm:$0xff] %vm436_vm0, %v2778_v0  ;;  %v405_v50 = vsel %vm341_vm4, %v309_v22, %v373_v35  ;;  %vm350_vm8 = vcmp.ge.f32.partialorder %v318_v36, 0.0  ;;  %v380_v51 = vmul.f32 0.2, %v316_v39  ;;  %v319_v52 = vadd.f32 %v2922_v5, %v284_v40 }
  0x1c   : > { %462 = vst.msk [vmem:[#allocation2 + $0xc0] sm:$0xff] %vm436_vm0, %v2778_v0  ;;  %v411_v53 = vsel %vm347_vm5, %v315_v25, %v379_v38  ;;  %v409_v54 = vsel %vm345_vm6, %v313_v28, %v377_v42  ;;  %vm348_vm9 = vcmp.ge.f32.partialorder %v316_v39, 0.0  ;;  %v314_v55 = vadd.f32 %v2922_v5, %v279_v43  ;;  %v256_v42 = vld [vmem:[%s2898_s24 + $0xa0] sm:$0xff] }
  0x1d   : > { %463 = vst.msk [vmem:[#allocation2 + $0xc8] sm:$0xff] %vm436_vm0, %v2778_v0  ;;  %v406_v57 = vsel %vm342_vm7, %v310_v31, %v374_v44  ;;  %v375_v58 = vmul.f32 0.2, %v311_v45  ;;  %v324_v59 = vadd.f32 %v2922_v5, %v289_v46  ;;  %v287_v60 = vmul.f32 %v2907_v2, %v250_v56  ;;  %v251_v44 = vld [vmem:[%s2898_s24 + $0x78] sm:$0xff] }
  0x1e   : > { %465 = vst.msk [vmem:[#allocation2 + $0xd8] sm:$0xff] %vm436_vm0, %v2778_v0  ;;  %v414_v62 = vsel %vm350_vm8, %v318_v36, %v382_v48  ;;  %vm343_vm10 = vcmp.ge.f32.partialorder %v311_v45, 0.0  ;;  %v385_v63 = vmul.f32 0.2, %v321_v49  ;;  %v412_v1 = vsel %vm348_vm9, %v316_v39, %v380_v51 }
  0x1f   : > { %466 = vst.msk [vmem:[#allocation2 + $0xe0] sm:$0xff] %vm436_vm0, %v2778_v0  ;;  %vm353_vm11 = vcmp.ge.f32.partialorder %v321_v49, 0.0  ;;  %v383_v3 = vmul.f32 0.2, %v319_v52  ;;  %v322_v4 = vadd.f32 %v2922_v5, %v287_v60  ;;  %vm351_vm12 = vcmp.ge.f32.partialorder %v319_v52, 0.0  ;;  %v259_v60 = vld [vmem:[%s2898_s24 + $0xb8] sm:$0xff] }
  0x20   : > { %468 = vst.msk [vmem:[#allocation2 + $0xf0] sm:$0xff] %vm436_vm0, %v2778_v0  ;;  %v378_v7 = vmul.f32 0.2, %v314_v55  ;;  %v292_v9 = vmul.f32 %v2907_v2, %v255_v6  ;;  %v407_v10 = vsel %vm343_vm10, %v311_v45, %v375_v58  ;;  %vm346_vm13 = vcmp.ge.f32.partialorder %v314_v55, 0.0 }
  0x21   : > { %469 = vst.msk [vmem:[#allocation2 + $0xf8] sm:$0xff] %vm436_vm0, %v2778_v0  ;;  %v388_v11 = vmul.f32 0.2, %v324_v59  ;;  %v417_v12 = vsel %vm353_vm11, %v321_v49, %v385_v63  ;;  %vm356_vm14 = vcmp.ge.f32.partialorder %v324_v59, 0.0  ;;  %v386_v13 = vmul.f32 0.2, %v322_v4 }
  0x22   : > { %471 = vst.msk [vmem:[#allocation2 + $0x108] sm:$0xff] %vm436_vm0, %v2778_v0  ;;  %v327_v14 = vadd.f32 %v2922_v5, %v292_v9  ;;  %v415_v16 = vsel %vm351_vm12, %v319_v52, %v383_v3  ;;  %vm354_vm15 = vcmp.ge.f32.partialorder %v322_v4, 0.0  ;;  %v410_v19 = vsel %vm346_vm13, %v314_v55, %v378_v7  ;;  %v261_v49 = vld [vmem:[%s2898_s24 + $0xc8] sm:$0xff] }
  0x23   : > { %472 = vst.msk [vmem:[#allocation2 + $0x110] sm:$0xff] %vm436_vm0, %v2778_v0  ;;  %v420_v22 = vsel %vm356_vm14, %v324_v59, %v388_v11  ;;  %v290_v23 = vmul.f32 %v2907_v2, %v253_v21  ;;  %v418_v25 = vsel %vm354_vm15, %v322_v4, %v386_v13  ;;  %v285_v26 = vmul.f32 %v2907_v2, %v248_v24  ;;  %v264_v4 = vld [vmem:[%s2898_s24 + $0xe0] sm:$0xff] }
  0x24   : > { %474 = vst.msk [vmem:[#allocation2 + $0x120] sm:$0xff] %vm436_vm0, %v2778_v0  ;;  %v391_v20 = vmul.f32 0.2, %v327_v14  ;;  %vm359_vm2 = vcmp.ge.f32.partialorder %v327_v14, 0.0  ;;  %v295_v33 = vmul.f32 %v2907_v2, %v258_v29  ;;  %v293_v43 = vmul.f32 %v2907_v2, %v256_v42 }
  0x25   : > { %475 = vst.msk [vmem:[#allocation2 + $0x128] sm:$0xff] %vm436_vm0, %v2778_v0  ;;  %v325_v28 = vadd.f32 %v2922_v5, %v290_v23  ;;  %v320_v32 = vadd.f32 %v2922_v5, %v285_v26  ;;  %v298_v51 = vmul.f32 %v2907_v2, %v261_v49  ;;  %v301_v7 = vmul.f32 %v2907_v2, %v264_v4 }
  0x26   : > { %477 = vst.msk [vmem:[#allocation2 + $0x138] sm:$0xff] %vm436_vm0, %v2778_v0  ;;  %v423_v31 = vsel %vm359_vm2, %v327_v14, %v391_v20  ;;  %v330_v38 = vadd.f32 %v2922_v5, %v295_v33  ;;  %v328_v48 = vadd.f32 %v2922_v5, %v293_v43  ;;  %v263_v43 = vld [vmem:[%s2898_s24 + $0xd8] sm:$0xff]  ;;  %vm749_vm2 = vcmask 130112  }
  0x27   : > { %478 = vst.msk [vmem:[#allocation2 + $0x140] sm:$0xff] %vm436_vm0, %v2778_v0  ;;  %v389_v35 = vmul.f32 0.2, %v325_v28  ;;  %vm357_vm3 = vcmp.ge.f32.partialorder %v325_v28, 0.0  ;;  %v384_v37 = vmul.f32 0.2, %v320_v32  ;;  %v333_v56 = vadd.f32 %v2922_v5, %v298_v51 }
  0x28   : > { %480 = vst.msk [vmem:[#allocation2 + $0x150] sm:$0xff] %vm436_vm0, %v2778_v0  ;;  %vm352_vm4 = vcmp.ge.f32.partialorder %v320_v32, 0.0  ;;  %v394_v41 = vmul.f32 0.2, %v330_v38  ;;  %vm362_vm5 = vcmp.ge.f32.partialorder %v330_v38, 0.0  ;;  %vm360_vm6 = vcmp.ge.f32.partialorder %v328_v48, 0.0 }
  0x29   : > { %481 = vst.msk [vmem:[#allocation2 + $0x158] sm:$0xff] %vm436_vm0, %v2778_v0  ;;  %v421_v39 = vsel %vm357_vm3, %v325_v28, %v389_v35  ;;  %v416_v40 = vsel %vm352_vm4, %v320_v32, %v384_v37  ;;  %v397_v59 = vmul.f32 0.2, %v333_v56  ;;  %vm365_vm8 = vcmp.ge.f32.partialorder %v333_v56, 0.0  ;;  %v260_v32 = vld [vmem:[%s2898_s24 + $0xc0] sm:$0xff] }
  0x2a   : > { %483 = vst.msk [vmem:[#allocation2 + $0x168] sm:$0xff] %vm436_vm0, %v2778_v0  ;;  %v426_v46 = vsel %vm362_vm5, %v330_v38, %v394_v41  ;;  %vm942_vm3 = vcmask 195712  }
  0x2b   : > { %484 = vst.msk [vmem:[#allocation2 + $0x170] sm:$0xff] %vm436_vm0, %v2778_v0 }
  0x2c   : > { %486 = vst.msk [vmem:[#allocation2 + $0x180] sm:$0xff] %vm436_vm0, %v2778_v0 }
  0x2d   : > { %487 = vst.msk [vmem:[#allocation2 + $0x188] sm:$0xff] %vm436_vm0, %v2778_v0 }
  0x2e   : > { %489 = vst.msk [vmem:[#allocation2 + $0x198] sm:$0xff] %vm436_vm0, %v2778_v0 }
  0x2f   : > { %490 = vst.msk [vmem:[#allocation2 + $0x1a0] sm:$0xff] %vm436_vm0, %v2778_v0 }
  0x30   : > { %440 = vst.msk [vmem:[#allocation2 + $0x10] sm:$0x3] %vm439_vm1, %v2778_v0 }
  0x31   : > { %443 = vst.msk [vmem:[#allocation2 + $0x28] sm:$0x3] %vm439_vm1, %v2778_v0 }
  0x32   : > { %446 = vst.msk [vmem:[#allocation2 + $0x40] sm:$0x3] %vm439_vm1, %v2778_v0 }
  0x33   : > { %449 = vst.msk [vmem:[#allocation2 + $0x58] sm:$0x3] %vm439_vm1, %v2778_v0 }
  0x34   : > { %452 = vst.msk [vmem:[#allocation2 + $0x70] sm:$0x3] %vm439_vm1, %v2778_v0 }
  0x35   : > { %455 = vst.msk [vmem:[#allocation2 + $0x88] sm:$0x3] %vm439_vm1, %v2778_v0 }
  0x36   : > { %458 = vst.msk [vmem:[#allocation2 + $0xa0] sm:$0x3] %vm439_vm1, %v2778_v0 }
  0x37   : > { %v590_v18 = vld [vmem:[#allocation2 + $0x9] sm:$0xff]  ;;  %461 = vst.msk [vmem:[#allocation2 + $0xb8] sm:$0x3] %vm439_vm1, %v2778_v0 }
  0x38   : > { %655 = vrot.lane.b32.xlu0 %v590_v18, %s2779_s20  ;;  %464 = vst.msk [vmem:[#allocation2 + $0xd0] sm:$0x3] %vm439_vm1, %v2778_v0 }
  0x39   : > { %467 = vst.msk [vmem:[#allocation2 + $0xe8] sm:$0x3] %vm439_vm1, %v2778_v0 }
  0x3a   : > { %470 = vst.msk [vmem:[#allocation2 + $0x100] sm:$0x3] %vm439_vm1, %v2778_v0 }
  0x3b   : > { %473 = vst.msk [vmem:[#allocation2 + $0x118] sm:$0x3] %vm439_vm1, %v2778_v0 }
  0x3c   : > { %476 = vst.msk [vmem:[#allocation2 + $0x130] sm:$0x3] %vm439_vm1, %v2778_v0 }
  0x3d   : > { %479 = vst.msk [vmem:[#allocation2 + $0x148] sm:$0x3] %vm439_vm1, %v2778_v0 }
  0x3e   : > { %482 = vst.msk [vmem:[#allocation2 + $0x160] sm:$0x3] %vm439_vm1, %v2778_v0 }
  0x3f   : > { %485 = vst.msk [vmem:[#allocation2 + $0x178] sm:$0x3] %vm439_vm1, %v2778_v0 }
  0x40   : > { %488 = vst.msk [vmem:[#allocation2 + $0x190] sm:$0x3] %vm439_vm1, %v2778_v0 }
  0x41   : > { %491 = vst.msk [vmem:[#allocation2 + $0x1a8] sm:$0x3] %vm439_vm1, %v2778_v0  ;;  %v282_v0 = vmul.f32 %v2907_v2, %v245_v61  ;;  %v296_v61 = vmul.f32 %v2907_v2, %v259_v60  ;;  %v783_v60 = vld [vmem:[#allocation2 + $0xa] sm:$0xff] }
  0x42   : > { %493 = vst.msk [vmem:[#allocation2 + $0x19] sm:$0xff] %vm436_vm0, %v404_v30 }
  0x43   : > { %497 = vst.msk [vmem:[#allocation2 + $0x49] sm:$0xff] %vm436_vm0, %v408_v47  ;;  %v317_v8 = vadd.f32 %v2922_v5, %v282_v0  ;;  %v288_v47 = vmul.f32 %v2907_v2, %v251_v44  ;;  %v429_v0 = vsel %vm365_vm8, %v333_v56, %v397_v59  ;;  %v331_v3 = vadd.f32 %v2922_v5, %v296_v61  ;;  %v525_v56 = vld [vmem:[#allocation2] sm:$0xff] }
  0x44   : > { %494 = vst.msk [vmem:[#allocation2 + $0x21] sm:$0xff] %vm436_vm0, %v405_v50  ;;  %vm1521_vm8 = vcmask 392512  }
  0x45   : > { %500 = vst.msk [vmem:[#allocation2 + $0x69] sm:$0xff] %vm436_vm0, %v411_v53  ;;  %v381_v17 = vmul.f32 0.2, %v317_v8  ;;  %vm349_vm1 = vcmp.ge.f32.partialorder %v317_v8, 0.0  ;;  %v323_v50 = vadd.f32 %v2922_v5, %v288_v47  ;;  %v392_v53 = vmul.f32 0.2, %v328_v48 }
  0x46   : > { %498 = vst.msk [vmem:[#allocation2 + $0x51] sm:$0xff] %vm436_vm0, %v409_v54  ;;  %v395_v9 = vmul.f32 0.2, %v331_v3  ;;  %vm363_vm9 = vcmp.ge.f32.partialorder %v331_v3, 0.0 }
  0x47   : > { %495 = vst.msk [vmem:[#allocation2 + $0x31] sm:$0xff] %vm436_vm0, %v406_v57  ;;  %v413_v27 = vsel %vm349_vm1, %v317_v8, %v381_v17  ;;  %v387_v55 = vmul.f32 0.2, %v323_v50  ;;  %v424_v57 = vsel %vm360_vm6, %v328_v48, %v392_v53  ;;  %vm355_vm7 = vcmp.ge.f32.partialorder %v323_v50, 0.0 }
  0x48   : > { %503 = vst.msk [vmem:[#allocation2 + $0x91] sm:$0xff] %vm436_vm0, %v414_v62  ;;  %v254_v62 = vld [vmem:[%s2898_s24 + $0x90] sm:$0xff]  ;;  %v427_v13 = vsel %vm363_vm9, %v331_v3, %v395_v9  ;;  %vm1135_vm6 = vcmask 261312   ;;  %vm1715_vm9 = vcmask 458112  }
  0x49   : > { %v591_v15 = vld [vmem:[#allocation2 + $0x19] sm:$0xff]  ;;  %501 = vst.msk [vmem:[#allocation2 + $0x79] sm:$0xff] %vm436_vm0, %v412_v1  ;;  %v419_v58 = vsel %vm355_vm7, %v323_v50, %v387_v55  ;;  %v291_v1 = vmul.f32 %v2907_v2, %v254_v62  ;;  %v526_v62 = vld [vmem:[#allocation2 + $0x8] sm:$0xff]  ;;  %vm1328_vm7 = vcmask 326912  }
  0x4a   : > { %657 = vrot.lane.b32.xlu1 %v591_v15, %s2779_s20  ;;  %v595_v18 = vld [vmem:[#allocation2 + $0x49] sm:$0xff]  ;;  %496 = vst.msk [vmem:[#allocation2 + $0x39] sm:$0xff] %vm436_vm0, %v407_v10  ;;  %v3172_v4 = vld [vmem:[#allocation2 + $0x18] sm:$0xff] }
  0x4b   : > { %665 = vrot.lane.b32.xlu0 %v595_v18, %s2779_s20  ;;  %506 = vst.msk [vmem:[#allocation2 + $0xb1] sm:$0xff] %vm436_vm0, %v417_v12  ;;  %v592_v34 = vld [vmem:[#allocation2 + $0x21] sm:$0xff]  ;;  %v326_v6 = vadd.f32 %v2922_v5, %v291_v1  ;;  %v336_v12 = vadd.f32 %v2922_v5, %v301_v7 }
  0x4c   : > { %504 = vst.msk [vmem:[#allocation2 + $0x99] sm:$0xff] %vm436_vm0, %v415_v16  ;;  %v598_v36 = vld [vmem:[#allocation2 + $0x69] sm:$0xff]  ;;  %v3182_v9 = vld [vmem:[#allocation2 + $0x1a] sm:$0xff] }
  0x4d   : > { %499 = vst.msk [vmem:[#allocation2 + $0x61] sm:$0xff] %vm436_vm0, %v410_v19  ;;  %v596_v52 = vld [vmem:[#allocation2 + $0x51] sm:$0xff]  ;;  %v390_v11 = vmul.f32 0.2, %v326_v6  ;;  %vm358_vm10 = vcmp.ge.f32.partialorder %v326_v6, 0.0  ;;  %vm368_vm11 = vcmp.ge.f32.partialorder %v336_v12, 0.0 }
  0x4e   : > { %v593_v30 = vld [vmem:[#allocation2 + $0x31] sm:$0xff]  ;;  %509 = vst.msk [vmem:[#allocation2 + $0xd9] sm:$0xff] %vm436_vm0, %v420_v22  ;;  %v400_v15 = vmul.f32 0.2, %v336_v12  ;;  %v257_v18 = vld [vmem:[%s2898_s24 + $0xa8] sm:$0xff] }
  0x4f   : > { %661 = vrot.lane.b32.xlu2 %v593_v30, %s2779_s20  ;;  %507 = vst.msk [vmem:[#allocation2 + $0xc1] sm:$0xff] %vm436_vm0, %v418_v25  ;;  %v601_v54 = vld [vmem:[#allocation2 + $0x91] sm:$0xff]  ;;  %v422_v14 = vsel %vm358_vm10, %v326_v6, %v390_v11  ;;  %v294_v21 = vmul.f32 %v2907_v2, %v257_v18  ;;  %v265_v30 = vld [vmem:[%s2898_s24 + $0xe8] sm:$0xff]  ;;  %v3193_v11 = vld [vmem:[#allocation2 + $0x20] sm:$0xff]  ;;  %vm1908_vm10 = vcmask 523712  }
  0x50   : > { %502 = vst.msk [vmem:[#allocation2 + $0x81] sm:$0xff] %vm436_vm0, %v413_v27  ;;  %v599_v8 = vld [vmem:[#allocation2 + $0x79] sm:$0xff]  ;;  %v262_v16 = vld [vmem:[%s2898_s24 + $0xd0] sm:$0xff]  ;;  %v432_v20 = vsel %vm368_vm11, %v336_v12, %v400_v15  ;;  %v782_v6 = vld [vmem:[#allocation2 + $0x2] sm:$0xff]  ;;  %vm2101_vm11 = vcmask 589312  }
  0x51   : > { %512 = vst.msk [vmem:[#allocation2 + $0xf9] sm:$0xff] %vm436_vm0, %v423_v31  ;;  %v3048_v45 = vld [vmem:[#allocation2 + $0x39] sm:$0xff]  ;;  %v299_v17 = vmul.f32 %v2907_v2, %v262_v16  ;;  %v329_v23 = vadd.f32 %v2922_v5, %v294_v21  ;;  %v302_v31 = vmul.f32 %v2907_v2, %v265_v30  ;;  %v3155_v61 = vld [vmem:[#allocation2 + $0x30] sm:$0xff]  ;;  %v3195_v12 = vld [vmem:[#allocation2 + $0x22] sm:$0xff] }
  0x52   : > { %659 = vrot.lane.b32.xlu1 %v592_v34, %s2779_s20  ;;  %510 = vst.msk [vmem:[#allocation2 + $0xe1] sm:$0xff] %vm436_vm0, %v421_v39  ;;  %v604_v10 = vld [vmem:[#allocation2 + $0xb1] sm:$0xff]  ;;  %v297_v34 = vmul.f32 %v2907_v2, %v260_v32  ;;  %v3205_v15 = vld [vmem:[#allocation2 + $0x3a] sm:$0xff] }
  0x53   : > { %671 = vrot.lane.b32.xlu0 %v598_v36, %s2779_s20  ;;  %505 = vst.msk [vmem:[#allocation2 + $0xa9] sm:$0xff] %vm436_vm0, %v416_v40  ;;  %v334_v22 = vadd.f32 %v2922_v5, %v299_v17  ;;  %v602_v24 = vld [vmem:[#allocation2 + $0x99] sm:$0xff]  ;;  %v393_v27 = vmul.f32 0.2, %v329_v23  ;;  %vm361_vm13 = vcmp.ge.f32.partialorder %v329_v23, 0.0  ;;  %v337_v35 = vadd.f32 %v2922_v5, %v302_v31  ;;  %v3221_v21 = vld [vmem:[#allocation2 + $0x4a] sm:$0xff] }
  0x54   : > { %515 = vst.msk [vmem:[#allocation2 + $0x121] sm:$0xff] %vm436_vm0, %v426_v46  ;;  %v3066_v63 = vld [vmem:[#allocation2 + $0x61] sm:$0xff]  ;;  %v332_v36 = vadd.f32 %v2922_v5, %v297_v34  ;;  %v300_v46 = vmul.f32 %v2907_v2, %v263_v43  ;;  %v3166_v3 = vld [vmem:[#allocation2 + $0x32] sm:$0xff] }
  0x55   : > { %513 = vst.msk [vmem:[#allocation2 + $0x109] sm:$0xff] %vm436_vm0, %v424_v57  ;;  %v398_v25 = vmul.f32 0.2, %v334_v22  ;;  %v607_v26 = vld [vmem:[#allocation2 + $0xd9] sm:$0xff]  ;;  %vm366_vm12 = vcmp.ge.f32.partialorder %v334_v22, 0.0  ;;  %v425_v29 = vsel %vm361_vm13, %v329_v23, %v393_v27  ;;  %vm369_vm14 = vcmp.ge.f32.partialorder %v337_v35, 0.0 }
  0x56   : > { %508 = vst.msk [vmem:[#allocation2 + $0xc9] sm:$0xff] %vm436_vm0, %v419_v58  ;;  %v605_v37 = vld [vmem:[#allocation2 + $0xc1] sm:$0xff]  ;;  %v401_v38 = vmul.f32 0.2, %v337_v35  ;;  %v396_v40 = vmul.f32 0.2, %v332_v36  ;;  %v335_v47 = vadd.f32 %v2922_v5, %v300_v46 }
  0x57   : > { %663 = vrot.lane.b32.xlu2 %v3048_v45, %s2779_s20  ;;  %518 = vst.msk [vmem:[#allocation2 + $0x141] sm:$0xff] %vm436_vm0, %v429_v0  ;;  %v3084_v19 = vld [vmem:[#allocation2 + $0x81] sm:$0xff]  ;;  %v430_v28 = vsel %vm366_vm12, %v334_v22, %v398_v25  ;;  %vm364_vm15 = vcmp.ge.f32.partialorder %v332_v36, 0.0  ;;  %v3176_v7 = vld [vmem:[#allocation2 + $0x38] sm:$0xff]  ;;  %v3227_v23 = vld [vmem:[#allocation2 + $0x90] sm:$0xff]  ;;  %vm2175_vm12 = vcmask 588800  }
  0x58   : > { %516 = vst.msk [vmem:[#allocation2 + $0x129] sm:$0xff] %vm436_vm0, %v427_v13  ;;  %v610_v39 = vld [vmem:[#allocation2 + $0xf9] sm:$0xff]  ;;  %v433_v41 = vsel %vm369_vm14, %v337_v35, %v401_v38  ;;  %v428_v42 = vsel %vm364_vm15, %v332_v36, %v396_v40  ;;  %v399_v50 = vmul.f32 0.2, %v335_v47  ;;  %vm367_vm1 = vcmp.ge.f32.partialorder %v335_v47, 0.0  ;;  %v3256_v31 = vld [vmem:[#allocation2 + $0x82] sm:$0xff] }
  0x59   : > { %511 = vst.msk [vmem:[#allocation2 + $0xf1] sm:$0xff] %vm436_vm0, %v422_v14  ;;  %v608_v48 = vld [vmem:[#allocation2 + $0xe1] sm:$0xff]  ;;  %v3242_v27 = vld [vmem:[#allocation2 + $0x78] sm:$0xff]  ;;  %vm2454_vm13 = vcmask 57344  }
  0x5a   : > { %667 = vrot.lane.b32.xlu1 %v596_v52, %s2779_s20  ;;  %521 = vst.msk [vmem:[#allocation2 + $0x169] sm:$0xff] %vm436_vm0, %v432_v20  ;;  %v3099_v33 = vld [vmem:[#allocation2 + $0xa9] sm:$0xff]  ;;  %v431_v51 = vsel %vm367_vm1, %v335_v47, %v399_v50  ;;  %v3199_v13 = vld [vmem:[#allocation2 + $0x60] sm:$0xff]  ;;  %v3267_v35 = vld [vmem:[#allocation2 + $0x98] sm:$0xff] }
  0x5b   : > { %677 = vrot.lane.b32.xlu0 %v601_v54, %s2779_s20  ;;  %519 = vst.msk [vmem:[#allocation2 + $0x151] sm:$0xff] %vm436_vm0, %v430_v28  ;;  %v3117_v49 = vld [vmem:[#allocation2 + $0x121] sm:$0xff]  ;;  %v3216_v20 = vld [vmem:[#allocation2 + $0x50] sm:$0xff]  ;;  %v3278_v40 = vld [vmem:[#allocation2 + $0xd8] sm:$0xff] }
  0x5c   : > { %514 = vst.msk [vmem:[#allocation2 + $0x111] sm:$0xff] %vm436_vm0, %v425_v29  ;;  %v611_v2 = vld [vmem:[#allocation2 + $0x109] sm:$0xff]  ;;  %v3211_v16 = vld [vmem:[#allocation2 + $0x7a] sm:$0xff] }
  0x5d   : > { %522 = vst.msk [vmem:[#allocation2 + $0x171] sm:$0xff] %vm436_vm0, %v433_v41  ;;  %v3111_v44 = vld [vmem:[#allocation2 + $0xc9] sm:$0xff]  ;;  %v3225_v22 = vld [vmem:[#allocation2 + $0x80] sm:$0xff] }
  0x5e   : > { %517 = vst.msk [vmem:[#allocation2 + $0x139] sm:$0xff] %vm436_vm0, %v428_v42  ;;  %v3127_v5 = vld [vmem:[#allocation2 + $0x141] sm:$0xff]  ;;  %v3248_v28 = vld [vmem:[#allocation2 + $0x6a] sm:$0xff] }
  0x5f   : > { %669 = vrot.lane.b32.xlu2 %v3066_v63, %s2779_s20  ;;  %520 = vst.msk [vmem:[#allocation2 + $0x159] sm:$0xff] %vm436_vm0, %v431_v51  ;;  %v3134_v54 = vld [vmem:[#allocation2 + $0x129] sm:$0xff]  ;;  %v3237_v25 = vld [vmem:[#allocation2 + $0x9a] sm:$0xff] }
  0x60   : > { %v3123_v52 = vld [vmem:[#allocation2 + $0xf1] sm:$0xff]  ;;  %557 = vst.msk [vmem:[#allocation3] sm:$0xff] %vm436_vm0, %v525_v56  ;;  %v3201_v14 = vld [vmem:[#allocation2 + $0x68] sm:$0xff]  ;;  %v3294_v46 = vld [vmem:[#allocation2 + $0xc0] sm:$0xff] }
  0x61   : > { %v3138_v55 = vld [vmem:[#allocation2 + $0x169] sm:$0xff]  ;;  %561 = vst.msk [vmem:[#allocation3 + $0x20] sm:$0xff] %vm436_vm0, %v3155_v61 }
  0x62   : > { %673 = vrot.lane.b32.xlu1 %v599_v8, %s2779_s20  ;;  %v3148_v59 = vld [vmem:[#allocation2 + $0x151] sm:$0xff]  ;;  %558 = vst.msk [vmem:[#allocation3 + $0x8] sm:$0xff] %vm436_vm0, %v526_v62  ;;  %v3178_v8 = vld [vmem:[#allocation2 + $0x48] sm:$0xff]  ;;  %v3321_v62 = vld [vmem:[#allocation2 + $0xe0] sm:$0xff] }
  0x63   : > { %683 = vrot.lane.b32.xlu0 %v604_v10, %s2779_s20  ;;  %v3132_v53 = vld [vmem:[#allocation2 + $0x111] sm:$0xff]  ;;  %559 = vst.msk [vmem:[#allocation3 + $0x10] sm:$0xff] %vm436_vm0, %v3172_v4  ;;  %v3250_v29 = vld [vmem:[#allocation2 + $0xa8] sm:$0xff] }
  0x64   : > { %v3162_v1 = vld [vmem:[#allocation2 + $0x171] sm:$0xff]  ;;  %562 = vst.msk [vmem:[#allocation3 + $0x28] sm:$0xff] %vm436_vm0, %v3176_v7  ;;  %v3262_v32 = vld [vmem:[#allocation2 + $0xc2] sm:$0xff] }
  0x65   : > { %v3144_v57 = vld [vmem:[#allocation2 + $0x139] sm:$0xff]  ;;  %563 = vst.msk [vmem:[#allocation3 + $0x30] sm:$0xff] %vm436_vm0, %v3178_v8  ;;  %v3252_v30 = vld [vmem:[#allocation2 + $0xb0] sm:$0xff]  ;;  %v3287_v42 = vld [vmem:[#allocation2 + $0xe2] sm:$0xff] }
  0x66   : > { %v3157_v0 = vld [vmem:[#allocation2 + $0x159] sm:$0xff]  ;;  %560 = vst.msk [vmem:[#allocation3 + $0x18] sm:$0xff] %vm436_vm0, %v3193_v11  ;;  %v3281_v41 = vld [vmem:[#allocation2 + $0xaa] sm:$0xff] }
  0x67   : > { %675 = vrot.lane.b32.xlu2 %v3084_v19, %s2779_s20  ;;  %v3187_v10 = vld [vmem:[#allocation2 + $0x52] sm:$0xff]  ;;  %565 = vst.msk [vmem:[#allocation3 + $0x40] sm:$0xff] %vm436_vm0, %v3199_v13  ;;  %v3308_v56 = vld [vmem:[#allocation2 + $0xca] sm:$0xff] }
  0x68   : > { %566 = vst.msk [vmem:[#allocation3 + $0x48] sm:$0xff] %vm436_vm0, %v3201_v14  ;;  %v3303_v51 = vld [vmem:[#allocation2 + $0xf0] sm:$0xff] }
  0x69   : > { %564 = vst.msk [vmem:[#allocation3 + $0x38] sm:$0xff] %vm436_vm0, %v3216_v20 }
  0x6a   : > { %679 = vrot.lane.b32.xlu1 %v602_v24, %s2779_s20  ;;  %568 = vst.msk [vmem:[#allocation3 + $0x58] sm:$0xff] %vm436_vm0, %v3225_v22  ;;  %v3231_v24 = vld [vmem:[#allocation2 + $0x62] sm:$0xff] }
  0x6b   : > { %689 = vrot.lane.b32.xlu0 %v607_v26, %s2779_s20  ;;  %569 = vst.msk [vmem:[#allocation3 + $0x60] sm:$0xff] %vm436_vm0, %v3227_v23 }
  0x6c   : > { %567 = vst.msk [vmem:[#allocation3 + $0x50] sm:$0xff] %vm436_vm0, %v3242_v27 }
  0x6d   : > { %571 = vst.msk [vmem:[#allocation3 + $0x70] sm:$0xff] %vm436_vm0, %v3250_v29 }
  0x6e   : > { %572 = vst.msk [vmem:[#allocation3 + $0x78] sm:$0xff] %vm436_vm0, %v3252_v30 }
  0x6f   : > { %681 = vrot.lane.b32.xlu2 %v3099_v33, %s2779_s20  ;;  %4280 = vst [vmem:[#allocation4_spill] sm:$0xff] %v3262_v32 }
  0x70   : > { %570 = vst.msk [vmem:[#allocation3 + $0x68] sm:$0xff] %vm436_vm0, %v3267_v35 }
  0x71   : > { %4281 = vst [vmem:[#allocation5_spill] sm:$0xff] %v3281_v41 }
  0x72   : > { %685 = vrot.lane.b32.xlu1 %v605_v37, %s2779_s20  ;;  %v3273_v37 = vld [vmem:[#allocation2 + $0x92] sm:$0xff]  ;;  %4282 = vst [vmem:[#allocation6_spill] sm:$0xff] %v3287_v42 }
  0x73   : > { %695 = vrot.lane.b32.xlu0 %v610_v39, %s2779_s20  ;;  %v3276_v39 = vld [vmem:[#allocation2 + $0xc8] sm:$0xff]  ;;  %575 = vst.msk [vmem:[#allocation3 + $0x90] sm:$0xff] %vm436_vm0, %v3278_v40 }
  0x74   : > { %574 = vst.msk [vmem:[#allocation3 + $0x88] sm:$0xff] %vm436_vm0, %v3276_v39 }
  0x75   : > { %573 = vst.msk [vmem:[#allocation3 + $0x80] sm:$0xff] %vm436_vm0, %v3294_v46 }
  0x76   : > { %4283 = vst [vmem:[#allocation7_spill] sm:$0xff] %v3308_v56 }
  0x77   : > { %687 = vrot.lane.b32.xlu2 %v3111_v44, %s2779_s20  ;;  %577 = vst.msk [vmem:[#allocation3 + $0xa0] sm:$0xff] %vm436_vm0, %v3303_v51 }
  0x78   : > { %576 = vst.msk [vmem:[#allocation3 + $0x98] sm:$0xff] %vm436_vm0, %v3321_v62 }
  0x7a   : > { %691 = vrot.lane.b32.xlu1 %v608_v48, %s2779_s20  ;;  %v3300_v48 = vld [vmem:[#allocation2 + $0xb2] sm:$0xff] }
  0x7b   : > { %701 = vrot.lane.b32.xlu0 %v3117_v49, %s2779_s20 }
  0x7f   : > { %693 = vrot.lane.b32.xlu2 %v3123_v52, %s2779_s20 }
  0x82   : > { %697 = vrot.lane.b32.xlu1 %v611_v2, %s2779_s20  ;;  %v3305_v2 = vld [vmem:[#allocation2 + $0xf8] sm:$0xff] }
  0x83   : > { %707 = vrot.lane.b32.xlu0 %v3127_v5, %s2779_s20  ;;  %578 = vst.msk [vmem:[#allocation3 + $0xa8] sm:$0xff] %vm436_vm0, %v3305_v2 }
  0x87   : > { %699 = vrot.lane.b32.xlu2 %v3132_v53, %s2779_s20  ;;  %v654_v58 = vpop.permute.xlu0 %653 }
  0x88   : > { %750 = vst.msk [vmem:[#allocation3] sm:$0xff] %vm749_vm2, %v654_v58  ;;  %v3314_v58 = vld [vmem:[#allocation2 + $0x10a] sm:$0xff] }
  0x89   : > { %4284 = vst [vmem:[#allocation8_spill] sm:$0xff] %v3314_v58 }
  0x8a   : > { %703 = vrot.lane.b32.xlu1 %v3134_v54, %s2779_s20 }
  0x8b   : > { %713 = vrot.lane.b32.xlu0 %v3138_v55, %s2779_s20 }
  0x8f   : > { %705 = vrot.lane.b32.xlu2 %v3144_v57, %s2779_s20 }
  0x92   : > { %709 = vrot.lane.b32.xlu1 %v3148_v59, %s2779_s20 }
  0x93   : > { %848 = vrot.lane.b32.xlu0 %v783_v60, %s2780_s29 }
  0x97   : > { %711 = vrot.lane.b32.xlu2 %v3157_v0, %s2779_s20 }
  0x9a   : > { %715 = vrot.lane.b32.xlu1 %v3162_v1, %s2779_s20 }
  0x9b   : > { %854 = vrot.lane.b32.xlu0 %v3166_v3, %s2780_s29 }
  0x9f   : > { %846 = vrot.lane.b32.xlu2 %v782_v6, %s2780_s29 }
  0xa2   : > { %850 = vrot.lane.b32.xlu1 %v3182_v9, %s2780_s29 }
  0xa3   : > { %860 = vrot.lane.b32.xlu0 %v3187_v10, %s2780_s29 }
  0xa7   : > { %852 = vrot.lane.b32.xlu2 %v3195_v12, %s2780_s29 }
  0xa9   : > { %v662_v17 = vpop.permute.xlu2 %661 }
  0xaa   : > { %856 = vrot.lane.b32.xlu1 %v3205_v15, %s2780_s29  ;;  %754 = vst.msk [vmem:[#allocation3 + $0x20] sm:$0xff] %vm749_vm2, %v662_v17  ;;  %v656_v18 = vpop.permute.xlu0 %655  ;;  %v3327_v17 = vld [vmem:[#allocation2 + $0xda] sm:$0xff] }
  0xab   : > { %866 = vrot.lane.b32.xlu0 %v3211_v16, %s2780_s29  ;;  %751 = vst.msk [vmem:[#allocation3 + $0x8] sm:$0xff] %vm749_vm2, %v656_v18 }
  0xac   : > { %4285 = vst [vmem:[#allocation9_spill] sm:$0xff] %v3327_v17 }
  0xaf   : > { %858 = vrot.lane.b32.xlu2 %v3221_v21, %s2780_s29 }
  0xb1   : > { %v664_v26 = vpop.permute.xlu2 %663 }
  0xb2   : > { %862 = vrot.lane.b32.xlu1 %v3231_v24, %s2780_s29  ;;  %755 = vst.msk [vmem:[#allocation3 + $0x28] sm:$0xff] %vm749_vm2, %v664_v26  ;;  %v3330_v26 = vld [vmem:[#allocation2 + $0x110] sm:$0xff] }
  0xb3   : > { %872 = vrot.lane.b32.xlu0 %v3237_v25, %s2780_s29  ;;  %580 = vst.msk [vmem:[#allocation3 + $0xb8] sm:$0xff] %vm436_vm0, %v3330_v26 }
  0xb7   : > { %864 = vrot.lane.b32.xlu2 %v3248_v28, %s2780_s29 }
  0xb9   : > { %v670_v34 = vpop.permute.xlu2 %669 }
  0xba   : > { %868 = vrot.lane.b32.xlu1 %v3256_v31, %s2780_s29  ;;  %758 = vst.msk [vmem:[#allocation3 + $0x40] sm:$0xff] %vm749_vm2, %v670_v34  ;;  %v3332_v34 = vld [vmem:[#allocation2 + $0x120] sm:$0xff] }
  0xbb   : > { %878 = vrot.lane.b32.xlu0 %v3262_v32, %s2780_s29  ;;  %581 = vst.msk [vmem:[#allocation3 + $0xc0] sm:$0xff] %vm436_vm0, %v3332_v34  ;;  %v3386_v32 = vld [vmem:[#allocation2 + $0x168] sm:$0xff] }
  0xbc   : > { %v658_v36 = vpop.permute.xlu1 %657  ;;  %587 = vst.msk [vmem:[#allocation3 + $0xf0] sm:$0xff] %vm436_vm0, %v3386_v32 }
  0xbd   : > { %752 = vst.msk [vmem:[#allocation3 + $0x10] sm:$0xff] %vm749_vm2, %v658_v36  ;;  %v666_v38 = vpop.permute.xlu0 %665  ;;  %v3335_v36 = vld [vmem:[#allocation2 + $0xf2] sm:$0xff] }
  0xbe   : > { %756 = vst.msk [vmem:[#allocation3 + $0x30] sm:$0xff] %vm749_vm2, %v666_v38  ;;  %v3341_v38 = vld [vmem:[#allocation2 + $0x12a] sm:$0xff] }
  0xbf   : > { %870 = vrot.lane.b32.xlu2 %v3273_v37, %s2780_s29  ;;  %4286 = vst [vmem:[#allocation10_spill] sm:$0xff] %v3335_v36 }
  0xc0   : > { %4287 = vst [vmem:[#allocation11_spill] sm:$0xff] %v3341_v38 }
  0xc1   : > { %v676_v43 = vpop.permute.xlu2 %675 }
  0xc2   : > { %874 = vrot.lane.b32.xlu1 %v3281_v41, %s2780_s29  ;;  %761 = vst.msk [vmem:[#allocation3 + $0x58] sm:$0xff] %vm749_vm2, %v676_v43 }
  0xc3   : > { %884 = vrot.lane.b32.xlu0 %v3287_v42, %s2780_s29  ;;  %v3381_v42 = vld [vmem:[#allocation2 + $0x122] sm:$0xff] }
  0xc4   : > { %v660_v47 = vpop.permute.xlu1 %659  ;;  %4291 = vst [vmem:[#allocation15_spill] sm:$0xff] %v3381_v42 }
  0xc5   : > { %753 = vst.msk [vmem:[#allocation3 + $0x18] sm:$0xff] %vm749_vm2, %v660_v47  ;;  %v672_v50 = vpop.permute.xlu0 %671  ;;  %v3348_v47 = vld [vmem:[#allocation2 + $0x108] sm:$0xff] }
  0xc6   : > { %759 = vst.msk [vmem:[#allocation3 + $0x48] sm:$0xff] %vm749_vm2, %v672_v50 }
  0xc7   : > { %876 = vrot.lane.b32.xlu2 %v3300_v48, %s2780_s29  ;;  %579 = vst.msk [vmem:[#allocation3 + $0xb0] sm:$0xff] %vm436_vm0, %v3348_v47 }
  0xc9   : > { %v682_v60 = vpop.permute.xlu2 %681 }
  0xca   : > { %880 = vrot.lane.b32.xlu1 %v3308_v56, %s2780_s29  ;;  %764 = vst.msk [vmem:[#allocation3 + $0x70] sm:$0xff] %vm749_vm2, %v682_v60  ;;  %v3354_v60 = vld [vmem:[#allocation2 + $0xfa] sm:$0xff] }
  0xcb   : > { %890 = vrot.lane.b32.xlu0 %v3314_v58, %s2780_s29  ;;  %4288 = vst [vmem:[#allocation12_spill] sm:$0xff] %v3354_v60  ;;  %v3359_v58 = vld [vmem:[#allocation2 + $0x140] sm:$0xff] }
  0xcc   : > { %v668_v6 = vpop.permute.xlu1 %667  ;;  %584 = vst.msk [vmem:[#allocation3 + $0xd8] sm:$0xff] %vm436_vm0, %v3359_v58 }
  0xcd   : > { %757 = vst.msk [vmem:[#allocation3 + $0x38] sm:$0xff] %vm749_vm2, %v668_v6  ;;  %v678_v18 = vpop.permute.xlu0 %677 }
  0xce   : > { %762 = vst.msk [vmem:[#allocation3 + $0x60] sm:$0xff] %vm749_vm2, %v678_v18  ;;  %v3357_v18 = vld [vmem:[#allocation2 + $0x138] sm:$0xff] }
  0xcf   : > { %882 = vrot.lane.b32.xlu2 %v3327_v17, %s2780_s29  ;;  %583 = vst.msk [vmem:[#allocation3 + $0xd0] sm:$0xff] %vm436_vm0, %v3357_v18  ;;  %v3412_v17 = vld [vmem:[#allocation2 + $0x15a] sm:$0xff] }
  0xd0   : > { %4294 = vst [vmem:[#allocation18_spill] sm:$0xff] %v3412_v17 }
  0xd1   : > { %v688_v43 = vpop.permute.xlu2 %687 }
  0xd2   : > { %886 = vrot.lane.b32.xlu1 %v3335_v36, %s2780_s29  ;;  %767 = vst.msk [vmem:[#allocation3 + $0x88] sm:$0xff] %vm749_vm2, %v688_v43  ;;  %v3362_v43 = vld [vmem:[#allocation2 + $0x112] sm:$0xff] }
  0xd3   : > { %896 = vrot.lane.b32.xlu0 %v3341_v38, %s2780_s29  ;;  %4289 = vst [vmem:[#allocation13_spill] sm:$0xff] %v3362_v43  ;;  %v3368_v38 = vld [vmem:[#allocation2 + $0x152] sm:$0xff] }
  0xd4   : > { %v674_v50 = vpop.permute.xlu1 %673  ;;  %4290 = vst [vmem:[#allocation14_spill] sm:$0xff] %v3368_v38 }
  0xd5   : > { %760 = vst.msk [vmem:[#allocation3 + $0x50] sm:$0xff] %vm749_vm2, %v674_v50  ;;  %v684_v6 = vpop.permute.xlu0 %683 }
  0xd6   : > { %765 = vst.msk [vmem:[#allocation3 + $0x78] sm:$0xff] %vm749_vm2, %v684_v6  ;;  %v3375_v6 = vld [vmem:[#allocation2 + $0x128] sm:$0xff] }
  0xd7   : > { %888 = vrot.lane.b32.xlu2 %v3354_v60, %s2780_s29  ;;  %582 = vst.msk [vmem:[#allocation3 + $0xc8] sm:$0xff] %vm436_vm0, %v3375_v6  ;;  %v3384_v60 = vld [vmem:[#allocation2 + $0x158] sm:$0xff] }
  0xd8   : > { %586 = vst.msk [vmem:[#allocation3 + $0xe8] sm:$0xff] %vm436_vm0, %v3384_v60 }
  0xd9   : > { %v694_v50 = vpop.permute.xlu2 %693 }
  0xda   : > { %892 = vrot.lane.b32.xlu1 %v3362_v43, %s2780_s29  ;;  %770 = vst.msk [vmem:[#allocation3 + $0xa0] sm:$0xff] %vm749_vm2, %v694_v50  ;;  %v3389_v50 = vld [vmem:[#allocation2 + $0x13a] sm:$0xff] }
  0xdb   : > { %902 = vrot.lane.b32.xlu0 %v3368_v38, %s2780_s29  ;;  %4292 = vst [vmem:[#allocation16_spill] sm:$0xff] %v3389_v50  ;;  %v3395_v38 = vld [vmem:[#allocation2 + $0x172] sm:$0xff] }
  0xdc   : > { %v680_v36 = vpop.permute.xlu1 %679  ;;  %4293 = vst [vmem:[#allocation17_spill] sm:$0xff] %v3395_v38 }
  0xdd   : > { %763 = vst.msk [vmem:[#allocation3 + $0x68] sm:$0xff] %vm749_vm2, %v680_v36  ;;  %v690_v56 = vpop.permute.xlu0 %689 }
  0xde   : > { %768 = vst.msk [vmem:[#allocation3 + $0x90] sm:$0xff] %vm749_vm2, %v690_v56  ;;  %v3402_v56 = vld [vmem:[#allocation2 + $0x150] sm:$0xff] }
  0xdf   : > { %894 = vrot.lane.b32.xlu2 %v3381_v42, %s2780_s29  ;;  %585 = vst.msk [vmem:[#allocation3 + $0xe0] sm:$0xff] %vm436_vm0, %v3402_v56  ;;  %v3408_v42 = vld [vmem:[#allocation2 + $0x142] sm:$0xff] }
  0xe1   : > { %v700_v36 = vpop.permute.xlu2 %699 }
  0xe2   : > { %898 = vrot.lane.b32.xlu1 %v3389_v50, %s2780_s29  ;;  %773 = vst.msk [vmem:[#allocation3 + $0xb8] sm:$0xff] %vm749_vm2, %v700_v36 }
  0xe3   : > { %908 = vrot.lane.b32.xlu0 %v3395_v38, %s2780_s29  ;;  %v3419_v38 = vld [vmem:[#allocation2 + $0x170] sm:$0xff] }
  0xe4   : > { %v686_v43 = vpop.permute.xlu1 %685  ;;  %588 = vst.msk [vmem:[#allocation3 + $0xf8] sm:$0xff] %vm436_vm0, %v3419_v38 }
  0xe5   : > { %766 = vst.msk [vmem:[#allocation3 + $0x80] sm:$0xff] %vm749_vm2, %v686_v43  ;;  %v696_v41 = vpop.permute.xlu0 %695  ;;  %v3425_v43 = vld [vmem:[#allocation2 + $0x16a] sm:$0xff] }
  0xe6   : > { %771 = vst.msk [vmem:[#allocation3 + $0xa8] sm:$0xff] %vm749_vm2, %v696_v41 }
  0xe7   : > { %900 = vrot.lane.b32.xlu2 %v3408_v42, %s2780_s29 }
  0xe9   : > { %v706_v36 = vpop.permute.xlu2 %705 }
  0xea   : > { %904 = vrot.lane.b32.xlu1 %v3412_v17, %s2780_s29  ;;  %776 = vst.msk [vmem:[#allocation3 + $0xd0] sm:$0xff] %vm749_vm2, %v706_v36 }
  0xeb   : > { %1043 = vrot.lane.b32.xlu0 %v3155_v61, %s2781_s30 }
  0xec   : > { %v692_v41 = vpop.permute.xlu1 %691 }
  0xed   : > { %769 = vst.msk [vmem:[#allocation3 + $0x98] sm:$0xff] %vm749_vm2, %v692_v41  ;;  %v702_v50 = vpop.permute.xlu0 %701 }
  0xee   : > { %774 = vst.msk [vmem:[#allocation3 + $0xc0] sm:$0xff] %vm749_vm2, %v702_v50 }
  0xef   : > { %906 = vrot.lane.b32.xlu2 %v3425_v43, %s2780_s29 }
  0xf1   : > { %v712_v36 = vpop.permute.xlu2 %711 }
  0xf2   : > { %1039 = vrot.lane.b32.xlu1 %v3172_v4, %s2781_s30  ;;  %779 = vst.msk [vmem:[#allocation3 + $0xe8] sm:$0xff] %vm749_vm2, %v712_v36 }
  0xf3   : > { %1049 = vrot.lane.b32.xlu0 %v3216_v20, %s2781_s30 }
  0xf4   : > { %v698_v61 = vpop.permute.xlu1 %697 }
  0xf5   : > { %772 = vst.msk [vmem:[#allocation3 + $0xb0] sm:$0xff] %vm749_vm2, %v698_v61  ;;  %v708_v17 = vpop.permute.xlu0 %707 }
  0xf6   : > { %777 = vst.msk [vmem:[#allocation3 + $0xd8] sm:$0xff] %vm749_vm2, %v708_v17 }
  0xf7   : > { %1041 = vrot.lane.b32.xlu2 %v3193_v11, %s2781_s30 }
  0xf9   : > { %v847_v50 = vpop.permute.xlu2 %846 }
  0xfa   : > { %1045 = vrot.lane.b32.xlu1 %v3176_v7, %s2781_s30  ;;  %943 = vst.msk [vmem:[#allocation3] sm:$0xff] %vm942_vm3, %v847_v50  ;;  %v2769_v50 = vld [vmem:[%s4262_s3] ss:$0 sm:$0xff] }
  0xfb   : > { %1055 = vrot.lane.b32.xlu0 %v3242_v27, %s2781_s30 }
  0xfc   : > { %v704_v4 = vpop.permute.xlu1 %703 }
  0xfd   : > { %775 = vst.msk [vmem:[#allocation3 + $0xc8] sm:$0xff] %vm749_vm2, %v704_v4  ;;  %v714_v20 = vpop.permute.xlu0 %713 }
  0xfe   : > { %780 = vst.msk [vmem:[#allocation3 + $0xf0] sm:$0xff] %vm749_vm2, %v714_v20 }
  0xff   : > { %1047 = vrot.lane.b32.xlu2 %v3178_v8, %s2781_s30 }
 0x101   : > { %v853_v11 = vpop.permute.xlu2 %852 }
 0x102   : > { %1051 = vrot.lane.b32.xlu1 %v3199_v13, %s2781_s30  ;;  %946 = vst.msk [vmem:[#allocation3 + $0x18] sm:$0xff] %vm942_vm3, %v853_v11 }
 0x103   : > { %1061 = vrot.lane.b32.xlu0 %v3267_v35, %s2781_s30 }
 0x104   : > { %v710_v7 = vpop.permute.xlu1 %709 }
 0x105   : > { %778 = vst.msk [vmem:[#allocation3 + $0xe0] sm:$0xff] %vm749_vm2, %v710_v7  ;;  %v849_v27 = vpop.permute.xlu0 %848 }
 0x106   : > { %944 = vst.msk [vmem:[#allocation3 + $0x8] sm:$0xff] %vm942_vm3, %v849_v27 }
 0x107   : > { %1053 = vrot.lane.b32.xlu2 %v3201_v14, %s2781_s30  ;;  %v266_v14 = vld [vmem:[%s2898_s24 + $0xf0] sm:$0xff] }
 0x109   : > { %v859_v8 = vpop.permute.xlu2 %858 }
 0x10a   : > { %1057 = vrot.lane.b32.xlu1 %v3225_v22, %s2781_s30  ;;  %949 = vst.msk [vmem:[#allocation3 + $0x30] sm:$0xff] %vm942_vm3, %v859_v8  ;;  %v2768_v22 = vld [vmem:[%s4261_s2] ss:$0 sm:$0xff] }
 0x10b   : > { %1067 = vrot.lane.b32.xlu0 %v3294_v46, %s2781_s30  ;;  %v303_v46 = vmul.f32 %v2768_v22, %v266_v14 }
 0x10c   : > { %v716_v13 = vpop.permute.xlu1 %715 }
 0x10d   : > { %781 = vst.msk [vmem:[#allocation3 + $0xf8] sm:$0xff] %vm749_vm2, %v716_v13  ;;  %v855_v17 = vpop.permute.xlu0 %854 }
 0x10e   : > { %947 = vst.msk [vmem:[#allocation3 + $0x20] sm:$0xff] %vm942_vm3, %v855_v17 }
 0x10f   : > { %1059 = vrot.lane.b32.xlu2 %v3227_v23, %s2781_s30 }
 0x111   : > { %v865_v41 = vpop.permute.xlu2 %864 }
 0x112   : > { %1063 = vrot.lane.b32.xlu1 %v3250_v29, %s2781_s30  ;;  %952 = vst.msk [vmem:[#allocation3 + $0x48] sm:$0xff] %vm942_vm3, %v865_v41  ;;  %v338_v29 = vadd.f32 %v2769_v50, %v303_v46 }
 0x113   : > { %1073 = vrot.lane.b32.xlu0 %v3321_v62, %s2781_s30 }
 0x114   : > { %v851_v36 = vpop.permute.xlu1 %850  ;;  %v402_v62 = vmul.f32 0.2, %v338_v29  ;;  %vm370_vm4 = vcmp.ge.f32.partialorder %v338_v29, 0.0 }
 0x115   : > { %945 = vst.msk [vmem:[#allocation3 + $0x10] sm:$0xff] %vm942_vm3, %v851_v36  ;;  %v861_v61 = vpop.permute.xlu0 %860 }
 0x116   : > { %950 = vst.msk [vmem:[#allocation3 + $0x38] sm:$0xff] %vm942_vm3, %v861_v61  ;;  %v434_v20 = vsel %vm370_vm4, %v338_v29, %v402_v62 }
 0x117   : > { %1065 = vrot.lane.b32.xlu2 %v3252_v30, %s2781_s30  ;;  %523 = vst.msk [vmem:[#allocation2 + $0x181] sm:$0xff] %vm436_vm0, %v434_v20 }
 0x119   : > { %v871_v4 = vpop.permute.xlu2 %870 }
 0x11a   : > { %1069 = vrot.lane.b32.xlu1 %v3276_v39, %s2781_s30  ;;  %955 = vst.msk [vmem:[#allocation3 + $0x60] sm:$0xff] %vm942_vm3, %v871_v4  ;;  %v267_v39 = vld [vmem:[%s2898_s24 + $0xf8] sm:$0xff]  ;;  %v3545_v4 = vld [vmem:[#allocation2 + $0x49] sm:$0xff] }
 0x11b   : > { %1079 = vrot.lane.b32.xlu0 %v3348_v47, %s2781_s30  ;;  %v304_v27 = vmul.f32 %v2768_v22, %v267_v39  ;;  %v1168_v22 = vld [vmem:[#allocation2 + $0x19] sm:$0xff] }
 0x11c   : > { %v857_v11 = vpop.permute.xlu1 %856 }
 0x11d   : > { %948 = vst.msk [vmem:[#allocation3 + $0x28] sm:$0xff] %vm942_vm3, %v857_v11  ;;  %v867_v7 = vpop.permute.xlu0 %866  ;;  %v339_v13 = vadd.f32 %v2769_v50, %v304_v27  ;;  %v1169_v50 = vld [vmem:[#allocation2 + $0x21] sm:$0xff]  ;;  %v3554_v11 = vld [vmem:[#allocation2 + $0x51] sm:$0xff] }
 0x11e   : > { %953 = vst.msk [vmem:[#allocation3 + $0x50] sm:$0xff] %vm942_vm3, %v867_v7  ;;  %v1005_v46 = vld [vmem:[#allocation2 + $0x180] sm:$0xff] }
 0x11f   : > { %1071 = vrot.lane.b32.xlu2 %v3278_v40, %s2781_s30  ;;  %v403_v40 = vmul.f32 0.2, %v339_v13  ;;  %vm371_vm5 = vcmp.ge.f32.partialorder %v339_v13, 0.0 }
 0x121   : > { %v877_v30 = vpop.permute.xlu2 %876 }
 0x122   : > { %1075 = vrot.lane.b32.xlu1 %v3303_v51, %s2781_s30  ;;  %958 = vst.msk [vmem:[#allocation3 + $0x78] sm:$0xff] %vm942_vm3, %v877_v30  ;;  %v3558_v30 = vld [vmem:[#allocation2 + $0x69] sm:$0xff] }
 0x123   : > { %1085 = vrot.lane.b32.xlu0 %v3375_v6, %s2781_s30  ;;  %v435_v6 = vsel %vm371_vm5, %v339_v13, %v403_v40  ;;  %v3580_v40 = vld [vmem:[#allocation2 + $0x99] sm:$0xff] }
 0x124   : > { %v863_v47 = vpop.permute.xlu1 %862  ;;  %524 = vst.msk [vmem:[#allocation2 + $0x189] sm:$0xff] %vm436_vm0, %v435_v6  ;;  %v3584_v6 = vld [vmem:[#allocation2 + $0xb1] sm:$0xff] }
 0x125   : > { %951 = vst.msk [vmem:[#allocation3 + $0x40] sm:$0xff] %vm942_vm3, %v863_v47  ;;  %v873_v8 = vpop.permute.xlu0 %872  ;;  %v3567_v47 = vld [vmem:[#allocation2 + $0x79] sm:$0xff] }
 0x126   : > { %956 = vst.msk [vmem:[#allocation3 + $0x68] sm:$0xff] %vm942_vm3, %v873_v8  ;;  %v3571_v8 = vld [vmem:[#allocation2 + $0x91] sm:$0xff] }
 0x127   : > { %1077 = vrot.lane.b32.xlu2 %v3305_v2, %s2781_s30 }
 0x129   : > { %v883_v17 = vpop.permute.xlu2 %882 }
 0x12a   : > { %1081 = vrot.lane.b32.xlu1 %v3330_v26, %s2781_s30  ;;  %961 = vst.msk [vmem:[#allocation3 + $0x90] sm:$0xff] %vm942_vm3, %v883_v17 }
 0x12b   : > { %1091 = vrot.lane.b32.xlu0 %v3402_v56, %s2781_s30  ;;  %v1006_v36 = vld [vmem:[#allocation2 + $0x188] sm:$0xff] }
 0x12c   : > { %v869_v41 = vpop.permute.xlu1 %868 }
 0x12d   : > { %954 = vst.msk [vmem:[#allocation3 + $0x58] sm:$0xff] %vm942_vm3, %v869_v41  ;;  %v879_v14 = vpop.permute.xlu0 %878 }
 0x12e   : > { %959 = vst.msk [vmem:[#allocation3 + $0x80] sm:$0xff] %vm942_vm3, %v879_v14  ;;  %v3593_v14 = vld [vmem:[#allocation2 + $0xc1] sm:$0xff] }
 0x12f   : > { %1083 = vrot.lane.b32.xlu2 %v3332_v34, %s2781_s30 }
 0x131   : > { %v889_v2 = vpop.permute.xlu2 %888 }
 0x132   : > { %1087 = vrot.lane.b32.xlu1 %v3357_v18, %s2781_s30  ;;  %964 = vst.msk [vmem:[#allocation3 + $0xa8] sm:$0xff] %vm942_vm3, %v889_v2 }
 0x133   : > { %1097 = vrot.lane.b32.xlu0 %v3419_v38, %s2781_s30 }
 0x134   : > { %v875_v26 = vpop.permute.xlu1 %874 }
 0x135   : > { %957 = vst.msk [vmem:[#allocation3 + $0x70] sm:$0xff] %vm942_vm3, %v875_v26  ;;  %v885_v56 = vpop.permute.xlu0 %884  ;;  %v3597_v26 = vld [vmem:[#allocation2 + $0xd9] sm:$0xff] }
 0x136   : > { %962 = vst.msk [vmem:[#allocation3 + $0x98] sm:$0xff] %vm942_vm3, %v885_v56 }
 0x137   : > { %1089 = vrot.lane.b32.xlu2 %v3359_v58, %s2781_s30 }
 0x139   : > { %v895_v34 = vpop.permute.xlu2 %894 }
 0x13a   : > { %1093 = vrot.lane.b32.xlu1 %v3384_v60, %s2781_s30  ;;  %967 = vst.msk [vmem:[#allocation3 + $0xc0] sm:$0xff] %vm942_vm3, %v895_v34 }
 0x13b   : > { %1232 = vrot.lane.b32.xlu0 %v1168_v22, %s2782_s10  ;;  %v3606_v22 = vld [vmem:[#allocation2 + $0xe1] sm:$0xff] }
 0x13c   : > { %v881_v38 = vpop.permute.xlu1 %880 }
 0x13d   : > { %960 = vst.msk [vmem:[#allocation3 + $0x88] sm:$0xff] %vm942_vm3, %v881_v38  ;;  %v891_v18 = vpop.permute.xlu0 %890  ;;  %v3610_v38 = vld [vmem:[#allocation2 + $0xf9] sm:$0xff] }
 0x13e   : > { %965 = vst.msk [vmem:[#allocation3 + $0xb0] sm:$0xff] %vm942_vm3, %v891_v18 }
 0x13f   : > { %1095 = vrot.lane.b32.xlu2 %v3386_v32, %s2781_s30 }
 0x141   : > { %v901_v58 = vpop.permute.xlu2 %900 }
 0x142   : > { %1099 = vrot.lane.b32.xlu1 %v1005_v46, %s2781_s30  ;;  %970 = vst.msk [vmem:[#allocation3 + $0xd8] sm:$0xff] %vm942_vm3, %v901_v58  ;;  %v3619_v46 = vld [vmem:[#allocation2 + $0x109] sm:$0xff] }
 0x143   : > { %1238 = vrot.lane.b32.xlu0 %v3048_v45, %s2782_s10  ;;  %v3541_v45 = vld [vmem:[#allocation2 + $0x31] sm:$0xff] }
 0x144   : > { %v887_v60 = vpop.permute.xlu1 %886 }
 0x145   : > { %963 = vst.msk [vmem:[#allocation3 + $0xa0] sm:$0xff] %vm942_vm3, %v887_v60  ;;  %v897_v61 = vpop.permute.xlu0 %896 }
 0x146   : > { %968 = vst.msk [vmem:[#allocation3 + $0xc8] sm:$0xff] %vm942_vm3, %v897_v61  ;;  %v1198_v61 = vld [vmem:[#allocation2 + $0x181] sm:$0xff] }
 0x147   : > { %1101 = vrot.lane.b32.xlu2 %v1006_v36, %s2781_s30 }
 0x149   : > { %v907_v29 = vpop.permute.xlu2 %906 }
 0x14a   : > { %1234 = vrot.lane.b32.xlu1 %v1169_v50, %s2782_s10  ;;  %973 = vst.msk [vmem:[#allocation3 + $0xf0] sm:$0xff] %vm942_vm3, %v907_v29 }
 0x14b   : > { %1244 = vrot.lane.b32.xlu0 %v3066_v63, %s2782_s10 }
 0x14c   : > { %v893_v32 = vpop.permute.xlu1 %892 }
 0x14d   : > { %966 = vst.msk [vmem:[#allocation3 + $0xb8] sm:$0xff] %vm942_vm3, %v893_v32  ;;  %v903_v62 = vpop.permute.xlu0 %902  ;;  %v1199_v32 = vld [vmem:[#allocation2 + $0x189] sm:$0xff] }
 0x14e   : > { %971 = vst.msk [vmem:[#allocation3 + $0xe0] sm:$0xff] %vm942_vm3, %v903_v62 }
 0x14f   : > { %1236 = vrot.lane.b32.xlu2 %v3541_v45, %s2782_s10 }
 0x151   : > { %v1042_v20 = vpop.permute.xlu2 %1041 }
 0x152   : > { %1240 = vrot.lane.b32.xlu1 %v3545_v4, %s2782_s10  ;;  %1137 = vst.msk [vmem:[#allocation3 + $0x8] sm:$0xff] %vm1135_vm6, %v1042_v20 }
 0x153   : > { %1250 = vrot.lane.b32.xlu0 %v3084_v19, %s2782_s10 }
 0x154   : > { %v899_v63 = vpop.permute.xlu1 %898 }
 0x155   : > { %969 = vst.msk [vmem:[#allocation3 + $0xd0] sm:$0xff] %vm942_vm3, %v899_v63  ;;  %v909_v7 = vpop.permute.xlu0 %908  ;;  %v4296_v63 = vld [vmem:[#allocation5_spill] sm:$0xff] }
 0x156   : > { %974 = vst.msk [vmem:[#allocation3 + $0xf8] sm:$0xff] %vm942_vm3, %v909_v7 }
 0x157   : > { %1242 = vrot.lane.b32.xlu2 %v3554_v11, %s2782_s10 }
 0x159   : > { %v1048_v39 = vpop.permute.xlu2 %1047 }
 0x15a   : > { %1246 = vrot.lane.b32.xlu1 %v3558_v30, %s2782_s10  ;;  %1140 = vst.msk [vmem:[#allocation3 + $0x20] sm:$0xff] %vm1135_vm6, %v1048_v39 }
 0x15b   : > { %1256 = vrot.lane.b32.xlu0 %v3099_v33, %s2782_s10 }
 0x15c   : > { %v905_v19 = vpop.permute.xlu1 %904 }
 0x15d   : > { %972 = vst.msk [vmem:[#allocation3 + $0xe8] sm:$0xff] %vm942_vm3, %v905_v19  ;;  %v1044_v27 = vpop.permute.xlu0 %1043 }
 0x15e   : > { %1138 = vst.msk [vmem:[#allocation3 + $0x10] sm:$0xff] %vm1135_vm6, %v1044_v27  ;;  %v4299_v27 = vld [vmem:[#allocation7_spill] sm:$0xff] }
 0x15f   : > { %1248 = vrot.lane.b32.xlu2 %v3567_v47, %s2782_s10 }
 0x161   : > { %v1054_v13 = vpop.permute.xlu2 %1053 }
 0x162   : > { %1252 = vrot.lane.b32.xlu1 %v3571_v8, %s2782_s10  ;;  %1143 = vst.msk [vmem:[#allocation3 + $0x38] sm:$0xff] %vm1135_vm6, %v1054_v13 }
 0x163   : > { %1262 = vrot.lane.b32.xlu0 %v3111_v44, %s2782_s10 }
 0x164   : > { %v1040_v33 = vpop.permute.xlu1 %1039 }
 0x165   : > { %1136 = vst.msk [vmem:[#allocation3] sm:$0xff] %vm1135_vm6, %v1040_v33  ;;  %v1050_v17 = vpop.permute.xlu0 %1049  ;;  %v4300_v33 = vld [vmem:[#allocation6_spill] sm:$0xff] }
 0x166   : > { %1141 = vst.msk [vmem:[#allocation3 + $0x28] sm:$0xff] %vm1135_vm6, %v1050_v17  ;;  %v4301_v17 = vld [vmem:[#allocation15_spill] sm:$0xff] }
 0x167   : > { %1254 = vrot.lane.b32.xlu2 %v3580_v40, %s2782_s10 }
 0x169   : > { %v1060_v41 = vpop.permute.xlu2 %1059 }
 0x16a   : > { %1258 = vrot.lane.b32.xlu1 %v3584_v6, %s2782_s10  ;;  %1146 = vst.msk [vmem:[#allocation3 + $0x50] sm:$0xff] %vm1135_vm6, %v1060_v41 }
 0x16b   : > { %1268 = vrot.lane.b32.xlu0 %v3123_v52, %s2782_s10 }
 0x16c   : > { %v1046_v44 = vpop.permute.xlu1 %1045 }
 0x16d   : > { %1139 = vst.msk [vmem:[#allocation3 + $0x18] sm:$0xff] %vm1135_vm6, %v1046_v44  ;;  %v1056_v2 = vpop.permute.xlu0 %1055 }
 0x16e   : > { %1144 = vst.msk [vmem:[#allocation3 + $0x40] sm:$0xff] %vm1135_vm6, %v1056_v2  ;;  %v4302_v2 = vld [vmem:[#allocation10_spill] sm:$0xff] }
 0x16f   : > { %1260 = vrot.lane.b32.xlu2 %v3593_v14, %s2782_s10 }
 0x171   : > { %v1066_v56 = vpop.permute.xlu2 %1065 }
 0x172   : > { %1264 = vrot.lane.b32.xlu1 %v3597_v26, %s2782_s10  ;;  %1149 = vst.msk [vmem:[#allocation3 + $0x68] sm:$0xff] %vm1135_vm6, %v1066_v56 }
 0x173   : > { %1274 = vrot.lane.b32.xlu0 %v3132_v53, %s2782_s10 }
 0x174   : > { %v1052_v52 = vpop.permute.xlu1 %1051 }
 0x175   : > { %1142 = vst.msk [vmem:[#allocation3 + $0x30] sm:$0xff] %vm1135_vm6, %v1052_v52  ;;  %v1062_v34 = vpop.permute.xlu0 %1061  ;;  %v4303_v52 = vld [vmem:[#allocation8_spill] sm:$0xff] }
 0x176   : > { %1147 = vst.msk [vmem:[#allocation3 + $0x58] sm:$0xff] %vm1135_vm6, %v1062_v34 }
 0x177   : > { %1266 = vrot.lane.b32.xlu2 %v3606_v22, %s2782_s10 }
 0x179   : > { %v1072_v18 = vpop.permute.xlu2 %1071 }
 0x17a   : > { %1270 = vrot.lane.b32.xlu1 %v3610_v38, %s2782_s10  ;;  %1152 = vst.msk [vmem:[#allocation3 + $0x80] sm:$0xff] %vm1135_vm6, %v1072_v18 }
 0x17b   : > { %1280 = vrot.lane.b32.xlu0 %v3144_v57, %s2782_s10 }
 0x17c   : > { %v1058_v53 = vpop.permute.xlu1 %1057 }
 0x17d   : > { %1145 = vst.msk [vmem:[#allocation3 + $0x48] sm:$0xff] %vm1135_vm6, %v1058_v53  ;;  %v1068_v58 = vpop.permute.xlu0 %1067  ;;  %v4304_v53 = vld [vmem:[#allocation13_spill] sm:$0xff] }
 0x17e   : > { %1150 = vst.msk [vmem:[#allocation3 + $0x70] sm:$0xff] %vm1135_vm6, %v1068_v58 }
 0x17f   : > { %1272 = vrot.lane.b32.xlu2 %v3619_v46, %s2782_s10 }
 0x181   : > { %v1078_v60 = vpop.permute.xlu2 %1077 }
 0x182   : > { %1276 = vrot.lane.b32.xlu1 %v3117_v49, %s2782_s10  ;;  %1155 = vst.msk [vmem:[#allocation3 + $0x98] sm:$0xff] %vm1135_vm6, %v1078_v60  ;;  %v4305_v60 = vld [vmem:[#allocation11_spill] sm:$0xff] }
 0x183   : > { %1286 = vrot.lane.b32.xlu0 %v3157_v0, %s2782_s10 }
 0x184   : > { %v1064_v57 = vpop.permute.xlu1 %1063 }
 0x185   : > { %1148 = vst.msk [vmem:[#allocation3 + $0x60] sm:$0xff] %vm1135_vm6, %v1064_v57  ;;  %v1074_v36 = vpop.permute.xlu0 %1073 }
 0x186   : > { %1153 = vst.msk [vmem:[#allocation3 + $0x88] sm:$0xff] %vm1135_vm6, %v1074_v36  ;;  %v4306_v36 = vld [vmem:[#allocation16_spill] sm:$0xff] }
 0x187   : > { %1278 = vrot.lane.b32.xlu2 %v3134_v54, %s2782_s10 }
 0x189   : > { %v1084_v50 = vpop.permute.xlu2 %1083 }
 0x18a   : > { %1282 = vrot.lane.b32.xlu1 %v3127_v5, %s2782_s10  ;;  %1158 = vst.msk [vmem:[#allocation3 + $0xb0] sm:$0xff] %vm1135_vm6, %v1084_v50  ;;  %v4307_v50 = vld [vmem:[#allocation14_spill] sm:$0xff] }
 0x18b   : > { %1292 = vrot.lane.b32.xlu0 %v1198_v61, %s2782_s10 }
 0x18c   : > { %v1070_v49 = vpop.permute.xlu1 %1069 }
 0x18d   : > { %1151 = vst.msk [vmem:[#allocation3 + $0x78] sm:$0xff] %vm1135_vm6, %v1070_v49  ;;  %v1080_v0 = vpop.permute.xlu0 %1079 }
 0x18e   : > { %1156 = vst.msk [vmem:[#allocation3 + $0xa0] sm:$0xff] %vm1135_vm6, %v1080_v0  ;;  %v4308_v0 = vld [vmem:[#allocation18_spill] sm:$0xff] }
 0x18f   : > { %1284 = vrot.lane.b32.xlu2 %v3148_v59, %s2782_s10 }
 0x191   : > { %v1090_v29 = vpop.permute.xlu2 %1089 }
 0x192   : > { %1288 = vrot.lane.b32.xlu1 %v3138_v55, %s2782_s10  ;;  %1161 = vst.msk [vmem:[#allocation3 + $0xc8] sm:$0xff] %vm1135_vm6, %v1090_v29  ;;  %v1749_v29 = vld [vmem:[#allocation2 + $0x39] sm:$0xff] }
 0x193   : > { %1427 = vrot.lane.b32.xlu0 %v3195_v12, %s2783_s11 }
 0x194   : > { %v1076_v5 = vpop.permute.xlu1 %1075 }
 0x195   : > { %1154 = vst.msk [vmem:[#allocation3 + $0x90] sm:$0xff] %vm1135_vm6, %v1076_v5  ;;  %v1086_v54 = vpop.permute.xlu0 %1085 }
 0x196   : > { %1159 = vst.msk [vmem:[#allocation3 + $0xb8] sm:$0xff] %vm1135_vm6, %v1086_v54  ;;  %v4309_v54 = vld [vmem:[#allocation17_spill] sm:$0xff] }
 0x197   : > { %1290 = vrot.lane.b32.xlu2 %v3162_v1, %s2782_s10 }
 0x199   : > { %v1096_v59 = vpop.permute.xlu2 %1095 }
 0x19a   : > { %1294 = vrot.lane.b32.xlu1 %v1199_v32, %s2782_s10  ;;  %1164 = vst.msk [vmem:[#allocation3 + $0xe0] sm:$0xff] %vm1135_vm6, %v1096_v59 }
 0x19b   : > { %1433 = vrot.lane.b32.xlu0 %v3221_v21, %s2783_s11 }
 0x19c   : > { %v1082_v55 = vpop.permute.xlu1 %1081 }
 0x19d   : > { %1157 = vst.msk [vmem:[#allocation3 + $0xa8] sm:$0xff] %vm1135_vm6, %v1082_v55  ;;  %v1092_v12 = vpop.permute.xlu0 %1091  ;;  %v1941_v55 = vld [vmem:[#allocation2 + $0x32] sm:$0xff] }
 0x19e   : > { %1162 = vst.msk [vmem:[#allocation3 + $0xd0] sm:$0xff] %vm1135_vm6, %v1092_v12 }
 0x19f   : > { %1425 = vrot.lane.b32.xlu2 %v3182_v9, %s2783_s11 }
 0x1a1   : > { %v1102_v62 = vpop.permute.xlu2 %1101 }
 0x1a2   : > { %1429 = vrot.lane.b32.xlu1 %v3166_v3, %s2783_s11  ;;  %1167 = vst.msk [vmem:[#allocation3 + $0xf8] sm:$0xff] %vm1135_vm6, %v1102_v62 }
 0x1a3   : > { %1439 = vrot.lane.b32.xlu0 %v3248_v28, %s2783_s11 }
 0x1a4   : > { %v1088_v1 = vpop.permute.xlu1 %1087 }
 0x1a5   : > { %1160 = vst.msk [vmem:[#allocation3 + $0xc0] sm:$0xff] %vm1135_vm6, %v1088_v1  ;;  %v1098_v21 = vpop.permute.xlu0 %1097  ;;  %v1556_v1 = vld [vmem:[#allocation2 + $0x38] sm:$0xff] }
 0x1a6   : > { %1165 = vst.msk [vmem:[#allocation3 + $0xe8] sm:$0xff] %vm1135_vm6, %v1098_v21 }
 0x1a7   : > { %1431 = vrot.lane.b32.xlu2 %v3205_v15, %s2783_s11 }
 0x1a9   : > { %v1237_v9 = vpop.permute.xlu2 %1236 }
 0x1aa   : > { %1435 = vrot.lane.b32.xlu1 %v3187_v10, %s2783_s11  ;;  %1331 = vst.msk [vmem:[#allocation3 + $0x10] sm:$0xff] %vm1328_vm7, %v1237_v9  ;;  %v1942_v9 = vld [vmem:[#allocation2 + $0x3a] sm:$0xff] }
 0x1ab   : > { %1445 = vrot.lane.b32.xlu0 %v3273_v37, %s2783_s11 }
 0x1ac   : > { %v1094_v3 = vpop.permute.xlu1 %1093 }
 0x1ad   : > { %1163 = vst.msk [vmem:[#allocation3 + $0xd8] sm:$0xff] %vm1135_vm6, %v1094_v3  ;;  %v1233_v28 = vpop.permute.xlu0 %1232  ;;  %v1943_v3 = vld [vmem:[#allocation2 + $0x4a] sm:$0xff] }
 0x1ae   : > { %1329 = vst.msk [vmem:[#allocation3] sm:$0xff] %vm1328_vm7, %v1233_v28 }
 0x1af   : > { %1437 = vrot.lane.b32.xlu2 %v3231_v24, %s2783_s11 }
 0x1b1   : > { %v1243_v15 = vpop.permute.xlu2 %1242 }
 0x1b2   : > { %1441 = vrot.lane.b32.xlu1 %v3211_v16, %s2783_s11  ;;  %1334 = vst.msk [vmem:[#allocation3 + $0x28] sm:$0xff] %vm1328_vm7, %v1243_v15  ;;  %v4295_v16 = vld [vmem:[#allocation9_spill] sm:$0xff]  ;;  %v1557_v15 = vld [vmem:[#allocation2 + $0x48] sm:$0xff] }
 0x1b3   : > { %1451 = vrot.lane.b32.xlu0 %v3300_v48, %s2783_s11 }
 0x1b4   : > { %v1100_v10 = vpop.permute.xlu1 %1099 }
 0x1b5   : > { %1166 = vst.msk [vmem:[#allocation3 + $0xf0] sm:$0xff] %vm1135_vm6, %v1100_v10  ;;  %v1239_v37 = vpop.permute.xlu0 %1238 }
 0x1b6   : > { %1332 = vst.msk [vmem:[#allocation3 + $0x18] sm:$0xff] %vm1328_vm7, %v1239_v37 }
 0x1b7   : > { %1443 = vrot.lane.b32.xlu2 %v3256_v31, %s2783_s11  ;;  %v4297_v31 = vld [vmem:[#allocation4_spill] sm:$0xff] }
 0x1b9   : > { %v1249_v20 = vpop.permute.xlu2 %1248 }
 0x1ba   : > { %1447 = vrot.lane.b32.xlu1 %v3237_v25, %s2783_s11  ;;  %1337 = vst.msk [vmem:[#allocation3 + $0x40] sm:$0xff] %vm1328_vm7, %v1249_v20  ;;  %v4298_v25 = vld [vmem:[#allocation12_spill] sm:$0xff] }
 0x1bb   : > { %1457 = vrot.lane.b32.xlu0 %v4295_v16, %s2783_s11 }
 0x1bc   : > { %v1235_v24 = vpop.permute.xlu1 %1234 }
 0x1bd   : > { %1330 = vst.msk [vmem:[#allocation3 + $0x8] sm:$0xff] %vm1328_vm7, %v1235_v24  ;;  %v1245_v48 = vpop.permute.xlu0 %1244  ;;  %v1949_v24 = vld [vmem:[#allocation2 + $0x92] sm:$0xff] }
 0x1be   : > { %1335 = vst.msk [vmem:[#allocation3 + $0x30] sm:$0xff] %vm1328_vm7, %v1245_v48 }
 0x1bf   : > { %1449 = vrot.lane.b32.xlu2 %v4296_v63, %s2783_s11 }
 0x1c1   : > { %v1255_v7 = vpop.permute.xlu2 %1254 }
 0x1c2   : > { %1453 = vrot.lane.b32.xlu1 %v4297_v31, %s2783_s11  ;;  %1340 = vst.msk [vmem:[#allocation3 + $0x58] sm:$0xff] %vm1328_vm7, %v1255_v7  ;;  %v1764_v7 = vld [vmem:[#allocation2 + $0xf1] sm:$0xff] }
 0x1c3   : > { %1463 = vrot.lane.b32.xlu0 %v4298_v25, %s2783_s11  ;;  %v1944_v25 = vld [vmem:[#allocation2 + $0x52] sm:$0xff] }
 0x1c4   : > { %v1241_v39 = vpop.permute.xlu1 %1240 }
 0x1c5   : > { %1333 = vst.msk [vmem:[#allocation3 + $0x20] sm:$0xff] %vm1328_vm7, %v1241_v39  ;;  %v1251_v19 = vpop.permute.xlu0 %1250  ;;  %v1565_v39 = vld [vmem:[#allocation2 + $0xa8] sm:$0xff] }
 0x1c6   : > { %1338 = vst.msk [vmem:[#allocation3 + $0x48] sm:$0xff] %vm1328_vm7, %v1251_v19 }
 0x1c7   : > { %1455 = vrot.lane.b32.xlu2 %v4299_v27, %s2783_s11  ;;  %v1950_v27 = vld [vmem:[#allocation2 + $0x9a] sm:$0xff] }
 0x1c9   : > { %v1261_v13 = vpop.permute.xlu2 %1260 }
 0x1ca   : > { %1459 = vrot.lane.b32.xlu1 %v4300_v33, %s2783_s11  ;;  %1343 = vst.msk [vmem:[#allocation3 + $0x70] sm:$0xff] %vm1328_vm7, %v1261_v13  ;;  %v1957_v33 = vld [vmem:[#allocation2 + $0xf2] sm:$0xff] }
 0x1cb   : > { %1469 = vrot.lane.b32.xlu0 %v4301_v17, %s2783_s11  ;;  %v1572_v17 = vld [vmem:[#allocation2 + $0xf8] sm:$0xff] }
 0x1cc   : > { %v1247_v41 = vpop.permute.xlu1 %1246 }
 0x1cd   : > { %1336 = vst.msk [vmem:[#allocation3 + $0x38] sm:$0xff] %vm1328_vm7, %v1247_v41  ;;  %v1257_v44 = vpop.permute.xlu0 %1256 }
 0x1ce   : > { %1341 = vst.msk [vmem:[#allocation3 + $0x60] sm:$0xff] %vm1328_vm7, %v1257_v44  ;;  %v1559_v44 = vld [vmem:[#allocation2 + $0x60] sm:$0xff] }
 0x1cf   : > { %1461 = vrot.lane.b32.xlu2 %v4302_v2, %s2783_s11 }
 0x1d1   : > { %v1267_v56 = vpop.permute.xlu2 %1266 }
 0x1d2   : > { %1465 = vrot.lane.b32.xlu1 %v4303_v52, %s2783_s11  ;;  %1346 = vst.msk [vmem:[#allocation3 + $0x88] sm:$0xff] %vm1328_vm7, %v1267_v56  ;;  %v1752_v56 = vld [vmem:[#allocation2 + $0x61] sm:$0xff] }
 0x1d3   : > { %1475 = vrot.lane.b32.xlu0 %v3408_v42, %s2783_s11 }
 0x1d4   : > { %v1253_v34 = vpop.permute.xlu1 %1252 }
 0x1d5   : > { %1339 = vst.msk [vmem:[#allocation3 + $0x50] sm:$0xff] %vm1328_vm7, %v1253_v34  ;;  %v1263_v18 = vpop.permute.xlu0 %1262 }
 0x1d6   : > { %1344 = vst.msk [vmem:[#allocation3 + $0x78] sm:$0xff] %vm1328_vm7, %v1263_v18  ;;  %v1758_v18 = vld [vmem:[#allocation2 + $0xa9] sm:$0xff] }
 0x1d7   : > { %1467 = vrot.lane.b32.xlu2 %v4304_v53, %s2783_s11 }
 0x1d9   : > { %v1273_v58 = vpop.permute.xlu2 %1272 }
 0x1da   : > { %1471 = vrot.lane.b32.xlu1 %v4305_v60, %s2783_s11  ;;  %1349 = vst.msk [vmem:[#allocation3 + $0xa0] sm:$0xff] %vm1328_vm7, %v1273_v58  ;;  %v1945_v58 = vld [vmem:[#allocation2 + $0x62] sm:$0xff]  ;;  %v1566_v60 = vld [vmem:[#allocation2 + $0xb0] sm:$0xff] }
 0x1db   : > { %1481 = vrot.lane.b32.xlu0 %v3425_v43, %s2783_s11 }
 0x1dc   : > { %v1259_v57 = vpop.permute.xlu1 %1258 }
 0x1dd   : > { %1342 = vst.msk [vmem:[#allocation3 + $0x68] sm:$0xff] %vm1328_vm7, %v1259_v57  ;;  %v1269_v42 = vpop.permute.xlu0 %1268 }
 0x1de   : > { %1347 = vst.msk [vmem:[#allocation3 + $0x90] sm:$0xff] %vm1328_vm7, %v1269_v42 }
 0x1df   : > { %1473 = vrot.lane.b32.xlu2 %v4306_v36, %s2783_s11 }
 0x1e1   : > { %v1279_v61 = vpop.permute.xlu2 %1278 }
 0x1e2   : > { %1477 = vrot.lane.b32.xlu1 %v4307_v50, %s2783_s11  ;;  %1352 = vst.msk [vmem:[#allocation3 + $0xb8] sm:$0xff] %vm1328_vm7, %v1279_v61  ;;  %v1958_v61 = vld [vmem:[#allocation2 + $0xfa] sm:$0xff]  ;;  %v1573_v50 = vld [vmem:[#allocation2 + $0x108] sm:$0xff] }
 0x1e3   : > { %1812 = vrot.lane.b32.xlu0 %v3541_v45, %s2784_s12  ;;  %v1555_v45 = vld [vmem:[#allocation2 + $0x30] sm:$0xff] }
 0x1e4   : > { %v1265_v43 = vpop.permute.xlu1 %1264 }
 0x1e5   : > { %1345 = vst.msk [vmem:[#allocation3 + $0x80] sm:$0xff] %vm1328_vm7, %v1265_v43  ;;  %v1275_v49 = vpop.permute.xlu0 %1274 }
 0x1e6   : > { %1350 = vst.msk [vmem:[#allocation3 + $0xa8] sm:$0xff] %vm1328_vm7, %v1275_v49  ;;  %v2174_v49 = vld [vmem:[%s4260_s1 + $0x40] sm:$0xff] }
 0x1e7   : > { %1479 = vrot.lane.b32.xlu2 %v4308_v0, %s2783_s11  ;;  %2279 = vmatpush.msra.mxu0 %v2174_v49 }
 0x1e8   : > { %2722 = vmatpush.msra.mxu1 %v2174_v49  ;;  %2723 = vmatpush.msra.mxu2 %v2174_v49 }
 0x1e9   : > { %v1285_v5 = vpop.permute.xlu2 %1284  ;;  %2724 = vmatpush.msra.mxu3 %v2174_v49 }
 0x1ea   : > { %1483 = vrot.lane.b32.xlu1 %v4309_v54, %s2783_s11  ;;  %1355 = vst.msk [vmem:[#allocation3 + $0xd0] sm:$0xff] %vm1328_vm7, %v1285_v5  ;;  %v2173_v54 = vld [vmem:[%s4260_s1 + $0x38] sm:$0xff] }
 0x1eb   : > { %1814 = vrot.lane.b32.xlu0 %v1749_v29, %s2784_s12  ;;  %v1560_v29 = vld [vmem:[#allocation2 + $0x68] sm:$0xff]  ;;  %2280 = vmatpush.msra.mxu0 %v2173_v54 }
 0x1ec   : > { %v1271_v32 = vpop.permute.xlu1 %1270  ;;  %2725 = vmatpush.msra.mxu1 %v2173_v54  ;;  %2726 = vmatpush.msra.mxu2 %v2173_v54 }
 0x1ed   : > { %1348 = vst.msk [vmem:[#allocation3 + $0x98] sm:$0xff] %vm1328_vm7, %v1271_v32  ;;  %v1281_v59 = vpop.permute.xlu0 %1280  ;;  %v2172_v32 = vld [vmem:[%s4260_s1 + $0x30] sm:$0xff]  ;;  %2727 = vmatpush.msra.mxu3 %v2173_v54  ;;  %v1961_v54 = vld [vmem:[#allocation2 + $0x122] sm:$0xff] }
 0x1ee   : > { %1353 = vst.msk [vmem:[#allocation3 + $0xc0] sm:$0xff] %vm1328_vm7, %v1281_v59  ;;  %v1952_v59 = vld [vmem:[#allocation2 + $0xb2] sm:$0xff]  ;;  %2281 = vmatpush.msra.mxu0 %v2172_v32  ;;  %2728 = vmatpush.msra.mxu1 %v2172_v32 }
 0x1ef   : > { %1619 = vrot.lane.b32.xlu2 %v1555_v45, %s2785_s13  ;;  %v2171_v45 = vld [vmem:[%s4260_s1 + $0x28] sm:$0xff]  ;;  %2729 = vmatpush.msra.mxu2 %v2172_v32 }
 0x1f0   : > { %2282 = vmatpush.msra.mxu0 %v2171_v45  ;;  %2731 = vmatpush.msra.mxu1 %v2171_v45 }
 0x1f1   : > { %v1291_v12 = vpop.permute.xlu2 %1290  ;;  %2732 = vmatpush.msra.mxu2 %v2171_v45  ;;  %2730 = vmatpush.msra.mxu3 %v2172_v32 }
 0x1f2   : > { %2005 = vrot.lane.b32.xlu1 %v1941_v55, %s2786_s14  ;;  %1358 = vst.msk [vmem:[#allocation3 + $0xe8] sm:$0xff] %vm1328_vm7, %v1291_v12  ;;  %v2170_v12 = vld [vmem:[%s4260_s1 + $0x20] sm:$0xff] }
 0x1f3   : > { %1635 = vrot.lane.b32.xlu0 %v3227_v23, %s2785_s13  ;;  %2283 = vmatpush.msra.mxu0 %v2170_v12 }
 0x1f4   : > { %v1277_v62 = vpop.permute.xlu1 %1276  ;;  %2734 = vmatpush.msra.mxu1 %v2170_v12  ;;  %2735 = vmatpush.msra.mxu2 %v2170_v12 }
 0x1f5   : > { %1351 = vst.msk [vmem:[#allocation3 + $0xb0] sm:$0xff] %vm1328_vm7, %v1277_v62  ;;  %v1287_v21 = vpop.permute.xlu0 %1286  ;;  %2733 = vmatpush.msra.mxu3 %v2171_v45 }
 0x1f6   : > { %1356 = vst.msk [vmem:[#allocation3 + $0xd8] sm:$0xff] %vm1328_vm7, %v1287_v21  ;;  %v2168_v21 = vld [vmem:[%s4260_s1 + $0x10] sm:$0xff] }
 0x1f7   : > { %1621 = vrot.lane.b32.xlu2 %v1556_v1, %s2785_s13  ;;  %2736 = vmatpush.msra.mxu3 %v2170_v12 }
 0x1f9   : > { %v1426_v28 = vpop.permute.xlu2 %1425 }
 0x1fa   : > { %2007 = vrot.lane.b32.xlu1 %v1942_v9, %s2786_s14  ;;  %1522 = vst.msk [vmem:[#allocation3] sm:$0xff] %vm1521_vm8, %v1426_v28  ;;  %v1579_v9 = vld [vmem:[#allocation2 + $0x150] sm:$0xff] }
 0x1fb   : > { %2009 = vrot.lane.b32.xlu0 %v1943_v3, %s2786_s14  ;;  %v2167_v3 = vld [vmem:[%s4260_s1 + $0x8] sm:$0xff] }
 0x1fc   : > { %v1283_v23 = vpop.permute.xlu1 %1282  ;;  %v1959_v28 = vld [vmem:[#allocation2 + $0x10a] sm:$0xff] }
 0x1fd   : > { %1354 = vst.msk [vmem:[#allocation3 + $0xc8] sm:$0xff] %vm1328_vm7, %v1283_v23  ;;  %v1293_v10 = vpop.permute.xlu0 %1292 }
 0x1fe   : > { %1359 = vst.msk [vmem:[#allocation3 + $0xf0] sm:$0xff] %vm1328_vm7, %v1293_v10  ;;  %v1946_v10 = vld [vmem:[#allocation2 + $0x6a] sm:$0xff] }
 0x1ff   : > { %1623 = vrot.lane.b32.xlu2 %v1557_v15, %s2785_s13 }
 0x201   : > { %v1432_v37 = vpop.permute.xlu2 %1431 }
 0x202   : > { %1816 = vrot.lane.b32.xlu1 %v3545_v4, %s2784_s12  ;;  %1525 = vst.msk [vmem:[#allocation3 + $0x18] sm:$0xff] %vm1521_vm8, %v1432_v37 }
 0x203   : > { %1637 = vrot.lane.b32.xlu0 %v3267_v35, %s2785_s13  ;;  %v1558_v35 = vld [vmem:[#allocation2 + $0x50] sm:$0xff] }
 0x204   : > { %v1289_v20 = vpop.permute.xlu1 %1288 }
 0x205   : > { %1357 = vst.msk [vmem:[#allocation3 + $0xe0] sm:$0xff] %vm1328_vm7, %v1289_v20  ;;  %v1428_v16 = vpop.permute.xlu0 %1427  ;;  %v1567_v20 = vld [vmem:[#allocation2 + $0xc0] sm:$0xff] }
 0x206   : > { %1523 = vst.msk [vmem:[#allocation3 + $0x8] sm:$0xff] %vm1521_vm8, %v1428_v16 }
 0x207   : > { %1828 = vrot.lane.b32.xlu2 %v3571_v8, %s2784_s12 }
 0x209   : > { %v1438_v48 = vpop.permute.xlu2 %1437 }
 0x20a   : > { %2021 = vrot.lane.b32.xlu1 %v1949_v24, %s2786_s14  ;;  %1528 = vst.msk [vmem:[#allocation3 + $0x30] sm:$0xff] %vm1521_vm8, %v1438_v48  ;;  %v1772_v48 = vld [vmem:[#allocation2 + $0x151] sm:$0xff] }
 0x20b   : > { %1651 = vrot.lane.b32.xlu0 %v3303_v51, %s2785_s13 }
 0x20c   : > { %v1295_v4 = vpop.permute.xlu1 %1294 }
 0x20d   : > { %1360 = vst.msk [vmem:[#allocation3 + $0xf8] sm:$0xff] %vm1328_vm7, %v1295_v4  ;;  %v1434_v63 = vpop.permute.xlu0 %1433 }
 0x20e   : > { %1526 = vst.msk [vmem:[#allocation3 + $0x20] sm:$0xff] %vm1521_vm8, %v1434_v63  ;;  %v1574_v63 = vld [vmem:[#allocation2 + $0x110] sm:$0xff] }
 0x20f   : > { %1625 = vrot.lane.b32.xlu2 %v1558_v35, %s2785_s13  ;;  %v1965_v35 = vld [vmem:[#allocation2 + $0x152] sm:$0xff] }
 0x211   : > { %v1444_v31 = vpop.permute.xlu2 %1443 }
 0x212   : > { %1818 = vrot.lane.b32.xlu1 %v3554_v11, %s2784_s12  ;;  %1531 = vst.msk [vmem:[#allocation3 + $0x48] sm:$0xff] %vm1521_vm8, %v1444_v31  ;;  %v1561_v31 = vld [vmem:[#allocation2 + $0x78] sm:$0xff] }
 0x213   : > { %1844 = vrot.lane.b32.xlu0 %v1764_v7, %s2784_s12 }
 0x214   : > { %v1430_v8 = vpop.permute.xlu1 %1429 }
 0x215   : > { %1524 = vst.msk [vmem:[#allocation3 + $0x10] sm:$0xff] %vm1521_vm8, %v1430_v8  ;;  %v1440_v51 = vpop.permute.xlu0 %1439 }
 0x216   : > { %1529 = vst.msk [vmem:[#allocation3 + $0x38] sm:$0xff] %vm1521_vm8, %v1440_v51  ;;  %v1953_v51 = vld [vmem:[#allocation2 + $0xc2] sm:$0xff] }
 0x217   : > { %1830 = vrot.lane.b32.xlu2 %v3580_v40, %s2784_s12 }
 0x219   : > { %v1450_v19 = vpop.permute.xlu2 %1449 }
 0x21a   : > { %2011 = vrot.lane.b32.xlu1 %v1944_v25, %s2786_s14  ;;  %1534 = vst.msk [vmem:[#allocation3 + $0x60] sm:$0xff] %vm1521_vm8, %v1450_v19 }
 0x21b   : > { %1639 = vrot.lane.b32.xlu0 %v1565_v39, %s2785_s13 }
 0x21c   : > { %v1436_v11 = vpop.permute.xlu1 %1435 }
 0x21d   : > { %1527 = vst.msk [vmem:[#allocation3 + $0x28] sm:$0xff] %vm1521_vm8, %v1436_v11  ;;  %v1446_v13 = vpop.permute.xlu0 %1445  ;;  %v1580_v11 = vld [vmem:[#allocation2 + $0x158] sm:$0xff] }
 0x21e   : > { %1532 = vst.msk [vmem:[#allocation3 + $0x50] sm:$0xff] %vm1521_vm8, %v1446_v13 }
 0x21f   : > { %2023 = vrot.lane.b32.xlu2 %v1950_v27, %s2786_s14  ;;  %v1960_v27 = vld [vmem:[#allocation2 + $0x112] sm:$0xff] }
 0x221   : > { %v1456_v40 = vpop.permute.xlu2 %1455 }
 0x222   : > { %2037 = vrot.lane.b32.xlu1 %v1957_v33, %s2786_s14  ;;  %1537 = vst.msk [vmem:[#allocation3 + $0x78] sm:$0xff] %vm1521_vm8, %v1456_v40 }
 0x223   : > { %1653 = vrot.lane.b32.xlu0 %v1572_v17, %s2785_s13  ;;  %v1947_v17 = vld [vmem:[#allocation2 + $0x7a] sm:$0xff] }
 0x224   : > { %v1442_v41 = vpop.permute.xlu1 %1441 }
 0x225   : > { %1530 = vst.msk [vmem:[#allocation3 + $0x40] sm:$0xff] %vm1521_vm8, %v1442_v41  ;;  %v1452_v2 = vpop.permute.xlu0 %1451  ;;  %v1767_v41 = vld [vmem:[#allocation2 + $0x111] sm:$0xff] }
 0x226   : > { %1535 = vst.msk [vmem:[#allocation3 + $0x68] sm:$0xff] %vm1521_vm8, %v1452_v2 }
 0x227   : > { %1627 = vrot.lane.b32.xlu2 %v1559_v44, %s2785_s13 }
 0x229   : > { %v1462_v52 = vpop.permute.xlu2 %1461 }
 0x22a   : > { %1820 = vrot.lane.b32.xlu1 %v1752_v56, %s2784_s12  ;;  %1540 = vst.msk [vmem:[#allocation3 + $0x90] sm:$0xff] %vm1521_vm8, %v1462_v52  ;;  %v1773_v52 = vld [vmem:[#allocation2 + $0x159] sm:$0xff] }
 0x22b   : > { %1846 = vrot.lane.b32.xlu0 %v3610_v38, %s2784_s12  ;;  %v1951_v38 = vld [vmem:[#allocation2 + $0xaa] sm:$0xff] }
 0x22c   : > { %v1448_v34 = vpop.permute.xlu1 %1447 }
 0x22d   : > { %1533 = vst.msk [vmem:[#allocation3 + $0x58] sm:$0xff] %vm1521_vm8, %v1448_v34  ;;  %v1458_v53 = vpop.permute.xlu0 %1457 }
 0x22e   : > { %1538 = vst.msk [vmem:[#allocation3 + $0x80] sm:$0xff] %vm1521_vm8, %v1458_v53  ;;  %v1575_v53 = vld [vmem:[#allocation2 + $0x120] sm:$0xff] }
 0x22f   : > { %1832 = vrot.lane.b32.xlu2 %v1758_v18, %s2784_s12  ;;  %v1966_v18 = vld [vmem:[#allocation2 + $0x15a] sm:$0xff] }
 0x231   : > { %v1468_v57 = vpop.permute.xlu2 %1467 }
 0x232   : > { %2013 = vrot.lane.b32.xlu1 %v1945_v58, %s2786_s14  ;;  %1543 = vst.msk [vmem:[#allocation3 + $0xa8] sm:$0xff] %vm1521_vm8, %v1468_v57  ;;  %v1562_v57 = vld [vmem:[#allocation2 + $0x80] sm:$0xff] }
 0x233   : > { %1641 = vrot.lane.b32.xlu0 %v1566_v60, %s2785_s13 }
 0x234   : > { %v1454_v42 = vpop.permute.xlu1 %1453 }
 0x235   : > { %1536 = vst.msk [vmem:[#allocation3 + $0x70] sm:$0xff] %vm1521_vm8, %v1454_v42  ;;  %v1464_v36 = vpop.permute.xlu0 %1463 }
 0x236   : > { %1541 = vst.msk [vmem:[#allocation3 + $0x98] sm:$0xff] %vm1521_vm8, %v1464_v36  ;;  %v1755_v36 = vld [vmem:[#allocation2 + $0x81] sm:$0xff] }
 0x237   : > { %2025 = vrot.lane.b32.xlu2 %v1951_v38, %s2786_s14 }
 0x239   : > { %v1474_v43 = vpop.permute.xlu2 %1473 }
 0x23a   : > { %2039 = vrot.lane.b32.xlu1 %v1958_v61, %s2786_s14  ;;  %1546 = vst.msk [vmem:[#allocation3 + $0xc0] sm:$0xff] %vm1521_vm8, %v1474_v43  ;;  %v1954_v61 = vld [vmem:[#allocation2 + $0xca] sm:$0xff] }
 0x23b   : > { %1655 = vrot.lane.b32.xlu0 %v1573_v50, %s2785_s13 }
 0x23c   : > { %v1460_v0 = vpop.permute.xlu1 %1459 }
 0x23d   : > { %1539 = vst.msk [vmem:[#allocation3 + $0x88] sm:$0xff] %vm1521_vm8, %v1460_v0  ;;  %v1470_v5 = vpop.permute.xlu0 %1469  ;;  %v1761_v0 = vld [vmem:[#allocation2 + $0xc9] sm:$0xff] }
 0x23e   : > { %1544 = vst.msk [vmem:[#allocation3 + $0xb0] sm:$0xff] %vm1521_vm8, %v1470_v5  ;;  %v1581_v5 = vld [vmem:[#allocation2 + $0x168] sm:$0xff] }
 0x23f   : > { %1629 = vrot.lane.b32.xlu2 %v1560_v29, %s2785_s13 }
 0x241   : > { %v1480_v55 = vpop.permute.xlu2 %1479 }
 0x242   : > { %1822 = vrot.lane.b32.xlu1 %v3558_v30, %s2784_s12  ;;  %1549 = vst.msk [vmem:[#allocation3 + $0xd8] sm:$0xff] %vm1521_vm8, %v1480_v55  ;;  %v2169_v30 = vld [vmem:[%s4260_s1 + $0x18] sm:$0xff]  ;;  %v1948_v55 = vld [vmem:[#allocation2 + $0x82] sm:$0xff] }
 0x243   : > { %2027 = vrot.lane.b32.xlu0 %v1952_v59, %s2786_s14  ;;  %2284 = vmatpush.msra.mxu0 %v2169_v30 }
 0x244   : > { %v1466_v62 = vpop.permute.xlu1 %1465  ;;  %2737 = vmatpush.msra.mxu1 %v2169_v30  ;;  %2738 = vmatpush.msra.mxu2 %v2169_v30 }
 0x245   : > { %1542 = vst.msk [vmem:[#allocation3 + $0xa0] sm:$0xff] %vm1521_vm8, %v1466_v62  ;;  %v1476_v1 = vpop.permute.xlu0 %1475  ;;  %2285 = vmatpush.msra.mxu0 %v2168_v21  ;;  %2739 = vmatpush.msra.mxu3 %v2169_v30  ;;  %v1768_v62 = vld [vmem:[#allocation2 + $0x121] sm:$0xff] }
 0x246   : > { %1547 = vst.msk [vmem:[#allocation3 + $0xc8] sm:$0xff] %vm1521_vm8, %v1476_v1  ;;  %2740 = vmatpush.msra.mxu1 %v2168_v21  ;;  %2741 = vmatpush.msra.mxu2 %v2168_v21 }
 0x247   : > { %1834 = vrot.lane.b32.xlu2 %v3584_v6, %s2784_s12  ;;  %2286 = vmatpush.msra.mxu0 %v2167_v3  ;;  %v2166_v6 = vld [vmem:[%s4260_s1] sm:$0xff] }
 0x248   : > { %2743 = vmatpush.msra.mxu1 %v2167_v3  ;;  %2744 = vmatpush.msra.mxu2 %v2167_v3 }
 0x249   : > { %v1620_v23 = vpop.permute.xlu2 %1619  ;;  %2287 = vmatpush.msra.mxu0 %v2166_v6  ;;  %2742 = vmatpush.msra.mxu3 %v2168_v21 }
 0x24a   : > { %1667 = vrot.lane.b32.xlu1 %v1579_v9, %s2785_s13  ;;  %1716 = vst.msk [vmem:[#allocation3] sm:$0xff] %vm1715_vm9, %v1620_v23  ;;  %2746 = vmatpush.msra.mxu1 %v2166_v6  ;;  %v1774_v9 = vld [vmem:[#allocation2 + $0x169] sm:$0xff]  ;;  %v1955_v23 = vld [vmem:[#allocation2 + $0xda] sm:$0xff] }
 0x24b   : > { %2041 = vrot.lane.b32.xlu0 %v1959_v28, %s2786_s14  ;;  %2747 = vmatpush.msra.mxu2 %v2166_v6  ;;  %v1967_v28 = vld [vmem:[#allocation2 + $0x16a] sm:$0xff] }
 0x24c   : > { %v1472_v15 = vpop.permute.xlu1 %1471  ;;  %2745 = vmatpush.msra.mxu3 %v2167_v3 }
 0x24d   : > { %1545 = vst.msk [vmem:[#allocation3 + $0xb8] sm:$0xff] %vm1521_vm8, %v1472_v15  ;;  %v1482_v37 = vpop.permute.xlu0 %1481 }
 0x24e   : > { %1550 = vst.msk [vmem:[#allocation3 + $0xe0] sm:$0xff] %vm1521_vm8, %v1482_v37  ;;  %2748 = vmatpush.msra.mxu3 %v2166_v6  ;;  %v1569_v37 = vld [vmem:[#allocation2 + $0xd8] sm:$0xff] }
 0x24f   : > { %2015 = vrot.lane.b32.xlu2 %v1946_v10, %s2786_s14 }
 0x251   : > { %v1622_v16 = vpop.permute.xlu2 %1621 }
 0x252   : > { %1848 = vrot.lane.b32.xlu1 %v3619_v46, %s2784_s12  ;;  %1717 = vst.msk [vmem:[#allocation3 + $0x8] sm:$0xff] %vm1715_vm9, %v1622_v16  ;;  %v1576_v16 = vld [vmem:[#allocation2 + $0x128] sm:$0xff] }
 0x253   : > { %1643 = vrot.lane.b32.xlu0 %v1567_v20, %s2785_s13 }
 0x254   : > { %v1478_v24 = vpop.permute.xlu1 %1477 }
 0x255   : > { %1548 = vst.msk [vmem:[#allocation3 + $0xd0] sm:$0xff] %vm1521_vm8, %v1478_v24  ;;  %v1813_v4 = vpop.permute.xlu0 %1812  ;;  %v1962_v24 = vld [vmem:[#allocation2 + $0x12a] sm:$0xff] }
 0x256   : > { %1909 = vst.msk [vmem:[#allocation3] sm:$0xff] %vm1908_vm10, %v1813_v4 }
 0x257   : > { %1860 = vrot.lane.b32.xlu2 %v1772_v48, %s2784_s12 }
 0x259   : > { %v1624_v7 = vpop.permute.xlu2 %1623 }
 0x25a   : > { %2053 = vrot.lane.b32.xlu1 %v1965_v35, %s2786_s14  ;;  %1718 = vst.msk [vmem:[#allocation3 + $0x10] sm:$0xff] %vm1715_vm9, %v1624_v7  ;;  %v1582_v35 = vld [vmem:[#allocation2 + $0x170] sm:$0xff] }
 0x25b   : > { %1657 = vrot.lane.b32.xlu0 %v1574_v63, %s2785_s13  ;;  %v1769_v7 = vld [vmem:[#allocation2 + $0x129] sm:$0xff] }
 0x25c   : > { %v1484_v46 = vpop.permute.xlu1 %1483 }
 0x25d   : > { %1551 = vst.msk [vmem:[#allocation3 + $0xe8] sm:$0xff] %vm1521_vm8, %v1484_v46  ;;  %v1815_v8 = vpop.permute.xlu0 %1814 }
 0x25e   : > { %1910 = vst.msk [vmem:[#allocation3 + $0x8] sm:$0xff] %vm1908_vm10, %v1815_v8 }
 0x25f   : > { %1631 = vrot.lane.b32.xlu2 %v1561_v31, %s2785_s13 }
 0x261   : > { %v1829_v25 = vpop.permute.xlu2 %1828 }
 0x262   : > { %1824 = vrot.lane.b32.xlu1 %v3567_v47, %s2784_s12 }
 0x263   : > { %2029 = vrot.lane.b32.xlu0 %v1953_v51, %s2786_s14  ;;  %v1775_v51 = vld [vmem:[#allocation2 + $0x171] sm:$0xff] }
 0x264   : > { %v2006_v39 = vpop.permute.xlu1 %2005 }
 0x265   : > { %2102 = vst.msk [vmem:[#allocation3] sm:$0xff] %vm2101_vm11, %v2006_v39  ;;  %v1636_v19 = vpop.permute.xlu0 %1635  ;;  %v1968_v39 = vld [vmem:[#allocation2 + $0x172] sm:$0xff] }
 0x266   : > { %1724 = vst.msk [vmem:[#allocation3 + $0x40] sm:$0xff] %vm1715_vm9, %v1636_v19  ;;  %v1956_v19 = vld [vmem:[#allocation2 + $0xe2] sm:$0xff] }
 0x267   : > { %1917 = vst.msk [vmem:[#allocation3 + $0x40] sm:$0xff] %vm1908_vm10, %v1829_v25  ;;  %1836 = vrot.lane.b32.xlu2 %v3593_v14, %s2784_s12  ;;  %v1568_v14 = vld [vmem:[#allocation2 + $0xc8] sm:$0xff] }
 0x269   : > { %v1626_v13 = vpop.permute.xlu2 %1625 }
 0x26a   : > { %1669 = vrot.lane.b32.xlu1 %v1580_v11, %s2785_s13  ;;  %1719 = vst.msk [vmem:[#allocation3 + $0x18] sm:$0xff] %vm1715_vm9, %v1626_v13  ;;  %v1570_v13 = vld [vmem:[#allocation2 + $0xe0] sm:$0xff] }
 0x26b   : > { %2043 = vrot.lane.b32.xlu0 %v1960_v27, %s2786_s14 }
 0x26c   : > { %v2008_v47 = vpop.permute.xlu1 %2007  ;;  %v2134_v33 = vld [vmem:[#allocation3] sm:$0xff] }
 0x26d   : > { %2103 = vst.msk [vmem:[#allocation3 + $0x8] sm:$0xff] %vm2101_vm11, %v2008_v47  ;;  %2686 = vmatmul.msk.f32.vlgmr.msra.gmra.mxu0 %vm2175_vm12, %v2134_v33  ;;  %v2010_v40 = vpop.permute.xlu0 %2009  ;;  %v1577_v33 = vld [vmem:[#allocation2 + $0x138] sm:$0xff] }
 0x26f   : > { %2017 = vrot.lane.b32.xlu2 %v1947_v17, %s2786_s14  ;;  %v1963_v17 = vld [vmem:[#allocation2 + $0x13a] sm:$0xff] }
 0x271   : > { %v1831_v44 = vpop.permute.xlu2 %1830 }
 0x272   : > { %1850 = vrot.lane.b32.xlu1 %v1767_v41, %s2784_s12 }
 0x273   : > { %1645 = vrot.lane.b32.xlu0 %v1568_v14, %s2785_s13  ;;  %v1583_v14 = vld [vmem:[#allocation2 + $0x180] sm:$0xff] }
 0x274   : > { %v1817_v2 = vpop.permute.xlu1 %1816  ;;  %v2135_v56 = vld [vmem:[#allocation3 + $0x8] sm:$0xff] }
 0x275   : > { %1911 = vst.msk [vmem:[#allocation3 + $0x10] sm:$0xff] %vm1908_vm10, %v1817_v2  ;;  %2687 = vmatmul.msk.f32.gmra.mxu0 %vm2175_vm12, %v2135_v56  ;;  %v1638_v34 = vpop.permute.xlu0 %1637 }
 0x276   : > { %2104 = vst.msk [vmem:[#allocation3 + $0x10] sm:$0xff] %vm2101_vm11, %v2010_v40 }
 0x277   : > { %1725 = vst.msk [vmem:[#allocation3 + $0x48] sm:$0xff] %vm1715_vm9, %v1638_v34  ;;  %1862 = vrot.lane.b32.xlu2 %v1773_v52, %s2784_s12  ;;  %v1770_v52 = vld [vmem:[#allocation2 + $0x139] sm:$0xff]  ;;  %v1584_v34 = vld [vmem:[#allocation2 + $0x188] sm:$0xff] }
 0x278   : > { %1918 = vst.msk [vmem:[#allocation3 + $0x48] sm:$0xff] %vm1908_vm10, %v1831_v44 }
 0x279   : > { %v2024_v58 = vpop.permute.xlu2 %2023 }
 0x27a   : > { %2055 = vrot.lane.b32.xlu1 %v1966_v18, %s2786_s14  ;;  %2111 = vst.msk [vmem:[#allocation3 + $0x48] sm:$0xff] %vm2101_vm11, %v2024_v58  ;;  %v1776_v58 = vld [vmem:[#allocation2 + $0x181] sm:$0xff] }
 0x27b   : > { %1659 = vrot.lane.b32.xlu0 %v1575_v53, %s2785_s13 }
 0x27c   : > { %v2022_v60 = vpop.permute.xlu1 %2021 }
 0x27d   : > { %2110 = vst.msk [vmem:[#allocation3 + $0x40] sm:$0xff] %vm2101_vm11, %v2022_v60  ;;  %v2136_v42 = vld [vmem:[#allocation3 + $0x10] sm:$0xff]  ;;  %v1652_v38 = vpop.permute.xlu0 %1651 }
 0x27e   : > { %2688 = vmatmul.msk.f32.gmra.mxu0 %vm2175_vm12, %v2136_v42  ;;  %1732 = vst.msk [vmem:[#allocation3 + $0x80] sm:$0xff] %vm1715_vm9, %v1652_v38  ;;  %v1964_v42 = vld [vmem:[#allocation2 + $0x142] sm:$0xff] }
 0x27f   : > { %1633 = vrot.lane.b32.xlu2 %v1562_v57, %s2785_s13  ;;  %v1969_v57 = vld [vmem:[#allocation2 + $0x182] sm:$0xff] }
 0x281   : > { %v1628_v50 = vpop.permute.xlu2 %1627  ;;  %v2143_v45 = vld [vmem:[#allocation3 + $0x48] sm:$0xff] }
 0x282   : > { %1826 = vrot.lane.b32.xlu1 %v1755_v36, %s2784_s12  ;;  %1720 = vst.msk [vmem:[#allocation3 + $0x20] sm:$0xff] %vm1715_vm9, %v1628_v50 }
 0x283   : > { %2031 = vrot.lane.b32.xlu0 %v1954_v61, %s2786_s14  ;;  %v1578_v61 = vld [vmem:[#allocation2 + $0x140] sm:$0xff] }
 0x284   : > { %v1819_v43 = vpop.permute.xlu1 %1818  ;;  %v2142_v49 = vld [vmem:[#allocation3 + $0x40] sm:$0xff] }
 0x285   : > { %1912 = vst.msk [vmem:[#allocation3 + $0x18] sm:$0xff] %vm1908_vm10, %v1819_v43  ;;  %2694 = vmatmul.msk.f32.vlgmr.msra.gmra.mxu1 %vm2175_vm12, %v2142_v49  ;;  %v1845_v29 = vpop.permute.xlu0 %1844  ;;  %v1771_v49 = vld [vmem:[#allocation2 + $0x141] sm:$0xff] }
 0x286   : > { %1925 = vst.msk [vmem:[#allocation3 + $0x80] sm:$0xff] %vm1908_vm10, %v1845_v29 }
 0x287   : > { %1838 = vrot.lane.b32.xlu2 %v1761_v0, %s2784_s12  ;;  %v1585_v0 = vld [vmem:[#allocation2 + $0x198] sm:$0xff] }
 0x289   : > { %v1833_v32 = vpop.permute.xlu2 %1832 }
 0x28a   : > { %1671 = vrot.lane.b32.xlu1 %v1581_v5, %s2785_s13 }
 0x28b   : > { %2045 = vrot.lane.b32.xlu0 %v1961_v54, %s2786_s14 }
 0x28c   : > { %v2012_v59 = vpop.permute.xlu1 %2011 }
 0x28d   : > { %2105 = vst.msk [vmem:[#allocation3 + $0x18] sm:$0xff] %vm2101_vm11, %v2012_v59  ;;  %v1640_v12 = vpop.permute.xlu0 %1639  ;;  %2695 = vmatmul.msk.f32.gmra.mxu1 %vm2175_vm12, %v2143_v45  ;;  %v1970_v59 = vld [vmem:[#allocation2 + $0x18a] sm:$0xff] }
 0x28e   : > { %1726 = vst.msk [vmem:[#allocation3 + $0x50] sm:$0xff] %vm1715_vm9, %v1640_v12 }
 0x28f   : > { %1919 = vst.msk [vmem:[#allocation3 + $0x50] sm:$0xff] %vm1908_vm10, %v1833_v32  ;;  %2019 = vrot.lane.b32.xlu2 %v1948_v55, %s2786_s14  ;;  %v1777_v32 = vld [vmem:[#allocation2 + $0x189] sm:$0xff] }
 0x291   : > { %v2026_v1 = vpop.permute.xlu2 %2025 }
 0x292   : > { %1852 = vrot.lane.b32.xlu1 %v1768_v62, %s2784_s12  ;;  %2112 = vst.msk [vmem:[#allocation3 + $0x50] sm:$0xff] %vm2101_vm11, %v2026_v1 }
 0x293   : > { %1840 = vrot.lane.b32.xlu0 %v3597_v26, %s2784_s12 }
 0x294   : > { %v2038_v30 = vpop.permute.xlu1 %2037  ;;  %v2137_v21 = vld [vmem:[#allocation3 + $0x18] sm:$0xff] }
 0x295   : > { %2118 = vst.msk [vmem:[#allocation3 + $0x80] sm:$0xff] %vm2101_vm11, %v2038_v30  ;;  %2689 = vmatmul.msk.f32.gmra.mxu0 %vm2175_vm12, %v2137_v21  ;;  %v1654_v3 = vpop.permute.xlu0 %1653  ;;  %v1778_v21 = vld [vmem:[#allocation2 + $0x199] sm:$0xff] }
 0x296   : > { %1733 = vst.msk [vmem:[#allocation3 + $0x88] sm:$0xff] %vm1715_vm9, %v1654_v3 }
 0x297   : > { %1864 = vrot.lane.b32.xlu2 %v1774_v9, %s2784_s12  ;;  %v1972_v9 = vld [vmem:[#allocation2 + $0x1a2] sm:$0xff] }
 0x299   : > { %v1630_v6 = vpop.permute.xlu2 %1629  ;;  %v2144_v15 = vld [vmem:[#allocation3 + $0x50] sm:$0xff] }
 0x29a   : > { %2057 = vrot.lane.b32.xlu1 %v1967_v28, %s2786_s14  ;;  %1721 = vst.msk [vmem:[#allocation3 + $0x28] sm:$0xff] %vm1715_vm9, %v1630_v6  ;;  %2696 = vmatmul.msk.f32.gmra.mxu1 %vm2175_vm12, %v2144_v15  ;;  %v1586_v15 = vld [vmem:[#allocation2 + $0x1a0] sm:$0xff] }
 0x29b   : > { %2033 = vrot.lane.b32.xlu0 %v1955_v23, %s2786_s14  ;;  %v1971_v23 = vld [vmem:[#allocation2 + $0x19a] sm:$0xff] }
 0x29c   : > { %v1821_v26 = vpop.permute.xlu1 %1820  ;;  %v2150_v10 = vld [vmem:[#allocation3 + $0x80] sm:$0xff] }
 0x29d   : > { %1913 = vst.msk [vmem:[#allocation3 + $0x20] sm:$0xff] %vm1908_vm10, %v1821_v26  ;;  %2702 = vmatmul.msk.f32.vlgmr.msra.gmra.mxu2 %vm2175_vm12, %v2150_v10  ;;  %v1847_v20 = vpop.permute.xlu0 %1846 }
 0x29e   : > { %1926 = vst.msk [vmem:[#allocation3 + $0x88] sm:$0xff] %vm1908_vm10, %v1847_v20  ;;  %v1779_v20 = vld [vmem:[#allocation2 + $0x1a1] sm:$0xff] }
 0x29f   : > { %1647 = vrot.lane.b32.xlu2 %v1569_v37, %s2785_s13 }
 0x2a1   : > { %v1835_v48 = vpop.permute.xlu2 %1834 }
 0x2a2   : > { %1661 = vrot.lane.b32.xlu1 %v1576_v16, %s2785_s13 }
 0x2a3   : > { %2047 = vrot.lane.b32.xlu0 %v1962_v24, %s2786_s14 }
 0x2a4   : > { %v2014_v4 = vpop.permute.xlu1 %2013 }
 0x2a5   : > { %2106 = vst.msk [vmem:[#allocation3 + $0x20] sm:$0xff] %vm2101_vm11, %v2014_v4  ;;  %v1642_v63 = vpop.permute.xlu0 %1641 }
 0x2a6   : > { %1727 = vst.msk [vmem:[#allocation3 + $0x58] sm:$0xff] %vm1715_vm9, %v1642_v63 }
 0x2a7   : > { %1920 = vst.msk [vmem:[#allocation3 + $0x58] sm:$0xff] %vm1908_vm10, %v1835_v48  ;;  %1673 = vrot.lane.b32.xlu2 %v1582_v35, %s2785_s13 }
 0x2a9   : > { %v2016_v46 = vpop.permute.xlu2 %2015 }
 0x2aa   : > { %1854 = vrot.lane.b32.xlu1 %v1769_v7, %s2784_s12 }
 0x2ab   : > { %1842 = vrot.lane.b32.xlu0 %v3606_v22, %s2784_s12 }
 0x2ac   : > { %v2040_v31 = vpop.permute.xlu1 %2039  ;;  %v2138_v8 = vld [vmem:[#allocation3 + $0x20] sm:$0xff] }
 0x2ad   : > { %2119 = vst.msk [vmem:[#allocation3 + $0x88] sm:$0xff] %vm2101_vm11, %v2040_v31  ;;  %2690 = vmatmul.msk.f32.gmra.mxu0 %vm2175_vm12, %v2138_v8  ;;  %v1656_v25 = vpop.permute.xlu0 %1655 }
 0x2ae   : > { %1734 = vst.msk [vmem:[#allocation3 + $0x90] sm:$0xff] %vm1715_vm9, %v1656_v25 }
 0x2af   : > { %1866 = vrot.lane.b32.xlu2 %v1775_v51, %s2784_s12 }
 0x2b1   : > { %v1861_v11 = vpop.permute.xlu2 %1860 }
 0x2b2   : > { %2059 = vrot.lane.b32.xlu1 %v1968_v39, %s2786_s14 }
 0x2b3   : > { %2035 = vrot.lane.b32.xlu0 %v1956_v19, %s2786_s14 }
 0x2b4   : > { %v1823_v22 = vpop.permute.xlu1 %1822  ;;  %v2151_v27 = vld [vmem:[#allocation3 + $0x88] sm:$0xff] }
 0x2b5   : > { %1914 = vst.msk [vmem:[#allocation3 + $0x28] sm:$0xff] %vm1908_vm10, %v1823_v22  ;;  %2703 = vmatmul.msk.f32.gmra.mxu2 %vm2175_vm12, %v2151_v27  ;;  %v2028_v47 = vpop.permute.xlu0 %2027 }
 0x2b6   : > { %2107 = vst.msk [vmem:[#allocation3 + $0x28] sm:$0xff] %vm2101_vm11, %v2016_v46 }
 0x2b7   : > { %2113 = vst.msk [vmem:[#allocation3 + $0x58] sm:$0xff] %vm2101_vm11, %v2028_v47  ;;  %1649 = vrot.lane.b32.xlu2 %v1570_v13, %s2785_s13 }
 0x2b9   : > { %v1632_v40 = vpop.permute.xlu2 %1631 }
 0x2ba   : > { %1663 = vrot.lane.b32.xlu1 %v1577_v33, %s2785_s13  ;;  %1722 = vst.msk [vmem:[#allocation3 + $0x30] sm:$0xff] %vm1715_vm9, %v1632_v40 }
 0x2bb   : > { %2049 = vrot.lane.b32.xlu0 %v1963_v17, %s2786_s14 }
 0x2bc   : > { %v1668_v41 = vpop.permute.xlu1 %1667 }
 0x2bd   : > { %1740 = vst.msk [vmem:[#allocation3 + $0xc0] sm:$0xff] %vm1715_vm9, %v1668_v41  ;;  %v2139_v44 = vld [vmem:[#allocation3 + $0x28] sm:$0xff]  ;;  %v2042_v2 = vpop.permute.xlu0 %2041 }
 0x2be   : > { %1933 = vst.msk [vmem:[#allocation3 + $0xc0] sm:$0xff] %vm1908_vm10, %v1861_v11  ;;  %2691 = vmatmul.msk.f32.gmra.mxu0 %vm2175_vm12, %v2139_v44  ;;  %v2145_v56 = vld [vmem:[#allocation3 + $0x58] sm:$0xff] }
 0x2bf   : > { %2697 = vmatmul.msk.f32.gmra.mxu1 %vm2175_vm12, %v2145_v56  ;;  %1675 = vrot.lane.b32.xlu2 %v1583_v14, %s2785_s13 }
 0x2c1   : > { %v1837_v18 = vpop.permute.xlu2 %1836 }
 0x2c2   : > { %1856 = vrot.lane.b32.xlu1 %v1770_v52, %s2784_s12 }
 0x2c3   : > { %1677 = vrot.lane.b32.xlu0 %v1584_v34, %s2785_s13 }
 0x2c4   : > { %v1849_v53 = vpop.permute.xlu1 %1848 }
 0x2c5   : > { %1927 = vst.msk [vmem:[#allocation3 + $0x90] sm:$0xff] %vm1908_vm10, %v1849_v53  ;;  %v1644_v60 = vpop.permute.xlu0 %1643 }
 0x2c6   : > { %2120 = vst.msk [vmem:[#allocation3 + $0x90] sm:$0xff] %vm2101_vm11, %v2042_v2 }
 0x2c7   : > { %1728 = vst.msk [vmem:[#allocation3 + $0x60] sm:$0xff] %vm1715_vm9, %v1644_v60  ;;  %1868 = vrot.lane.b32.xlu2 %v1776_v58, %s2784_s12 }
 0x2c8   : > { %1921 = vst.msk [vmem:[#allocation3 + $0x60] sm:$0xff] %vm1908_vm10, %v1837_v18 }
 0x2c9   : > { %v2018_v38 = vpop.permute.xlu2 %2017 }
 0x2ca   : > { %2061 = vrot.lane.b32.xlu1 %v1969_v57, %s2786_s14 }
 0x2cb   : > { %2051 = vrot.lane.b32.xlu0 %v1964_v42, %s2786_s14 }
 0x2cc   : > { %v2054_v36 = vpop.permute.xlu1 %2053 }
 0x2cd   : > { %2126 = vst.msk [vmem:[#allocation3 + $0xc0] sm:$0xff] %vm2101_vm11, %v2054_v36  ;;  %v1658_v50 = vpop.permute.xlu0 %1657  ;;  %v2152_v43 = vld [vmem:[#allocation3 + $0x90] sm:$0xff] }
 0x2ce   : > { %1735 = vst.msk [vmem:[#allocation3 + $0x98] sm:$0xff] %vm1715_vm9, %v1658_v50  ;;  %2704 = vmatmul.msk.f32.gmra.mxu2 %vm2175_vm12, %v2152_v43 }
 0x2cf   : > { %1665 = vrot.lane.b32.xlu2 %v1578_v61, %s2785_s13 }
 0x2d1   : > { %v1863_v29 = vpop.permute.xlu2 %1862 }
 0x2d2   : > { %1858 = vrot.lane.b32.xlu1 %v1771_v49, %s2784_s12 }
 0x2d3   : > { %1679 = vrot.lane.b32.xlu0 %v1585_v0, %s2785_s13 }
 0x2d4   : > { %v1825_v5 = vpop.permute.xlu1 %1824  ;;  %v2158_v54 = vld [vmem:[#allocation3 + $0xc0] sm:$0xff] }
 0x2d5   : > { %1915 = vst.msk [vmem:[#allocation3 + $0x30] sm:$0xff] %vm1908_vm10, %v1825_v5  ;;  %2710 = vmatmul.msk.f32.vlgmr.msra.gmra.mxu3 %vm2175_vm12, %v2158_v54  ;;  %v2030_v45 = vpop.permute.xlu0 %2029 }
 0x2d6   : > { %2108 = vst.msk [vmem:[#allocation3 + $0x30] sm:$0xff] %vm2101_vm11, %v2018_v38 }
 0x2d7   : > { %2114 = vst.msk [vmem:[#allocation3 + $0x60] sm:$0xff] %vm2101_vm11, %v2030_v45  ;;  %1870 = vrot.lane.b32.xlu2 %v1777_v32, %s2784_s12 }
 0x2d9   : > { %v1634_v55 = vpop.permute.xlu2 %1633 }
 0x2da   : > { %2063 = vrot.lane.b32.xlu1 %v1970_v59, %s2786_s14  ;;  %1723 = vst.msk [vmem:[#allocation3 + $0x38] sm:$0xff] %vm1715_vm9, %v1634_v55 }
 0x2db   : > { %1487 = vrot.lane.b32.xlu0 %v1970_v59, %s2783_s11 }
 0x2dc   : > { %v1670_v12 = vpop.permute.xlu1 %1669 }
 0x2dd   : > { %1741 = vst.msk [vmem:[#allocation3 + $0xc8] sm:$0xff] %vm1715_vm9, %v1670_v12  ;;  %v2140_v62 = vld [vmem:[#allocation3 + $0x30] sm:$0xff]  ;;  %v2044_v1 = vpop.permute.xlu0 %2043 }
 0x2de   : > { %1934 = vst.msk [vmem:[#allocation3 + $0xc8] sm:$0xff] %vm1908_vm10, %v1863_v29  ;;  %2692 = vmatmul.msk.f32.gmra.mxu0 %vm2175_vm12, %v2140_v62  ;;  %v2146_v30 = vld [vmem:[#allocation3 + $0x60] sm:$0xff] }
 0x2df   : > { %2698 = vmatmul.msk.f32.gmra.mxu1 %vm2175_vm12, %v2146_v30  ;;  %1485 = vrot.lane.b32.xlu2 %v1969_v57, %s2783_s11 }
 0x2e1   : > { %v1839_v3 = vpop.permute.xlu2 %1838 }
 0x2e2   : > { %1872 = vrot.lane.b32.xlu1 %v1778_v21, %s2784_s12 }
 0x2e3   : > { %2067 = vrot.lane.b32.xlu0 %v1972_v9, %s2786_s14 }
 0x2e4   : > { %v1851_v28 = vpop.permute.xlu1 %1850 }
 0x2e5   : > { %1928 = vst.msk [vmem:[#allocation3 + $0x98] sm:$0xff] %vm1908_vm10, %v1851_v28  ;;  %v1646_v6 = vpop.permute.xlu0 %1645 }
 0x2e6   : > { %2121 = vst.msk [vmem:[#allocation3 + $0x98] sm:$0xff] %vm2101_vm11, %v2044_v1 }
 0x2e7   : > { %1729 = vst.msk [vmem:[#allocation3 + $0x68] sm:$0xff] %vm1715_vm9, %v1646_v6  ;;  %2065 = vrot.lane.b32.xlu2 %v1971_v23, %s2786_s14  ;;  %s235_s14 = scalar_lea.vmem %s4264_s5, %s2685_s21 }
 0x2e8   : > { %1922 = vst.msk [vmem:[#allocation3 + $0x68] sm:$0xff] %vm1908_vm10, %v1839_v3 }
 0x2e9   : > { %v2020_v26 = vpop.permute.xlu2 %2019 }
 0x2ea   : > { %1681 = vrot.lane.b32.xlu1 %v1586_v15, %s2785_s13  ;;  %v2289_v10 = vpop.f32.mrf.mxu0 }
 0x2eb   : > { %2558 = vst.msk [vmem:[%s3995_s16] sm:$0xff] %vm436_vm0, %v2289_v10  ;;  %v2456_v48 = vmul.f32 %v2289_v10, %v2289_v10  ;;  %v2385_v63 = vsel %vm436_vm0, %v2289_v10, 0.0 }
 0x2ec   : > { %v2056_v37 = vpop.permute.xlu1 %2055 }
 0x2ed   : > { %2127 = vst.msk [vmem:[#allocation3 + $0xc8] sm:$0xff] %vm2101_vm11, %v2056_v37  ;;  %v1660_v16 = vpop.permute.xlu0 %1659  ;;  %v2153_v24 = vld [vmem:[#allocation3 + $0x98] sm:$0xff]  ;;  %v2488_v25 = vsel %vm436_vm0, %v2456_v48, 0.0 }
 0x2ee   : > { %1736 = vst.msk [vmem:[#allocation3 + $0xa0] sm:$0xff] %vm1715_vm9, %v1660_v16  ;;  %2705 = vmatmul.msk.f32.gmra.mxu2 %vm2175_vm12, %v2153_v24 }
 0x2ef   : > { %1874 = vrot.lane.b32.xlu2 %v1779_v20, %s2784_s12 }
 0x2f1   : > { %v1865_v4 = vpop.permute.xlu2 %1864 }
 0x2f2   : > { %v2292_v35 = vpop.f32.mrf.mxu0 }
 0x2f3   : > { %v2386_v7 = vsel %vm436_vm0, %v2292_v35, 0.0  ;;  %v2457_v46 = vmul.f32 %v2292_v35, %v2292_v35  ;;  %2559 = vst.msk [vmem:[%s3995_s16 + $0x8] sm:$0xff] %vm436_vm0, %v2292_v35 }
 0x2f4   : > { %v2387_v31 = vadd.f32 %v2386_v7, %v2385_v63  ;;  %v1827_v8 = vpop.permute.xlu1 %1826  ;;  %v2159_v51 = vld [vmem:[#allocation3 + $0xc8] sm:$0xff] }
 0x2f5   : > { %v2489_v39 = vsel %vm436_vm0, %v2457_v46, 0.0  ;;  %1916 = vst.msk [vmem:[#allocation3 + $0x38] sm:$0xff] %vm1908_vm10, %v1827_v8  ;;  %2711 = vmatmul.msk.f32.gmra.mxu3 %vm2175_vm12, %v2159_v51  ;;  %v2032_v19 = vpop.permute.xlu0 %2031 }
 0x2f6   : > { %v2490_v11 = vadd.f32 %v2489_v39, %v2488_v25  ;;  %2109 = vst.msk [vmem:[#allocation3 + $0x38] sm:$0xff] %vm2101_vm11, %v2020_v26 }
 0x2f7   : > { %2115 = vst.msk [vmem:[#allocation3 + $0x68] sm:$0xff] %vm2101_vm11, %v2032_v19 }
 0x2f9   : > { %v1648_v22 = vpop.permute.xlu2 %1647 }
 0x2fa   : > { %1730 = vst.msk [vmem:[#allocation3 + $0x70] sm:$0xff] %vm1715_vm9, %v1648_v22 }
 0x2fb   : > { %v2295_v27 = vpop.f32.mrf.mxu0 }
 0x2fc   : > { %v2388_v13 = vsel %vm436_vm0, %v2295_v27, 0.0  ;;  %v2458_v47 = vmul.f32 %v2295_v27, %v2295_v27  ;;  %2560 = vst.msk [vmem:[%s3995_s16 + $0x10] sm:$0xff] %vm436_vm0, %v2295_v27  ;;  %v1672_v33 = vpop.permute.xlu1 %1671 }
 0x2fd   : > { %v2389_v17 = vadd.f32 %v2388_v13, %v2387_v31  ;;  %1742 = vst.msk [vmem:[#allocation3 + $0xd0] sm:$0xff] %vm1715_vm9, %v1672_v33  ;;  %v2141_v40 = vld [vmem:[#allocation3 + $0x38] sm:$0xff]  ;;  %v2046_v41 = vpop.permute.xlu0 %2045 }
 0x2fe   : > { %v2491_v14 = vsel %vm436_vm0, %v2458_v47, 0.0  ;;  %2693 = vmatmul.msk.f32.gmra.mxu0 %vm2175_vm12, %v2141_v40  ;;  %1935 = vst.msk [vmem:[#allocation3 + $0xd0] sm:$0xff] %vm1908_vm10, %v1865_v4  ;;  %v2147_v44 = vld [vmem:[#allocation3 + $0x68] sm:$0xff] }
 0x2ff   : > { %v2492_v2 = vadd.f32 %v2491_v14, %v2490_v11  ;;  %2699 = vmatmul.msk.f32.gmra.mxu1 %vm2175_vm12, %v2147_v44 }
 0x301   : > { %v1674_v56 = vpop.permute.xlu2 %1673 }
 0x302   : > { %v4024_v52 = vpop.f32.mrf.mxu1  ;;  %1743 = vst.msk [vmem:[#allocation3 + $0xd8] sm:$0xff] %vm1715_vm9, %v1674_v56 }
 0x303   : > { %2566 = vst.msk [vmem:[%s3995_s16 + $0x40] sm:$0xff] %vm436_vm0, %v4024_v52 }
 0x304   : > { %v1853_v34 = vpop.permute.xlu1 %1852 }
 0x305   : > { %1929 = vst.msk [vmem:[#allocation3 + $0xa0] sm:$0xff] %vm1908_vm10, %v1853_v34  ;;  %v1841_v18 = vpop.permute.xlu0 %1840 }
 0x306   : > { %2122 = vst.msk [vmem:[#allocation3 + $0xa0] sm:$0xff] %vm2101_vm11, %v2046_v41 }
 0x307   : > { %1923 = vst.msk [vmem:[#allocation3 + $0x70] sm:$0xff] %vm1908_vm10, %v1841_v18 }
 0x309   : > { %v1867_v53 = vpop.permute.xlu2 %1866 }
 0x30a   : > { %v4033_v58 = vpop.f32.mrf.mxu1  ;;  %1936 = vst.msk [vmem:[#allocation3 + $0xd8] sm:$0xff] %vm1908_vm10, %v1867_v53 }
 0x30b   : > { %2567 = vst.msk [vmem:[%s3995_s16 + $0x48] sm:$0xff] %vm436_vm0, %v4033_v58 }
 0x30c   : > { %v2058_v60 = vpop.permute.xlu1 %2057 }
 0x30d   : > { %2128 = vst.msk [vmem:[#allocation3 + $0xd0] sm:$0xff] %vm2101_vm11, %v2058_v60  ;;  %v2034_v57 = vpop.permute.xlu0 %2033  ;;  %v2154_v42 = vld [vmem:[#allocation3 + $0xa0] sm:$0xff] }
 0x30e   : > { %2116 = vst.msk [vmem:[#allocation3 + $0x70] sm:$0xff] %vm2101_vm11, %v2034_v57  ;;  %2706 = vmatmul.msk.f32.gmra.mxu2 %vm2175_vm12, %v2154_v42 }
 0x311   : > { %v1650_v38 = vpop.permute.xlu2 %1649 }
 0x312   : > { %v2298_v36 = vpop.f32.mrf.mxu0  ;;  %1731 = vst.msk [vmem:[#allocation3 + $0x78] sm:$0xff] %vm1715_vm9, %v1650_v38 }
 0x313   : > { %v2390_v61 = vsel %vm436_vm0, %v2298_v36, 0.0  ;;  %v2459_v50 = vmul.f32 %v2298_v36, %v2298_v36  ;;  %2561 = vst.msk [vmem:[%s3995_s16 + $0x18] sm:$0xff] %vm436_vm0, %v2298_v36 }
 0x314   : > { %v2391_v43 = vadd.f32 %v2390_v61, %v2389_v17  ;;  %v1662_v49 = vpop.permute.xlu1 %1661  ;;  %v2160_v0 = vld [vmem:[#allocation3 + $0xd0] sm:$0xff] }
 0x315   : > { %v2493_v29 = vsel %vm436_vm0, %v2459_v50, 0.0  ;;  %1737 = vst.msk [vmem:[#allocation3 + $0xa8] sm:$0xff] %vm1715_vm9, %v1662_v49  ;;  %2712 = vmatmul.msk.f32.gmra.mxu3 %vm2175_vm12, %v2160_v0  ;;  %v2048_v5 = vpop.permute.xlu0 %2047  ;;  %v2148_v54 = vld [vmem:[#allocation3 + $0x70] sm:$0xff] }
 0x316   : > { %v2494_v32 = vadd.f32 %v2493_v29, %v2492_v2  ;;  %2700 = vmatmul.msk.f32.gmra.mxu1 %vm2175_vm12, %v2148_v54 }
 0x317   : > { %v4050_v45 = vpop.f32.mrf.mxu1 }
 0x318   : > { %2568 = vst.msk [vmem:[%s3995_s16 + $0x50] sm:$0xff] %vm436_vm0, %v4050_v45 }
 0x319   : > { %v1676_v59 = vpop.permute.xlu2 %1675 }
 0x31a   : > { %1744 = vst.msk [vmem:[#allocation3 + $0xe0] sm:$0xff] %vm1715_vm9, %v1676_v59 }
 0x31c   : > { %v1855_v55 = vpop.permute.xlu1 %1854 }
 0x31d   : > { %1930 = vst.msk [vmem:[#allocation3 + $0xa8] sm:$0xff] %vm1908_vm10, %v1855_v55  ;;  %v1843_v12 = vpop.permute.xlu0 %1842 }
 0x31e   : > { %2123 = vst.msk [vmem:[#allocation3 + $0xa8] sm:$0xff] %vm2101_vm11, %v2048_v5 }
 0x31f   : > { %1924 = vst.msk [vmem:[#allocation3 + $0x78] sm:$0xff] %vm1908_vm10, %v1843_v12 }
 0x320   : > { %v4059_v62 = vpop.f32.mrf.mxu2 }
 0x321   : > { %2574 = vst.msk [vmem:[%s3995_s16 + $0x80] sm:$0xff] %vm436_vm0, %v4059_v62  ;;  %v1869_v1 = vpop.permute.xlu2 %1868 }
 0x322   : > { %1937 = vst.msk [vmem:[#allocation3 + $0xe0] sm:$0xff] %vm1908_vm10, %v1869_v1 }
 0x324   : > { %v2060_v30 = vpop.permute.xlu1 %2059 }
 0x325   : > { %2129 = vst.msk [vmem:[#allocation3 + $0xd8] sm:$0xff] %vm2101_vm11, %v2060_v30  ;;  %v2036_v21 = vpop.permute.xlu0 %2035  ;;  %v2155_v9 = vld [vmem:[#allocation3 + $0xa8] sm:$0xff]  ;;  %v2400_v30 = vsel %vm436_vm0, %v4024_v52, 0.0 }
 0x326   : > { %2117 = vst.msk [vmem:[#allocation3 + $0x78] sm:$0xff] %vm2101_vm11, %v2036_v21  ;;  %2707 = vmatmul.msk.f32.gmra.mxu2 %vm2175_vm12, %v2155_v9  ;;  %v2465_v21 = vmul.f32 %v4033_v58, %v4033_v58 }
 0x329   : > { %v1666_v3 = vpop.permute.xlu2 %1665 }
 0x32a   : > { %v2301_v28 = vpop.f32.mrf.mxu0  ;;  %1739 = vst.msk [vmem:[#allocation3 + $0xb8] sm:$0xff] %vm1715_vm9, %v1666_v3 }
 0x32b   : > { %v2392_v23 = vsel %vm436_vm0, %v2301_v28, 0.0  ;;  %v2460_v6 = vmul.f32 %v2301_v28, %v2301_v28  ;;  %2562 = vst.msk [vmem:[%s3995_s16 + $0x20] sm:$0xff] %vm436_vm0, %v2301_v28 }
 0x32c   : > { %v2393_v15 = vadd.f32 %v2392_v23, %v2391_v43  ;;  %v1664_v26 = vpop.permute.xlu1 %1663  ;;  %v2161_v10 = vld [vmem:[#allocation3 + $0xd8] sm:$0xff] }
 0x32d   : > { %v2495_v37 = vsel %vm436_vm0, %v2460_v6, 0.0  ;;  %1738 = vst.msk [vmem:[#allocation3 + $0xb0] sm:$0xff] %vm1715_vm9, %v1664_v26  ;;  %2713 = vmatmul.msk.f32.gmra.mxu3 %vm2175_vm12, %v2161_v10  ;;  %v2149_v20 = vld [vmem:[#allocation3 + $0x78] sm:$0xff]  ;;  %v2050_v16 = vpop.permute.xlu0 %2049  ;;  %v2402_v6 = vsel %vm436_vm0, %v4033_v58, 0.0 }
 0x32e   : > { %v2496_v24 = vadd.f32 %v2495_v37, %v2494_v32  ;;  %2701 = vmatmul.msk.f32.gmra.mxu1 %vm2175_vm12, %v2149_v20  ;;  %v2464_v32 = vmul.f32 %v4024_v52, %v4024_v52  ;;  %v2505_v37 = vsel %vm436_vm0, %v2465_v21, 0.0  ;;  %v2404_v52 = vsel %vm436_vm0, %v4050_v45, 0.0 }
 0x330   : > { %v2503_v23 = vsel %vm436_vm0, %v2464_v32, 0.0 }
 0x331   : > { %v1871_v48 = vpop.permute.xlu2 %1870 }
 0x334   : > { %v1857_v4 = vpop.permute.xlu1 %1856 }
 0x335   : > { %1931 = vst.msk [vmem:[#allocation3 + $0xb0] sm:$0xff] %vm1908_vm10, %v1857_v4  ;;  %v1678_v35 = vpop.permute.xlu0 %1677 }
 0x336   : > { %2124 = vst.msk [vmem:[#allocation3 + $0xb0] sm:$0xff] %vm2101_vm11, %v2050_v16 }
 0x337   : > { %1745 = vst.msk [vmem:[#allocation3 + $0xe8] sm:$0xff] %vm1715_vm9, %v1678_v35 }
 0x338   : > { %v4079_v63 = vpop.f32.mrf.mxu2  ;;  %1938 = vst.msk [vmem:[#allocation3 + $0xe8] sm:$0xff] %vm1908_vm10, %v1871_v48 }
 0x339   : > { %2575 = vst.msk [vmem:[%s3995_s16 + $0x88] sm:$0xff] %vm436_vm0, %v4079_v63  ;;  %v1486_v7 = vpop.permute.xlu2 %1485 }
 0x33a   : > { %1552 = vst.msk [vmem:[#allocation3 + $0xf0] sm:$0xff] %vm1521_vm8, %v1486_v7 }
 0x33b   : > { %v2304_v46 = vpop.f32.mrf.mxu0 }
 0x33c   : > { %v2394_v31 = vsel %vm436_vm0, %v2304_v46, 0.0  ;;  %v2461_v8 = vmul.f32 %v2304_v46, %v2304_v46  ;;  %2563 = vst.msk [vmem:[%s3995_s16 + $0x28] sm:$0xff] %vm436_vm0, %v2304_v46  ;;  %v2062_v51 = vpop.permute.xlu1 %2061  ;;  %v4089_v25 = vpop.f32.mrf.mxu1 }
 0x33d   : > { %v2395_v39 = vadd.f32 %v2394_v31, %v2393_v15  ;;  %2130 = vst.msk [vmem:[#allocation3 + $0xe0] sm:$0xff] %vm2101_vm11, %v2062_v51  ;;  %v2156_v19 = vld [vmem:[#allocation3 + $0xb0] sm:$0xff]  ;;  %v2052_v11 = vpop.permute.xlu0 %2051  ;;  %v2466_v15 = vmul.f32 %v4050_v45, %v4050_v45  ;;  %v2467_v20 = vmul.f32 %v4089_v25, %v4089_v25  ;;  %v2406_v58 = vsel %vm436_vm0, %v4089_v25, 0.0 }
 0x33e   : > { %v2497_v22 = vsel %vm436_vm0, %v2461_v8, 0.0  ;;  %2708 = vmatmul.msk.f32.gmra.mxu2 %vm2175_vm12, %v2156_v19  ;;  %2569 = vst.msk [vmem:[%s3995_s16 + $0x58] sm:$0xff] %vm436_vm0, %v4089_v25 }
 0x33f   : > { %v2498_v27 = vadd.f32 %v2497_v22, %v2496_v24  ;;  %v2507_v48 = vsel %vm436_vm0, %v2466_v15, 0.0  ;;  %v2509_v46 = vsel %vm436_vm0, %v2467_v20, 0.0 }
 0x341   : > { %v2066_v44 = vpop.permute.xlu2 %2065 }
 0x344   : > { %v1859_v13 = vpop.permute.xlu1 %1858  ;;  %v2162_v47 = vld [vmem:[#allocation3 + $0xe0] sm:$0xff] }
 0x345   : > { %1932 = vst.msk [vmem:[#allocation3 + $0xb8] sm:$0xff] %vm1908_vm10, %v1859_v13  ;;  %2714 = vmatmul.msk.f32.gmra.mxu3 %vm2175_vm12, %v2162_v47  ;;  %v1680_v33 = vpop.permute.xlu0 %1679 }
 0x346   : > { %2125 = vst.msk [vmem:[#allocation3 + $0xb8] sm:$0xff] %vm2101_vm11, %v2052_v11 }
 0x347   : > { %1746 = vst.msk [vmem:[#allocation3 + $0xf0] sm:$0xff] %vm1715_vm9, %v1680_v33 }
 0x349   : > { %v1875_v53 = vpop.permute.xlu2 %1874 }
 0x34c   : > { %v2064_v17 = vpop.permute.xlu1 %2063 }
 0x34d   : > { %2131 = vst.msk [vmem:[#allocation3 + $0xe8] sm:$0xff] %vm2101_vm11, %v2064_v17  ;;  %v2157_v40 = vld [vmem:[#allocation3 + $0xb8] sm:$0xff]  ;;  %v1488_v41 = vpop.permute.xlu0 %1487 }
 0x34e   : > { %2709 = vmatmul.msk.f32.gmra.mxu2 %vm2175_vm12, %v2157_v40  ;;  %1553 = vst.msk [vmem:[#allocation3 + $0xf8] sm:$0xff] %vm1521_vm8, %v1488_v41 }
 0x351   : > { %v4104_v14 = vpop.f32.mrf.mxu2 }
 0x352   : > { %2576 = vst.msk [vmem:[%s3995_s16 + $0x90] sm:$0xff] %vm436_vm0, %v4104_v14 }
 0x354   : > { %v1873_v2 = vpop.permute.xlu1 %1872  ;;  %v2163_v56 = vld [vmem:[#allocation3 + $0xe8] sm:$0xff] }
 0x355   : > { %1939 = vst.msk [vmem:[#allocation3 + $0xf0] sm:$0xff] %vm1908_vm10, %v1873_v2  ;;  %2715 = vmatmul.msk.f32.gmra.mxu3 %vm2175_vm12, %v2163_v56  ;;  %v2068_v38 = vpop.permute.xlu0 %2067 }
 0x356   : > { %2132 = vst.msk [vmem:[#allocation3 + $0xf0] sm:$0xff] %vm2101_vm11, %v2066_v44 }
 0x358   : > { %v4112_v34 = vpop.f32.mrf.mxu3 }
 0x359   : > { %2582 = vst.msk [vmem:[%s3995_s16 + $0xc0] sm:$0xff] %vm436_vm0, %v4112_v34 }
 0x35b   : > { %v2307_v18 = vpop.f32.mrf.mxu0 }
 0x35c   : > { %v2396_v60 = vsel %vm436_vm0, %v2307_v18, 0.0  ;;  %v2462_v57 = vmul.f32 %v2307_v18, %v2307_v18  ;;  %2564 = vst.msk [vmem:[%s3995_s16 + $0x30] sm:$0xff] %vm436_vm0, %v2307_v18  ;;  %v1682_v42 = vpop.permute.xlu1 %1681  ;;  %v2325_v50 = vpop.f32.mrf.mxu1  ;;  %v2472_v18 = vmul.f32 %v4059_v62, %v4059_v62 }
 0x35d   : > { %v2397_v36 = vadd.f32 %v2396_v60, %v2395_v39  ;;  %1747 = vst.msk [vmem:[#allocation3 + $0xf8] sm:$0xff] %vm1715_vm9, %v1682_v42  ;;  %v2164_v61 = vld [vmem:[#allocation3 + $0xf0] sm:$0xff]  ;;  %v2468_v4 = vmul.f32 %v2325_v50, %v2325_v50  ;;  %v2408_v45 = vsel %vm436_vm0, %v2325_v50, 0.0 }
 0x35e   : > { %v2499_v43 = vsel %vm436_vm0, %v2462_v57, 0.0  ;;  %1940 = vst.msk [vmem:[#allocation3 + $0xf8] sm:$0xff] %vm1908_vm10, %v1875_v53  ;;  %2716 = vmatmul.msk.f32.gmra.mxu3 %vm2175_vm12, %v2164_v61 }
 0x35f   : > { %v2500_v49 = vadd.f32 %v2499_v43, %v2498_v27  ;;  %2133 = vst.msk [vmem:[#allocation3 + $0xf8] sm:$0xff] %vm2101_vm11, %v2068_v38  ;;  %v2511_v39 = vsel %vm436_vm0, %v2468_v4, 0.0  ;;  %v2416_v38 = vsel %vm436_vm0, %v4059_v62, 0.0 }
 0x360   : > { %2570 = vst.msk [vmem:[%s3995_s16 + $0x60] sm:$0xff] %vm436_vm0, %v2325_v50 }
 0x366   : > { %v2165_v0 = vld [vmem:[#allocation3 + $0xf8] sm:$0xff] }
 0x367   : > { %2717 = vmatmul.msk.f32.gmra.mxu3 %vm2175_vm12, %v2165_v0  ;;  %v2418_v0 = vsel %vm436_vm0, %v4079_v63, 0.0 }
 0x371   : > { %v4128_v29 = vpop.f32.mrf.mxu2 }
 0x372   : > { %2577 = vst.msk [vmem:[%s3995_s16 + $0x98] sm:$0xff] %vm436_vm0, %v4128_v29 }
 0x378   : > { %v4133_v5 = vpop.f32.mrf.mxu3 }
 0x379   : > { %2583 = vst.msk [vmem:[%s3995_s16 + $0xc8] sm:$0xff] %vm436_vm0, %v4133_v5 }
 0x37b   : > { %v2310_v54 = vpop.f32.mrf.mxu0 }
 0x37c   : > { %v2398_v59 = vsel %vm436_vm0, %v2310_v54, 0.0  ;;  %v2463_v55 = vmul.f32 %v2310_v54, %v2310_v54  ;;  %2565 = vst.msk [vmem:[%s3995_s16 + $0x38] sm:$0xff] %vm436_vm0, %v2310_v54  ;;  %v2328_v12 = vpop.f32.mrf.mxu1  ;;  %v2474_v54 = vmul.f32 %v4104_v14, %v4104_v14 }
 0x37d   : > { %v2399_v1 = vadd.f32 %v2398_v59, %v2397_v36  ;;  %2571 = vst.msk [vmem:[%s3995_s16 + $0x68] sm:$0xff] %vm436_vm0, %v2328_v12  ;;  %v2469_v31 = vmul.f32 %v2328_v12, %v2328_v12  ;;  %v2410_v19 = vsel %vm436_vm0, %v2328_v12, 0.0  ;;  %v2473_v36 = vmul.f32 %v4079_v63, %v4079_v63 }
 0x37e   : > { %v2501_v9 = vsel %vm436_vm0, %v2463_v55, 0.0  ;;  %v2420_v12 = vsel %vm436_vm0, %v4104_v14, 0.0  ;;  %v2523_v21 = vsel %vm436_vm0, %v2474_v54, 0.0 }
 0x37f   : > { %v2401_v3 = vadd.f32 %v2400_v30, %v2399_v1  ;;  %v2502_v28 = vadd.f32 %v2501_v9, %v2500_v49  ;;  %v2513_v22 = vsel %vm436_vm0, %v2469_v31, 0.0  ;;  %v2519_v49 = vsel %vm436_vm0, %v2472_v18, 0.0 }
 0x380   : > { %v2521_v62 = vsel %vm436_vm0, %v2473_v36, 0.0  ;;  %v2475_v1 = vmul.f32 %v4128_v29, %v4128_v29  ;;  %v2422_v9 = vsel %vm436_vm0, %v4128_v29, 0.0  ;;  %v2480_v31 = vmul.f32 %v4112_v34, %v4112_v34 }
 0x381   : > { %v2403_v26 = vadd.f32 %v2402_v6, %v2401_v3  ;;  %v2504_v10 = vadd.f32 %v2503_v23, %v2502_v28 }
 0x382   : > { %v2525_v6 = vsel %vm436_vm0, %v2475_v1, 0.0 }
 0x383   : > { %v2405_v16 = vadd.f32 %v2404_v52, %v2403_v26  ;;  %v2506_v24 = vadd.f32 %v2505_v37, %v2504_v10 }
 0x385   : > { %v2508_v35 = vadd.f32 %v2507_v48, %v2506_v24  ;;  %v2407_v7 = vadd.f32 %v2406_v58, %v2405_v16 }
 0x387   : > { %v2409_v8 = vadd.f32 %v2408_v45, %v2407_v7  ;;  %v2510_v51 = vadd.f32 %v2509_v46, %v2508_v35 }
 0x389   : > { %v2411_v11 = vadd.f32 %v2410_v19, %v2409_v8  ;;  %v2512_v25 = vadd.f32 %v2511_v39, %v2510_v51 }
 0x38b   : > { %v2514_v27 = vadd.f32 %v2513_v22, %v2512_v25  ;;  %v2481_v25 = vmul.f32 %v4133_v5, %v4133_v5 }
 0x391   : > { %v2349_v13 = vpop.f32.mrf.mxu2 }
 0x392   : > { %2578 = vst.msk [vmem:[%s3995_s16 + $0xa0] sm:$0xff] %vm436_vm0, %v2349_v13  ;;  %v2476_v3 = vmul.f32 %v2349_v13, %v2349_v13  ;;  %v2424_v15 = vsel %vm436_vm0, %v2349_v13, 0.0 }
 0x393   : > { %v2331_v47 = vpop.f32.mrf.mxu1 }
 0x394   : > { %2572 = vst.msk [vmem:[%s3995_s16 + $0x70] sm:$0xff] %vm436_vm0, %v2331_v47  ;;  %v2470_v17 = vmul.f32 %v2331_v47, %v2331_v47  ;;  %v2412_v40 = vsel %vm436_vm0, %v2331_v47, 0.0  ;;  %v2527_v10 = vsel %vm436_vm0, %v2476_v3, 0.0  ;;  %v2535_v47 = vsel %vm436_vm0, %v2480_v31, 0.0 }
 0x395   : > { %v2413_v2 = vadd.f32 %v2412_v40, %v2411_v11  ;;  %v2432_v11 = vsel %vm436_vm0, %v4112_v34, 0.0  ;;  %v2537_v34 = vsel %vm436_vm0, %v2481_v25, 0.0 }
 0x396   : > { %v2515_v44 = vsel %vm436_vm0, %v2470_v17, 0.0  ;;  %v2434_v17 = vsel %vm436_vm0, %v4133_v5, 0.0 }
 0x397   : > { %v2516_v57 = vadd.f32 %v2515_v44, %v2514_v27 }
 0x398   : > { %v4172_v33 = vpop.f32.mrf.mxu3 }
 0x399   : > { %2584 = vst.msk [vmem:[%s3995_s16 + $0xd0] sm:$0xff] %vm436_vm0, %v4172_v33  ;;  %v2482_v40 = vmul.f32 %v4172_v33, %v4172_v33 }
 0x3a9   : > { %v2352_v41 = vpop.f32.mrf.mxu2 }
 0x3aa   : > { %2579 = vst.msk [vmem:[%s3995_s16 + $0xa8] sm:$0xff] %vm436_vm0, %v2352_v41  ;;  %v2477_v29 = vmul.f32 %v2352_v41, %v2352_v41  ;;  %v2426_v24 = vsel %vm436_vm0, %v2352_v41, 0.0 }
 0x3ab   : > { %v2334_v56 = vpop.f32.mrf.mxu1 }
 0x3ac   : > { %v2414_v53 = vsel %vm436_vm0, %v2334_v56, 0.0  ;;  %v2471_v60 = vmul.f32 %v2334_v56, %v2334_v56  ;;  %2573 = vst.msk [vmem:[%s3995_s16 + $0x78] sm:$0xff] %vm436_vm0, %v2334_v56  ;;  %v2529_v4 = vsel %vm436_vm0, %v2477_v29, 0.0 }
 0x3ad   : > { %v2415_v42 = vadd.f32 %v2414_v53, %v2413_v2  ;;  %v2436_v2 = vsel %vm436_vm0, %v4172_v33, 0.0 }
 0x3ae   : > { %v2517_v61 = vsel %vm436_vm0, %v2471_v60, 0.0  ;;  %v2539_v60 = vsel %vm436_vm0, %v2482_v40, 0.0 }
 0x3af   : > { %v2417_v50 = vadd.f32 %v2416_v38, %v2415_v42  ;;  %v2518_v43 = vadd.f32 %v2517_v61, %v2516_v57 }
 0x3b0   : > { %v2370_v32 = vpop.f32.mrf.mxu3 }
 0x3b1   : > { %v2419_v59 = vadd.f32 %v2418_v0, %v2417_v50  ;;  %v2520_v55 = vadd.f32 %v2519_v49, %v2518_v43  ;;  %2585 = vst.msk [vmem:[%s3995_s16 + $0xd8] sm:$0xff] %vm436_vm0, %v2370_v32  ;;  %v2483_v5 = vmul.f32 %v2370_v32, %v2370_v32  ;;  %v2438_v42 = vsel %vm436_vm0, %v2370_v32, 0.0 }
 0x3b3   : > { %v2421_v30 = vadd.f32 %v2420_v12, %v2419_v59  ;;  %v2522_v63 = vadd.f32 %v2521_v62, %v2520_v55  ;;  %v2541_v36 = vsel %vm436_vm0, %v2483_v5, 0.0 }
 0x3b5   : > { %v2524_v28 = vadd.f32 %v2523_v21, %v2522_v63  ;;  %v2423_v23 = vadd.f32 %v2422_v9, %v2421_v30 }
 0x3b7   : > { %v2425_v14 = vadd.f32 %v2424_v15, %v2423_v23  ;;  %v2526_v26 = vadd.f32 %v2525_v6, %v2524_v28 }
 0x3b9   : > { %v2528_v37 = vadd.f32 %v2527_v10, %v2526_v26  ;;  %v2427_v58 = vadd.f32 %v2426_v24, %v2425_v14 }
 0x3bb   : > { %v2530_v46 = vadd.f32 %v2529_v4, %v2528_v37 }
 0x3c1   : > { %v2355_v52 = vpop.f32.mrf.mxu2 }
 0x3c2   : > { %2580 = vst.msk [vmem:[%s3995_s16 + $0xb0] sm:$0xff] %vm436_vm0, %v2355_v52  ;;  %v2478_v16 = vmul.f32 %v2355_v52, %v2355_v52  ;;  %v2428_v48 = vsel %vm436_vm0, %v2355_v52, 0.0 }
 0x3c3   : > { %v2429_v7 = vadd.f32 %v2428_v48, %v2427_v58 }
 0x3c4   : > { %v2531_v35 = vsel %vm436_vm0, %v2478_v16, 0.0 }
 0x3c5   : > { %v2532_v39 = vadd.f32 %v2531_v35, %v2530_v46 }
 0x3c8   : > { %v2373_v20 = vpop.f32.mrf.mxu3 }
 0x3c9   : > { %2586 = vst.msk [vmem:[%s3995_s16 + $0xe0] sm:$0xff] %vm436_vm0, %v2373_v20  ;;  %v2484_v61 = vmul.f32 %v2373_v20, %v2373_v20  ;;  %v2440_v33 = vsel %vm436_vm0, %v2373_v20, 0.0 }
 0x3cb   : > { %v2543_v0 = vsel %vm436_vm0, %v2484_v61, 0.0 }
 0x3d1   : > { %v2358_v45 = vpop.f32.mrf.mxu2 }
 0x3d2   : > { %v2430_v8 = vsel %vm436_vm0, %v2358_v45, 0.0  ;;  %v2479_v51 = vmul.f32 %v2358_v45, %v2358_v45  ;;  %2581 = vst.msk [vmem:[%s3995_s16 + $0xb8] sm:$0xff] %vm436_vm0, %v2358_v45 }
 0x3d3   : > { %v2431_v19 = vadd.f32 %v2430_v8, %v2429_v7 }
 0x3d4   : > { %v2533_v22 = vsel %vm436_vm0, %v2479_v51, 0.0 }
 0x3d5   : > { %v2433_v27 = vadd.f32 %v2432_v11, %v2431_v19  ;;  %v2534_v13 = vadd.f32 %v2533_v22, %v2532_v39 }
 0x3d7   : > { %v2435_v41 = vadd.f32 %v2434_v17, %v2433_v27  ;;  %v2536_v44 = vadd.f32 %v2535_v47, %v2534_v13 }
 0x3d8   : > { %v2376_v56 = vpop.f32.mrf.mxu3 }
 0x3d9   : > { %v2437_v18 = vadd.f32 %v2436_v2, %v2435_v41  ;;  %v2538_v53 = vadd.f32 %v2537_v34, %v2536_v44  ;;  %2587 = vst.msk [vmem:[%s3995_s16 + $0xe8] sm:$0xff] %vm436_vm0, %v2376_v56  ;;  %v2485_v54 = vmul.f32 %v2376_v56, %v2376_v56  ;;  %v2442_v62 = vsel %vm436_vm0, %v2376_v56, 0.0 }
 0x3db   : > { %v2540_v57 = vadd.f32 %v2539_v60, %v2538_v53  ;;  %v2439_v38 = vadd.f32 %v2438_v42, %v2437_v18  ;;  %v2545_v1 = vsel %vm436_vm0, %v2485_v54, 0.0 }
 0x3dd   : > { %v2542_v43 = vadd.f32 %v2541_v36, %v2540_v57  ;;  %v2441_v49 = vadd.f32 %v2440_v33, %v2439_v38 }
 0x3df   : > { %v2544_v55 = vadd.f32 %v2543_v0, %v2542_v43  ;;  %v2443_v12 = vadd.f32 %v2442_v62, %v2441_v49 }
 0x3e1   : > { %v2379_v50 = vpop.f32.mrf.mxu3  ;;  %v2546_v63 = vadd.f32 %v2545_v1, %v2544_v55 }
 0x3e2   : > { %2588 = vst.msk [vmem:[%s3995_s16 + $0xf0] sm:$0xff] %vm436_vm0, %v2379_v50  ;;  %v2486_v59 = vmul.f32 %v2379_v50, %v2379_v50  ;;  %v2444_v32 = vsel %vm436_vm0, %v2379_v50, 0.0 }
 0x3e3   : > { %v2445_v21 = vadd.f32 %v2444_v32, %v2443_v12 }
 0x3e4   : > { %v2547_v30 = vsel %vm436_vm0, %v2486_v59, 0.0 }
 0x3e5   : > { %v2548_v23 = vadd.f32 %v2547_v30, %v2546_v63 }
 0x3ea   : > { %v2382_v9 = vpop.f32.mrf.mxu3 }
 0x3eb   : > { %v2446_v3 = vsel %vm436_vm0, %v2382_v9, 0.0  ;;  %v2487_v28 = vmul.f32 %v2382_v9, %v2382_v9  ;;  %2589 = vst.msk [vmem:[%s3995_s16 + $0xf8] sm:$0xff] %vm436_vm0, %v2382_v9 }
 0x3ec   : > { %v2447_v6 = vadd.f32 %v2446_v3, %v2445_v21 }
 0x3ed   : > { %v2549_v15 = vsel %vm436_vm0, %v2487_v28, 0.0 }
 0x3ee   : > { %v2448_v14 = vrot.slane %v2447_v6, 4  ;;  %v2550_v26 = vadd.f32 %v2549_v15, %v2548_v23 }
 0x3f0   : > { %v2449_v10 = vadd.f32 %v2448_v14, %v2447_v6  ;;  %v2551_v37 = vrot.slane %v2550_v26, 4 }
 0x3f2   : > { %v2450_v52 = vrot.slane %v2449_v10, 2  ;;  %v2552_v20 = vadd.f32 %v2551_v37, %v2550_v26 }
 0x3f4   : > { %v2451_v29 = vadd.f32 %v2450_v52, %v2449_v10  ;;  %v2553_v16 = vrot.slane %v2552_v20, 2 }
 0x3f6   : > { %v2452_v24 = vrot.slane %v2451_v29, 1  ;;  %v2554_v48 = vadd.f32 %v2553_v16, %v2552_v20 }
 0x3f8   : > { %v2453_v58 = vadd.f32 %v2452_v24, %v2451_v29  ;;  %v2555_v4 = vrot.slane %v2554_v48, 1 }
 0x3fa   : > { %2455 = vst.msk [vmem:[%s235_s14] sm:$0x1] %vm2454_vm13, %v2453_v58  ;;  %v2556_v35 = vadd.f32 %v2555_v4, %v2554_v48 }
 0x3fc   : > { %2557 = vst.msk [vmem:[%s235_s14 + $0x1] sm:$0x1] %vm2454_vm13, %v2556_v35 }
 0x3fd PF: > { %s16_s18 = sadd.s32 1, %s2776_s18  }
 0x3fe   : > { %p13_p4 = scmp.ge.s32.totalorder %s16_s18, 4  }
 0x400   :  { %15 = sbr.rel (!%p13_p4) target bundleno = 1 (0x1), region = 80 }

// kernel: conv_block_forward.3
= control target key start
LH: loop header
LB: loop body
LE: loop exit
PB: predicated region body
PF: predicated region fallthrough
CT: control target
= control target key end

     0   :  { %s2571_s12 = smov 0   ;;  %s3935_s0 = inlined_call_operand.vmem [shape: f32[2,16,16,4], index: 0, kind: input, shape index: {}]   ;;  %s3936_s1 = inlined_call_operand.vmem [shape: f32[36,8], index: 1, kind: input, shape index: {}]   ;;  %s3937_s2 = inlined_call_operand.vmem [shape: f32[2,16,16,8], index: 2, kind: output, shape index: {0}]   ;;  %s3938_s3 = inlined_call_operand.vmem [shape: f32[2,2,8], index: 3, kind: output, shape index: {1}]  }
   0x1 LB: > { %s2455_s13 = sadd.s32 4294967295, %s2540_s12   ;;  %p2459_p0 = scmp.ge.s32.totalorder %s2540_s12, 1  ;;  %s2540_s12 = sphi %s2571_s12, %s14_s12  }
   0x2   : > { %p140_p1 = scmp.lt.s32.totalorder %s2540_s12, 3 }
   0x4   : > { %p141_p2 = pnand %p2459_p0, %p140_p1 }
   0x6   : > { %144 = sbr.rel (%p141_p2) target bundleno = 1014 (0x3f6), region = 28 }
   0xb   : > { %vm214_vm0 = vcmask 31744   ;;  %v2542_v0 = vmov 0.0   ;;  %s2543_s14 = smov 4   ;;  %p168_p3 = scmp.lt.s32.totalorder %s2455_s13, 1  ;;  %vm217_vm1 = vcmask 25600   ;;  %vm527_vm2 = vcmask 64544  }
   0xc   : > { %215 = vst.msk [vmem:[#allocation2] sm:$0xff] %vm214_vm0, %v2542_v0  ;;  %s2544_s19 = smov 8   ;;  %s2545_s20 = smov 12   ;;  %vm720_vm3 = vcmask 97344   ;;  %vm913_vm4 = vcmask 130144   ;;  %vm1106_vm5 = vcmask 162944  }
   0xd   : > { %216 = vst.msk [vmem:[#allocation2 + $0x8] sm:$0xff] %vm214_vm0, %v2542_v0  ;;  %s4030_s13 = smov (!%p168_p3, %s2455_s13), 1  ;;  %s2546_s21 = smov 16   ;;  %vm1299_vm6 = vcmask 195744   ;;  %vm2046_vm7 = vcmask 1043456   ;;  %vm1493_vm8 = vcmask 228544  }
   0xe   : > { %219 = vst.msk [vmem:[#allocation2 + $0x18] sm:$0xff] %vm214_vm0, %v2542_v0  ;;  %s2500_s15 = sshll.u32 %s4030_s13, 8  ;;  %s2547_s22 = smov 20   ;;  %vm1686_vm9 = vcmask 261344   ;;  %vm1879_vm10 = vcmask 294144   ;;  %vm1949_vm11 = vcmask 293888  }
   0xf   : > { %220 = vst.msk [vmem:[#allocation2 + $0x20] sm:$0xff] %vm214_vm0, %v2542_v0  ;;  %s2654_s18 = scalar_lea.vmem %s3935_s0, %s2500_s15  ;;  %s2548_s23 = smov 28   ;;  %vm2163_vm12 = vcmask 64512   ;;  %vm2233_vm13 = vcmask 57344  }
  0x10   : > { %222 = vst.msk [vmem:[#allocation2 + $0x30] sm:$0xff] %vm214_vm0, %v2542_v0  ;;  %v182_v2 = vld [vmem:[%s2654_s18] sm:$0xff]  ;;  %v183_v5 = vld [vmem:[%s2654_s18 + $0x8] sm:$0xff]  ;;  %v184_v8 = vld [vmem:[%s2654_s18 + $0x10] sm:$0xff]  ;;  %s2549_s24 = smov 32   ;;  %s2550_s25 = smov 24  }
  0x11   : > { %223 = vst.msk [vmem:[#allocation2 + $0x38] sm:$0xff] %vm214_vm0, %v2542_v0  ;;  %v186_v6 = vld [vmem:[%s2654_s18 + $0x20] sm:$0xff]  ;;  %v187_v7 = vld [vmem:[%s2654_s18 + $0x28] sm:$0xff]  ;;  %v189_v9 = vld [vmem:[%s2654_s18 + $0x38] sm:$0xff]  ;;  %s3662_s11 = scalar_lea.vmem %s3937_s2, %s2500_s15 }
  0x12   : > { %225 = vst.msk [vmem:[#allocation2 + $0x48] sm:$0xff] %vm214_vm0, %v2542_v0  ;;  %v190_v10 = vld [vmem:[%s2654_s18 + $0x40] sm:$0xff]  ;;  %v185_v11 = vld [vmem:[%s2654_s18 + $0x18] sm:$0xff]  ;;  %v192_v12 = vld [vmem:[%s2654_s18 + $0x50] sm:$0xff] }
  0x13   : > { %226 = vst.msk [vmem:[#allocation2 + $0x50] sm:$0xff] %vm214_vm0, %v2542_v0  ;;  %v193_v13 = vld [vmem:[%s2654_s18 + $0x58] sm:$0xff]  ;;  %v188_v14 = vld [vmem:[%s2654_s18 + $0x30] sm:$0xff]  ;;  %v195_v16 = vld [vmem:[%s2654_s18 + $0x68] sm:$0xff] }
  0x14   : > { %v367_v1 = vld [vmem:[#allocation2 + $0x1] sm:$0xff]  ;;  %228 = vst.msk [vmem:[#allocation2 + $0x60] sm:$0xff] %vm214_vm0, %v2542_v0  ;;  %v196_v18 = vld [vmem:[%s2654_s18 + $0x70] sm:$0xff]  ;;  %v201_v25 = vld [vmem:[%s2654_s18 + $0x98] sm:$0xff] }
  0x15   : > { %431 = vrot.lane.b32.xlu0 %v367_v1, %s2543_s14  ;;  %229 = vst.msk [vmem:[#allocation2 + $0x68] sm:$0xff] %vm214_vm0, %v2542_v0  ;;  %v191_v19 = vld [vmem:[%s2654_s18 + $0x48] sm:$0xff]  ;;  %v198_v21 = vld [vmem:[%s2654_s18 + $0x80] sm:$0xff]  ;;  %v197_v29 = vld [vmem:[%s2654_s18 + $0x78] sm:$0xff] }
  0x16   : > { %231 = vst.msk [vmem:[#allocation2 + $0x78] sm:$0xff] %vm214_vm0, %v2542_v0  ;;  %v199_v22 = vld [vmem:[%s2654_s18 + $0x88] sm:$0xff]  ;;  %v194_v23 = vld [vmem:[%s2654_s18 + $0x60] sm:$0xff]  ;;  %v204_v30 = vld [vmem:[%s2654_s18 + $0xb0] sm:$0xff] }
  0x17   : > { %232 = vst.msk [vmem:[#allocation2 + $0x80] sm:$0xff] %vm214_vm0, %v2542_v0  ;;  %v202_v27 = vld [vmem:[%s2654_s18 + $0xa0] sm:$0xff]  ;;  %v205_v33 = vld [vmem:[%s2654_s18 + $0xb8] sm:$0xff]  ;;  %v200_v35 = vld [vmem:[%s2654_s18 + $0x90] sm:$0xff] }
  0x18   : > { %234 = vst.msk [vmem:[#allocation2 + $0x90] sm:$0xff] %vm214_vm0, %v2542_v0  ;;  %v207_v36 = vld [vmem:[%s2654_s18 + $0xc8] sm:$0xff]  ;;  %v208_v39 = vld [vmem:[%s2654_s18 + $0xd0] sm:$0xff]  ;;  %v210_v42 = vld [vmem:[%s2654_s18 + $0xe0] sm:$0xff] }
  0x19   : > { %235 = vst.msk [vmem:[#allocation2 + $0x98] sm:$0xff] %vm214_vm0, %v2542_v0  ;;  %v203_v41 = vld [vmem:[%s2654_s18 + $0xa8] sm:$0xff]  ;;  %v206_v47 = vld [vmem:[%s2654_s18 + $0xc0] sm:$0xff]  ;;  %v209_v51 = vld [vmem:[%s2654_s18 + $0xd8] sm:$0xff] }
  0x1a   : > { %237 = vst.msk [vmem:[#allocation2 + $0xa8] sm:$0xff] %vm214_vm0, %v2542_v0  ;;  %v211_v45 = vld [vmem:[%s2654_s18 + $0xe8] sm:$0xff]  ;;  %v303_v63 = vld [vmem:[#allocation2] sm:$0xff] }
  0x1b   : > { %238 = vst.msk [vmem:[#allocation2 + $0xb0] sm:$0xff] %vm214_vm0, %v2542_v0 }
  0x1c   : > { %240 = vst.msk [vmem:[#allocation2 + $0xc0] sm:$0xff] %vm214_vm0, %v2542_v0 }
  0x1d   : > { %241 = vst.msk [vmem:[#allocation2 + $0xc8] sm:$0xff] %vm214_vm0, %v2542_v0 }
  0x1e   : > { %243 = vst.msk [vmem:[#allocation2 + $0xd8] sm:$0xff] %vm214_vm0, %v2542_v0 }
  0x1f   : > { %244 = vst.msk [vmem:[#allocation2 + $0xe0] sm:$0xff] %vm214_vm0, %v2542_v0 }
  0x20   : > { %246 = vst.msk [vmem:[#allocation2 + $0xf0] sm:$0xff] %vm214_vm0, %v2542_v0 }
  0x21   : > { %247 = vst.msk [vmem:[#allocation2 + $0xf8] sm:$0xff] %vm214_vm0, %v2542_v0 }
  0x22   : > { %249 = vst.msk [vmem:[#allocation2 + $0x108] sm:$0xff] %vm214_vm0, %v2542_v0 }
  0x23   : > { %250 = vst.msk [vmem:[#allocation2 + $0x110] sm:$0xff] %vm214_vm0, %v2542_v0 }
  0x24   : > { %252 = vst.msk [vmem:[#allocation2 + $0x120] sm:$0xff] %vm214_vm0, %v2542_v0 }
  0x25   : > { %253 = vst.msk [vmem:[#allocation2 + $0x128] sm:$0xff] %vm214_vm0, %v2542_v0 }
  0x26   : > { %255 = vst.msk [vmem:[#allocation2 + $0x138] sm:$0xff] %vm214_vm0, %v2542_v0 }
  0x27   : > { %256 = vst.msk [vmem:[#allocation2 + $0x140] sm:$0xff] %vm214_vm0, %v2542_v0 }
  0x28   : > { %258 = vst.msk [vmem:[#allocation2 + $0x150] sm:$0xff] %vm214_vm0, %v2542_v0 }
  0x29   : > { %259 = vst.msk [vmem:[#allocation2 + $0x158] sm:$0xff] %vm214_vm0, %v2542_v0 }
  0x2a   : > { %261 = vst.msk [vmem:[#allocation2 + $0x168] sm:$0xff] %vm214_vm0, %v2542_v0 }
  0x2b   : > { %262 = vst.msk [vmem:[#allocation2 + $0x170] sm:$0xff] %vm214_vm0, %v2542_v0 }
  0x2c   : > { %264 = vst.msk [vmem:[#allocation2 + $0x180] sm:$0xff] %vm214_vm0, %v2542_v0 }
  0x2d   : > { %265 = vst.msk [vmem:[#allocation2 + $0x188] sm:$0xff] %vm214_vm0, %v2542_v0 }
  0x2e   : > { %267 = vst.msk [vmem:[#allocation2 + $0x198] sm:$0xff] %vm214_vm0, %v2542_v0 }
  0x2f   : > { %268 = vst.msk [vmem:[#allocation2 + $0x1a0] sm:$0xff] %vm214_vm0, %v2542_v0 }
  0x30   : > { %271 = vst.msk [vmem:[#allocation2 + $0x19] sm:$0xff] %vm214_vm0, %v182_v2 }
  0x31   : > { %218 = vst.msk [vmem:[#allocation2 + $0x10] sm:$0x3] %vm217_vm1, %v2542_v0 }
  0x32   : > { %221 = vst.msk [vmem:[#allocation2 + $0x28] sm:$0x3] %vm217_vm1, %v2542_v0 }
  0x33   : > { %224 = vst.msk [vmem:[#allocation2 + $0x40] sm:$0x3] %vm217_vm1, %v2542_v0 }
  0x34   : > { %227 = vst.msk [vmem:[#allocation2 + $0x58] sm:$0x3] %vm217_vm1, %v2542_v0 }
  0x35   : > { %230 = vst.msk [vmem:[#allocation2 + $0x70] sm:$0x3] %vm217_vm1, %v2542_v0 }
  0x36   : > { %233 = vst.msk [vmem:[#allocation2 + $0x88] sm:$0x3] %vm217_vm1, %v2542_v0 }
  0x37   : > { %v2680_v3 = vld [vmem:[#allocation2 + $0x19] sm:$0xff]  ;;  %236 = vst.msk [vmem:[#allocation2 + $0xa0] sm:$0x3] %vm217_vm1, %v2542_v0 }
  0x38   : > { %435 = vrot.lane.b32.xlu1 %v2680_v3, %s2543_s14  ;;  %v368_v4 = vld [vmem:[#allocation2 + $0x9] sm:$0xff]  ;;  %239 = vst.msk [vmem:[#allocation2 + $0xb8] sm:$0x3] %vm217_vm1, %v2542_v0 }
  0x39   : > { %433 = vrot.lane.b32.xlu0 %v368_v4, %s2543_s14  ;;  %242 = vst.msk [vmem:[#allocation2 + $0xd0] sm:$0x3] %vm217_vm1, %v2542_v0  ;;  %v561_v1 = vld [vmem:[#allocation2 + $0xa] sm:$0xff]  ;;  %v2888_v4 = vld [vmem:[#allocation2 + $0x18] sm:$0xff] }
  0x3a   : > { %245 = vst.msk [vmem:[#allocation2 + $0xe8] sm:$0x3] %vm217_vm1, %v2542_v0 }
  0x3b   : > { %248 = vst.msk [vmem:[#allocation2 + $0x100] sm:$0x3] %vm217_vm1, %v2542_v0 }
  0x3c   : > { %251 = vst.msk [vmem:[#allocation2 + $0x118] sm:$0x3] %vm217_vm1, %v2542_v0 }
  0x3d   : > { %254 = vst.msk [vmem:[#allocation2 + $0x130] sm:$0x3] %vm217_vm1, %v2542_v0 }
  0x3e   : > { %257 = vst.msk [vmem:[#allocation2 + $0x148] sm:$0x3] %vm217_vm1, %v2542_v0 }
  0x3f   : > { %260 = vst.msk [vmem:[#allocation2 + $0x160] sm:$0x3] %vm217_vm1, %v2542_v0 }
  0x40   : > { %263 = vst.msk [vmem:[#allocation2 + $0x178] sm:$0x3] %vm217_vm1, %v2542_v0 }
  0x41   : > { %266 = vst.msk [vmem:[#allocation2 + $0x190] sm:$0x3] %vm217_vm1, %v2542_v0 }
  0x42   : > { %269 = vst.msk [vmem:[#allocation2 + $0x1a8] sm:$0x3] %vm217_vm1, %v2542_v0 }
  0x43   : > { %272 = vst.msk [vmem:[#allocation2 + $0x21] sm:$0xff] %vm214_vm0, %v183_v5 }
  0x44   : > { %275 = vst.msk [vmem:[#allocation2 + $0x49] sm:$0xff] %vm214_vm0, %v186_v6  ;;  %v304_v6 = vld [vmem:[#allocation2 + $0x8] sm:$0xff] }
  0x45   : > { %276 = vst.msk [vmem:[#allocation2 + $0x51] sm:$0xff] %vm214_vm0, %v187_v7 }
  0x46   : > { %273 = vst.msk [vmem:[#allocation2 + $0x31] sm:$0xff] %vm214_vm0, %v184_v8 }
  0x47   : > { %278 = vst.msk [vmem:[#allocation2 + $0x69] sm:$0xff] %vm214_vm0, %v189_v9  ;;  %v560_v9 = vld [vmem:[#allocation2 + $0x2] sm:$0xff] }
  0x48   : > { %279 = vst.msk [vmem:[#allocation2 + $0x79] sm:$0xff] %vm214_vm0, %v190_v10 }
  0x49   : > { %274 = vst.msk [vmem:[#allocation2 + $0x39] sm:$0xff] %vm214_vm0, %v185_v11 }
  0x4a   : > { %v2726_v15 = vld [vmem:[#allocation2 + $0x21] sm:$0xff]  ;;  %281 = vst.msk [vmem:[#allocation2 + $0x91] sm:$0xff] %vm214_vm0, %v192_v12 }
  0x4b   : > { %437 = vrot.lane.b32.xlu1 %v2726_v15, %s2543_s14  ;;  %v2732_v17 = vld [vmem:[#allocation2 + $0x49] sm:$0xff]  ;;  %282 = vst.msk [vmem:[#allocation2 + $0x99] sm:$0xff] %vm214_vm0, %v193_v13  ;;  %v2899_v7 = vld [vmem:[#allocation2 + $0x1a] sm:$0xff] }
  0x4c   : > { %443 = vrot.lane.b32.xlu0 %v2732_v17, %s2543_s14  ;;  %277 = vst.msk [vmem:[#allocation2 + $0x61] sm:$0xff] %vm214_vm0, %v188_v14  ;;  %v2750_v24 = vld [vmem:[#allocation2 + $0x51] sm:$0xff]  ;;  %v2907_v10 = vld [vmem:[#allocation2 + $0x20] sm:$0xff]  ;;  %v2914_v12 = vld [vmem:[#allocation2 + $0x48] sm:$0xff] }
  0x4d   : > { %v2740_v20 = vld [vmem:[#allocation2 + $0x31] sm:$0xff]  ;;  %284 = vst.msk [vmem:[#allocation2 + $0xb1] sm:$0xff] %vm214_vm0, %v195_v16  ;;  %v2926_v16 = vld [vmem:[#allocation2 + $0x22] sm:$0xff] }
  0x4e   : > { %439 = vrot.lane.b32.xlu2 %v2740_v20, %s2543_s14  ;;  %285 = vst.msk [vmem:[#allocation2 + $0xc1] sm:$0xff] %vm214_vm0, %v196_v18  ;;  %v2754_v26 = vld [vmem:[#allocation2 + $0x69] sm:$0xff]  ;;  %v2922_v14 = vld [vmem:[#allocation2 + $0x52] sm:$0xff] }
  0x4f   : > { %280 = vst.msk [vmem:[#allocation2 + $0x81] sm:$0xff] %vm214_vm0, %v191_v19  ;;  %v2773_v31 = vld [vmem:[#allocation2 + $0x79] sm:$0xff]  ;;  %v2873_v61 = vld [vmem:[#allocation2 + $0x30] sm:$0xff] }
  0x50   : > { %287 = vst.msk [vmem:[#allocation2 + $0xd9] sm:$0xff] %vm214_vm0, %v198_v21  ;;  %v2761_v28 = vld [vmem:[#allocation2 + $0x39] sm:$0xff]  ;;  %v2930_v18 = vld [vmem:[#allocation2 + $0x50] sm:$0xff] }
  0x51   : > { %288 = vst.msk [vmem:[#allocation2 + $0xe1] sm:$0xff] %vm214_vm0, %v199_v22  ;;  %v2775_v32 = vld [vmem:[#allocation2 + $0x91] sm:$0xff]  ;;  %v2918_v13 = vld [vmem:[#allocation2 + $0x3a] sm:$0xff] }
  0x52   : > { %283 = vst.msk [vmem:[#allocation2 + $0xa9] sm:$0xff] %vm214_vm0, %v194_v23  ;;  %v2791_v37 = vld [vmem:[#allocation2 + $0x99] sm:$0xff] }
  0x53   : > { %445 = vrot.lane.b32.xlu1 %v2750_v24, %s2543_s14  ;;  %290 = vst.msk [vmem:[#allocation2 + $0xf9] sm:$0xff] %vm214_vm0, %v201_v25  ;;  %v2780_v34 = vld [vmem:[#allocation2 + $0x61] sm:$0xff]  ;;  %v2890_v5 = vld [vmem:[#allocation2 + $0x38] sm:$0xff] }
  0x54   : > { %449 = vrot.lane.b32.xlu0 %v2754_v26, %s2543_s14  ;;  %291 = vst.msk [vmem:[#allocation2 + $0x109] sm:$0xff] %vm214_vm0, %v202_v27  ;;  %v2793_v38 = vld [vmem:[#allocation2 + $0xb1] sm:$0xff]  ;;  %v2912_v11 = vld [vmem:[#allocation2 + $0x60] sm:$0xff]  ;;  %v2938_v21 = vld [vmem:[#allocation2 + $0x68] sm:$0xff] }
  0x55   : > { %286 = vst.msk [vmem:[#allocation2 + $0xc9] sm:$0xff] %vm214_vm0, %v197_v29  ;;  %v2809_v43 = vld [vmem:[#allocation2 + $0xc1] sm:$0xff]  ;;  %v2901_v8 = vld [vmem:[#allocation2 + $0x32] sm:$0xff]  ;;  %v2951_v29 = vld [vmem:[#allocation2 + $0x4a] sm:$0xff] }
  0x56   : > { %441 = vrot.lane.b32.xlu2 %v2761_v28, %s2543_s14  ;;  %293 = vst.msk [vmem:[#allocation2 + $0x121] sm:$0xff] %vm214_vm0, %v204_v30  ;;  %v2798_v40 = vld [vmem:[#allocation2 + $0x81] sm:$0xff] }
  0x57   : > { %294 = vst.msk [vmem:[#allocation2 + $0x129] sm:$0xff] %vm214_vm0, %v205_v33  ;;  %v2811_v44 = vld [vmem:[#allocation2 + $0xd9] sm:$0xff]  ;;  %v2942_v22 = vld [vmem:[#allocation2 + $0x62] sm:$0xff] }
  0x58   : > { %289 = vst.msk [vmem:[#allocation2 + $0xf1] sm:$0xff] %vm214_vm0, %v200_v35  ;;  %v2825_v48 = vld [vmem:[#allocation2 + $0xe1] sm:$0xff]  ;;  %v2957_v33 = vld [vmem:[#allocation2 + $0x78] sm:$0xff] }
  0x59   : > { %296 = vst.msk [vmem:[#allocation2 + $0x141] sm:$0xff] %vm214_vm0, %v207_v36  ;;  %v2816_v46 = vld [vmem:[#allocation2 + $0xa9] sm:$0xff]  ;;  %v2936_v19 = vld [vmem:[#allocation2 + $0x80] sm:$0xff] }
  0x5a   : > { %297 = vst.msk [vmem:[#allocation2 + $0x151] sm:$0xff] %vm214_vm0, %v208_v39  ;;  %v2827_v49 = vld [vmem:[#allocation2 + $0xf9] sm:$0xff]  ;;  %v2963_v35 = vld [vmem:[#allocation2 + $0xa8] sm:$0xff]  ;;  %v2965_v36 = vld [vmem:[#allocation2 + $0x90] sm:$0xff] }
  0x5b   : > { %451 = vrot.lane.b32.xlu1 %v2773_v31, %s2543_s14  ;;  %292 = vst.msk [vmem:[#allocation2 + $0x111] sm:$0xff] %vm214_vm0, %v203_v41  ;;  %v2839_v52 = vld [vmem:[#allocation2 + $0x109] sm:$0xff]  ;;  %v2946_v25 = vld [vmem:[#allocation2 + $0x7a] sm:$0xff] }
  0x5c   : > { %455 = vrot.lane.b32.xlu0 %v2775_v32, %s2543_s14  ;;  %299 = vst.msk [vmem:[#allocation2 + $0x169] sm:$0xff] %vm214_vm0, %v210_v42  ;;  %v2831_v50 = vld [vmem:[#allocation2 + $0xc9] sm:$0xff]  ;;  %v2973_v42 = vld [vmem:[#allocation2 + $0x9a] sm:$0xff] }
  0x5d   : > { %300 = vst.msk [vmem:[#allocation2 + $0x171] sm:$0xff] %vm214_vm0, %v211_v45  ;;  %v2841_v53 = vld [vmem:[#allocation2 + $0x121] sm:$0xff]  ;;  %v2978_v45 = vld [vmem:[#allocation2 + $0x6a] sm:$0xff] }
  0x5e   : > { %447 = vrot.lane.b32.xlu2 %v2780_v34, %s2543_s14  ;;  %295 = vst.msk [vmem:[#allocation2 + $0x139] sm:$0xff] %vm214_vm0, %v206_v47  ;;  %v2851_v55 = vld [vmem:[#allocation2 + $0x129] sm:$0xff]  ;;  %v2982_v47 = vld [vmem:[#allocation2 + $0x98] sm:$0xff] }
  0x5f   : > { %298 = vst.msk [vmem:[#allocation2 + $0x159] sm:$0xff] %vm214_vm0, %v209_v51  ;;  %v2845_v54 = vld [vmem:[#allocation2 + $0xf1] sm:$0xff]  ;;  %v2969_v39 = vld [vmem:[#allocation2 + $0x82] sm:$0xff] }
  0x60   : > { %v2853_v56 = vld [vmem:[#allocation2 + $0x141] sm:$0xff]  ;;  %339 = vst.msk [vmem:[#allocation3 + $0x20] sm:$0xff] %vm214_vm0, %v2873_v61 }
  0x61   : > { %v2863_v58 = vld [vmem:[#allocation2 + $0x151] sm:$0xff]  ;;  %335 = vst.msk [vmem:[#allocation3] sm:$0xff] %vm214_vm0, %v303_v63  ;;  %v2988_v51 = vld [vmem:[#allocation2 + $0xc8] sm:$0xff] }
  0x62   : > { %v2857_v57 = vld [vmem:[#allocation2 + $0x111] sm:$0xff]  ;;  %3969 = vst [vmem:[#allocation4_spill] sm:$0xff] %v2863_v58 }
  0x63   : > { %457 = vrot.lane.b32.xlu1 %v2791_v37, %s2543_s14  ;;  %v2865_v59 = vld [vmem:[#allocation2 + $0x169] sm:$0xff]  ;;  %337 = vst.msk [vmem:[#allocation3 + $0x10] sm:$0xff] %vm214_vm0, %v2888_v4 }
  0x64   : > { %461 = vrot.lane.b32.xlu0 %v2793_v38, %s2543_s14  ;;  %v2881_v0 = vld [vmem:[#allocation2 + $0x171] sm:$0xff]  ;;  %340 = vst.msk [vmem:[#allocation3 + $0x28] sm:$0xff] %vm214_vm0, %v2890_v5 }
  0x65   : > { %v2869_v60 = vld [vmem:[#allocation2 + $0x139] sm:$0xff]  ;;  %3970 = vst [vmem:[#allocation5_spill] sm:$0xff] %v2881_v0  ;;  %v2994_v63 = vld [vmem:[#allocation2 + $0xaa] sm:$0xff] }
  0x66   : > { %453 = vrot.lane.b32.xlu2 %v2798_v40, %s2543_s14  ;;  %v2885_v2 = vld [vmem:[#allocation2 + $0x159] sm:$0xff]  ;;  %336 = vst.msk [vmem:[#allocation3 + $0x8] sm:$0xff] %vm214_vm0, %v304_v6  ;;  %v2998_v6 = vld [vmem:[#allocation2 + $0xc2] sm:$0xff] }
  0x67   : > { %3971 = vst [vmem:[#allocation6_spill] sm:$0xff] %v2899_v7 }
  0x68   : > { %3972 = vst [vmem:[#allocation7_spill] sm:$0xff] %v2901_v8 }
  0x69   : > { %338 = vst.msk [vmem:[#allocation3 + $0x18] sm:$0xff] %vm214_vm0, %v2907_v10 }
  0x6a   : > { %343 = vst.msk [vmem:[#allocation3 + $0x40] sm:$0xff] %vm214_vm0, %v2912_v11 }
  0x6b   : > { %463 = vrot.lane.b32.xlu1 %v2809_v43, %s2543_s14  ;;  %3973 = vst [vmem:[#allocation8_spill] sm:$0xff] %v2918_v13 }
  0x6c   : > { %467 = vrot.lane.b32.xlu0 %v2811_v44, %s2543_s14  ;;  %341 = vst.msk [vmem:[#allocation3 + $0x30] sm:$0xff] %vm214_vm0, %v2914_v12 }
  0x6d   : > { %3974 = vst [vmem:[#allocation9_spill] sm:$0xff] %v2922_v14 }
  0x6e   : > { %459 = vrot.lane.b32.xlu2 %v2816_v46, %s2543_s14  ;;  %3975 = vst [vmem:[#allocation10_spill] sm:$0xff] %v2926_v16 }
  0x6f   : > { %342 = vst.msk [vmem:[#allocation3 + $0x38] sm:$0xff] %vm214_vm0, %v2930_v18 }
  0x70   : > { %346 = vst.msk [vmem:[#allocation3 + $0x58] sm:$0xff] %vm214_vm0, %v2936_v19 }
  0x71   : > { %3976 = vst [vmem:[#allocation11_spill] sm:$0xff] %v2942_v22 }
  0x72   : > { %344 = vst.msk [vmem:[#allocation3 + $0x48] sm:$0xff] %vm214_vm0, %v2938_v21 }
  0x73   : > { %469 = vrot.lane.b32.xlu1 %v2825_v48, %s2543_s14  ;;  %3977 = vst [vmem:[#allocation12_spill] sm:$0xff] %v2946_v25 }
  0x74   : > { %473 = vrot.lane.b32.xlu0 %v2827_v49, %s2543_s14  ;;  %3978 = vst [vmem:[#allocation13_spill] sm:$0xff] %v2951_v29 }
  0x75   : > { %345 = vst.msk [vmem:[#allocation3 + $0x50] sm:$0xff] %vm214_vm0, %v2957_v33 }
  0x76   : > { %465 = vrot.lane.b32.xlu2 %v2831_v50, %s2543_s14  ;;  %349 = vst.msk [vmem:[#allocation3 + $0x70] sm:$0xff] %vm214_vm0, %v2963_v35 }
  0x77   : > { %3979 = vst [vmem:[#allocation14_spill] sm:$0xff] %v2969_v39 }
  0x78   : > { %347 = vst.msk [vmem:[#allocation3 + $0x60] sm:$0xff] %vm214_vm0, %v2965_v36 }
  0x79   : > { %3980 = vst [vmem:[#allocation15_spill] sm:$0xff] %v2973_v42 }
  0x7a   : > { %3981 = vst [vmem:[#allocation16_spill] sm:$0xff] %v2978_v45 }
  0x7b   : > { %475 = vrot.lane.b32.xlu1 %v2839_v52, %s2543_s14  ;;  %348 = vst.msk [vmem:[#allocation3 + $0x68] sm:$0xff] %vm214_vm0, %v2982_v47 }
  0x7c   : > { %479 = vrot.lane.b32.xlu0 %v2841_v53, %s2543_s14  ;;  %352 = vst.msk [vmem:[#allocation3 + $0x88] sm:$0xff] %vm214_vm0, %v2988_v51 }
  0x7d   : > { %3982 = vst [vmem:[#allocation17_spill] sm:$0xff] %v2994_v63 }
  0x7e   : > { %471 = vrot.lane.b32.xlu2 %v2845_v54, %s2543_s14  ;;  %3983 = vst [vmem:[#allocation18_spill] sm:$0xff] %v2998_v6 }
  0x83   : > { %481 = vrot.lane.b32.xlu1 %v2851_v55, %s2543_s14 }
  0x84   : > { %485 = vrot.lane.b32.xlu0 %v2853_v56, %s2543_s14 }
  0x86   : > { %477 = vrot.lane.b32.xlu2 %v2857_v57, %s2543_s14 }
  0x87   : > { %v432_v62 = vpop.permute.xlu0 %431 }
  0x88   : > { %528 = vst.msk [vmem:[#allocation3] sm:$0xff] %vm527_vm2, %v432_v62  ;;  %v2990_v62 = vld [vmem:[#allocation2 + $0xb0] sm:$0xff] }
  0x89   : > { %350 = vst.msk [vmem:[#allocation3 + $0x78] sm:$0xff] %vm214_vm0, %v2990_v62 }
  0x8b   : > { %487 = vrot.lane.b32.xlu1 %v2863_v58, %s2543_s14 }
  0x8c   : > { %491 = vrot.lane.b32.xlu0 %v2865_v59, %s2543_s14 }
  0x8e   : > { %483 = vrot.lane.b32.xlu2 %v2869_v60, %s2543_s14 }
  0x93   : > { %493 = vrot.lane.b32.xlu1 %v2881_v0, %s2543_s14  ;;  %v3122_v0 = vld [vmem:[#allocation2 + $0x168] sm:$0xff] }
  0x94   : > { %626 = vrot.lane.b32.xlu0 %v561_v1, %s2544_s19  ;;  %365 = vst.msk [vmem:[#allocation3 + $0xf0] sm:$0xff] %vm214_vm0, %v3122_v0 }
  0x96   : > { %489 = vrot.lane.b32.xlu2 %v2885_v2, %s2543_s14  ;;  %s2464_s14 = sshll.u32 %s4030_s13, 1 }
  0x97   : > { %s181_s17 = scalar_lea.vmem %s3938_s3, %s2464_s14 }
  0x9b   : > { %628 = vrot.lane.b32.xlu1 %v2899_v7, %s2544_s19  ;;  %v3095_v7 = vld [vmem:[#allocation2 + $0x158] sm:$0xff] }
  0x9c   : > { %632 = vrot.lane.b32.xlu0 %v2901_v8, %s2544_s19  ;;  %364 = vst.msk [vmem:[#allocation3 + $0xe8] sm:$0xff] %vm214_vm0, %v3095_v7  ;;  %v3104_v8 = vld [vmem:[#allocation2 + $0x152] sm:$0xff] }
  0x9d   : > { %3995 = vst [vmem:[#allocation30_spill] sm:$0xff] %v3104_v8 }
  0x9e   : > { %624 = vrot.lane.b32.xlu2 %v560_v9, %s2544_s19  ;;  %v3003_v9 = vld [vmem:[#allocation2 + $0x92] sm:$0xff] }
  0x9f   : > { %3984 = vst [vmem:[#allocation19_spill] sm:$0xff] %v3003_v9 }
  0xa3   : > { %634 = vrot.lane.b32.xlu1 %v2918_v13, %s2544_s19  ;;  %v3068_v13 = vld [vmem:[#allocation2 + $0x138] sm:$0xff] }
  0xa4   : > { %638 = vrot.lane.b32.xlu0 %v2922_v14, %s2544_s19  ;;  %361 = vst.msk [vmem:[#allocation3 + $0xd0] sm:$0xff] %vm214_vm0, %v3068_v13  ;;  %v3077_v14 = vld [vmem:[#allocation2 + $0x12a] sm:$0xff] }
  0xa5   : > { %3992 = vst [vmem:[#allocation27_spill] sm:$0xff] %v3077_v14 }
  0xa6   : > { %630 = vrot.lane.b32.xlu2 %v2926_v16, %s2544_s19 }
  0xa8   : > { %v440_v23 = vpop.permute.xlu2 %439 }
  0xa9   : > { %532 = vst.msk [vmem:[#allocation3 + $0x20] sm:$0xff] %vm527_vm2, %v440_v23  ;;  %v3007_v23 = vld [vmem:[#allocation2 + $0xc0] sm:$0xff] }
  0xaa   : > { %v436_v27 = vpop.permute.xlu1 %435  ;;  %351 = vst.msk [vmem:[#allocation3 + $0x80] sm:$0xff] %vm214_vm0, %v3007_v23 }
  0xab   : > { %640 = vrot.lane.b32.xlu1 %v2942_v22, %s2544_s19  ;;  %530 = vst.msk [vmem:[#allocation3 + $0x10] sm:$0xff] %vm527_vm2, %v436_v27  ;;  %v434_v30 = vpop.permute.xlu0 %433  ;;  %v3041_v22 = vld [vmem:[#allocation2 + $0x110] sm:$0xff] }
  0xac   : > { %644 = vrot.lane.b32.xlu0 %v2946_v25, %s2544_s19  ;;  %529 = vst.msk [vmem:[#allocation3 + $0x8] sm:$0xff] %vm527_vm2, %v434_v30  ;;  %v3050_v25 = vld [vmem:[#allocation2 + $0x10a] sm:$0xff] }
  0xad   : > { %358 = vst.msk [vmem:[#allocation3 + $0xb8] sm:$0xff] %vm214_vm0, %v3041_v22 }
  0xae   : > { %636 = vrot.lane.b32.xlu2 %v2951_v29, %s2544_s19  ;;  %3989 = vst [vmem:[#allocation24_spill] sm:$0xff] %v3050_v25  ;;  %v3100_v29 = vld [vmem:[#allocation2 + $0x13a] sm:$0xff] }
  0xaf   : > { %3994 = vst [vmem:[#allocation29_spill] sm:$0xff] %v3100_v29 }
  0xb0   : > { %v442_v41 = vpop.permute.xlu2 %441 }
  0xb1   : > { %533 = vst.msk [vmem:[#allocation3 + $0x28] sm:$0xff] %vm527_vm2, %v442_v41  ;;  %v3014_v41 = vld [vmem:[#allocation2 + $0xf0] sm:$0xff] }
  0xb2   : > { %355 = vst.msk [vmem:[#allocation3 + $0xa0] sm:$0xff] %vm214_vm0, %v3014_v41 }
  0xb3   : > { %646 = vrot.lane.b32.xlu1 %v2969_v39, %s2544_s19  ;;  %v3023_v39 = vld [vmem:[#allocation2 + $0xe2] sm:$0xff] }
  0xb4   : > { %650 = vrot.lane.b32.xlu0 %v2973_v42, %s2544_s19  ;;  %3986 = vst [vmem:[#allocation21_spill] sm:$0xff] %v3023_v39 }
  0xb6   : > { %642 = vrot.lane.b32.xlu2 %v2978_v45, %s2544_s19  ;;  %v3073_v45 = vld [vmem:[#allocation2 + $0x112] sm:$0xff] }
  0xb7   : > { %3991 = vst [vmem:[#allocation26_spill] sm:$0xff] %v3073_v45 }
  0xb8   : > { %v448_v1 = vpop.permute.xlu2 %447 }
  0xb9   : > { %536 = vst.msk [vmem:[#allocation3 + $0x40] sm:$0xff] %vm527_vm2, %v448_v1  ;;  %v3017_v1 = vld [vmem:[#allocation2 + $0xd8] sm:$0xff] }
  0xba   : > { %353 = vst.msk [vmem:[#allocation3 + $0x90] sm:$0xff] %vm214_vm0, %v3017_v1 }
  0xbb   : > { %652 = vrot.lane.b32.xlu1 %v2994_v63, %s2544_s19  ;;  %v3019_v63 = vld [vmem:[#allocation2 + $0xca] sm:$0xff] }
  0xbc   : > { %656 = vrot.lane.b32.xlu0 %v2998_v6, %s2544_s19  ;;  %3985 = vst [vmem:[#allocation20_spill] sm:$0xff] %v3019_v63 }
  0xbd   : > { %v438_v27 = vpop.permute.xlu1 %437 }
  0xbe   : > { %531 = vst.msk [vmem:[#allocation3 + $0x18] sm:$0xff] %vm527_vm2, %v438_v27  ;;  %v444_v30 = vpop.permute.xlu0 %443  ;;  %648 = vrot.lane.b32.xlu2 %v3003_v9, %s2544_s19  ;;  %v3030_v27 = vld [vmem:[#allocation2 + $0xb2] sm:$0xff] }
  0xbf   : > { %534 = vst.msk [vmem:[#allocation3 + $0x30] sm:$0xff] %vm527_vm2, %v444_v30  ;;  %v3034_v30 = vld [vmem:[#allocation2 + $0xe0] sm:$0xff]  ;;  %v3046_v9 = vld [vmem:[#allocation2 + $0xf2] sm:$0xff] }
  0xc0   : > { %v454_v6 = vpop.permute.xlu2 %453  ;;  %3987 = vst [vmem:[#allocation22_spill] sm:$0xff] %v3030_v27 }
  0xc1   : > { %539 = vst.msk [vmem:[#allocation3 + $0x58] sm:$0xff] %vm527_vm2, %v454_v6 }
  0xc2   : > { %354 = vst.msk [vmem:[#allocation3 + $0x98] sm:$0xff] %vm214_vm0, %v3034_v30 }
  0xc3   : > { %658 = vrot.lane.b32.xlu1 %v3019_v63, %s2544_s19  ;;  %v3044_v63 = vld [vmem:[#allocation2 + $0xf8] sm:$0xff]  ;;  %3988 = vst [vmem:[#allocation23_spill] sm:$0xff] %v3046_v9 }
  0xc4   : > { %662 = vrot.lane.b32.xlu0 %v3023_v39, %s2544_s19  ;;  %356 = vst.msk [vmem:[#allocation3 + $0xa8] sm:$0xff] %vm214_vm0, %v3044_v63 }
  0xc5   : > { %v446_v42 = vpop.permute.xlu1 %445 }
  0xc6   : > { %535 = vst.msk [vmem:[#allocation3 + $0x38] sm:$0xff] %vm527_vm2, %v446_v42  ;;  %v450_v6 = vpop.permute.xlu0 %449  ;;  %654 = vrot.lane.b32.xlu2 %v3030_v27, %s2544_s19  ;;  %v3057_v42 = vld [vmem:[#allocation2 + $0xda] sm:$0xff] }
  0xc7   : > { %537 = vst.msk [vmem:[#allocation3 + $0x48] sm:$0xff] %vm527_vm2, %v450_v6  ;;  %v3061_v6 = vld [vmem:[#allocation2 + $0x108] sm:$0xff] }
  0xc8   : > { %v460_v39 = vpop.permute.xlu2 %459  ;;  %3990 = vst [vmem:[#allocation25_spill] sm:$0xff] %v3057_v42 }
  0xc9   : > { %542 = vst.msk [vmem:[#allocation3 + $0x70] sm:$0xff] %vm527_vm2, %v460_v39 }
  0xca   : > { %357 = vst.msk [vmem:[#allocation3 + $0xb0] sm:$0xff] %vm214_vm0, %v3061_v6 }
  0xcb   : > { %664 = vrot.lane.b32.xlu1 %v3046_v9, %s2544_s19  ;;  %v3071_v9 = vld [vmem:[#allocation2 + $0x120] sm:$0xff] }
  0xcc   : > { %668 = vrot.lane.b32.xlu0 %v3050_v25, %s2544_s19  ;;  %359 = vst.msk [vmem:[#allocation3 + $0xc0] sm:$0xff] %vm214_vm0, %v3071_v9 }
  0xcd   : > { %v452_v27 = vpop.permute.xlu1 %451 }
  0xce   : > { %538 = vst.msk [vmem:[#allocation3 + $0x50] sm:$0xff] %vm527_vm2, %v452_v27  ;;  %v456_v39 = vpop.permute.xlu0 %455  ;;  %660 = vrot.lane.b32.xlu2 %v3057_v42, %s2544_s19  ;;  %v3084_v27 = vld [vmem:[#allocation2 + $0xfa] sm:$0xff] }
  0xcf   : > { %540 = vst.msk [vmem:[#allocation3 + $0x60] sm:$0xff] %vm527_vm2, %v456_v39  ;;  %v3088_v39 = vld [vmem:[#allocation2 + $0x128] sm:$0xff] }
  0xd0   : > { %v466_v25 = vpop.permute.xlu2 %465  ;;  %3993 = vst [vmem:[#allocation28_spill] sm:$0xff] %v3084_v27 }
  0xd1   : > { %545 = vst.msk [vmem:[#allocation3 + $0x88] sm:$0xff] %vm527_vm2, %v466_v25 }
  0xd2   : > { %360 = vst.msk [vmem:[#allocation3 + $0xc8] sm:$0xff] %vm214_vm0, %v3088_v39 }
  0xd3   : > { %670 = vrot.lane.b32.xlu1 %v3073_v45, %s2544_s19  ;;  %v3098_v45 = vld [vmem:[#allocation2 + $0x140] sm:$0xff] }
  0xd4   : > { %674 = vrot.lane.b32.xlu0 %v3077_v14, %s2544_s19  ;;  %362 = vst.msk [vmem:[#allocation3 + $0xd8] sm:$0xff] %vm214_vm0, %v3098_v45 }
  0xd5   : > { %v458_v42 = vpop.permute.xlu1 %457 }
  0xd6   : > { %541 = vst.msk [vmem:[#allocation3 + $0x68] sm:$0xff] %vm527_vm2, %v458_v42  ;;  %v462_v25 = vpop.permute.xlu0 %461  ;;  %666 = vrot.lane.b32.xlu2 %v3084_v27, %s2544_s19  ;;  %v3111_v42 = vld [vmem:[#allocation2 + $0x122] sm:$0xff] }
  0xd7   : > { %543 = vst.msk [vmem:[#allocation3 + $0x78] sm:$0xff] %vm527_vm2, %v462_v25  ;;  %v3115_v25 = vld [vmem:[#allocation2 + $0x150] sm:$0xff] }
  0xd8   : > { %v472_v14 = vpop.permute.xlu2 %471  ;;  %3996 = vst [vmem:[#allocation31_spill] sm:$0xff] %v3111_v42 }
  0xd9   : > { %548 = vst.msk [vmem:[#allocation3 + $0xa0] sm:$0xff] %vm527_vm2, %v472_v14 }
  0xda   : > { %363 = vst.msk [vmem:[#allocation3 + $0xe0] sm:$0xff] %vm214_vm0, %v3115_v25 }
  0xdb   : > { %676 = vrot.lane.b32.xlu1 %v3100_v29, %s2544_s19  ;;  %v3125_v29 = vld [vmem:[#allocation2 + $0x15a] sm:$0xff] }
  0xdc   : > { %680 = vrot.lane.b32.xlu0 %v3104_v8, %s2544_s19  ;;  %3997 = vst [vmem:[#allocation32_spill] sm:$0xff] %v3125_v29  ;;  %v3129_v8 = vld [vmem:[#allocation2 + $0x172] sm:$0xff] }
  0xdd   : > { %v464_v27 = vpop.permute.xlu1 %463  ;;  %3998 = vst [vmem:[#allocation33_spill] sm:$0xff] %v3129_v8 }
  0xde   : > { %544 = vst.msk [vmem:[#allocation3 + $0x80] sm:$0xff] %vm527_vm2, %v464_v27  ;;  %v468_v14 = vpop.permute.xlu0 %467  ;;  %672 = vrot.lane.b32.xlu2 %v3111_v42, %s2544_s19  ;;  %v3134_v27 = vld [vmem:[#allocation2 + $0x142] sm:$0xff]  ;;  %v3138_v42 = vld [vmem:[#allocation2 + $0x170] sm:$0xff] }
  0xdf   : > { %546 = vst.msk [vmem:[#allocation3 + $0x90] sm:$0xff] %vm527_vm2, %v468_v14 }
  0xe0   : > { %v478_v16 = vpop.permute.xlu2 %477  ;;  %366 = vst.msk [vmem:[#allocation3 + $0xf8] sm:$0xff] %vm214_vm0, %v3138_v42 }
  0xe1   : > { %551 = vst.msk [vmem:[#allocation3 + $0xb8] sm:$0xff] %vm527_vm2, %v478_v16 }
  0xe3   : > { %682 = vrot.lane.b32.xlu1 %v3125_v29, %s2544_s19  ;;  %v3149_v29 = vld [vmem:[#allocation2 + $0x16a] sm:$0xff] }
  0xe4   : > { %686 = vrot.lane.b32.xlu0 %v3129_v8, %s2544_s19 }
  0xe5   : > { %v470_v14 = vpop.permute.xlu1 %469 }
  0xe6   : > { %547 = vst.msk [vmem:[#allocation3 + $0x98] sm:$0xff] %vm527_vm2, %v470_v14  ;;  %v474_v58 = vpop.permute.xlu0 %473  ;;  %678 = vrot.lane.b32.xlu2 %v3134_v27, %s2544_s19 }
  0xe7   : > { %549 = vst.msk [vmem:[#allocation3 + $0xa8] sm:$0xff] %vm527_vm2, %v474_v58 }
  0xe8   : > { %v484_v16 = vpop.permute.xlu2 %483 }
  0xe9   : > { %554 = vst.msk [vmem:[#allocation3 + $0xd0] sm:$0xff] %vm527_vm2, %v484_v16 }
  0xeb   : > { %817 = vrot.lane.b32.xlu1 %v2888_v4, %s2545_s20 }
  0xec   : > { %821 = vrot.lane.b32.xlu0 %v2873_v61, %s2545_s20 }
  0xed   : > { %v476_v8 = vpop.permute.xlu1 %475 }
  0xee   : > { %550 = vst.msk [vmem:[#allocation3 + $0xb0] sm:$0xff] %vm527_vm2, %v476_v8  ;;  %v480_v14 = vpop.permute.xlu0 %479  ;;  %684 = vrot.lane.b32.xlu2 %v3149_v29, %s2544_s19 }
  0xef   : > { %552 = vst.msk [vmem:[#allocation3 + $0xc0] sm:$0xff] %vm527_vm2, %v480_v14  ;;  %v212_v14 = vld [vmem:[%s2654_s18 + $0xf0] sm:$0xff] }
  0xf0   : > { %v490_v58 = vpop.permute.xlu2 %489  ;;  %301 = vst.msk [vmem:[#allocation2 + $0x181] sm:$0xff] %vm214_vm0, %v212_v14 }
  0xf1   : > { %557 = vst.msk [vmem:[#allocation3 + $0xe8] sm:$0xff] %vm527_vm2, %v490_v58 }
  0xf3   : > { %823 = vrot.lane.b32.xlu1 %v2890_v5, %s2545_s20 }
  0xf4   : > { %827 = vrot.lane.b32.xlu0 %v2930_v18, %s2545_s20 }
  0xf5   : > { %v482_v4 = vpop.permute.xlu1 %481 }
  0xf6   : > { %553 = vst.msk [vmem:[#allocation3 + $0xc8] sm:$0xff] %vm527_vm2, %v482_v4  ;;  %v486_v61 = vpop.permute.xlu0 %485  ;;  %819 = vrot.lane.b32.xlu2 %v2907_v10, %s2545_s20  ;;  %v213_v4 = vld [vmem:[%s2654_s18 + $0xf8] sm:$0xff] }
  0xf7   : > { %555 = vst.msk [vmem:[#allocation3 + $0xd8] sm:$0xff] %vm527_vm2, %v486_v61 }
  0xf8   : > { %v625_v8 = vpop.permute.xlu2 %624  ;;  %302 = vst.msk [vmem:[#allocation2 + $0x189] sm:$0xff] %vm214_vm0, %v213_v4  ;;  %v4004_v4 = vld [vmem:[#allocation6_spill] sm:$0xff] }
  0xf9   : > { %721 = vst.msk [vmem:[#allocation3] sm:$0xff] %vm720_vm3, %v625_v8 }
  0xfb   : > { %829 = vrot.lane.b32.xlu1 %v2912_v11, %s2545_s20 }
  0xfc   : > { %833 = vrot.lane.b32.xlu0 %v2957_v33, %s2545_s20 }
  0xfd   : > { %v488_v5 = vpop.permute.xlu1 %487 }
  0xfe   : > { %556 = vst.msk [vmem:[#allocation3 + $0xe0] sm:$0xff] %vm527_vm2, %v488_v5  ;;  %v492_v18 = vpop.permute.xlu0 %491  ;;  %825 = vrot.lane.b32.xlu2 %v2914_v12, %s2545_s20 }
  0xff   : > { %558 = vst.msk [vmem:[#allocation3 + $0xf0] sm:$0xff] %vm527_vm2, %v492_v18 }
 0x100   : > { %v631_v10 = vpop.permute.xlu2 %630 }
 0x101   : > { %724 = vst.msk [vmem:[#allocation3 + $0x18] sm:$0xff] %vm720_vm3, %v631_v10  ;;  %v784_v10 = vld [vmem:[#allocation2 + $0x188] sm:$0xff] }
 0x103   : > { %835 = vrot.lane.b32.xlu1 %v2936_v19, %s2545_s20 }
 0x104   : > { %839 = vrot.lane.b32.xlu0 %v2982_v47, %s2545_s20 }
 0x105   : > { %v494_v11 = vpop.permute.xlu1 %493 }
 0x106   : > { %559 = vst.msk [vmem:[#allocation3 + $0xf8] sm:$0xff] %vm527_vm2, %v494_v11  ;;  %v627_v33 = vpop.permute.xlu0 %626  ;;  %831 = vrot.lane.b32.xlu2 %v2938_v21, %s2545_s20 }
 0x107   : > { %722 = vst.msk [vmem:[#allocation3 + $0x8] sm:$0xff] %vm720_vm3, %v627_v33 }
 0x108   : > { %v637_v12 = vpop.permute.xlu2 %636 }
 0x109   : > { %727 = vst.msk [vmem:[#allocation3 + $0x30] sm:$0xff] %vm720_vm3, %v637_v12  ;;  %v976_v12 = vld [vmem:[#allocation2 + $0x181] sm:$0xff] }
 0x10b   : > { %841 = vrot.lane.b32.xlu1 %v2963_v35, %s2545_s20 }
 0x10c   : > { %845 = vrot.lane.b32.xlu0 %v3007_v23, %s2545_s20 }
 0x10d   : > { %v629_v19 = vpop.permute.xlu1 %628 }
 0x10e   : > { %723 = vst.msk [vmem:[#allocation3 + $0x10] sm:$0xff] %vm720_vm3, %v629_v19  ;;  %v633_v16 = vpop.permute.xlu0 %632  ;;  %837 = vrot.lane.b32.xlu2 %v2965_v36, %s2545_s20  ;;  %v3999_v19 = vld [vmem:[#allocation4_spill] sm:$0xff] }
 0x10f   : > { %725 = vst.msk [vmem:[#allocation3 + $0x20] sm:$0xff] %vm720_vm3, %v633_v16 }
 0x110   : > { %v643_v21 = vpop.permute.xlu2 %642 }
 0x111   : > { %730 = vst.msk [vmem:[#allocation3 + $0x48] sm:$0xff] %vm720_vm3, %v643_v21 }
 0x113   : > { %847 = vrot.lane.b32.xlu1 %v2988_v51, %s2545_s20 }
 0x114   : > { %851 = vrot.lane.b32.xlu0 %v3034_v30, %s2545_s20 }
 0x115   : > { %v635_v35 = vpop.permute.xlu1 %634 }
 0x116   : > { %726 = vst.msk [vmem:[#allocation3 + $0x28] sm:$0xff] %vm720_vm3, %v635_v35  ;;  %v639_v23 = vpop.permute.xlu0 %638  ;;  %843 = vrot.lane.b32.xlu2 %v2990_v62, %s2545_s20  ;;  %v4001_v35 = vld [vmem:[#allocation5_spill] sm:$0xff] }
 0x117   : > { %728 = vst.msk [vmem:[#allocation3 + $0x38] sm:$0xff] %vm720_vm3, %v639_v23 }
 0x118   : > { %v649_v58 = vpop.permute.xlu2 %648 }
 0x119   : > { %733 = vst.msk [vmem:[#allocation3 + $0x60] sm:$0xff] %vm720_vm3, %v649_v58  ;;  %v4002_v58 = vld [vmem:[#allocation7_spill] sm:$0xff] }
 0x11b   : > { %853 = vrot.lane.b32.xlu1 %v3014_v41, %s2545_s20 }
 0x11c   : > { %857 = vrot.lane.b32.xlu0 %v3061_v6, %s2545_s20 }
 0x11d   : > { %v641_v51 = vpop.permute.xlu1 %640 }
 0x11e   : > { %729 = vst.msk [vmem:[#allocation3 + $0x40] sm:$0xff] %vm720_vm3, %v641_v51  ;;  %v645_v30 = vpop.permute.xlu0 %644  ;;  %849 = vrot.lane.b32.xlu2 %v3017_v1, %s2545_s20  ;;  %v4003_v51 = vld [vmem:[#allocation13_spill] sm:$0xff] }
 0x11f   : > { %731 = vst.msk [vmem:[#allocation3 + $0x50] sm:$0xff] %vm720_vm3, %v645_v30 }
 0x120   : > { %v655_v62 = vpop.permute.xlu2 %654 }
 0x121   : > { %736 = vst.msk [vmem:[#allocation3 + $0x78] sm:$0xff] %vm720_vm3, %v655_v62 }
 0x123   : > { %859 = vrot.lane.b32.xlu1 %v3041_v22, %s2545_s20 }
 0x124   : > { %863 = vrot.lane.b32.xlu0 %v3088_v39, %s2545_s20 }
 0x125   : > { %v647_v6 = vpop.permute.xlu1 %646 }
 0x126   : > { %732 = vst.msk [vmem:[#allocation3 + $0x58] sm:$0xff] %vm720_vm3, %v647_v6  ;;  %v651_v61 = vpop.permute.xlu0 %650  ;;  %855 = vrot.lane.b32.xlu2 %v3044_v63, %s2545_s20 }
 0x127   : > { %734 = vst.msk [vmem:[#allocation3 + $0x68] sm:$0xff] %vm720_vm3, %v651_v61  ;;  %v4005_v61 = vld [vmem:[#allocation9_spill] sm:$0xff] }
 0x128   : > { %v661_v1 = vpop.permute.xlu2 %660 }
 0x129   : > { %739 = vst.msk [vmem:[#allocation3 + $0x90] sm:$0xff] %vm720_vm3, %v661_v1  ;;  %v4006_v1 = vld [vmem:[#allocation16_spill] sm:$0xff] }
 0x12b   : > { %865 = vrot.lane.b32.xlu1 %v3068_v13, %s2545_s20 }
 0x12c   : > { %869 = vrot.lane.b32.xlu0 %v3115_v25, %s2545_s20 }
 0x12d   : > { %v653_v22 = vpop.permute.xlu1 %652 }
 0x12e   : > { %735 = vst.msk [vmem:[#allocation3 + $0x70] sm:$0xff] %vm720_vm3, %v653_v22  ;;  %v657_v39 = vpop.permute.xlu0 %656  ;;  %861 = vrot.lane.b32.xlu2 %v3071_v9, %s2545_s20  ;;  %v783_v9 = vld [vmem:[#allocation2 + $0x180] sm:$0xff] }
 0x12f   : > { %737 = vst.msk [vmem:[#allocation3 + $0x80] sm:$0xff] %vm720_vm3, %v657_v39 }
 0x130   : > { %v667_v8 = vpop.permute.xlu2 %666 }
 0x131   : > { %742 = vst.msk [vmem:[#allocation3 + $0xa8] sm:$0xff] %vm720_vm3, %v667_v8  ;;  %v4007_v8 = vld [vmem:[#allocation8_spill] sm:$0xff] }
 0x133   : > { %871 = vrot.lane.b32.xlu1 %v3095_v7, %s2545_s20 }
 0x134   : > { %875 = vrot.lane.b32.xlu0 %v3138_v42, %s2545_s20 }
 0x135   : > { %v659_v13 = vpop.permute.xlu1 %658 }
 0x136   : > { %738 = vst.msk [vmem:[#allocation3 + $0x88] sm:$0xff] %vm720_vm3, %v659_v13  ;;  %v663_v5 = vpop.permute.xlu0 %662  ;;  %867 = vrot.lane.b32.xlu2 %v3098_v45, %s2545_s20 }
 0x137   : > { %740 = vst.msk [vmem:[#allocation3 + $0x98] sm:$0xff] %vm720_vm3, %v663_v5  ;;  %v4008_v5 = vld [vmem:[#allocation12_spill] sm:$0xff] }
 0x138   : > { %v673_v18 = vpop.permute.xlu2 %672 }
 0x139   : > { %745 = vst.msk [vmem:[#allocation3 + $0xc0] sm:$0xff] %vm720_vm3, %v673_v18 }
 0x13b   : > { %877 = vrot.lane.b32.xlu1 %v783_v9, %s2545_s20  ;;  %v4009_v9 = vld [vmem:[#allocation19_spill] sm:$0xff] }
 0x13c   : > { %1010 = vrot.lane.b32.xlu0 %v2680_v3, %s2546_s21 }
 0x13d   : > { %v665_v7 = vpop.permute.xlu1 %664 }
 0x13e   : > { %741 = vst.msk [vmem:[#allocation3 + $0xa0] sm:$0xff] %vm720_vm3, %v665_v7  ;;  %v669_v42 = vpop.permute.xlu0 %668  ;;  %873 = vrot.lane.b32.xlu2 %v3122_v0, %s2545_s20 }
 0x13f   : > { %743 = vst.msk [vmem:[#allocation3 + $0xb0] sm:$0xff] %vm720_vm3, %v669_v42  ;;  %v4010_v42 = vld [vmem:[#allocation11_spill] sm:$0xff] }
 0x140   : > { %v679_v45 = vpop.permute.xlu2 %678 }
 0x141   : > { %748 = vst.msk [vmem:[#allocation3 + $0xd8] sm:$0xff] %vm720_vm3, %v679_v45 }
 0x143   : > { %1012 = vrot.lane.b32.xlu1 %v2726_v15, %s2546_s21 }
 0x144   : > { %1016 = vrot.lane.b32.xlu0 %v2761_v28, %s2546_s21 }
 0x145   : > { %v671_v3 = vpop.permute.xlu1 %670 }
 0x146   : > { %744 = vst.msk [vmem:[#allocation3 + $0xb8] sm:$0xff] %vm720_vm3, %v671_v3  ;;  %v675_v11 = vpop.permute.xlu0 %674  ;;  %879 = vrot.lane.b32.xlu2 %v784_v10, %s2545_s20  ;;  %v4011_v10 = vld [vmem:[#allocation15_spill] sm:$0xff]  ;;  %v4012_v3 = vld [vmem:[#allocation22_spill] sm:$0xff] }
 0x147   : > { %746 = vst.msk [vmem:[#allocation3 + $0xc8] sm:$0xff] %vm720_vm3, %v675_v11 }
 0x148   : > { %v685_v0 = vpop.permute.xlu2 %684 }
 0x149   : > { %751 = vst.msk [vmem:[#allocation3 + $0xf0] sm:$0xff] %vm720_vm3, %v685_v0 }
 0x14b   : > { %1018 = vrot.lane.b32.xlu1 %v2732_v17, %s2546_s21 }
 0x14c   : > { %1022 = vrot.lane.b32.xlu0 %v2780_v34, %s2546_s21 }
 0x14d   : > { %v677_v15 = vpop.permute.xlu1 %676 }
 0x14e   : > { %747 = vst.msk [vmem:[#allocation3 + $0xd0] sm:$0xff] %vm720_vm3, %v677_v15  ;;  %v681_v28 = vpop.permute.xlu0 %680  ;;  %1014 = vrot.lane.b32.xlu2 %v2740_v20, %s2546_s21  ;;  %v4013_v15 = vld [vmem:[#allocation14_spill] sm:$0xff] }
 0x14f   : > { %749 = vst.msk [vmem:[#allocation3 + $0xe0] sm:$0xff] %vm720_vm3, %v681_v28 }
 0x150   : > { %v820_v33 = vpop.permute.xlu2 %819 }
 0x151   : > { %915 = vst.msk [vmem:[#allocation3 + $0x8] sm:$0xff] %vm913_vm4, %v820_v33  ;;  %v4014_v33 = vld [vmem:[#allocation18_spill] sm:$0xff] }
 0x153   : > { %1024 = vrot.lane.b32.xlu1 %v2754_v26, %s2546_s21 }
 0x154   : > { %1028 = vrot.lane.b32.xlu0 %v2798_v40, %s2546_s21 }
 0x155   : > { %v683_v17 = vpop.permute.xlu1 %682 }
 0x156   : > { %750 = vst.msk [vmem:[#allocation3 + $0xe8] sm:$0xff] %vm720_vm3, %v683_v17  ;;  %v687_v34 = vpop.permute.xlu0 %686  ;;  %1020 = vrot.lane.b32.xlu2 %v2750_v24, %s2546_s21  ;;  %v4015_v17 = vld [vmem:[#allocation25_spill] sm:$0xff] }
 0x157   : > { %752 = vst.msk [vmem:[#allocation3 + $0xf8] sm:$0xff] %vm720_vm3, %v687_v34 }
 0x158   : > { %v826_v20 = vpop.permute.xlu2 %825 }
 0x159   : > { %918 = vst.msk [vmem:[#allocation3 + $0x20] sm:$0xff] %vm913_vm4, %v826_v20 }
 0x15b   : > { %1030 = vrot.lane.b32.xlu1 %v2775_v32, %s2546_s21 }
 0x15c   : > { %1034 = vrot.lane.b32.xlu0 %v2816_v46, %s2546_s21 }
 0x15d   : > { %v818_v26 = vpop.permute.xlu1 %817 }
 0x15e   : > { %914 = vst.msk [vmem:[#allocation3] sm:$0xff] %vm913_vm4, %v818_v26  ;;  %v822_v40 = vpop.permute.xlu0 %821  ;;  %1026 = vrot.lane.b32.xlu2 %v2773_v31, %s2546_s21  ;;  %v4016_v26 = vld [vmem:[#allocation17_spill] sm:$0xff] }
 0x15f   : > { %916 = vst.msk [vmem:[#allocation3 + $0x10] sm:$0xff] %vm913_vm4, %v822_v40 }
 0x160   : > { %v832_v24 = vpop.permute.xlu2 %831 }
 0x161   : > { %921 = vst.msk [vmem:[#allocation3 + $0x38] sm:$0xff] %vm913_vm4, %v832_v24  ;;  %v4017_v24 = vld [vmem:[#allocation21_spill] sm:$0xff] }
 0x163   : > { %1036 = vrot.lane.b32.xlu1 %v2793_v38, %s2546_s21 }
 0x164   : > { %1040 = vrot.lane.b32.xlu0 %v2831_v50, %s2546_s21 }
 0x165   : > { %v824_v32 = vpop.permute.xlu1 %823 }
 0x166   : > { %917 = vst.msk [vmem:[#allocation3 + $0x18] sm:$0xff] %vm913_vm4, %v824_v32  ;;  %v828_v46 = vpop.permute.xlu0 %827  ;;  %1032 = vrot.lane.b32.xlu2 %v2791_v37, %s2546_s21  ;;  %v4018_v32 = vld [vmem:[#allocation28_spill] sm:$0xff] }
 0x167   : > { %919 = vst.msk [vmem:[#allocation3 + $0x28] sm:$0xff] %vm913_vm4, %v828_v46 }
 0x168   : > { %v838_v31 = vpop.permute.xlu2 %837 }
 0x169   : > { %924 = vst.msk [vmem:[#allocation3 + $0x50] sm:$0xff] %vm913_vm4, %v838_v31 }
 0x16b   : > { %1042 = vrot.lane.b32.xlu1 %v2811_v44, %s2546_s21 }
 0x16c   : > { %1046 = vrot.lane.b32.xlu0 %v2845_v54, %s2546_s21 }
 0x16d   : > { %v830_v38 = vpop.permute.xlu1 %829 }
 0x16e   : > { %920 = vst.msk [vmem:[#allocation3 + $0x30] sm:$0xff] %vm913_vm4, %v830_v38  ;;  %v834_v50 = vpop.permute.xlu0 %833  ;;  %1038 = vrot.lane.b32.xlu2 %v2809_v43, %s2546_s21  ;;  %v4019_v38 = vld [vmem:[#allocation20_spill] sm:$0xff] }
 0x16f   : > { %922 = vst.msk [vmem:[#allocation3 + $0x40] sm:$0xff] %vm913_vm4, %v834_v50 }
 0x170   : > { %v844_v37 = vpop.permute.xlu2 %843 }
 0x171   : > { %927 = vst.msk [vmem:[#allocation3 + $0x68] sm:$0xff] %vm913_vm4, %v844_v37  ;;  %v4020_v37 = vld [vmem:[#allocation24_spill] sm:$0xff] }
 0x173   : > { %1048 = vrot.lane.b32.xlu1 %v2827_v49, %s2546_s21 }
 0x174   : > { %1052 = vrot.lane.b32.xlu0 %v2857_v57, %s2546_s21 }
 0x175   : > { %v836_v44 = vpop.permute.xlu1 %835 }
 0x176   : > { %923 = vst.msk [vmem:[#allocation3 + $0x48] sm:$0xff] %vm913_vm4, %v836_v44  ;;  %v840_v54 = vpop.permute.xlu0 %839  ;;  %1044 = vrot.lane.b32.xlu2 %v2825_v48, %s2546_s21  ;;  %v4021_v44 = vld [vmem:[#allocation31_spill] sm:$0xff] }
 0x177   : > { %925 = vst.msk [vmem:[#allocation3 + $0x58] sm:$0xff] %vm913_vm4, %v840_v54 }
 0x178   : > { %v850_v43 = vpop.permute.xlu2 %849 }
 0x179   : > { %930 = vst.msk [vmem:[#allocation3 + $0x80] sm:$0xff] %vm913_vm4, %v850_v43 }
 0x17b   : > { %1054 = vrot.lane.b32.xlu1 %v2841_v53, %s2546_s21 }
 0x17c   : > { %1058 = vrot.lane.b32.xlu0 %v2869_v60, %s2546_s21 }
 0x17d   : > { %v842_v49 = vpop.permute.xlu1 %841 }
 0x17e   : > { %926 = vst.msk [vmem:[#allocation3 + $0x60] sm:$0xff] %vm913_vm4, %v842_v49  ;;  %v846_v57 = vpop.permute.xlu0 %845  ;;  %1050 = vrot.lane.b32.xlu2 %v2839_v52, %s2546_s21  ;;  %v4022_v49 = vld [vmem:[#allocation23_spill] sm:$0xff] }
 0x17f   : > { %928 = vst.msk [vmem:[#allocation3 + $0x70] sm:$0xff] %vm913_vm4, %v846_v57 }
 0x180   : > { %v856_v48 = vpop.permute.xlu2 %855 }
 0x181   : > { %933 = vst.msk [vmem:[#allocation3 + $0x98] sm:$0xff] %vm913_vm4, %v856_v48  ;;  %v4023_v48 = vld [vmem:[#allocation27_spill] sm:$0xff] }
 0x183   : > { %1060 = vrot.lane.b32.xlu1 %v2853_v56, %s2546_s21 }
 0x184   : > { %1064 = vrot.lane.b32.xlu0 %v2885_v2, %s2546_s21 }
 0x185   : > { %v848_v53 = vpop.permute.xlu1 %847 }
 0x186   : > { %929 = vst.msk [vmem:[#allocation3 + $0x78] sm:$0xff] %vm913_vm4, %v848_v53  ;;  %v852_v60 = vpop.permute.xlu0 %851  ;;  %1056 = vrot.lane.b32.xlu2 %v2851_v55, %s2546_s21  ;;  %v977_v55 = vld [vmem:[#allocation2 + $0x189] sm:$0xff] }
 0x187   : > { %931 = vst.msk [vmem:[#allocation3 + $0x88] sm:$0xff] %vm913_vm4, %v852_v60 }
 0x188   : > { %v862_v52 = vpop.permute.xlu2 %861 }
 0x189   : > { %936 = vst.msk [vmem:[#allocation3 + $0xb0] sm:$0xff] %vm913_vm4, %v862_v52  ;;  %v4024_v52 = vld [vmem:[#allocation26_spill] sm:$0xff] }
 0x18b   : > { %1066 = vrot.lane.b32.xlu1 %v2865_v59, %s2546_s21  ;;  %v4000_v59 = vld [vmem:[#allocation10_spill] sm:$0xff] }
 0x18c   : > { %1070 = vrot.lane.b32.xlu0 %v976_v12, %s2546_s21 }
 0x18d   : > { %v854_v56 = vpop.permute.xlu1 %853 }
 0x18e   : > { %932 = vst.msk [vmem:[#allocation3 + $0x90] sm:$0xff] %vm913_vm4, %v854_v56  ;;  %v858_v2 = vpop.permute.xlu0 %857  ;;  %1062 = vrot.lane.b32.xlu2 %v3999_v19, %s2546_s21  ;;  %v4025_v56 = vld [vmem:[#allocation30_spill] sm:$0xff]  ;;  %v4026_v19 = vld [vmem:[#allocation29_spill] sm:$0xff] }
 0x18f   : > { %934 = vst.msk [vmem:[#allocation3 + $0xa0] sm:$0xff] %vm913_vm4, %v858_v2 }
 0x190   : > { %v868_v16 = vpop.permute.xlu2 %867 }
 0x191   : > { %939 = vst.msk [vmem:[#allocation3 + $0xc8] sm:$0xff] %vm913_vm4, %v868_v16  ;;  %v1526_v16 = vld [vmem:[#allocation2 + $0x31] sm:$0xff] }
 0x193   : > { %1072 = vrot.lane.b32.xlu1 %v977_v55, %s2546_s21 }
 0x194   : > { %1205 = vrot.lane.b32.xlu0 %v4000_v59, %s2547_s22  ;;  %v4027_v59 = vld [vmem:[#allocation33_spill] sm:$0xff] }
 0x195   : > { %v860_v21 = vpop.permute.xlu1 %859 }
 0x196   : > { %935 = vst.msk [vmem:[#allocation3 + $0xa8] sm:$0xff] %vm913_vm4, %v860_v21  ;;  %v864_v14 = vpop.permute.xlu0 %863  ;;  %1068 = vrot.lane.b32.xlu2 %v4001_v35, %s2546_s21  ;;  %v1719_v35 = vld [vmem:[#allocation2 + $0x32] sm:$0xff] }
 0x197   : > { %937 = vst.msk [vmem:[#allocation3 + $0xb8] sm:$0xff] %vm913_vm4, %v864_v14  ;;  %v4028_v14 = vld [vmem:[#allocation32_spill] sm:$0xff] }
 0x198   : > { %v874_v23 = vpop.permute.xlu2 %873 }
 0x199   : > { %942 = vst.msk [vmem:[#allocation3 + $0xe0] sm:$0xff] %vm913_vm4, %v874_v23 }
 0x19b   : > { %1207 = vrot.lane.b32.xlu1 %v4002_v58, %s2547_s22  ;;  %v1527_v58 = vld [vmem:[#allocation2 + $0x39] sm:$0xff] }
 0x19c   : > { %1211 = vrot.lane.b32.xlu0 %v4003_v51, %s2547_s22  ;;  %v1333_v51 = vld [vmem:[#allocation2 + $0x30] sm:$0xff] }
 0x19d   : > { %v866_v30 = vpop.permute.xlu1 %865 }
 0x19e   : > { %938 = vst.msk [vmem:[#allocation3 + $0xc0] sm:$0xff] %vm913_vm4, %v866_v30  ;;  %v870_v62 = vpop.permute.xlu0 %869  ;;  %1203 = vrot.lane.b32.xlu2 %v4004_v4, %s2547_s22  ;;  %v1720_v4 = vld [vmem:[#allocation2 + $0x3a] sm:$0xff] }
 0x19f   : > { %940 = vst.msk [vmem:[#allocation3 + $0xd0] sm:$0xff] %vm913_vm4, %v870_v62 }
 0x1a0   : > { %v880_v6 = vpop.permute.xlu2 %879 }
 0x1a1   : > { %945 = vst.msk [vmem:[#allocation3 + $0xf8] sm:$0xff] %vm913_vm4, %v880_v6 }
 0x1a3   : > { %1213 = vrot.lane.b32.xlu1 %v4005_v61, %s2547_s22  ;;  %v1334_v61 = vld [vmem:[#allocation2 + $0x38] sm:$0xff] }
 0x1a4   : > { %1217 = vrot.lane.b32.xlu0 %v4006_v1, %s2547_s22 }
 0x1a5   : > { %v872_v22 = vpop.permute.xlu1 %871 }
 0x1a6   : > { %941 = vst.msk [vmem:[#allocation3 + $0xd8] sm:$0xff] %vm913_vm4, %v872_v22  ;;  %v876_v39 = vpop.permute.xlu0 %875  ;;  %1209 = vrot.lane.b32.xlu2 %v4007_v8, %s2547_s22 }
 0x1a7   : > { %943 = vst.msk [vmem:[#allocation3 + $0xe8] sm:$0xff] %vm913_vm4, %v876_v39  ;;  %v1528_v39 = vld [vmem:[#allocation2 + $0x49] sm:$0xff] }
 0x1a8   : > { %v1015_v13 = vpop.permute.xlu2 %1014 }
 0x1a9   : > { %1109 = vst.msk [vmem:[#allocation3 + $0x10] sm:$0xff] %vm1106_vm5, %v1015_v13  ;;  %v1721_v13 = vld [vmem:[#allocation2 + $0x4a] sm:$0xff] }
 0x1ab   : > { %1219 = vrot.lane.b32.xlu1 %v4008_v5, %s2547_s22  ;;  %v1335_v5 = vld [vmem:[#allocation2 + $0x48] sm:$0xff] }
 0x1ac   : > { %1223 = vrot.lane.b32.xlu0 %v4009_v9, %s2547_s22 }
 0x1ad   : > { %v878_v18 = vpop.permute.xlu1 %877 }
 0x1ae   : > { %944 = vst.msk [vmem:[#allocation3 + $0xf0] sm:$0xff] %vm913_vm4, %v878_v18  ;;  %v1011_v7 = vpop.permute.xlu0 %1010  ;;  %1215 = vrot.lane.b32.xlu2 %v4010_v42, %s2547_s22  ;;  %v1727_v18 = vld [vmem:[#allocation2 + $0x92] sm:$0xff] }
 0x1af   : > { %1107 = vst.msk [vmem:[#allocation3] sm:$0xff] %vm1106_vm5, %v1011_v7  ;;  %v1534_v42 = vld [vmem:[#allocation2 + $0x91] sm:$0xff] }
 0x1b0   : > { %v1021_v45 = vpop.permute.xlu2 %1020 }
 0x1b1   : > { %1112 = vst.msk [vmem:[#allocation3 + $0x28] sm:$0xff] %vm1106_vm5, %v1021_v45 }
 0x1b3   : > { %1225 = vrot.lane.b32.xlu1 %v4011_v10, %s2547_s22 }
 0x1b4   : > { %1229 = vrot.lane.b32.xlu0 %v4012_v3, %s2547_s22  ;;  %v1529_v3 = vld [vmem:[#allocation2 + $0x51] sm:$0xff] }
 0x1b5   : > { %v1013_v11 = vpop.permute.xlu1 %1012 }
 0x1b6   : > { %1108 = vst.msk [vmem:[#allocation3 + $0x8] sm:$0xff] %vm1106_vm5, %v1013_v11  ;;  %v1017_v0 = vpop.permute.xlu0 %1016  ;;  %1221 = vrot.lane.b32.xlu2 %v4013_v15, %s2547_s22 }
 0x1b7   : > { %1110 = vst.msk [vmem:[#allocation3 + $0x18] sm:$0xff] %vm1106_vm5, %v1017_v0  ;;  %v1336_v0 = vld [vmem:[#allocation2 + $0x50] sm:$0xff] }
 0x1b8   : > { %v1027_v28 = vpop.permute.xlu2 %1026 }
 0x1b9   : > { %1115 = vst.msk [vmem:[#allocation3 + $0x40] sm:$0xff] %vm1106_vm5, %v1027_v28  ;;  %v1722_v28 = vld [vmem:[#allocation2 + $0x52] sm:$0xff] }
 0x1bb   : > { %1231 = vrot.lane.b32.xlu1 %v4014_v33, %s2547_s22 }
 0x1bc   : > { %1235 = vrot.lane.b32.xlu0 %v4015_v17, %s2547_s22  ;;  %v1542_v17 = vld [vmem:[#allocation2 + $0xf1] sm:$0xff] }
 0x1bd   : > { %v1019_v34 = vpop.permute.xlu1 %1018 }
 0x1be   : > { %1111 = vst.msk [vmem:[#allocation3 + $0x20] sm:$0xff] %vm1106_vm5, %v1019_v34  ;;  %v1023_v20 = vpop.permute.xlu0 %1022  ;;  %1227 = vrot.lane.b32.xlu2 %v4016_v26, %s2547_s22  ;;  %v1535_v34 = vld [vmem:[#allocation2 + $0x99] sm:$0xff] }
 0x1bf   : > { %1113 = vst.msk [vmem:[#allocation3 + $0x30] sm:$0xff] %vm1106_vm5, %v1023_v20  ;;  %v1735_v26 = vld [vmem:[#allocation2 + $0xf2] sm:$0xff] }
 0x1c0   : > { %v1033_v40 = vpop.permute.xlu2 %1032 }
 0x1c1   : > { %1118 = vst.msk [vmem:[#allocation3 + $0x58] sm:$0xff] %vm1106_vm5, %v1033_v40 }
 0x1c3   : > { %1237 = vrot.lane.b32.xlu1 %v4017_v24, %s2547_s22  ;;  %v1343_v24 = vld [vmem:[#allocation2 + $0xa8] sm:$0xff] }
 0x1c4   : > { %1241 = vrot.lane.b32.xlu0 %v4018_v32, %s2547_s22  ;;  %v1728_v32 = vld [vmem:[#allocation2 + $0x9a] sm:$0xff] }
 0x1c5   : > { %v1025_v46 = vpop.permute.xlu1 %1024 }
 0x1c6   : > { %1114 = vst.msk [vmem:[#allocation3 + $0x38] sm:$0xff] %vm1106_vm5, %v1025_v46  ;;  %v1029_v31 = vpop.permute.xlu0 %1028  ;;  %1233 = vrot.lane.b32.xlu2 %v4019_v38, %s2547_s22  ;;  %v1530_v38 = vld [vmem:[#allocation2 + $0x61] sm:$0xff] }
 0x1c7   : > { %1116 = vst.msk [vmem:[#allocation3 + $0x48] sm:$0xff] %vm1106_vm5, %v1029_v31 }
 0x1c8   : > { %v1039_v50 = vpop.permute.xlu2 %1038 }
 0x1c9   : > { %1121 = vst.msk [vmem:[#allocation3 + $0x70] sm:$0xff] %vm1106_vm5, %v1039_v50 }
 0x1cb   : > { %1243 = vrot.lane.b32.xlu1 %v4020_v37, %s2547_s22  ;;  %v1337_v37 = vld [vmem:[#allocation2 + $0x60] sm:$0xff] }
 0x1cc   : > { %1247 = vrot.lane.b32.xlu0 %v4021_v44, %s2547_s22 }
 0x1cd   : > { %v1031_v54 = vpop.permute.xlu1 %1030 }
 0x1ce   : > { %1117 = vst.msk [vmem:[#allocation3 + $0x50] sm:$0xff] %vm1106_vm5, %v1031_v54  ;;  %v1035_v43 = vpop.permute.xlu0 %1034  ;;  %1239 = vrot.lane.b32.xlu2 %v4022_v49, %s2547_s22 }
 0x1cf   : > { %1119 = vst.msk [vmem:[#allocation3 + $0x60] sm:$0xff] %vm1106_vm5, %v1035_v43  ;;  %v1723_v43 = vld [vmem:[#allocation2 + $0x62] sm:$0xff] }
 0x1d0   : > { %v1045_v57 = vpop.permute.xlu2 %1044 }
 0x1d1   : > { %1124 = vst.msk [vmem:[#allocation3 + $0x88] sm:$0xff] %vm1106_vm5, %v1045_v57  ;;  %v1543_v57 = vld [vmem:[#allocation2 + $0xf9] sm:$0xff] }
 0x1d3   : > { %1249 = vrot.lane.b32.xlu1 %v4023_v48, %s2547_s22  ;;  %v1536_v48 = vld [vmem:[#allocation2 + $0xa9] sm:$0xff] }
 0x1d4   : > { %1253 = vrot.lane.b32.xlu0 %v3134_v27, %s2547_s22 }
 0x1d5   : > { %v1037_v53 = vpop.permute.xlu1 %1036 }
 0x1d6   : > { %1120 = vst.msk [vmem:[#allocation3 + $0x68] sm:$0xff] %vm1106_vm5, %v1037_v53  ;;  %v1041_v60 = vpop.permute.xlu0 %1040  ;;  %1245 = vrot.lane.b32.xlu2 %v4024_v52, %s2547_s22 }
 0x1d7   : > { %1122 = vst.msk [vmem:[#allocation3 + $0x78] sm:$0xff] %vm1106_vm5, %v1041_v60  ;;  %v1736_v60 = vld [vmem:[#allocation2 + $0xfa] sm:$0xff] }
 0x1d8   : > { %v1051_v12 = vpop.permute.xlu2 %1050 }
 0x1d9   : > { %1127 = vst.msk [vmem:[#allocation3 + $0xa0] sm:$0xff] %vm1106_vm5, %v1051_v12  ;;  %v1344_v12 = vld [vmem:[#allocation2 + $0xb0] sm:$0xff] }
 0x1db   : > { %1255 = vrot.lane.b32.xlu1 %v4025_v56, %s2547_s22  ;;  %v1729_v56 = vld [vmem:[#allocation2 + $0xaa] sm:$0xff] }
 0x1dc   : > { %1259 = vrot.lane.b32.xlu0 %v3149_v29, %s2547_s22 }
 0x1dd   : > { %v1043_v2 = vpop.permute.xlu1 %1042 }
 0x1de   : > { %1123 = vst.msk [vmem:[#allocation3 + $0x80] sm:$0xff] %vm1106_vm5, %v1043_v2  ;;  %v1047_v27 = vpop.permute.xlu0 %1046  ;;  %1251 = vrot.lane.b32.xlu2 %v4026_v19, %s2547_s22  ;;  %v1531_v19 = vld [vmem:[#allocation2 + $0x69] sm:$0xff] }
 0x1df   : > { %1125 = vst.msk [vmem:[#allocation3 + $0x90] sm:$0xff] %vm1106_vm5, %v1047_v27 }
 0x1e0   : > { %v1057_v55 = vpop.permute.xlu2 %1056 }
 0x1e1   : > { %1130 = vst.msk [vmem:[#allocation3 + $0xb8] sm:$0xff] %vm1106_vm5, %v1057_v55 }
 0x1e3   : > { %1261 = vrot.lane.b32.xlu1 %v4027_v59, %s2547_s22  ;;  %v1338_v59 = vld [vmem:[#allocation2 + $0x68] sm:$0xff] }
 0x1e4   : > { %1590 = vrot.lane.b32.xlu0 %v1526_v16, %s2548_s23  ;;  %v1351_v16 = vld [vmem:[#allocation2 + $0x108] sm:$0xff] }
 0x1e5   : > { %v1049_v29 = vpop.permute.xlu1 %1048 }
 0x1e6   : > { %1126 = vst.msk [vmem:[#allocation3 + $0x98] sm:$0xff] %vm1106_vm5, %v1049_v29  ;;  %v1053_v21 = vpop.permute.xlu0 %1052  ;;  %1257 = vrot.lane.b32.xlu2 %v4028_v14, %s2547_s22  ;;  %v1948_v29 = vld [vmem:[%s3936_s1 + $0x20] sm:$0xf] }
 0x1e7   : > { %1128 = vst.msk [vmem:[#allocation3 + $0xa8] sm:$0xff] %vm1106_vm5, %v1053_v21  ;;  %2465 = vmatpush.msk.msra.mxu0 %vm2046_vm7, %v1948_v29  ;;  %2502 = vmatpush.msk.msra.mxu1 %vm2046_vm7, %v1948_v29 }
 0x1e8   : > { %v1063_v23 = vpop.permute.xlu2 %1062  ;;  %2503 = vmatpush.msk.msra.mxu2 %vm2046_vm7, %v1948_v29  ;;  %2504 = vmatpush.msk.msra.mxu3 %vm2046_vm7, %v1948_v29 }
 0x1e9   : > { %1133 = vst.msk [vmem:[#allocation3 + $0xd0] sm:$0xff] %vm1106_vm5, %v1063_v23  ;;  %v1946_v23 = vld [vmem:[%s3936_s1 + $0x10] sm:$0xff] }
 0x1eb   : > { %1783 = vrot.lane.b32.xlu1 %v1719_v35, %s2549_s24  ;;  %v1947_v35 = vld [vmem:[%s3936_s1 + $0x18] sm:$0xff] }
 0x1ec   : > { %1592 = vrot.lane.b32.xlu0 %v1527_v58, %s2548_s23  ;;  %2062 = vmatpush.msra.mxu0 %v1947_v35 }
 0x1ed   : > { %v1055_v30 = vpop.permute.xlu1 %1054  ;;  %2505 = vmatpush.msra.mxu1 %v1947_v35  ;;  %2506 = vmatpush.msra.mxu2 %v1947_v35 }
 0x1ee   : > { %1129 = vst.msk [vmem:[#allocation3 + $0xb0] sm:$0xff] %vm1106_vm5, %v1055_v30  ;;  %v1059_v62 = vpop.permute.xlu0 %1058  ;;  %1397 = vrot.lane.b32.xlu2 %v1333_v51, %s2550_s25  ;;  %v1945_v51 = vld [vmem:[%s3936_s1 + $0x8] sm:$0xff]  ;;  %2507 = vmatpush.msra.mxu3 %v1947_v35  ;;  %v1730_v30 = vld [vmem:[#allocation2 + $0xb2] sm:$0xff] }
 0x1ef   : > { %1131 = vst.msk [vmem:[#allocation3 + $0xc0] sm:$0xff] %vm1106_vm5, %v1059_v62  ;;  %2063 = vmatpush.msra.mxu0 %v1946_v23  ;;  %2508 = vmatpush.msra.mxu1 %v1946_v23  ;;  %v1537_v62 = vld [vmem:[#allocation2 + $0xb1] sm:$0xff]  ;;  %v1739_v35 = vld [vmem:[#allocation2 + $0x122] sm:$0xff] }
 0x1f0   : > { %v1069_v6 = vpop.permute.xlu2 %1068  ;;  %2509 = vmatpush.msra.mxu2 %v1946_v23  ;;  %2510 = vmatpush.msra.mxu3 %v1946_v23  ;;  %v1726_v23 = vld [vmem:[#allocation2 + $0x82] sm:$0xff] }
 0x1f1   : > { %1136 = vst.msk [vmem:[#allocation3 + $0xe8] sm:$0xff] %vm1106_vm5, %v1069_v6  ;;  %2064 = vmatpush.msra.mxu0 %v1945_v51  ;;  %2511 = vmatpush.msra.mxu1 %v1945_v51 }
 0x1f2   : > { %2512 = vmatpush.msra.mxu2 %v1945_v51  ;;  %2513 = vmatpush.msra.mxu3 %v1945_v51 }
 0x1f3   : > { %1785 = vrot.lane.b32.xlu1 %v1720_v4, %s2549_s24  ;;  %v1944_v4 = vld [vmem:[%s3936_s1] sm:$0xff] }
 0x1f4   : > { %1413 = vrot.lane.b32.xlu0 %v2965_v36, %s2550_s25  ;;  %2065 = vmatpush.msra.mxu0 %v1944_v4 }
 0x1f5   : > { %v1061_v1 = vpop.permute.xlu1 %1060  ;;  %2514 = vmatpush.msra.mxu1 %v1944_v4  ;;  %2515 = vmatpush.msra.mxu2 %v1944_v4 }
 0x1f6   : > { %1132 = vst.msk [vmem:[#allocation3 + $0xc8] sm:$0xff] %vm1106_vm5, %v1061_v1  ;;  %v1065_v22 = vpop.permute.xlu0 %1064  ;;  %1399 = vrot.lane.b32.xlu2 %v1334_v61, %s2550_s25  ;;  %2516 = vmatpush.msra.mxu3 %v1944_v4 }
 0x1f7   : > { %1134 = vst.msk [vmem:[#allocation3 + $0xd8] sm:$0xff] %vm1106_vm5, %v1065_v22  ;;  %v1737_v22 = vld [vmem:[#allocation2 + $0x10a] sm:$0xff] }
 0x1f8   : > { %v1204_v8 = vpop.permute.xlu2 %1203 }
 0x1f9   : > { %1300 = vst.msk [vmem:[#allocation3] sm:$0xff] %vm1299_vm6, %v1204_v8 }
 0x1fb   : > { %1594 = vrot.lane.b32.xlu1 %v1528_v39, %s2548_s23  ;;  %v1724_v39 = vld [vmem:[#allocation2 + $0x6a] sm:$0xff] }
 0x1fc   : > { %1787 = vrot.lane.b32.xlu0 %v1721_v13, %s2549_s24 }
 0x1fd   : > { %v1067_v36 = vpop.permute.xlu1 %1066 }
 0x1fe   : > { %1135 = vst.msk [vmem:[#allocation3 + $0xe0] sm:$0xff] %vm1106_vm5, %v1067_v36  ;;  %v1071_v9 = vpop.permute.xlu0 %1070  ;;  %1401 = vrot.lane.b32.xlu2 %v1335_v5, %s2550_s25  ;;  %v1743_v5 = vld [vmem:[#allocation2 + $0x152] sm:$0xff] }
 0x1ff   : > { %1137 = vst.msk [vmem:[#allocation3 + $0xf0] sm:$0xff] %vm1106_vm5, %v1071_v9  ;;  %v1345_v9 = vld [vmem:[#allocation2 + $0xc0] sm:$0xff] }
 0x200   : > { %v1210_v7 = vpop.permute.xlu2 %1209 }
 0x201   : > { %1303 = vst.msk [vmem:[#allocation3 + $0x18] sm:$0xff] %vm1299_vm6, %v1210_v7 }
 0x203   : > { %1799 = vrot.lane.b32.xlu1 %v1727_v18, %s2549_s24  ;;  %v1550_v18 = vld [vmem:[#allocation2 + $0x151] sm:$0xff] }
 0x204   : > { %1415 = vrot.lane.b32.xlu0 %v2982_v47, %s2550_s25 }
 0x205   : > { %v1073_v45 = vpop.permute.xlu1 %1072 }
 0x206   : > { %1138 = vst.msk [vmem:[#allocation3 + $0xf8] sm:$0xff] %vm1106_vm5, %v1073_v45  ;;  %v1206_v10 = vpop.permute.xlu0 %1205  ;;  %1606 = vrot.lane.b32.xlu2 %v1534_v42, %s2548_s23  ;;  %v1532_v45 = vld [vmem:[#allocation2 + $0x79] sm:$0xff] }
 0x207   : > { %1301 = vst.msk [vmem:[#allocation3 + $0x8] sm:$0xff] %vm1299_vm6, %v1206_v10 }
 0x208   : > { %v1216_v11 = vpop.permute.xlu2 %1215 }
 0x209   : > { %1306 = vst.msk [vmem:[#allocation3 + $0x30] sm:$0xff] %vm1299_vm6, %v1216_v11  ;;  %v1339_v11 = vld [vmem:[#allocation2 + $0x78] sm:$0xff] }
 0x20b   : > { %1596 = vrot.lane.b32.xlu1 %v1529_v3, %s2548_s23  ;;  %v1352_v3 = vld [vmem:[#allocation2 + $0x110] sm:$0xff] }
 0x20c   : > { %1429 = vrot.lane.b32.xlu0 %v3014_v41, %s2550_s25 }
 0x20d   : > { %v1208_v15 = vpop.permute.xlu1 %1207 }
 0x20e   : > { %1302 = vst.msk [vmem:[#allocation3 + $0x10] sm:$0xff] %vm1299_vm6, %v1208_v15  ;;  %v1212_v47 = vpop.permute.xlu0 %1211  ;;  %1403 = vrot.lane.b32.xlu2 %v1336_v0, %s2550_s25 }
 0x20f   : > { %1304 = vst.msk [vmem:[#allocation3 + $0x20] sm:$0xff] %vm1299_vm6, %v1212_v47  ;;  %v1358_v47 = vld [vmem:[#allocation2 + $0x158] sm:$0xff] }
 0x210   : > { %v1222_v33 = vpop.permute.xlu2 %1221 }
 0x211   : > { %1309 = vst.msk [vmem:[#allocation3 + $0x48] sm:$0xff] %vm1299_vm6, %v1222_v33  ;;  %v1731_v33 = vld [vmem:[#allocation2 + $0xc2] sm:$0xff] }
 0x213   : > { %1789 = vrot.lane.b32.xlu1 %v1722_v28, %s2549_s24 }
 0x214   : > { %1622 = vrot.lane.b32.xlu0 %v1542_v17, %s2548_s23  ;;  %v1538_v17 = vld [vmem:[#allocation2 + $0xc1] sm:$0xff] }
 0x215   : > { %v1214_v20 = vpop.permute.xlu1 %1213 }
 0x216   : > { %1305 = vst.msk [vmem:[#allocation3 + $0x28] sm:$0xff] %vm1299_vm6, %v1214_v20  ;;  %v1218_v41 = vpop.permute.xlu0 %1217  ;;  %1608 = vrot.lane.b32.xlu2 %v1535_v34, %s2548_s23 }
 0x217   : > { %1307 = vst.msk [vmem:[#allocation3 + $0x38] sm:$0xff] %vm1299_vm6, %v1218_v41 }
 0x218   : > { %v1228_v40 = vpop.permute.xlu2 %1227 }
 0x219   : > { %1312 = vst.msk [vmem:[#allocation3 + $0x60] sm:$0xff] %vm1299_vm6, %v1228_v40 }
 0x21b   : > { %1815 = vrot.lane.b32.xlu1 %v1735_v26, %s2549_s24  ;;  %v1545_v26 = vld [vmem:[#allocation2 + $0x111] sm:$0xff] }
 0x21c   : > { %1417 = vrot.lane.b32.xlu0 %v1343_v24, %s2550_s25  ;;  %v1738_v24 = vld [vmem:[#allocation2 + $0x112] sm:$0xff] }
 0x21d   : > { %v1220_v46 = vpop.permute.xlu1 %1219 }
 0x21e   : > { %1308 = vst.msk [vmem:[#allocation3 + $0x40] sm:$0xff] %vm1299_vm6, %v1220_v46  ;;  %v1224_v31 = vpop.permute.xlu0 %1223  ;;  %1801 = vrot.lane.b32.xlu2 %v1728_v32, %s2549_s24  ;;  %v1725_v32 = vld [vmem:[#allocation2 + $0x7a] sm:$0xff] }
 0x21f   : > { %1310 = vst.msk [vmem:[#allocation3 + $0x50] sm:$0xff] %vm1299_vm6, %v1224_v31 }
 0x220   : > { %v1234_v50 = vpop.permute.xlu2 %1233 }
 0x221   : > { %1315 = vst.msk [vmem:[#allocation3 + $0x78] sm:$0xff] %vm1299_vm6, %v1234_v50  ;;  %v1744_v50 = vld [vmem:[#allocation2 + $0x15a] sm:$0xff] }
 0x223   : > { %1598 = vrot.lane.b32.xlu1 %v1530_v38, %s2548_s23 }
 0x224   : > { %1431 = vrot.lane.b32.xlu0 %v3044_v63, %s2550_s25 }
 0x225   : > { %v1226_v44 = vpop.permute.xlu1 %1225 }
 0x226   : > { %1311 = vst.msk [vmem:[#allocation3 + $0x58] sm:$0xff] %vm1299_vm6, %v1226_v44  ;;  %v1230_v54 = vpop.permute.xlu0 %1229  ;;  %1405 = vrot.lane.b32.xlu2 %v1337_v37, %s2550_s25  ;;  %v1346_v44 = vld [vmem:[#allocation2 + $0xc8] sm:$0xff] }
 0x227   : > { %1313 = vst.msk [vmem:[#allocation3 + $0x68] sm:$0xff] %vm1299_vm6, %v1230_v54  ;;  %v1551_v54 = vld [vmem:[#allocation2 + $0x159] sm:$0xff] }
 0x228   : > { %v1240_v49 = vpop.permute.xlu2 %1239 }
 0x229   : > { %1318 = vst.msk [vmem:[#allocation3 + $0x90] sm:$0xff] %vm1299_vm6, %v1240_v49 }
 0x22b   : > { %1791 = vrot.lane.b32.xlu1 %v1723_v43, %s2549_s24 }
 0x22c   : > { %1624 = vrot.lane.b32.xlu0 %v1543_v57, %s2548_s23 }
 0x22d   : > { %v1232_v53 = vpop.permute.xlu1 %1231 }
 0x22e   : > { %1314 = vst.msk [vmem:[#allocation3 + $0x70] sm:$0xff] %vm1299_vm6, %v1232_v53  ;;  %v1236_v63 = vpop.permute.xlu0 %1235  ;;  %1610 = vrot.lane.b32.xlu2 %v1536_v48, %s2548_s23  ;;  %v1533_v48 = vld [vmem:[#allocation2 + $0x81] sm:$0xff] }
 0x22f   : > { %1316 = vst.msk [vmem:[#allocation3 + $0x80] sm:$0xff] %vm1299_vm6, %v1236_v63  ;;  %v1353_v63 = vld [vmem:[#allocation2 + $0x120] sm:$0xff] }
 0x230   : > { %v1246_v52 = vpop.permute.xlu2 %1245 }
 0x231   : > { %1321 = vst.msk [vmem:[#allocation3 + $0xa8] sm:$0xff] %vm1299_vm6, %v1246_v52 }
 0x233   : > { %1817 = vrot.lane.b32.xlu1 %v1736_v60, %s2549_s24  ;;  %v1340_v60 = vld [vmem:[#allocation2 + $0x80] sm:$0xff] }
 0x234   : > { %1419 = vrot.lane.b32.xlu0 %v1344_v12, %s2550_s25 }
 0x235   : > { %v1238_v2 = vpop.permute.xlu1 %1237 }
 0x236   : > { %1317 = vst.msk [vmem:[#allocation3 + $0x88] sm:$0xff] %vm1299_vm6, %v1238_v2  ;;  %v1242_v27 = vpop.permute.xlu0 %1241  ;;  %1803 = vrot.lane.b32.xlu2 %v1729_v56, %s2549_s24  ;;  %v1359_v2 = vld [vmem:[#allocation2 + $0x168] sm:$0xff] }
 0x237   : > { %1319 = vst.msk [vmem:[#allocation3 + $0x98] sm:$0xff] %vm1299_vm6, %v1242_v27 }
 0x238   : > { %v1252_v55 = vpop.permute.xlu2 %1251 }
 0x239   : > { %1324 = vst.msk [vmem:[#allocation3 + $0xc0] sm:$0xff] %vm1299_vm6, %v1252_v55  ;;  %v1539_v55 = vld [vmem:[#allocation2 + $0xc9] sm:$0xff] }
 0x23b   : > { %1600 = vrot.lane.b32.xlu1 %v1531_v19, %s2548_s23  ;;  %v1732_v19 = vld [vmem:[#allocation2 + $0xca] sm:$0xff] }
 0x23c   : > { %1433 = vrot.lane.b32.xlu0 %v1351_v16, %s2550_s25 }
 0x23d   : > { %v1244_v21 = vpop.permute.xlu1 %1243 }
 0x23e   : > { %1320 = vst.msk [vmem:[#allocation3 + $0xa0] sm:$0xff] %vm1299_vm6, %v1244_v21  ;;  %v1248_v14 = vpop.permute.xlu0 %1247  ;;  %1407 = vrot.lane.b32.xlu2 %v1338_v59, %s2550_s25  ;;  %v1546_v21 = vld [vmem:[#allocation2 + $0x121] sm:$0xff] }
 0x23f   : > { %1322 = vst.msk [vmem:[#allocation3 + $0xb0] sm:$0xff] %vm1299_vm6, %v1248_v14 }
 0x240   : > { %v1258_v58 = vpop.permute.xlu2 %1257 }
 0x241   : > { %1327 = vst.msk [vmem:[#allocation3 + $0xd8] sm:$0xff] %vm1299_vm6, %v1258_v58 }
 0x243   : > { %1445 = vrot.lane.b32.xlu1 %v3115_v25, %s2550_s25  ;;  %v1544_v25 = vld [vmem:[#allocation2 + $0x109] sm:$0xff] }
 0x244   : > { %1805 = vrot.lane.b32.xlu0 %v1730_v30, %s2549_s24 }
 0x245   : > { %v1250_v6 = vpop.permute.xlu1 %1249 }
 0x246   : > { %1323 = vst.msk [vmem:[#allocation3 + $0xb8] sm:$0xff] %vm1299_vm6, %v1250_v6  ;;  %v1254_v61 = vpop.permute.xlu0 %1253  ;;  %1612 = vrot.lane.b32.xlu2 %v1537_v62, %s2548_s23  ;;  %v1745_v62 = vld [vmem:[#allocation2 + $0x16a] sm:$0xff]  ;;  %v1540_v6 = vld [vmem:[#allocation2 + $0xd9] sm:$0xff] }
 0x247   : > { %1325 = vst.msk [vmem:[#allocation3 + $0xc8] sm:$0xff] %vm1299_vm6, %v1254_v61  ;;  %v1552_v61 = vld [vmem:[#allocation2 + $0x169] sm:$0xff] }
 0x248   : > { %v1398_v1 = vpop.permute.xlu2 %1397 }
 0x249   : > { %1494 = vst.msk [vmem:[#allocation3] sm:$0xff] %vm1493_vm8, %v1398_v1 }
 0x24b   : > { %1626 = vrot.lane.b32.xlu1 %v1544_v25, %s2548_s23 }
 0x24c   : > { %1819 = vrot.lane.b32.xlu0 %v1737_v22, %s2549_s24 }
 0x24d   : > { %v1256_v8 = vpop.permute.xlu1 %1255 }
 0x24e   : > { %1326 = vst.msk [vmem:[#allocation3 + $0xd0] sm:$0xff] %vm1299_vm6, %v1256_v8  ;;  %v1260_v13 = vpop.permute.xlu0 %1259  ;;  %1793 = vrot.lane.b32.xlu2 %v1724_v39, %s2549_s24  ;;  %v1354_v39 = vld [vmem:[#allocation2 + $0x128] sm:$0xff] }
 0x24f   : > { %1328 = vst.msk [vmem:[#allocation3 + $0xe0] sm:$0xff] %vm1299_vm6, %v1260_v13 }
 0x250   : > { %v1400_v36 = vpop.permute.xlu2 %1399 }
 0x251   : > { %1495 = vst.msk [vmem:[#allocation3 + $0x8] sm:$0xff] %vm1493_vm8, %v1400_v36  ;;  %v1347_v36 = vld [vmem:[#allocation2 + $0xd8] sm:$0xff] }
 0x253   : > { %1831 = vrot.lane.b32.xlu1 %v1743_v5, %s2549_s24  ;;  %v1733_v5 = vld [vmem:[#allocation2 + $0xda] sm:$0xff] }
 0x254   : > { %1421 = vrot.lane.b32.xlu0 %v1345_v9, %s2550_s25 }
 0x255   : > { %v1262_v7 = vpop.permute.xlu1 %1261 }
 0x256   : > { %1329 = vst.msk [vmem:[#allocation3 + $0xe8] sm:$0xff] %vm1299_vm6, %v1262_v7  ;;  %v1591_v42 = vpop.permute.xlu0 %1590  ;;  %1638 = vrot.lane.b32.xlu2 %v1550_v18, %s2548_s23  ;;  %v1547_v7 = vld [vmem:[#allocation2 + $0x129] sm:$0xff] }
 0x257   : > { %1687 = vst.msk [vmem:[#allocation3] sm:$0xff] %vm1686_vm9, %v1591_v42 }
 0x258   : > { %v1402_v10 = vpop.permute.xlu2 %1401 }
 0x259   : > { %1496 = vst.msk [vmem:[#allocation3 + $0x10] sm:$0xff] %vm1493_vm8, %v1402_v10  ;;  %v1360_v10 = vld [vmem:[#allocation2 + $0x170] sm:$0xff] }
 0x25b   : > { %1602 = vrot.lane.b32.xlu1 %v1532_v45, %s2548_s23  ;;  %v1740_v45 = vld [vmem:[#allocation2 + $0x12a] sm:$0xff] }
 0x25c   : > { %1435 = vrot.lane.b32.xlu0 %v1352_v3, %s2550_s25 }
 0x25d   : > { %v1784_v0 = vpop.permute.xlu1 %1783 }
 0x25e   : > { %1880 = vst.msk [vmem:[#allocation3] sm:$0xff] %vm1879_vm10, %v1784_v0  ;;  %v1593_v15 = vpop.permute.xlu0 %1592  ;;  %1409 = vrot.lane.b32.xlu2 %v1339_v11, %s2550_s25 }
 0x25f   : > { %1688 = vst.msk [vmem:[#allocation3 + $0x8] sm:$0xff] %vm1686_vm9, %v1593_v15  ;;  %v1746_v15 = vld [vmem:[#allocation2 + $0x172] sm:$0xff] }
 0x260   : > { %v1607_v28 = vpop.permute.xlu2 %1606 }
 0x263   : > { %1447 = vrot.lane.b32.xlu1 %v1358_v47, %s2550_s25 }
 0x264   : > { %1807 = vrot.lane.b32.xlu0 %v1731_v33, %s2549_s24  ;;  %v1553_v33 = vld [vmem:[#allocation2 + $0x171] sm:$0xff] }
 0x265   : > { %v1786_v34 = vpop.permute.xlu1 %1785  ;;  %v1912_v20 = vld [vmem:[#allocation3] sm:$0xff] }
 0x266   : > { %1881 = vst.msk [vmem:[#allocation3 + $0x8] sm:$0xff] %vm1879_vm10, %v1786_v34  ;;  %2466 = vmatmul.msk.f32.vlgmr.msra.gmra.mxu0 %vm1949_vm11, %v1912_v20  ;;  %v1414_v41 = vpop.permute.xlu0 %1413  ;;  %1614 = vrot.lane.b32.xlu2 %v1538_v17, %s2548_s23 }
 0x267   : > { %1502 = vst.msk [vmem:[#allocation3 + $0x40] sm:$0xff] %vm1493_vm8, %v1414_v41  ;;  %v1355_v41 = vld [vmem:[#allocation2 + $0x138] sm:$0xff] }
 0x268   : > { %1695 = vst.msk [vmem:[#allocation3 + $0x40] sm:$0xff] %vm1686_vm9, %v1607_v28  ;;  %v1404_v40 = vpop.permute.xlu2 %1403  ;;  %v1541_v28 = vld [vmem:[#allocation2 + $0xe1] sm:$0xff] }
 0x269   : > { %1497 = vst.msk [vmem:[#allocation3 + $0x18] sm:$0xff] %vm1493_vm8, %v1404_v40  ;;  %v1734_v40 = vld [vmem:[#allocation2 + $0xe2] sm:$0xff] }
 0x26b   : > { %1628 = vrot.lane.b32.xlu1 %v1545_v26, %s2548_s23 }
 0x26c   : > { %1821 = vrot.lane.b32.xlu0 %v1738_v24, %s2549_s24  ;;  %v1348_v24 = vld [vmem:[#allocation2 + $0xe0] sm:$0xff] }
 0x26d   : > { %v1595_v46 = vpop.permute.xlu1 %1594  ;;  %v1913_v31 = vld [vmem:[#allocation3 + $0x8] sm:$0xff] }
 0x26e   : > { %1689 = vst.msk [vmem:[#allocation3 + $0x10] sm:$0xff] %vm1686_vm9, %v1595_v46  ;;  %2467 = vmatmul.msk.f32.gmra.mxu0 %vm1949_vm11, %v1913_v31  ;;  %v1788_v38 = vpop.permute.xlu0 %1787  ;;  %1795 = vrot.lane.b32.xlu2 %v1725_v32, %s2549_s24 }
 0x26f   : > { %1882 = vst.msk [vmem:[#allocation3 + $0x10] sm:$0xff] %vm1879_vm10, %v1788_v38  ;;  %v1548_v38 = vld [vmem:[#allocation2 + $0x139] sm:$0xff] }
 0x270   : > { %v1609_v37 = vpop.permute.xlu2 %1608 }
 0x273   : > { %1833 = vrot.lane.b32.xlu1 %v1744_v50, %s2549_s24 }
 0x274   : > { %1423 = vrot.lane.b32.xlu0 %v1346_v44, %s2550_s25  ;;  %v1361_v44 = vld [vmem:[#allocation2 + $0x180] sm:$0xff] }
 0x275   : > { %v1800_v43 = vpop.permute.xlu1 %1799 }
 0x276   : > { %1888 = vst.msk [vmem:[#allocation3 + $0x40] sm:$0xff] %vm1879_vm10, %v1800_v43  ;;  %v1416_v49 = vpop.permute.xlu0 %1415  ;;  %v1914_v57 = vld [vmem:[#allocation3 + $0x10] sm:$0xff]  ;;  %1640 = vrot.lane.b32.xlu2 %v1551_v54, %s2548_s23 }
 0x277   : > { %1503 = vst.msk [vmem:[#allocation3 + $0x48] sm:$0xff] %vm1493_vm8, %v1416_v49  ;;  %2468 = vmatmul.msk.f32.gmra.mxu0 %vm1949_vm11, %v1914_v57  ;;  %v1747_v57 = vld [vmem:[#allocation2 + $0x182] sm:$0xff] }
 0x278   : > { %1696 = vst.msk [vmem:[#allocation3 + $0x48] sm:$0xff] %vm1686_vm9, %v1609_v37  ;;  %v1802_v53 = vpop.permute.xlu2 %1801  ;;  %v1741_v37 = vld [vmem:[#allocation2 + $0x13a] sm:$0xff] }
 0x279   : > { %1889 = vst.msk [vmem:[#allocation3 + $0x48] sm:$0xff] %vm1879_vm10, %v1802_v53  ;;  %v1362_v53 = vld [vmem:[#allocation2 + $0x188] sm:$0xff] }
 0x27b   : > { %1604 = vrot.lane.b32.xlu1 %v1533_v48, %s2548_s23 }
 0x27c   : > { %1437 = vrot.lane.b32.xlu0 %v1353_v63, %s2550_s25  ;;  %v1554_v63 = vld [vmem:[#allocation2 + $0x181] sm:$0xff] }
 0x27d   : > { %v1597_v52 = vpop.permute.xlu1 %1596  ;;  %v1920_v12 = vld [vmem:[#allocation3 + $0x40] sm:$0xff] }
 0x27e   : > { %1690 = vst.msk [vmem:[#allocation3 + $0x18] sm:$0xff] %vm1686_vm9, %v1597_v52  ;;  %2474 = vmatmul.msk.f32.vlgmr.msra.gmra.mxu1 %vm1949_vm11, %v1920_v12  ;;  %v1430_v56 = vpop.permute.xlu0 %1429  ;;  %1411 = vrot.lane.b32.xlu2 %v1340_v60, %s2550_s25 }
 0x27f   : > { %1510 = vst.msk [vmem:[#allocation3 + $0x80] sm:$0xff] %vm1493_vm8, %v1430_v56  ;;  %v1549_v56 = vld [vmem:[#allocation2 + $0x141] sm:$0xff] }
 0x280   : > { %v1406_v27 = vpop.permute.xlu2 %1405  ;;  %v1921_v16 = vld [vmem:[#allocation3 + $0x48] sm:$0xff] }
 0x281   : > { %1498 = vst.msk [vmem:[#allocation3 + $0x20] sm:$0xff] %vm1493_vm8, %v1406_v27  ;;  %v1742_v27 = vld [vmem:[#allocation2 + $0x142] sm:$0xff] }
 0x283   : > { %1449 = vrot.lane.b32.xlu1 %v1359_v2, %s2550_s25 }
 0x284   : > { %1809 = vrot.lane.b32.xlu0 %v1732_v19, %s2549_s24  ;;  %v1356_v19 = vld [vmem:[#allocation2 + $0x140] sm:$0xff] }
 0x285   : > { %v1790_v59 = vpop.permute.xlu1 %1789 }
 0x286   : > { %1883 = vst.msk [vmem:[#allocation3 + $0x18] sm:$0xff] %vm1879_vm10, %v1790_v59  ;;  %v1623_v29 = vpop.permute.xlu0 %1622  ;;  %1616 = vrot.lane.b32.xlu2 %v1539_v55, %s2548_s23  ;;  %2475 = vmatmul.msk.f32.gmra.mxu1 %vm1949_vm11, %v1921_v16 }
 0x287   : > { %1703 = vst.msk [vmem:[#allocation3 + $0x80] sm:$0xff] %vm1686_vm9, %v1623_v29  ;;  %v1748_v29 = vld [vmem:[#allocation2 + $0x18a] sm:$0xff] }
 0x288   : > { %v1611_v14 = vpop.permute.xlu2 %1610 }
 0x28b   : > { %1630 = vrot.lane.b32.xlu1 %v1546_v21, %s2548_s23 }
 0x28c   : > { %1823 = vrot.lane.b32.xlu0 %v1739_v35, %s2549_s24  ;;  %v1555_v35 = vld [vmem:[#allocation2 + $0x189] sm:$0xff] }
 0x28d   : > { %v1816_v58 = vpop.permute.xlu1 %1815  ;;  %v1915_v51 = vld [vmem:[#allocation3 + $0x18] sm:$0xff] }
 0x28e   : > { %1896 = vst.msk [vmem:[#allocation3 + $0x80] sm:$0xff] %vm1879_vm10, %v1816_v58  ;;  %2469 = vmatmul.msk.f32.gmra.mxu0 %vm1949_vm11, %v1915_v51  ;;  %v1418_v30 = vpop.permute.xlu0 %1417  ;;  %1797 = vrot.lane.b32.xlu2 %v1726_v23, %s2549_s24 }
 0x28f   : > { %1504 = vst.msk [vmem:[#allocation3 + $0x50] sm:$0xff] %vm1493_vm8, %v1418_v30  ;;  %v1556_v30 = vld [vmem:[#allocation2 + $0x199] sm:$0xff] }
 0x290   : > { %1697 = vst.msk [vmem:[#allocation3 + $0x50] sm:$0xff] %vm1686_vm9, %v1611_v14  ;;  %v1804_v4 = vpop.permute.xlu2 %1803  ;;  %v1363_v14 = vld [vmem:[#allocation2 + $0x198] sm:$0xff] }
 0x291   : > { %1890 = vst.msk [vmem:[#allocation3 + $0x50] sm:$0xff] %vm1879_vm10, %v1804_v4 }
 0x293   : > { %1835 = vrot.lane.b32.xlu1 %v1745_v62, %s2549_s24 }
 0x294   : > { %1618 = vrot.lane.b32.xlu0 %v1540_v6, %s2548_s23 }
 0x295   : > { %v1599_v25 = vpop.permute.xlu1 %1598  ;;  %v1928_v1 = vld [vmem:[#allocation3 + $0x80] sm:$0xff] }
 0x296   : > { %1691 = vst.msk [vmem:[#allocation3 + $0x20] sm:$0xff] %vm1686_vm9, %v1599_v25  ;;  %2482 = vmatmul.msk.f32.vlgmr.msra.gmra.mxu2 %vm1949_vm11, %v1928_v1  ;;  %v1432_v22 = vpop.permute.xlu0 %1431  ;;  %1642 = vrot.lane.b32.xlu2 %v1552_v61, %s2548_s23  ;;  %v1364_v25 = vld [vmem:[#allocation2 + $0x1a0] sm:$0xff] }
 0x297   : > { %1511 = vst.msk [vmem:[#allocation3 + $0x88] sm:$0xff] %vm1493_vm8, %v1432_v22  ;;  %v1750_v22 = vld [vmem:[#allocation2 + $0x1a2] sm:$0xff] }
 0x298   : > { %v1408_v8 = vpop.permute.xlu2 %1407  ;;  %v1922_v13 = vld [vmem:[#allocation3 + $0x50] sm:$0xff] }
 0x299   : > { %1499 = vst.msk [vmem:[#allocation3 + $0x28] sm:$0xff] %vm1493_vm8, %v1408_v8  ;;  %2476 = vmatmul.msk.f32.gmra.mxu1 %vm1949_vm11, %v1922_v13  ;;  %v1749_v8 = vld [vmem:[#allocation2 + $0x19a] sm:$0xff] }
 0x29b   : > { %1439 = vrot.lane.b32.xlu1 %v1354_v39, %s2550_s25 }
 0x29c   : > { %1811 = vrot.lane.b32.xlu0 %v1733_v5, %s2549_s24 }
 0x29d   : > { %v1792_v9 = vpop.permute.xlu1 %1791 }
 0x29e   : > { %1884 = vst.msk [vmem:[#allocation3 + $0x20] sm:$0xff] %vm1879_vm10, %v1792_v9  ;;  %v1625_v18 = vpop.permute.xlu0 %1624  ;;  %1425 = vrot.lane.b32.xlu2 %v1347_v36, %s2550_s25 }
 0x29f   : > { %1704 = vst.msk [vmem:[#allocation3 + $0x88] sm:$0xff] %vm1686_vm9, %v1625_v18 }
 0x2a0   : > { %v1613_v42 = vpop.permute.xlu2 %1612 }
 0x2a3   : > { %1632 = vrot.lane.b32.xlu1 %v1547_v7, %s2548_s23 }
 0x2a4   : > { %1825 = vrot.lane.b32.xlu0 %v1740_v45, %s2549_s24 }
 0x2a5   : > { %v1818_v3 = vpop.permute.xlu1 %1817  ;;  %v1916_v11 = vld [vmem:[#allocation3 + $0x20] sm:$0xff] }
 0x2a6   : > { %1897 = vst.msk [vmem:[#allocation3 + $0x88] sm:$0xff] %vm1879_vm10, %v1818_v3  ;;  %2470 = vmatmul.msk.f32.gmra.mxu0 %vm1949_vm11, %v1916_v11  ;;  %v1420_v0 = vpop.permute.xlu0 %1419  ;;  %1451 = vrot.lane.b32.xlu2 %v1360_v10, %s2550_s25 }
 0x2a7   : > { %1505 = vst.msk [vmem:[#allocation3 + $0x58] sm:$0xff] %vm1493_vm8, %v1420_v0 }
 0x2a8   : > { %1698 = vst.msk [vmem:[#allocation3 + $0x58] sm:$0xff] %vm1686_vm9, %v1613_v42  ;;  %v1794_v47 = vpop.permute.xlu2 %1793  ;;  %v1557_v42 = vld [vmem:[#allocation2 + $0x1a1] sm:$0xff] }
 0x2ab   : > { %1837 = vrot.lane.b32.xlu1 %v1746_v15, %s2549_s24 }
 0x2ac   : > { %1620 = vrot.lane.b32.xlu0 %v1541_v28, %s2548_s23 }
 0x2ad   : > { %v1601_v17 = vpop.permute.xlu1 %1600  ;;  %v1929_v34 = vld [vmem:[#allocation3 + $0x88] sm:$0xff] }
 0x2ae   : > { %1692 = vst.msk [vmem:[#allocation3 + $0x28] sm:$0xff] %vm1686_vm9, %v1601_v17  ;;  %2483 = vmatmul.msk.f32.gmra.mxu2 %vm1949_vm11, %v1929_v34  ;;  %v1434_v20 = vpop.permute.xlu0 %1433  ;;  %1644 = vrot.lane.b32.xlu2 %v1553_v33, %s2548_s23 }
 0x2af   : > { %1885 = vst.msk [vmem:[#allocation3 + $0x28] sm:$0xff] %vm1879_vm10, %v1794_v47 }
 0x2b0   : > { %1512 = vst.msk [vmem:[#allocation3 + $0x90] sm:$0xff] %vm1493_vm8, %v1434_v20  ;;  %v1639_v26 = vpop.permute.xlu2 %1638 }
 0x2b3   : > { %1441 = vrot.lane.b32.xlu1 %v1355_v41, %s2550_s25 }
 0x2b4   : > { %1813 = vrot.lane.b32.xlu0 %v1734_v40, %s2549_s24 }
 0x2b5   : > { %v1446_v32 = vpop.permute.xlu1 %1445 }
 0x2b6   : > { %1518 = vst.msk [vmem:[#allocation3 + $0xc0] sm:$0xff] %vm1493_vm8, %v1446_v32  ;;  %v1806_v46 = vpop.permute.xlu0 %1805  ;;  %v1917_v31 = vld [vmem:[#allocation3 + $0x28] sm:$0xff]  ;;  %1427 = vrot.lane.b32.xlu2 %v1348_v24, %s2550_s25 }
 0x2b7   : > { %1711 = vst.msk [vmem:[#allocation3 + $0xc0] sm:$0xff] %vm1686_vm9, %v1639_v26  ;;  %2471 = vmatmul.msk.f32.gmra.mxu0 %vm1949_vm11, %v1917_v31 }
 0x2b8   : > { %1891 = vst.msk [vmem:[#allocation3 + $0x58] sm:$0xff] %vm1879_vm10, %v1806_v46  ;;  %v1410_v50 = vpop.permute.xlu2 %1409 }
 0x2b9   : > { %1500 = vst.msk [vmem:[#allocation3 + $0x30] sm:$0xff] %vm1493_vm8, %v1410_v50 }
 0x2bb   : > { %1634 = vrot.lane.b32.xlu1 %v1548_v38, %s2548_s23 }
 0x2bc   : > { %1827 = vrot.lane.b32.xlu0 %v1741_v37, %s2549_s24 }
 0x2bd   : > { %v1627_v54 = vpop.permute.xlu1 %1626 }
 0x2be   : > { %1705 = vst.msk [vmem:[#allocation3 + $0x90] sm:$0xff] %vm1686_vm9, %v1627_v54  ;;  %v1820_v43 = vpop.permute.xlu0 %1819  ;;  %1453 = vrot.lane.b32.xlu2 %v1361_v44, %s2550_s25 }
 0x2bf   : > { %1898 = vst.msk [vmem:[#allocation3 + $0x90] sm:$0xff] %vm1879_vm10, %v1820_v43  ;;  %v1923_v49 = vld [vmem:[#allocation3 + $0x58] sm:$0xff] }
 0x2c0   : > { %2477 = vmatmul.msk.f32.gmra.mxu1 %vm1949_vm11, %v1923_v49  ;;  %v1615_v48 = vpop.permute.xlu2 %1614 }
 0x2c3   : > { %1839 = vrot.lane.b32.xlu1 %v1747_v57, %s2549_s24 }
 0x2c4   : > { %1455 = vrot.lane.b32.xlu0 %v1362_v53, %s2550_s25 }
 0x2c5   : > { %v1832_v60 = vpop.permute.xlu1 %1831 }
 0x2c6   : > { %1904 = vst.msk [vmem:[#allocation3 + $0xc0] sm:$0xff] %vm1879_vm10, %v1832_v60  ;;  %v1422_v52 = vpop.permute.xlu0 %1421  ;;  %v1930_v12 = vld [vmem:[#allocation3 + $0x90] sm:$0xff]  ;;  %1646 = vrot.lane.b32.xlu2 %v1554_v63, %s2548_s23 }
 0x2c7   : > { %1506 = vst.msk [vmem:[#allocation3 + $0x60] sm:$0xff] %vm1493_vm8, %v1422_v52  ;;  %2484 = vmatmul.msk.f32.gmra.mxu2 %vm1949_vm11, %v1930_v12 }
 0x2c8   : > { %1699 = vst.msk [vmem:[#allocation3 + $0x60] sm:$0xff] %vm1686_vm9, %v1615_v48  ;;  %v1796_v2 = vpop.permute.xlu2 %1795 }
 0x2cb   : > { %1636 = vrot.lane.b32.xlu1 %v1549_v56, %s2548_s23 }
 0x2cc   : > { %1829 = vrot.lane.b32.xlu0 %v1742_v27, %s2549_s24 }
 0x2cd   : > { %v1603_v55 = vpop.permute.xlu1 %1602  ;;  %v1936_v16 = vld [vmem:[#allocation3 + $0xc0] sm:$0xff] }
 0x2ce   : > { %1693 = vst.msk [vmem:[#allocation3 + $0x30] sm:$0xff] %vm1686_vm9, %v1603_v55  ;;  %2490 = vmatmul.msk.f32.vlgmr.msra.gmra.mxu3 %vm1949_vm11, %v1936_v16  ;;  %v1436_v59 = vpop.permute.xlu0 %1435  ;;  %1443 = vrot.lane.b32.xlu2 %v1356_v19, %s2550_s25 }
 0x2cf   : > { %1886 = vst.msk [vmem:[#allocation3 + $0x30] sm:$0xff] %vm1879_vm10, %v1796_v2 }
 0x2d0   : > { %1513 = vst.msk [vmem:[#allocation3 + $0x98] sm:$0xff] %vm1493_vm8, %v1436_v59  ;;  %v1641_v21 = vpop.permute.xlu2 %1640 }
 0x2d3   : > { %1841 = vrot.lane.b32.xlu1 %v1748_v29, %s2549_s24 }
 0x2d4   : > { %1457 = vrot.lane.b32.xlu0 %v1363_v14, %s2550_s25 }
 0x2d5   : > { %v1448_v23 = vpop.permute.xlu1 %1447 }
 0x2d6   : > { %1519 = vst.msk [vmem:[#allocation3 + $0xc8] sm:$0xff] %vm1493_vm8, %v1448_v23  ;;  %v1808_v58 = vpop.permute.xlu0 %1807  ;;  %v1918_v51 = vld [vmem:[#allocation3 + $0x30] sm:$0xff]  ;;  %1648 = vrot.lane.b32.xlu2 %v1555_v35, %s2548_s23 }
 0x2d7   : > { %1712 = vst.msk [vmem:[#allocation3 + $0xc8] sm:$0xff] %vm1686_vm9, %v1641_v21  ;;  %2472 = vmatmul.msk.f32.gmra.mxu0 %vm1949_vm11, %v1918_v51 }
 0x2d8   : > { %1892 = vst.msk [vmem:[#allocation3 + $0x60] sm:$0xff] %vm1879_vm10, %v1808_v58  ;;  %v1412_v62 = vpop.permute.xlu2 %1411 }
 0x2d9   : > { %1501 = vst.msk [vmem:[#allocation3 + $0x38] sm:$0xff] %vm1493_vm8, %v1412_v62 }
 0x2db   : > { %1650 = vrot.lane.b32.xlu1 %v1556_v30, %s2548_s23 }
 0x2dc   : > { %1265 = vrot.lane.b32.xlu0 %v1748_v29, %s2547_s22 }
 0x2dd   : > { %v1629_v4 = vpop.permute.xlu1 %1628 }
 0x2de   : > { %1706 = vst.msk [vmem:[#allocation3 + $0x98] sm:$0xff] %vm1686_vm9, %v1629_v4  ;;  %v1822_v6 = vpop.permute.xlu0 %1821  ;;  %1263 = vrot.lane.b32.xlu2 %v1747_v57, %s2547_s22 }
 0x2df   : > { %1899 = vst.msk [vmem:[#allocation3 + $0x98] sm:$0xff] %vm1879_vm10, %v1822_v6  ;;  %v1924_v61 = vld [vmem:[#allocation3 + $0x60] sm:$0xff] }
 0x2e0   : > { %2478 = vmatmul.msk.f32.gmra.mxu1 %vm1949_vm11, %v1924_v61  ;;  %v1617_v1 = vpop.permute.xlu2 %1616 }
 0x2e3   : > { %1459 = vrot.lane.b32.xlu1 %v1364_v25, %s2550_s25  ;;  %v2067_v39 = vpop.f32.mrf.mxu0 }
 0x2e4   : > { %2337 = vst.msk [vmem:[%s3662_s11] sm:$0xff] %vm2163_vm12, %v2067_v39  ;;  %1845 = vrot.lane.b32.xlu0 %v1750_v22, %s2549_s24  ;;  %v2235_v18 = vmul.f32 %v2067_v39, %v2067_v39  ;;  %v2164_v45 = vsel %vm2163_vm12, %v2067_v39, 0.0 }
 0x2e5   : > { %v1834_v13 = vpop.permute.xlu1 %1833 }
 0x2e6   : > { %1905 = vst.msk [vmem:[#allocation3 + $0xc8] sm:$0xff] %vm1879_vm10, %v1834_v13  ;;  %v1424_v5 = vpop.permute.xlu0 %1423  ;;  %v1931_v36 = vld [vmem:[#allocation3 + $0x98] sm:$0xff]  ;;  %1843 = vrot.lane.b32.xlu2 %v1749_v8, %s2549_s24  ;;  %v2267_v47 = vsel %vm2163_vm12, %v2235_v18, 0.0 }
 0x2e7   : > { %1507 = vst.msk [vmem:[#allocation3 + $0x68] sm:$0xff] %vm1493_vm8, %v1424_v5  ;;  %2485 = vmatmul.msk.f32.gmra.mxu2 %vm1949_vm11, %v1931_v36 }
 0x2e8   : > { %1700 = vst.msk [vmem:[#allocation3 + $0x68] sm:$0xff] %vm1686_vm9, %v1617_v1  ;;  %v1798_v9 = vpop.permute.xlu2 %1797 }
 0x2eb   : > { %v2070_v7 = vpop.f32.mrf.mxu0 }
 0x2ec   : > { %v2165_v10 = vsel %vm2163_vm12, %v2070_v7, 0.0  ;;  %v2236_v3 = vmul.f32 %v2070_v7, %v2070_v7  ;;  %2338 = vst.msk [vmem:[%s3662_s11 + $0x8] sm:$0xff] %vm2163_vm12, %v2070_v7 }
 0x2ed   : > { %v2166_v11 = vadd.f32 %v2165_v10, %v2164_v45  ;;  %v1605_v0 = vpop.permute.xlu1 %1604  ;;  %v1937_v15 = vld [vmem:[#allocation3 + $0xc8] sm:$0xff] }
 0x2ee   : > { %v2268_v28 = vsel %vm2163_vm12, %v2236_v3, 0.0  ;;  %1694 = vst.msk [vmem:[#allocation3 + $0x38] sm:$0xff] %vm1686_vm9, %v1605_v0  ;;  %2491 = vmatmul.msk.f32.gmra.mxu3 %vm1949_vm11, %v1937_v15  ;;  %v1438_v33 = vpop.permute.xlu0 %1437  ;;  %1652 = vrot.lane.b32.xlu2 %v1557_v42, %s2548_s23 }
 0x2ef   : > { %v2269_v17 = vadd.f32 %v2268_v28, %v2267_v47  ;;  %1887 = vst.msk [vmem:[#allocation3 + $0x38] sm:$0xff] %vm1879_vm10, %v1798_v9 }
 0x2f0   : > { %1514 = vst.msk [vmem:[#allocation3 + $0xa0] sm:$0xff] %vm1493_vm8, %v1438_v33  ;;  %v1643_v34 = vpop.permute.xlu2 %1642 }
 0x2f4   : > { %v2073_v20 = vpop.f32.mrf.mxu0 }
 0x2f5   : > { %v1450_v41 = vpop.permute.xlu1 %1449  ;;  %v2167_v26 = vsel %vm2163_vm12, %v2073_v20, 0.0  ;;  %v2237_v40 = vmul.f32 %v2073_v20, %v2073_v20  ;;  %2339 = vst.msk [vmem:[%s3662_s11 + $0x10] sm:$0xff] %vm2163_vm12, %v2073_v20 }
 0x2f6   : > { %1520 = vst.msk [vmem:[#allocation3 + $0xd0] sm:$0xff] %vm1493_vm8, %v1450_v41  ;;  %v2168_v24 = vadd.f32 %v2167_v26, %v2166_v11  ;;  %v1810_v32 = vpop.permute.xlu0 %1809  ;;  %v1919_v46 = vld [vmem:[#allocation3 + $0x38] sm:$0xff] }
 0x2f7   : > { %v2270_v31 = vsel %vm2163_vm12, %v2237_v40, 0.0  ;;  %1893 = vst.msk [vmem:[#allocation3 + $0x68] sm:$0xff] %vm1879_vm10, %v1810_v32  ;;  %2473 = vmatmul.msk.f32.gmra.mxu0 %vm1949_vm11, %v1919_v46 }
 0x2f8   : > { %v2271_v38 = vadd.f32 %v2270_v31, %v2269_v17  ;;  %1713 = vst.msk [vmem:[#allocation3 + $0xd0] sm:$0xff] %vm1686_vm9, %v1643_v34  ;;  %v1426_v50 = vpop.permute.xlu2 %1425 }
 0x2f9   : > { %1508 = vst.msk [vmem:[#allocation3 + $0x70] sm:$0xff] %vm1493_vm8, %v1426_v50 }
 0x2fb   : > { %v3693_v37 = vpop.f32.mrf.mxu1 }
 0x2fc   : > { %2345 = vst.msk [vmem:[%s3662_s11 + $0x40] sm:$0xff] %vm2163_vm12, %v3693_v37 }
 0x2fd   : > { %v1631_v44 = vpop.permute.xlu1 %1630 }
 0x2fe   : > { %1707 = vst.msk [vmem:[#allocation3 + $0xa0] sm:$0xff] %vm1686_vm9, %v1631_v44  ;;  %v1824_v54 = vpop.permute.xlu0 %1823  ;;  %v1925_v43 = vld [vmem:[#allocation3 + $0x68] sm:$0xff] }
 0x2ff   : > { %1900 = vst.msk [vmem:[#allocation3 + $0xa0] sm:$0xff] %vm1879_vm10, %v1824_v54  ;;  %2479 = vmatmul.msk.f32.gmra.mxu1 %vm1949_vm11, %v1925_v43 }
 0x300   : > { %v1452_v49 = vpop.permute.xlu2 %1451 }
 0x301   : > { %1521 = vst.msk [vmem:[#allocation3 + $0xd8] sm:$0xff] %vm1493_vm8, %v1452_v49 }
 0x303   : > { %v3702_v57 = vpop.f32.mrf.mxu1 }
 0x304   : > { %2346 = vst.msk [vmem:[%s3662_s11 + $0x48] sm:$0xff] %vm2163_vm12, %v3702_v57 }
 0x305   : > { %v1836_v48 = vpop.permute.xlu1 %1835 }
 0x306   : > { %1906 = vst.msk [vmem:[#allocation3 + $0xd0] sm:$0xff] %vm1879_vm10, %v1836_v48  ;;  %v1619_v53 = vpop.permute.xlu0 %1618  ;;  %v1932_v63 = vld [vmem:[#allocation3 + $0xa0] sm:$0xff] }
 0x307   : > { %1701 = vst.msk [vmem:[#allocation3 + $0x70] sm:$0xff] %vm1686_vm9, %v1619_v53  ;;  %2486 = vmatmul.msk.f32.gmra.mxu2 %vm1949_vm11, %v1932_v63 }
 0x308   : > { %v1645_v60 = vpop.permute.xlu2 %1644 }
 0x309   : > { %1714 = vst.msk [vmem:[#allocation3 + $0xd8] sm:$0xff] %vm1686_vm9, %v1645_v60 }
 0x30b   : > { %v2076_v52 = vpop.f32.mrf.mxu0 }
 0x30c   : > { %v2169_v12 = vsel %vm2163_vm12, %v2076_v52, 0.0  ;;  %v2238_v56 = vmul.f32 %v2076_v52, %v2076_v52  ;;  %2340 = vst.msk [vmem:[%s3662_s11 + $0x18] sm:$0xff] %vm2163_vm12, %v2076_v52 }
 0x30d   : > { %v2170_v2 = vadd.f32 %v2169_v12, %v2168_v24  ;;  %v1440_v27 = vpop.permute.xlu1 %1439  ;;  %v1938_v19 = vld [vmem:[#allocation3 + $0xd0] sm:$0xff] }
 0x30e   : > { %v2272_v55 = vsel %vm2163_vm12, %v2238_v56, 0.0  ;;  %1515 = vst.msk [vmem:[#allocation3 + $0xa8] sm:$0xff] %vm1493_vm8, %v1440_v27  ;;  %2492 = vmatmul.msk.f32.gmra.mxu3 %vm1949_vm11, %v1938_v19  ;;  %v1812_v16 = vpop.permute.xlu0 %1811 }
 0x30f   : > { %v2273_v59 = vadd.f32 %v2272_v55, %v2271_v38  ;;  %1894 = vst.msk [vmem:[#allocation3 + $0x70] sm:$0xff] %vm1879_vm10, %v1812_v16 }
 0x310   : > { %v1428_v29 = vpop.permute.xlu2 %1427 }
 0x311   : > { %1509 = vst.msk [vmem:[#allocation3 + $0x78] sm:$0xff] %vm1493_vm8, %v1428_v29 }
 0x315   : > { %v1633_v21 = vpop.permute.xlu1 %1632 }
 0x316   : > { %1708 = vst.msk [vmem:[#allocation3 + $0xa8] sm:$0xff] %vm1686_vm9, %v1633_v21  ;;  %v1826_v14 = vpop.permute.xlu0 %1825  ;;  %v1926_v35 = vld [vmem:[#allocation3 + $0x70] sm:$0xff]  ;;  %v3720_v23 = vpop.f32.mrf.mxu1 }
 0x317   : > { %1901 = vst.msk [vmem:[#allocation3 + $0xa8] sm:$0xff] %vm1879_vm10, %v1826_v14  ;;  %2480 = vmatmul.msk.f32.gmra.mxu1 %vm1949_vm11, %v1926_v35  ;;  %v2243_v14 = vmul.f32 %v3693_v37, %v3693_v37 }
 0x318   : > { %2347 = vst.msk [vmem:[%s3662_s11 + $0x50] sm:$0xff] %vm2163_vm12, %v3720_v23  ;;  %v1454_v58 = vpop.permute.xlu2 %1453 }
 0x319   : > { %v3727_v51 = vpop.f32.mrf.mxu2  ;;  %1522 = vst.msk [vmem:[#allocation3 + $0xe0] sm:$0xff] %vm1493_vm8, %v1454_v58 }
 0x31a   : > { %2353 = vst.msk [vmem:[%s3662_s11 + $0x80] sm:$0xff] %vm2163_vm12, %v3727_v51 }
 0x31d   : > { %v1838_v30 = vpop.permute.xlu1 %1837 }
 0x31e   : > { %1907 = vst.msk [vmem:[#allocation3 + $0xd8] sm:$0xff] %vm1879_vm10, %v1838_v30  ;;  %v1621_v62 = vpop.permute.xlu0 %1620  ;;  %v1933_v4 = vld [vmem:[#allocation3 + $0xa8] sm:$0xff] }
 0x31f   : > { %1702 = vst.msk [vmem:[#allocation3 + $0x78] sm:$0xff] %vm1686_vm9, %v1621_v62  ;;  %2487 = vmatmul.msk.f32.gmra.mxu2 %vm1949_vm11, %v1933_v4  ;;  %v2179_v62 = vsel %vm2163_vm12, %v3693_v37, 0.0  ;;  %v2244_v4 = vmul.f32 %v3702_v57, %v3702_v57 }
 0x320   : > { %v1647_v6 = vpop.permute.xlu2 %1646 }
 0x321   : > { %1715 = vst.msk [vmem:[#allocation3 + $0xe0] sm:$0xff] %vm1686_vm9, %v1647_v6  ;;  %v2284_v37 = vsel %vm2163_vm12, %v2244_v4, 0.0 }
 0x323   : > { %v2079_v61 = vpop.f32.mrf.mxu0 }
 0x324   : > { %v2171_v25 = vsel %vm2163_vm12, %v2079_v61, 0.0  ;;  %v2239_v1 = vmul.f32 %v2079_v61, %v2079_v61  ;;  %2341 = vst.msk [vmem:[%s3662_s11 + $0x20] sm:$0xff] %vm2163_vm12, %v2079_v61 }
 0x325   : > { %v2172_v22 = vadd.f32 %v2171_v25, %v2170_v2  ;;  %v1442_v39 = vpop.permute.xlu1 %1441  ;;  %v1939_v8 = vld [vmem:[#allocation3 + $0xd8] sm:$0xff] }
 0x326   : > { %v2274_v13 = vsel %vm2163_vm12, %v2239_v1, 0.0  ;;  %1516 = vst.msk [vmem:[#allocation3 + $0xb0] sm:$0xff] %vm1493_vm8, %v1442_v39  ;;  %2493 = vmatmul.msk.f32.gmra.mxu3 %vm1949_vm11, %v1939_v8  ;;  %v1814_v5 = vpop.permute.xlu0 %1813  ;;  %v2282_v1 = vsel %vm2163_vm12, %v2243_v14, 0.0  ;;  %v2245_v39 = vmul.f32 %v3720_v23, %v3720_v23 }
 0x327   : > { %v2275_v36 = vadd.f32 %v2274_v13, %v2273_v59  ;;  %1895 = vst.msk [vmem:[#allocation3 + $0x78] sm:$0xff] %vm1879_vm10, %v1814_v5  ;;  %v2183_v5 = vsel %vm2163_vm12, %v3720_v23, 0.0 }
 0x328   : > { %v1444_v9 = vpop.permute.xlu2 %1443 }
 0x329   : > { %1517 = vst.msk [vmem:[#allocation3 + $0xb8] sm:$0xff] %vm1493_vm8, %v1444_v9 }
 0x32d   : > { %v1635_v18 = vpop.permute.xlu1 %1634 }
 0x32e   : > { %1709 = vst.msk [vmem:[#allocation3 + $0xb0] sm:$0xff] %vm1686_vm9, %v1635_v18  ;;  %v1828_v7 = vpop.permute.xlu0 %1827  ;;  %v1927_v42 = vld [vmem:[#allocation3 + $0x78] sm:$0xff] }
 0x32f   : > { %1902 = vst.msk [vmem:[#allocation3 + $0xb0] sm:$0xff] %vm1879_vm10, %v1828_v7  ;;  %2481 = vmatmul.msk.f32.gmra.mxu1 %vm1949_vm11, %v1927_v42  ;;  %v2286_v42 = vsel %vm2163_vm12, %v2245_v39, 0.0 }
 0x330   : > { %v1649_v45 = vpop.permute.xlu2 %1648 }
 0x331   : > { %v3748_v10 = vpop.f32.mrf.mxu2 }
 0x332   : > { %2354 = vst.msk [vmem:[%s3662_s11 + $0x88] sm:$0xff] %vm2163_vm12, %v3748_v10 }
 0x334   : > { %v2082_v3 = vpop.f32.mrf.mxu0 }
 0x335   : > { %v2173_v11 = vsel %vm2163_vm12, %v2082_v3, 0.0  ;;  %v2240_v0 = vmul.f32 %v2082_v3, %v2082_v3  ;;  %2342 = vst.msk [vmem:[%s3662_s11 + $0x28] sm:$0xff] %vm2163_vm12, %v2082_v3  ;;  %v1840_v15 = vpop.permute.xlu1 %1839 }
 0x336   : > { %v2174_v47 = vadd.f32 %v2173_v11, %v2172_v22  ;;  %1908 = vst.msk [vmem:[#allocation3 + $0xe0] sm:$0xff] %vm1879_vm10, %v1840_v15  ;;  %v1456_v28 = vpop.permute.xlu0 %1455  ;;  %v1934_v33 = vld [vmem:[#allocation3 + $0xb0] sm:$0xff]  ;;  %v2181_v22 = vsel %vm2163_vm12, %v3702_v57, 0.0 }
 0x337   : > { %v2276_v17 = vsel %vm2163_vm12, %v2240_v0, 0.0  ;;  %1523 = vst.msk [vmem:[#allocation3 + $0xe8] sm:$0xff] %vm1493_vm8, %v1456_v28  ;;  %2488 = vmatmul.msk.f32.gmra.mxu2 %vm1949_vm11, %v1934_v33 }
 0x338   : > { %v2277_v34 = vadd.f32 %v2276_v17, %v2275_v36  ;;  %1716 = vst.msk [vmem:[#allocation3 + $0xe8] sm:$0xff] %vm1686_vm9, %v1649_v45  ;;  %v1264_v20 = vpop.permute.xlu2 %1263 }
 0x339   : > { %1330 = vst.msk [vmem:[#allocation3 + $0xf0] sm:$0xff] %vm1299_vm6, %v1264_v20 }
 0x33d   : > { %v3762_v41 = vpop.f32.mrf.mxu1  ;;  %v1637_v26 = vpop.permute.xlu1 %1636  ;;  %v1940_v40 = vld [vmem:[#allocation3 + $0xe0] sm:$0xff] }
 0x33e   : > { %2348 = vst.msk [vmem:[%s3662_s11 + $0x58] sm:$0xff] %vm2163_vm12, %v3762_v41  ;;  %2494 = vmatmul.msk.f32.gmra.mxu3 %vm1949_vm11, %v1940_v40  ;;  %v1830_v24 = vpop.permute.xlu0 %1829  ;;  %v2246_v36 = vmul.f32 %v3762_v41, %v3762_v41  ;;  %v2185_v57 = vsel %vm2163_vm12, %v3762_v41, 0.0 }
 0x33f   : > { %1710 = vst.msk [vmem:[#allocation3 + $0xb8] sm:$0xff] %vm1686_vm9, %v1637_v26 }
 0x340   : > { %1903 = vst.msk [vmem:[#allocation3 + $0xb8] sm:$0xff] %vm1879_vm10, %v1830_v24  ;;  %v1844_v50 = vpop.permute.xlu2 %1843  ;;  %v2288_v23 = vsel %vm2163_vm12, %v2246_v36, 0.0 }
 0x345   : > { %v1842_v32 = vpop.permute.xlu1 %1841 }
 0x346   : > { %1909 = vst.msk [vmem:[#allocation3 + $0xe8] sm:$0xff] %vm1879_vm10, %v1842_v32  ;;  %v1458_v46 = vpop.permute.xlu0 %1457 }
 0x347   : > { %1524 = vst.msk [vmem:[#allocation3 + $0xf0] sm:$0xff] %vm1493_vm8, %v1458_v46  ;;  %v1935_v31 = vld [vmem:[#allocation3 + $0xb8] sm:$0xff] }
 0x348   : > { %2489 = vmatmul.msk.f32.gmra.mxu2 %vm1949_vm11, %v1935_v31  ;;  %v1653_v53 = vpop.permute.xlu2 %1652 }
 0x34a   : > { %v3773_v38 = vpop.f32.mrf.mxu2 }
 0x34b   : > { %2355 = vst.msk [vmem:[%s3662_s11 + $0x90] sm:$0xff] %vm2163_vm12, %v3773_v38  ;;  %v2253_v14 = vmul.f32 %v3773_v38, %v3773_v38 }
 0x34d   : > { %v1651_v44 = vpop.permute.xlu1 %1650  ;;  %v1941_v54 = vld [vmem:[#allocation3 + $0xe8] sm:$0xff] }
 0x34e   : > { %1717 = vst.msk [vmem:[#allocation3 + $0xf0] sm:$0xff] %vm1686_vm9, %v1651_v44  ;;  %2495 = vmatmul.msk.f32.gmra.mxu3 %vm1949_vm11, %v1941_v54  ;;  %v1266_v43 = vpop.permute.xlu0 %1265 }
 0x34f   : > { %1910 = vst.msk [vmem:[#allocation3 + $0xf0] sm:$0xff] %vm1879_vm10, %v1844_v50 }
 0x350   : > { %1331 = vst.msk [vmem:[#allocation3 + $0xf8] sm:$0xff] %vm1299_vm6, %v1266_v43 }
 0x351   : > { %v3782_v49 = vpop.f32.mrf.mxu3 }
 0x352   : > { %2361 = vst.msk [vmem:[%s3662_s11 + $0xc0] sm:$0xff] %vm2163_vm12, %v3782_v49 }
 0x354   : > { %v2085_v48 = vpop.f32.mrf.mxu0 }
 0x355   : > { %v2175_v63 = vsel %vm2163_vm12, %v2085_v48, 0.0  ;;  %v2241_v60 = vmul.f32 %v2085_v48, %v2085_v48  ;;  %2343 = vst.msk [vmem:[%s3662_s11 + $0x30] sm:$0xff] %vm2163_vm12, %v2085_v48  ;;  %v1460_v52 = vpop.permute.xlu1 %1459 }
 0x356   : > { %v2176_v12 = vadd.f32 %v2175_v63, %v2174_v47  ;;  %1525 = vst.msk [vmem:[#allocation3 + $0xf8] sm:$0xff] %vm1493_vm8, %v1460_v52  ;;  %v1846_v56 = vpop.permute.xlu0 %1845  ;;  %v1942_v2 = vld [vmem:[#allocation3 + $0xf0] sm:$0xff] }
 0x357   : > { %v2278_v27 = vsel %vm2163_vm12, %v2241_v60, 0.0  ;;  %1718 = vst.msk [vmem:[#allocation3 + $0xf8] sm:$0xff] %vm1686_vm9, %v1653_v53  ;;  %2496 = vmatmul.msk.f32.gmra.mxu3 %vm1949_vm11, %v1942_v2  ;;  %v2251_v53 = vmul.f32 %v3727_v51, %v3727_v51  ;;  %v2252_v2 = vmul.f32 %v3748_v10, %v3748_v10 }
 0x358   : > { %v2279_v19 = vadd.f32 %v2278_v27, %v2277_v34  ;;  %1911 = vst.msk [vmem:[#allocation3 + $0xf8] sm:$0xff] %vm1879_vm10, %v1846_v56  ;;  %v2195_v56 = vsel %vm2163_vm12, %v3727_v51, 0.0  ;;  %v2199_v51 = vsel %vm2163_vm12, %v3773_v38, 0.0 }
 0x35d   : > { %v2103_v55 = vpop.f32.mrf.mxu1 }
 0x35e   : > { %2349 = vst.msk [vmem:[%s3662_s11 + $0x60] sm:$0xff] %vm2163_vm12, %v2103_v55  ;;  %v2247_v45 = vmul.f32 %v2103_v55, %v2103_v55  ;;  %v2187_v0 = vsel %vm2163_vm12, %v2103_v55, 0.0 }
 0x35f   : > { %v1943_v16 = vld [vmem:[#allocation3 + $0xf8] sm:$0xff] }
 0x360   : > { %2497 = vmatmul.msk.f32.gmra.mxu3 %vm1949_vm11, %v1943_v16  ;;  %v2290_v33 = vsel %vm2163_vm12, %v2247_v45, 0.0  ;;  %v2298_v16 = vsel %vm2163_vm12, %v2251_v53, 0.0 }
 0x36a   : > { %v3798_v59 = vpop.f32.mrf.mxu2 }
 0x36b   : > { %2356 = vst.msk [vmem:[%s3662_s11 + $0x98] sm:$0xff] %vm2163_vm12, %v3798_v59 }
 0x371   : > { %v3803_v29 = vpop.f32.mrf.mxu3 }
 0x372   : > { %2362 = vst.msk [vmem:[%s3662_s11 + $0xc8] sm:$0xff] %vm2163_vm12, %v3803_v29 }
 0x374   : > { %v2088_v21 = vpop.f32.mrf.mxu0 }
 0x375   : > { %v2177_v35 = vsel %vm2163_vm12, %v2088_v21, 0.0  ;;  %v2242_v58 = vmul.f32 %v2088_v21, %v2088_v21  ;;  %2344 = vst.msk [vmem:[%s3662_s11 + $0x38] sm:$0xff] %vm2163_vm12, %v2088_v21  ;;  %v2197_v21 = vsel %vm2163_vm12, %v3748_v10, 0.0  ;;  %v2201_v10 = vsel %vm2163_vm12, %v3798_v59, 0.0 }
 0x376   : > { %v2178_v30 = vadd.f32 %v2177_v35, %v2176_v12 }
 0x377   : > { %v2280_v6 = vsel %vm2163_vm12, %v2242_v58, 0.0 }
 0x378   : > { %v2180_v61 = vadd.f32 %v2179_v62, %v2178_v30  ;;  %v2281_v25 = vadd.f32 %v2280_v6, %v2279_v19  ;;  %v2300_v30 = vsel %vm2163_vm12, %v2252_v2, 0.0  ;;  %v2254_v62 = vmul.f32 %v3798_v59, %v3798_v59 }
 0x37a   : > { %v2182_v8 = vadd.f32 %v2181_v22, %v2180_v61  ;;  %v2283_v13 = vadd.f32 %v2282_v1, %v2281_v25  ;;  %v2302_v61 = vsel %vm2163_vm12, %v2253_v14, 0.0  ;;  %v2304_v39 = vsel %vm2163_vm12, %v2254_v62, 0.0 }
 0x37c   : > { %v2184_v9 = vadd.f32 %v2183_v5, %v2182_v8  ;;  %v2285_v18 = vadd.f32 %v2284_v37, %v2283_v13  ;;  %v2106_v7 = vpop.f32.mrf.mxu1 }
 0x37d   : > { %2350 = vst.msk [vmem:[%s3662_s11 + $0x68] sm:$0xff] %vm2163_vm12, %v2106_v7  ;;  %v2248_v15 = vmul.f32 %v2106_v7, %v2106_v7  ;;  %v2189_v17 = vsel %vm2163_vm12, %v2106_v7, 0.0 }
 0x37e   : > { %v2287_v3 = vadd.f32 %v2286_v42, %v2285_v18  ;;  %v2186_v11 = vadd.f32 %v2185_v57, %v2184_v9 }
 0x37f   : > { %v2292_v41 = vsel %vm2163_vm12, %v2248_v15, 0.0  ;;  %v2259_v15 = vmul.f32 %v3782_v49, %v3782_v49 }
 0x380   : > { %v2188_v47 = vadd.f32 %v2187_v0, %v2186_v11  ;;  %v2289_v28 = vadd.f32 %v2288_v23, %v2287_v3 }
 0x382   : > { %v2190_v34 = vadd.f32 %v2189_v17, %v2188_v47  ;;  %v2291_v20 = vadd.f32 %v2290_v33, %v2289_v28 }
 0x384   : > { %v2293_v26 = vadd.f32 %v2292_v41, %v2291_v20  ;;  %v2260_v20 = vmul.f32 %v3803_v29, %v3803_v29 }
 0x38a   : > { %v2127_v40 = vpop.f32.mrf.mxu2 }
 0x38b   : > { %2357 = vst.msk [vmem:[%s3662_s11 + $0xa0] sm:$0xff] %vm2163_vm12, %v2127_v40  ;;  %v2255_v25 = vmul.f32 %v2127_v40, %v2127_v40  ;;  %v2203_v8 = vsel %vm2163_vm12, %v2127_v40, 0.0 }
 0x38d   : > { %v2306_v37 = vsel %vm2163_vm12, %v2255_v25, 0.0 }
 0x391   : > { %v3840_v24 = vpop.f32.mrf.mxu3 }
 0x392   : > { %2363 = vst.msk [vmem:[%s3662_s11 + $0xd0] sm:$0xff] %vm2163_vm12, %v3840_v24 }
 0x394   : > { %v2109_v32 = vpop.f32.mrf.mxu1 }
 0x395   : > { %2351 = vst.msk [vmem:[%s3662_s11 + $0x70] sm:$0xff] %vm2163_vm12, %v2109_v32  ;;  %v2249_v31 = vmul.f32 %v2109_v32, %v2109_v32  ;;  %v2191_v50 = vsel %vm2163_vm12, %v2109_v32, 0.0  ;;  %v2314_v32 = vsel %vm2163_vm12, %v2259_v15, 0.0 }
 0x396   : > { %v2192_v43 = vadd.f32 %v2191_v50, %v2190_v34  ;;  %v2211_v34 = vsel %vm2163_vm12, %v3782_v49, 0.0  ;;  %v2316_v49 = vsel %vm2163_vm12, %v2260_v20, 0.0 }
 0x397   : > { %v2294_v54 = vsel %vm2163_vm12, %v2249_v31, 0.0  ;;  %v2261_v31 = vmul.f32 %v3840_v24, %v3840_v24 }
 0x398   : > { %v2295_v52 = vadd.f32 %v2294_v54, %v2293_v26 }
 0x3a2   : > { %v2130_v46 = vpop.f32.mrf.mxu2 }
 0x3a3   : > { %2358 = vst.msk [vmem:[%s3662_s11 + $0xa8] sm:$0xff] %vm2163_vm12, %v2130_v46  ;;  %v2256_v59 = vmul.f32 %v2130_v46, %v2130_v46  ;;  %v2205_v18 = vsel %vm2163_vm12, %v2130_v46, 0.0  ;;  %v2213_v46 = vsel %vm2163_vm12, %v3803_v29, 0.0 }
 0x3a5   : > { %v2308_v57 = vsel %vm2163_vm12, %v2256_v59, 0.0 }
 0x3a9   : > { %v3850_v44 = vpop.f32.mrf.mxu3 }
 0x3aa   : > { %2364 = vst.msk [vmem:[%s3662_s11 + $0xd8] sm:$0xff] %vm2163_vm12, %v3850_v44  ;;  %v2262_v29 = vmul.f32 %v3850_v44, %v3850_v44 }
 0x3ac   : > { %v2112_v48 = vpop.f32.mrf.mxu1  ;;  %v2320_v2 = vsel %vm2163_vm12, %v2262_v29, 0.0 }
 0x3ad   : > { %v2193_v63 = vsel %vm2163_vm12, %v2112_v48, 0.0  ;;  %v2250_v60 = vmul.f32 %v2112_v48, %v2112_v48  ;;  %2352 = vst.msk [vmem:[%s3662_s11 + $0x78] sm:$0xff] %vm2163_vm12, %v2112_v48  ;;  %v2215_v48 = vsel %vm2163_vm12, %v3840_v24, 0.0 }
 0x3ae   : > { %v2194_v12 = vadd.f32 %v2193_v63, %v2192_v43 }
 0x3af   : > { %v2296_v27 = vsel %vm2163_vm12, %v2250_v60, 0.0  ;;  %v2318_v60 = vsel %vm2163_vm12, %v2261_v31, 0.0 }
 0x3b0   : > { %v2196_v19 = vadd.f32 %v2195_v56, %v2194_v12  ;;  %v2297_v55 = vadd.f32 %v2296_v27, %v2295_v52  ;;  %v2217_v12 = vsel %vm2163_vm12, %v3850_v44, 0.0 }
 0x3b2   : > { %v2198_v35 = vadd.f32 %v2197_v21, %v2196_v19  ;;  %v2299_v58 = vadd.f32 %v2298_v16, %v2297_v55 }
 0x3b4   : > { %v2200_v4 = vadd.f32 %v2199_v51, %v2198_v35  ;;  %v2301_v6 = vadd.f32 %v2300_v30, %v2299_v58 }
 0x3b6   : > { %v2303_v1 = vadd.f32 %v2302_v61, %v2301_v6  ;;  %v2202_v22 = vadd.f32 %v2201_v10, %v2200_v4 }
 0x3b8   : > { %v2204_v38 = vadd.f32 %v2203_v8, %v2202_v22  ;;  %v2305_v13 = vadd.f32 %v2304_v39, %v2303_v1 }
 0x3ba   : > { %v2133_v5 = vpop.f32.mrf.mxu2  ;;  %v2307_v36 = vadd.f32 %v2306_v37, %v2305_v13  ;;  %v2206_v42 = vadd.f32 %v2205_v18, %v2204_v38 }
 0x3bb   : > { %2359 = vst.msk [vmem:[%s3662_s11 + $0xb0] sm:$0xff] %vm2163_vm12, %v2133_v5  ;;  %v2257_v7 = vmul.f32 %v2133_v5, %v2133_v5  ;;  %v2207_v45 = vsel %vm2163_vm12, %v2133_v5, 0.0 }
 0x3bc   : > { %v2309_v3 = vadd.f32 %v2308_v57, %v2307_v36  ;;  %v2208_v23 = vadd.f32 %v2207_v45, %v2206_v42 }
 0x3bd   : > { %v2310_v11 = vsel %vm2163_vm12, %v2257_v7, 0.0 }
 0x3be   : > { %v2311_v33 = vadd.f32 %v2310_v11, %v2309_v3 }
 0x3c1   : > { %v2151_v9 = vpop.f32.mrf.mxu3 }
 0x3c2   : > { %2365 = vst.msk [vmem:[%s3662_s11 + $0xe0] sm:$0xff] %vm2163_vm12, %v2151_v9  ;;  %v2263_v27 = vmul.f32 %v2151_v9, %v2151_v9  ;;  %v2219_v24 = vsel %vm2163_vm12, %v2151_v9, 0.0 }
 0x3c4   : > { %v2322_v21 = vsel %vm2163_vm12, %v2263_v27, 0.0 }
 0x3cb   : > { %v2136_v0 = vpop.f32.mrf.mxu2 }
 0x3cc   : > { %v2209_v47 = vsel %vm2163_vm12, %v2136_v0, 0.0  ;;  %v2258_v28 = vmul.f32 %v2136_v0, %v2136_v0  ;;  %2360 = vst.msk [vmem:[%s3662_s11 + $0xb8] sm:$0xff] %vm2163_vm12, %v2136_v0 }
 0x3cd   : > { %v2210_v17 = vadd.f32 %v2209_v47, %v2208_v23 }
 0x3ce   : > { %v2312_v41 = vsel %vm2163_vm12, %v2258_v28, 0.0 }
 0x3cf   : > { %v2212_v26 = vadd.f32 %v2211_v34, %v2210_v17  ;;  %v2313_v40 = vadd.f32 %v2312_v41, %v2311_v33 }
 0x3d1   : > { %v2214_v50 = vadd.f32 %v2213_v46, %v2212_v26  ;;  %v2315_v54 = vadd.f32 %v2314_v32, %v2313_v40  ;;  %v2154_v43 = vpop.f32.mrf.mxu3 }
 0x3d2   : > { %2366 = vst.msk [vmem:[%s3662_s11 + $0xe8] sm:$0xff] %vm2163_vm12, %v2154_v43  ;;  %v2264_v14 = vmul.f32 %v2154_v43, %v2154_v43  ;;  %v2221_v58 = vsel %vm2163_vm12, %v2154_v43, 0.0 }
 0x3d3   : > { %v2216_v53 = vadd.f32 %v2215_v48, %v2214_v50  ;;  %v2317_v63 = vadd.f32 %v2316_v49, %v2315_v54 }
 0x3d4   : > { %v2324_v51 = vsel %vm2163_vm12, %v2264_v14, 0.0 }
 0x3d5   : > { %v2319_v52 = vadd.f32 %v2318_v60, %v2317_v63  ;;  %v2218_v56 = vadd.f32 %v2217_v12, %v2216_v53 }
 0x3d7   : > { %v2321_v19 = vadd.f32 %v2320_v2, %v2319_v52  ;;  %v2220_v16 = vadd.f32 %v2219_v24, %v2218_v56 }
 0x3d9   : > { %v2323_v35 = vadd.f32 %v2322_v21, %v2321_v19  ;;  %v2222_v44 = vadd.f32 %v2221_v58, %v2220_v16 }
 0x3da   : > { %v2157_v55 = vpop.f32.mrf.mxu3 }
 0x3db   : > { %2367 = vst.msk [vmem:[%s3662_s11 + $0xf0] sm:$0xff] %vm2163_vm12, %v2157_v55  ;;  %v2265_v30 = vmul.f32 %v2157_v55, %v2157_v55  ;;  %v2223_v62 = vsel %vm2163_vm12, %v2157_v55, 0.0  ;;  %v2325_v4 = vadd.f32 %v2324_v51, %v2323_v35 }
 0x3dc   : > { %v2224_v61 = vadd.f32 %v2223_v62, %v2222_v44 }
 0x3dd   : > { %v2326_v6 = vsel %vm2163_vm12, %v2265_v30, 0.0 }
 0x3de   : > { %v2327_v22 = vadd.f32 %v2326_v6, %v2325_v4 }
 0x3e3   : > { %v2160_v10 = vpop.f32.mrf.mxu3 }
 0x3e4   : > { %v2225_v25 = vsel %vm2163_vm12, %v2160_v10, 0.0  ;;  %v2266_v1 = vmul.f32 %v2160_v10, %v2160_v10  ;;  %2368 = vst.msk [vmem:[%s3662_s11 + $0xf8] sm:$0xff] %vm2163_vm12, %v2160_v10 }
 0x3e5   : > { %v2226_v39 = vadd.f32 %v2225_v25, %v2224_v61 }
 0x3e6   : > { %v2328_v8 = vsel %vm2163_vm12, %v2266_v1, 0.0 }
 0x3e7   : > { %v2227_v38 = vrot.slane %v2226_v39, 4  ;;  %v2329_v13 = vadd.f32 %v2328_v8, %v2327_v22 }
 0x3e9   : > { %v2228_v37 = vadd.f32 %v2227_v38, %v2226_v39  ;;  %v2330_v5 = vrot.slane %v2329_v13, 4 }
 0x3eb   : > { %v2229_v36 = vrot.slane %v2228_v37, 2  ;;  %v2331_v9 = vadd.f32 %v2330_v5, %v2329_v13 }
 0x3ed   : > { %v2230_v59 = vadd.f32 %v2229_v36, %v2228_v37  ;;  %v2332_v18 = vrot.slane %v2331_v9, 2 }
 0x3ef   : > { %v2231_v7 = vrot.slane %v2230_v59, 1  ;;  %v2333_v42 = vadd.f32 %v2332_v18, %v2331_v9 }
 0x3f1   : > { %v2232_v57 = vadd.f32 %v2231_v7, %v2230_v59  ;;  %v2334_v45 = vrot.slane %v2333_v42, 1 }
 0x3f3   : > { %2234 = vst.msk [vmem:[%s181_s17] sm:$0x1] %vm2233_vm13, %v2232_v57  ;;  %v2335_v3 = vadd.f32 %v2334_v45, %v2333_v42 }
 0x3f5   : > { %2336 = vst.msk [vmem:[%s181_s17 + $0x1] sm:$0x1] %vm2233_vm13, %v2335_v3 }
 0x3f6 PF: > { %s14_s12 = sadd.s32 1, %s2540_s12  }
 0x3f7   : > { %p11_p4 = scmp.ge.s32.totalorder %s14_s12, 4  }
 0x3f9   :  { %13 = sbr.rel (!%p11_p4) target bundleno = 1 (0x1), region = 72 }

</bundles_post_ra>
